<compile_context>
chip_gen: v5e
topology: v5e:2x2
jax: 0.10.0
libtpu: 0.0.40
codegen_flags: <defaults>
</compile_context>

<pallas_src>
import functools

import jax
import jax.numpy as jnp
from jax.experimental import pallas as pl
from jax.experimental.pallas import tpu as pltpu


# ----------------------------- small static helpers -------------------------

def _round_up(x, m):
    return ((x + m - 1) // m) * m


def _pick_row_tile(h, w_al, target_m=2048):
    """Largest divisor TH of h with TH*w_al <= target_m (>=1)."""
    cap = max(1, target_m // w_al)
    best = 1
    for th in range(1, h + 1):
        if h % th == 0 and th <= cap:
            best = th
    return best


def _pick_flat_tile(n, target=4096):
    """Largest divisor of n that is a multiple of 8 and <= target, else n (full)."""
    cands = [t for t in range(1, n + 1) if n % t == 0 and t <= target and t % 8 == 0]
    return max(cands) if cands else n


# ----------------------------- Pallas kernels -------------------------------

def _conv3x3_bn_relu_kernel(xk_ref, w_ref, scale_ref, bias_ref, *refs,
                            TH, W, W_al, Cin, with_sums):
    """3x3 conv (kx folded into K, ky as 3 in-VMEM row-shifted matmuls) + BN + ReLU.

    When with_sums=True, also accumulates the GAP numerators for the attention branch
    (sum of the conv output) and the conv_avg branch (sum of the raw input).

    xk_ref   : ((H+2)*W_al, 3*Cin) bf16  zero-padded, kx-folded image (resident per image)
    w_ref    : (3, 3*Cin, Cout)    bf16  ky-major, (kx,cin)-folded conv weights
    scale/bias: (1, Cout) f32            folded BatchNorm affine
    o_ref    : (TH, W, Cout) f32         conv+BN+ReLU output row-tile
    ysum_ref : (1, Cout) f32             running sum_{h,w} of conv output (GAP numerator)
    xsum_ref : (1, Cin)  f32             running sum_{h,w} of raw input  (GAP numerator)
    acc_ref  : (TH*W_al, Cout) f32       VMEM accumulator scratch
    """
    if with_sums:
        o_ref, ysum_ref, xsum_ref, acc_ref = refs
    else:
        o_ref, acc_ref = refs

    t = pl.program_id(1)
    T = TH * W_al
    row0 = t * TH                                   # first output row of this tile

    def tap_rows(ky):
        # aligned (multiple-of-8) dynamic start: ((row0 + ky) * W_al)
        start = pl.multiple_of((row0 + ky) * W_al, 8)
        return xk_ref[pl.ds(start, T), :]           # (T, 3*Cin) bf16

    acc_ref[...] = jnp.dot(tap_rows(0), w_ref[0], preferred_element_type=jnp.float32)
    acc_ref[...] += jnp.dot(tap_rows(1), w_ref[1], preferred_element_type=jnp.float32)
    acc_ref[...] += jnp.dot(tap_rows(2), w_ref[2], preferred_element_type=jnp.float32)

    y = jnp.maximum(acc_ref[...] * scale_ref[...] + bias_ref[...], 0.0)
    # Trim the lane-alignment columns (W_al >= W, W_al % 8 == 0 -> reshape is layout-free).
    y_trim = y.reshape(TH, W_al, -1)[:, :W, :]
    o_ref[...] = y_trim

    if with_sums:
        @pl.when(t == 0)
        def _init():
            ysum_ref[...] = jnp.zeros_like(ysum_ref)
            xsum_ref[...] = jnp.zeros_like(xsum_ref)

        # GAP numerator of the conv output (valid columns only).
        ysum_ref[...] += jnp.sum(y_trim, axis=(0, 1))[None, :]
        # GAP numerator of the raw input: middle-kx channel slice, ky=1 rows == original
        # rows of this tile; the alignment columns there are exact zero padding.
        start1 = pl.multiple_of((row0 + 1) * W_al, 8)
        x_mid = xk_ref[pl.ds(start1, T), Cin:2 * Cin].astype(jnp.float32)
        xsum_ref[...] += jnp.sum(x_mid, axis=0, keepdims=True)


def _vec_head_kernel(v_ref, w_ref, scale_ref, bias_ref, o_ref, *, act, inv_n):
    """(B, Cin) GAP sums -> mean -> 1x1 conv (matmul) -> folded BN -> activation."""
    xm = v_ref[...] * inv_n
    y = jnp.dot(xm, w_ref[...], preferred_element_type=jnp.float32)
    y = y * scale_ref[...] + bias_ref[...]
    if act == "sigmoid":
        y = jax.nn.sigmoid(y)
    else:
        y = jnp.maximum(y, 0.0)
    o_ref[...] = y


def _arm_combine_kernel(feat_ref, atten_ref, other_ref, o_ref):
    """out = feat * atten (per-channel broadcast) + other ((1,C) broadcast or full tile)."""
    o_ref[...] = feat_ref[...] * atten_ref[...] + other_ref[...]


# ----------------------------- wrappers --------------------------------------

_VMEM_LIMIT = 48 * 1024 * 1024   # safe on v5e/v6e/v7x; tiles are sized to stay well below


def conv3x3_bn_relu(x, w, scale, bias, *, with_sums=True, target_m=2048):
    """x: (B, H, W, Cin) f32 NHWC; w: (3, 3, Cin, Cout).
    Returns y (B,H,W,Cout) f32 and, if with_sums, also
    (sum_{h,w} y (B,Cout) f32, sum_{h,w} x (B,Cin) f32)."""
    B, H, W, Cin = x.shape
    Cout = w.shape[-1]
    W_al = _round_up(max(W, 8), 8)                      # output columns incl. alignment pad
    Hp = H + 2

    # zero pad: 1 row top/bottom, 1 col left, (W_al - W + 1) cols right; bf16 for the MXU.
    xp = jnp.pad(x.astype(jnp.bfloat16),
                 ((0, 0), (1, 1), (1, W_al - W + 1), (0, 0)))
    # fold the kx taps into channels: (B, Hp, W_al, 3*Cin) -> flat (B, Hp*W_al, 3*Cin)
    xk = jnp.concatenate([xp[:, :, kx:kx + W_al, :] for kx in range(3)], axis=-1)
    xk = xk.reshape(B, Hp * W_al, 3 * Cin)
    w3 = w.reshape(3, 3 * Cin, Cout).astype(jnp.bfloat16)

    TH = _pick_row_tile(H, W_al, target_m)
    n_t = H // TH

    kernel = functools.partial(_conv3x3_bn_relu_kernel, TH=TH, W=W, W_al=W_al,
                               Cin=Cin, with_sums=with_sums)

    if with_sums:
        out_shape = (jax.ShapeDtypeStruct((B, H, W, Cout), jnp.float32),
                     jax.ShapeDtypeStruct((B, 1, Cout), jnp.float32),
                     jax.ShapeDtypeStruct((B, 1, Cin), jnp.float32))
        out_specs = (pl.BlockSpec((None, TH, W, Cout), lambda b, t: (b, t, 0, 0)),
                     pl.BlockSpec((None, 1, Cout), lambda b, t: (b, 0, 0)),
                     pl.BlockSpec((None, 1, Cin), lambda b, t: (b, 0, 0)))
    else:
        out_shape = jax.ShapeDtypeStruct((B, H, W, Cout), jnp.float32)
        out_specs = pl.BlockSpec((None, TH, W, Cout), lambda b, t: (b, t, 0, 0))

    res = pl.pallas_call(
        kernel,
        out_shape=out_shape,
        grid=(B, n_t),
        in_specs=[
            # padded image: resident per image (constant block index across row tiles)
            pl.BlockSpec((None, Hp * W_al, 3 * Cin), lambda b, t: (b, 0, 0)),
            pl.BlockSpec((3, 3 * Cin, Cout), lambda b, t: (0, 0, 0)),
            pl.BlockSpec((1, Cout), lambda b, t: (0, 0)),
            pl.BlockSpec((1, Cout), lambda b, t: (0, 0)),
        ],
        out_specs=out_specs,
        scratch_shapes=[pltpu.VMEM((TH * W_al, Cout), jnp.float32)],
        compiler_params=pltpu.CompilerParams(
            dimension_semantics=("parallel", "arbitrary"),
            vmem_limit_bytes=_VMEM_LIMIT),
    )(xk, w3, scale.reshape(1, Cout), bias.reshape(1, Cout))

    if with_sums:
        y, ysum, xsum = res
        return y, ysum[:, 0, :], xsum[:, 0, :]
    return res


def vec_head(vsum, w, scale, bias, *, act, count):
    """GAP sums (B, Cin) -> mean -> 1x1 conv -> BN -> act. Returns (B, Cout) f32."""
    B, Cin = vsum.shape
    Cout = w.shape[-1]
    kernel = functools.partial(_vec_head_kernel, act=act, inv_n=1.0 / float(count))
    return pl.pallas_call(
        kernel,
        out_shape=jax.ShapeDtypeStruct((B, Cout), jnp.float32),
    )(vsum, w, scale.reshape(1, Cout), bias.reshape(1, Cout))


def arm_combine(feat, atten, other, *, target=4096):
    """feat: (B,H,W,C); atten: (B,C); other: (B,C) (broadcast) or (B,H,W,C).
    Returns feat * atten + other, shape (B,H,W,C)."""
    B, H, W, C = feat.shape
    HW = H * W
    T = _pick_flat_tile(HW, target)
    n_t = HW // T

    featf = feat.reshape(B, HW, C)
    if other.ndim == 2:
        otherf = other.reshape(B, 1, C)
        other_spec = pl.BlockSpec((None, 1, C), lambda b, t: (b, 0, 0))
    else:
        otherf = other.reshape(B, HW, C)
        other_spec = pl.BlockSpec((None, T, C), lambda b, t: (b, t, 0))

    out = pl.pallas_call(
        _arm_combine_kernel,
        out_shape=jax.ShapeDtypeStruct((B, HW, C), jnp.float32),
        grid=(B, n_t),
        in_specs=[
            pl.BlockSpec((None, T, C), lambda b, t: (b, t, 0)),
            pl.BlockSpec((None, 1, C), lambda b, t: (b, 0, 0)),
            other_spec,
        ],
        out_specs=pl.BlockSpec((None, T, C), lambda b, t: (b, t, 0)),
        compiler_params=pltpu.CompilerParams(
            dimension_semantics=("parallel", "parallel"),
            vmem_limit_bytes=_VMEM_LIMIT),
    )(featf, atten.reshape(B, 1, C), otherf)
    return out.reshape(B, H, W, C)


def nearest_resize(x, h_out, w_out):
    """Glue: F.interpolate(mode='nearest') == pure index gather, no compute."""
    h_in, w_in = x.shape[1:3]
    rows = (jnp.arange(h_out) * h_in) // h_out
    cols = (jnp.arange(w_out) * w_in) // w_out
    return x[:, rows][:, :, cols]


# ----------------------------- parameters ------------------------------------

def _kaiming_conv(key, kh, kw, cin, cout):
    # kaiming_normal_(a=1): std = sqrt(2 / ((1 + a^2) * fan_in)), fan_in = cin*kh*kw
    std = (1.0 / (cin * kh * kw)) ** 0.5
    return std * jax.random.normal(key, (kh, kw, cin, cout), jnp.float32)


def _folded_bn(key, c, eps=1e-5):
    k1, k2, k3, k4 = jax.random.split(key, 4)
    gamma = 1.0 + 0.1 * jax.random.normal(k1, (c,), jnp.float32)
    beta = 0.1 * jax.random.normal(k2, (c,), jnp.float32)
    mean = 0.1 * jax.random.normal(k3, (c,), jnp.float32)
    var = 0.5 + jnp.abs(jax.random.normal(k4, (c,), jnp.float32))
    scale = gamma * jax.lax.rsqrt(var + eps)
    bias = beta - mean * scale
    return scale, bias


def init_params(key):
    ks = jax.random.split(key, 12)
    p = {}
    # arm32: ConvBNReLU(512->128, 3x3) + conv_atten(128->128, 1x1) + bn_atten
    s, b = _folded_bn(ks[1], 128)
    p["arm32_conv"] = dict(w=_kaiming_conv(ks[0], 3, 3, 512, 128), scale=s, bias=b)
    s, b = _folded_bn(ks[3], 128)
    p["arm32_atten"] = dict(w=_kaiming_conv(ks[2], 1, 1, 128, 128)[0, 0], scale=s, bias=b)
    # arm16: ConvBNReLU(256->128, 3x3) + conv_atten(128->128, 1x1) + bn_atten
    s, b = _folded_bn(ks[5], 128)
    p["arm16_conv"] = dict(w=_kaiming_conv(ks[4], 3, 3, 256, 128), scale=s, bias=b)
    s, b = _folded_bn(ks[7], 128)
    p["arm16_atten"] = dict(w=_kaiming_conv(ks[6], 1, 1, 128, 128)[0, 0], scale=s, bias=b)
    # conv_head32 / conv_head16: ConvBNReLU(128->128, 3x3)
    s, b = _folded_bn(ks[9], 128)
    p["head32"] = dict(w=_kaiming_conv(ks[8], 3, 3, 128, 128), scale=s, bias=b)
    s, b = _folded_bn(ks[11], 128)
    p["head16"] = dict(w=_kaiming_conv(ks[10], 3, 3, 128, 128), scale=s, bias=b)
    # conv_avg: ConvBNReLU(512->128, 1x1, padding=0)
    k_a, k_b = jax.random.split(jax.random.fold_in(key, 99))
    s, b = _folded_bn(k_b, 128)
    p["conv_avg"] = dict(w=_kaiming_conv(k_a, 1, 1, 512, 128)[0, 0], scale=s, bias=b)
    return p


# ----------------------------- forward ----------------------------------------

def context_path_forward(params, feat8, feat16, feat32):
    """feat8: (B,128,H/8,W/8), feat16: (B,256,H/16,W/16), feat32: (B,512,H/32,W/32), NCHW."""
    to_nhwc = lambda t: jnp.transpose(t, (0, 2, 3, 1))
    to_nchw = lambda t: jnp.transpose(t, (0, 3, 1, 2))
    f16, f32 = to_nhwc(feat16), to_nhwc(feat32)
    H32, W32 = f32.shape[1:3]
    H16, W16 = f16.shape[1:3]
    H8, W8 = feat8.shape[2:4]

    # --- ARM32 conv (fused: conv output GAP-sum + raw feat32 GAP-sum) ---
    f32c, f32c_sum, f32_in_sum = conv3x3_bn_relu(
        f32, params["arm32_conv"]["w"],
        params["arm32_conv"]["scale"], params["arm32_conv"]["bias"])
    # global context branch: avg_pool(feat32) -> 1x1 ConvBNReLU (broadcast applied in-kernel later)
    avg = vec_head(f32_in_sum, params["conv_avg"]["w"],
                   params["conv_avg"]["scale"], params["conv_avg"]["bias"],
                   act="relu", count=H32 * W32)                             # (B, 128)
    # ARM32 attention from the fused GAP numerator
    a32 = vec_head(f32c_sum, params["arm32_atten"]["w"],
                   params["arm32_atten"]["scale"], params["arm32_atten"]["bias"],
                   act="sigmoid", count=H32 * W32)                          # (B, 128)
    feat32_sum = arm_combine(f32c, a32, avg)             # arm32(x) + broadcast(avg)

    feat32_up = nearest_resize(feat32_sum, H16, W16)
    feat32_up = conv3x3_bn_relu(feat32_up, params["head32"]["w"],
                                params["head32"]["scale"], params["head32"]["bias"],
                                with_sums=False)

    # --- ARM16 ---
    f16c, f16c_sum, _ = conv3x3_bn_relu(
        f16, params["arm16_conv"]["w"],
        params["arm16_conv"]["scale"], params["arm16_conv"]["bias"])
    a16 = vec_head(f16c_sum, params["arm16_atten"]["w"],
                   params["arm16_atten"]["scale"], params["arm16_atten"]["bias"],
                   act="sigmoid", count=H16 * W16)
    feat16_sum = arm_combine(f16c, a16, feat32_up)       # arm16(x) + feat32_up

    feat16_up = nearest_resize(feat16_sum, H8, W8)
    feat16_up = conv3x3_bn_relu(feat16_up, params["head16"]["w"],
                                params["head16"]["scale"], params["head16"]["bias"],
                                with_sums=False)

    return feat8, to_nchw(feat16_up), to_nchw(feat32_up)


# ----------------------------- main -------------------------------------------

if __name__ == "__main__":
    key = jax.random.PRNGKey(0)
    kp, k8, k16, k32 = jax.random.split(key, 4)
    B, H8, W8 = 2, 16, 16
    # Stand-in Resnet18 feature maps (NCHW, channel counts fixed by the module).
    feat8 = jax.random.normal(k8, (B, 128, H8, W8), jnp.float32)
    feat16 = jax.random.normal(k16, (B, 256, H8 // 2, W8 // 2), jnp.float32)
    feat32 = jax.random.normal(k32, (B, 512, H8 // 4, W8 // 4), jnp.float32)
    params = init_params(kp)

    fwd = jax.jit(context_path_forward)
    out8, out16_up, out32_up = fwd(params, feat8, feat16, feat32)
    jax.block_until_ready((out8, out16_up, out32_up))

    assert out8.shape == (B, 128, H8, W8)
    assert out16_up.shape == (B, 128, H8, W8)
    assert out32_up.shape == (B, 128, H8 // 2, W8 // 2)
    print("KERNEL_OK")
</pallas_src>

<mosaic_0001>
module attributes {stable_mosaic.version = 11 : i64} {
  func.func @_vec_head_kernel(%arg0: memref<2x512xf32, #tpu.memory_space<vmem>>, %arg1: memref<512x128xf32, #tpu.memory_space<vmem>>, %arg2: memref<1x128xf32, #tpu.memory_space<vmem>>, %arg3: memref<1x128xf32, #tpu.memory_space<vmem>>, %arg4: memref<2x128xf32, #tpu.memory_space<vmem>>) attributes {dimension_semantics = [], scalar_prefetch = 0 : i64, scratch_operands = 0 : i64, tpu.core_type = #tpu.core_type<tc>} {
    %c0 = arith.constant 0 : index
    %c0_0 = arith.constant 0 : index
    %0 = vector.load %arg0[%c0, %c0_0] : memref<2x512xf32, #tpu.memory_space<vmem>>, vector<2x512xf32>
    %cst = arith.constant 6.250000e-02 : f32
    %1 = vector.broadcast %cst : f32 to vector<2x512xf32>
    %2 = arith.mulf %0, %1 : vector<2x512xf32>
    %c0_1 = arith.constant 0 : index
    %c0_2 = arith.constant 0 : index
    %3 = vector.load %arg1[%c0_1, %c0_2] : memref<512x128xf32, #tpu.memory_space<vmem>>, vector<512x128xf32>
    %cst_3 = arith.constant dense<0.000000e+00> : vector<2x128xf32>
    %4 = tpu.matmul %2, %3, %cst_3 {dimension_numbers = #tpu.dot_dimension_numbers<[1], [0], [0], [1], [0, 0, 1, 1], [], []>} : vector<2x512xf32>, vector<512x128xf32>, vector<2x128xf32> -> vector<2x128xf32>
    %c0_4 = arith.constant 0 : index
    %c0_5 = arith.constant 0 : index
    %5 = vector.load %arg2[%c0_4, %c0_5] : memref<1x128xf32, #tpu.memory_space<vmem>>, vector<1x128xf32>
    %6 = vector.broadcast %5 : vector<1x128xf32> to vector<2x128xf32>
    %7 = arith.mulf %4, %6 : vector<2x128xf32>
    %c0_6 = arith.constant 0 : index
    %c0_7 = arith.constant 0 : index
    %8 = vector.load %arg3[%c0_6, %c0_7] : memref<1x128xf32, #tpu.memory_space<vmem>>, vector<1x128xf32>
    %9 = vector.broadcast %8 : vector<1x128xf32> to vector<2x128xf32>
    %10 = arith.addf %7, %9 : vector<2x128xf32>
    %cst_8 = arith.constant 0.000000e+00 : f32
    %11 = vector.broadcast %cst_8 : f32 to vector<2x128xf32>
    %12 = arith.maximumf %10, %11 : vector<2x128xf32>
    %c0_9 = arith.constant 0 : index
    %c0_10 = arith.constant 0 : index
    %13 = vector.load %arg4[%c0_9, %c0_10] : memref<2x128xf32, #tpu.memory_space<vmem>>, vector<2x128xf32>
    tpu.vector_store %arg4[%c0_9, %c0_10], %12 {strides = array<i32>} : memref<2x128xf32, #tpu.memory_space<vmem>>, vector<2x128xf32>,
    return
  }
}

module attributes {stable_mosaic.version = 11 : i64} {
  func.func @_vec_head_kernel(%arg0: memref<2x128xf32, #tpu.memory_space<vmem>>, %arg1: memref<128x128xf32, #tpu.memory_space<vmem>>, %arg2: memref<1x128xf32, #tpu.memory_space<vmem>>, %arg3: memref<1x128xf32, #tpu.memory_space<vmem>>, %arg4: memref<2x128xf32, #tpu.memory_space<vmem>>) attributes {dimension_semantics = [], scalar_prefetch = 0 : i64, scratch_operands = 0 : i64, tpu.core_type = #tpu.core_type<tc>} {
    %c0 = arith.constant 0 : index
    %c0_0 = arith.constant 0 : index
    %0 = vector.load %arg0[%c0, %c0_0] : memref<2x128xf32, #tpu.memory_space<vmem>>, vector<2x128xf32>
    %cst = arith.constant 6.250000e-02 : f32
    %1 = vector.broadcast %cst : f32 to vector<2x128xf32>
    %2 = arith.mulf %0, %1 : vector<2x128xf32>
    %c0_1 = arith.constant 0 : index
    %c0_2 = arith.constant 0 : index
    %3 = vector.load %arg1[%c0_1, %c0_2] : memref<128x128xf32, #tpu.memory_space<vmem>>, vector<128x128xf32>
    %cst_3 = arith.constant dense<0.000000e+00> : vector<2x128xf32>
    %4 = tpu.matmul %2, %3, %cst_3 {dimension_numbers = #tpu.dot_dimension_numbers<[1], [0], [0], [1], [0, 0, 1, 1], [], []>} : vector<2x128xf32>, vector<128x128xf32>, vector<2x128xf32> -> vector<2x128xf32>
    %c0_4 = arith.constant 0 : index
    %c0_5 = arith.constant 0 : index
    %5 = vector.load %arg2[%c0_4, %c0_5] : memref<1x128xf32, #tpu.memory_space<vmem>>, vector<1x128xf32>
    %6 = vector.broadcast %5 : vector<1x128xf32> to vector<2x128xf32>
    %7 = arith.mulf %4, %6 : vector<2x128xf32>
    %c0_6 = arith.constant 0 : index
    %c0_7 = arith.constant 0 : index
    %8 = vector.load %arg3[%c0_6, %c0_7] : memref<1x128xf32, #tpu.memory_space<vmem>>, vector<1x128xf32>
    %9 = vector.broadcast %8 : vector<1x128xf32> to vector<2x128xf32>
    %10 = arith.addf %7, %9 : vector<2x128xf32>
    %11 = arith.negf %10 : vector<2x128xf32>
    %12 = math.exp %11 : vector<2x128xf32>
    %cst_8 = arith.constant 1.000000e+00 : f32
    %13 = vector.broadcast %cst_8 : f32 to vector<2x128xf32>
    %14 = arith.addf %13, %12 : vector<2x128xf32>
    %15 = arith.divf %13, %14 : vector<2x128xf32>
    %c0_9 = arith.constant 0 : index
    %c0_10 = arith.constant 0 : index
    %16 = vector.load %arg4[%c0_9, %c0_10] : memref<2x128xf32, #tpu.memory_space<vmem>>, vector<2x128xf32>
    tpu.vector_store %arg4[%c0_9, %c0_10], %15 {strides = array<i32>} : memref<2x128xf32, #tpu.memory_space<vmem>>, vector<2x128xf32>,
    return
  }
}

module attributes {stable_mosaic.version = 11 : i64} {
  func.func @_conv3x3_bn_relu_kernel(%arg0: i32, %arg1: i32, %arg2: memref<1x48x1536xbf16, #tpu.memory_space<vmem>>, %arg3: memref<3x1536x128xbf16, #tpu.memory_space<vmem>>, %arg4: memref<1x128xf32, #tpu.memory_space<vmem>>, %arg5: memref<1x128xf32, #tpu.memory_space<vmem>>, %arg6: memref<1x4x4x128xf32, #tpu.memory_space<vmem>>, %arg7: memref<1x1x128xf32, #tpu.memory_space<vmem>>, %arg8: memref<1x1x512xf32, #tpu.memory_space<vmem>>, %arg9: memref<32x128xf32, #tpu.memory_space<vmem>>) attributes {dimension_semantics = [#tpu.dimension_semantics<parallel>, #tpu.dimension_semantics<arbitrary>], iteration_bounds = array<i64: 2, 1>, scalar_prefetch = 0 : i64, scratch_operands = 1 : i64, tpu.core_type = #tpu.core_type<tc>, window_params = [{transform_indices = @transform_0, window_bounds = array<i64: 1, 48, 1536>}, {pipeline_mode = #tpu.pipeline_mode<synchronous>, transform_indices = @transform_1, window_bounds = array<i64: 3, 1536, 128>}, {pipeline_mode = #tpu.pipeline_mode<synchronous>, transform_indices = @transform_2, window_bounds = array<i64: 1, 128>}, {pipeline_mode = #tpu.pipeline_mode<synchronous>, transform_indices = @transform_3, window_bounds = array<i64: 1, 128>}, {transform_indices = @transform_4, window_bounds = array<i64: 1, 4, 4, 128>}, {transform_indices = @transform_5, window_bounds = array<i64: 1, 1, 128>}, {transform_indices = @transform_6, window_bounds = array<i64: 1, 1, 512>}]} {
    %c4_i32 = arith.constant 4 : i32
    %0 = arith.muli %arg1, %c4_i32 : i32
    %c0_i32 = arith.constant 0 : i32
    %1 = arith.addi %0, %c0_i32 : i32
    %c8_i32 = arith.constant 8 : i32
    %2 = arith.muli %1, %c8_i32 : i32
    %3 = tpu.assume_multiple %2, 8 : i32
    %c0 = arith.constant 0 : index
    %4 = arith.index_cast %3 : i32 to index
    %c0_0 = arith.constant 0 : index
    %5 = vector.load %arg2[%c0, %4, %c0_0] : memref<1x48x1536xbf16, #tpu.memory_space<vmem>>, vector<1x32x1536xbf16>
    %6 = vector.shape_cast %5 : vector<1x32x1536xbf16> to vector<32x1536xbf16>
    %c0_1 = arith.constant 0 : index
    %c0_2 = arith.constant 0 : index
    %c0_3 = arith.constant 0 : index
    %7 = vector.load %arg3[%c0_1, %c0_2, %c0_3] : memref<3x1536x128xbf16, #tpu.memory_space<vmem>>, vector<1x1536x128xbf16>
    %8 = vector.shape_cast %7 : vector<1x1536x128xbf16> to vector<1536x128xbf16>
    %cst = arith.constant dense<0.000000e+00> : vector<32x128xf32>
    %9 = tpu.matmul %6, %8, %cst {dimension_numbers = #tpu.dot_dimension_numbers<[1], [0], [0], [1], [0, 0, 1, 1], [], []>} : vector<32x1536xbf16>, vector<1536x128xbf16>, vector<32x128xf32> -> vector<32x128xf32>
    %c0_4 = arith.constant 0 : index
    %c0_5 = arith.constant 0 : index
    %10 = vector.load %arg9[%c0_4, %c0_5] : memref<32x128xf32, #tpu.memory_space<vmem>>, vector<32x128xf32>
    tpu.vector_store %arg9[%c0_4, %c0_5], %9 {strides = array<i32>} : memref<32x128xf32, #tpu.memory_space<vmem>>, vector<32x128xf32>,
    %c0_6 = arith.constant 0 : index
    %c0_7 = arith.constant 0 : index
    %11 = vector.load %arg9[%c0_6, %c0_7] : memref<32x128xf32, #tpu.memory_space<vmem>>, vector<32x128xf32>
    %c1_i32 = arith.constant 1 : i32
    %12 = arith.addi %0, %c1_i32 : i32
    %c8_i32_8 = arith.constant 8 : i32
    %13 = arith.muli %12, %c8_i32_8 : i32
    %14 = tpu.assume_multiple %13, 8 : i32
    %c0_9 = arith.constant 0 : index
    %15 = arith.index_cast %14 : i32 to index
    %c0_10 = arith.constant 0 : index
    %16 = vector.load %arg2[%c0_9, %15, %c0_10] : memref<1x48x1536xbf16, #tpu.memory_space<vmem>>, vector<1x32x1536xbf16>
    %17 = vector.shape_cast %16 : vector<1x32x1536xbf16> to vector<32x1536xbf16>
    %c1 = arith.constant 1 : index
    %c0_11 = arith.constant 0 : index
    %c0_12 = arith.constant 0 : index
    %18 = vector.load %arg3[%c1, %c0_11, %c0_12] : memref<3x1536x128xbf16, #tpu.memory_space<vmem>>, vector<1x1536x128xbf16>
    %19 = vector.shape_cast %18 : vector<1x1536x128xbf16> to vector<1536x128xbf16>
    %cst_13 = arith.constant dense<0.000000e+00> : vector<32x128xf32>
    %20 = tpu.matmul %17, %19, %cst_13 {dimension_numbers = #tpu.dot_dimension_numbers<[1], [0], [0], [1], [0, 0, 1, 1], [], []>} : vector<32x1536xbf16>, vector<1536x128xbf16>, vector<32x128xf32> -> vector<32x128xf32>
    %21 = arith.addf %11, %20 : vector<32x128xf32>
    %c0_14 = arith.constant 0 : index
    %c0_15 = arith.constant 0 : index
    %22 = vector.load %arg9[%c0_14, %c0_15] : memref<32x128xf32, #tpu.memory_space<vmem>>, vector<32x128xf32>
    tpu.vector_store %arg9[%c0_14, %c0_15], %21 {strides = array<i32>} : memref<32x128xf32, #tpu.memory_space<vmem>>, vector<32x128xf32>,
    %c0_16 = arith.constant 0 : index
    %c0_17 = arith.constant 0 : index
    %23 = vector.load %arg9[%c0_16, %c0_17] : memref<32x128xf32, #tpu.memory_space<vmem>>, vector<32x128xf32>
    %c2_i32 = arith.constant 2 : i32
    %24 = arith.addi %0, %c2_i32 : i32
    %c8_i32_18 = arith.constant 8 : i32
    %25 = arith.muli %24, %c8_i32_18 : i32
    %26 = tpu.assume_multiple %25, 8 : i32
    %c0_19 = arith.constant 0 : index
    %27 = arith.index_cast %26 : i32 to index
    %c0_20 = arith.constant 0 : index
    %28 = vector.load %arg2[%c0_19, %27, %c0_20] : memref<1x48x1536xbf16, #tpu.memory_space<vmem>>, vector<1x32x1536xbf16>
    %29 = vector.shape_cast %28 : vector<1x32x1536xbf16> to vector<32x1536xbf16>
    %c2 = arith.constant 2 : index
    %c0_21 = arith.constant 0 : index
    %c0_22 = arith.constant 0 : index
    %30 = vector.load %arg3[%c2, %c0_21, %c0_22] : memref<3x1536x128xbf16, #tpu.memory_space<vmem>>, vector<1x1536x128xbf16>
    %31 = vector.shape_cast %30 : vector<1x1536x128xbf16> to vector<1536x128xbf16>
    %cst_23 = arith.constant dense<0.000000e+00> : vector<32x128xf32>
    %32 = tpu.matmul %29, %31, %cst_23 {dimension_numbers = #tpu.dot_dimension_numbers<[1], [0], [0], [1], [0, 0, 1, 1], [], []>} : vector<32x1536xbf16>, vector<1536x128xbf16>, vector<32x128xf32> -> vector<32x128xf32>
    %33 = arith.addf %23, %32 : vector<32x128xf32>
    %c0_24 = arith.constant 0 : index
    %c0_25 = arith.constant 0 : index
    %34 = vector.load %arg9[%c0_24, %c0_25] : memref<32x128xf32, #tpu.memory_space<vmem>>, vector<32x128xf32>
    tpu.vector_store %arg9[%c0_24, %c0_25], %33 {strides = array<i32>} : memref<32x128xf32, #tpu.memory_space<vmem>>, vector<32x128xf32>,
    %c0_26 = arith.constant 0 : index
    %c0_27 = arith.constant 0 : index
    %35 = vector.load %arg9[%c0_26, %c0_27] : memref<32x128xf32, #tpu.memory_space<vmem>>, vector<32x128xf32>
    %c0_28 = arith.constant 0 : index
    %c0_29 = arith.constant 0 : index
    %36 = vector.load %arg4[%c0_28, %c0_29] : memref<1x128xf32, #tpu.memory_space<vmem>>, vector<1x128xf32>
    %37 = vector.broadcast %36 : vector<1x128xf32> to vector<32x128xf32>
    %38 = arith.mulf %35, %37 : vector<32x128xf32>
    %c0_30 = arith.constant 0 : index
    %c0_31 = arith.constant 0 : index
    %39 = vector.load %arg5[%c0_30, %c0_31] : memref<1x128xf32, #tpu.memory_space<vmem>>, vector<1x128xf32>
    %40 = vector.broadcast %39 : vector<1x128xf32> to vector<32x128xf32>
    %41 = arith.addf %38, %40 : vector<32x128xf32>
    %cst_32 = arith.constant 0.000000e+00 : f32
    %42 = vector.broadcast %cst_32 : f32 to vector<32x128xf32>
    %43 = arith.maximumf %41, %42 : vector<32x128xf32>
    %44 = vector.shape_cast %43 : vector<32x128xf32> to vector<4x8x128xf32>
    %45 = vector.extract_strided_slice %44 {offsets = [0, 0, 0], sizes = [4, 4, 128], strides = [1, 1, 1]} : vector<4x8x128xf32> to vector<4x4x128xf32>
    %c0_33 = arith.constant 0 : index
    %c0_34 = arith.constant 0 : index
    %c0_35 = arith.constant 0 : index
    %c0_36 = arith.constant 0 : index
    %46 = vector.load %arg6[%c0_33, %c0_34, %c0_35, %c0_36] : memref<1x4x4x128xf32, #tpu.memory_space<vmem>>, vector<1x4x4x128xf32>
    %47 = vector.shape_cast %46 : vector<1x4x4x128xf32> to vector<4x4x128xf32>
    %48 = vector.shape_cast %45 : vector<4x4x128xf32> to vector<1x4x4x128xf32>
    tpu.vector_store %arg6[%c0_33, %c0_34, %c0_35, %c0_36], %48 {strides = array<i32>} : memref<1x4x4x128xf32, #tpu.memory_space<vmem>>, vector<1x4x4x128xf32>,
    %c0_i32_37 = arith.constant 0 : i32
    %49 = arith.cmpi eq, %arg1, %c0_i32_37 : i32
    %50 = arith.extui %49 : i1 to i32
    %c0_i32_38 = arith.constant 0 : i32
    %51 = arith.cmpi ne, %50, %c0_i32_38 : i32
    scf.if %51 {
      %cst_56 = arith.constant 0.000000e+00 : f32
      %75 = vector.broadcast %cst_56 : f32 to vector<1x128xf32>
      %c0_57 = arith.constant 0 : index
      %c0_58 = arith.constant 0 : index
      %c0_59 = arith.constant 0 : index
      %76 = vector.load %arg7[%c0_57, %c0_58, %c0_59] : memref<1x1x128xf32, #tpu.memory_space<vmem>>, vector<1x1x128xf32>
      %77 = vector.shape_cast %76 : vector<1x1x128xf32> to vector<1x128xf32>
      %78 = vector.shape_cast %75 : vector<1x128xf32> to vector<1x1x128xf32>
      tpu.vector_store %arg7[%c0_57, %c0_58, %c0_59], %78 {strides = array<i32>} : memref<1x1x128xf32, #tpu.memory_space<vmem>>, vector<1x1x128xf32>,
      %cst_60 = arith.constant 0.000000e+00 : f32
      %79 = vector.broadcast %cst_60 : f32 to vector<1x512xf32>
      %c0_61 = arith.constant 0 : index
      %c0_62 = arith.constant 0 : index
      %c0_63 = arith.constant 0 : index
      %80 = vector.load %arg8[%c0_61, %c0_62, %c0_63] : memref<1x1x512xf32, #tpu.memory_space<vmem>>, vector<1x1x512xf32>
      %81 = vector.shape_cast %80 : vector<1x1x512xf32> to vector<1x512xf32>
      %82 = vector.shape_cast %79 : vector<1x512xf32> to vector<1x1x512xf32>
      tpu.vector_store %arg8[%c0_61, %c0_62, %c0_63], %82 {strides = array<i32>} : memref<1x1x512xf32, #tpu.memory_space<vmem>>, vector<1x1x512xf32>,
    } else {
    }
    %c0_39 = arith.constant 0 : index
    %c0_40 = arith.constant 0 : index
    %c0_41 = arith.constant 0 : index
    %52 = vector.load %arg7[%c0_39, %c0_40, %c0_41] : memref<1x1x128xf32, #tpu.memory_space<vmem>>, vector<1x1x128xf32>
    %53 = vector.shape_cast %52 : vector<1x1x128xf32> to vector<1x128xf32>
    %cst_42 = arith.constant dense<0.000000e+00> : vector<128xf32>
    %54 = vector.multi_reduction <add>, %45, %cst_42 [0, 1] : vector<4x4x128xf32> to vector<128xf32>
    %55 = vector.shape_cast %54 : vector<128xf32> to vector<1x128xf32>
    %56 = arith.addf %53, %55 : vector<1x128xf32>
    %c0_43 = arith.constant 0 : index
    %c0_44 = arith.constant 0 : index
    %c0_45 = arith.constant 0 : index
    %57 = vector.load %arg7[%c0_43, %c0_44, %c0_45] : memref<1x1x128xf32, #tpu.memory_space<vmem>>, vector<1x1x128xf32>
    %58 = vector.shape_cast %57 : vector<1x1x128xf32> to vector<1x128xf32>
    %59 = vector.shape_cast %56 : vector<1x128xf32> to vector<1x1x128xf32>
    tpu.vector_store %arg7[%c0_43, %c0_44, %c0_45], %59 {strides = array<i32>} : memref<1x1x128xf32, #tpu.memory_space<vmem>>, vector<1x1x128xf32>,
    %c1_i32_46 = arith.constant 1 : i32
    %60 = arith.addi %0, %c1_i32_46 : i32
    %c8_i32_47 = arith.constant 8 : i32
    %61 = arith.muli %60, %c8_i32_47 : i32
    %62 = tpu.assume_multiple %61, 8 : i32
    %c0_48 = arith.constant 0 : index
    %63 = arith.index_cast %62 : i32 to index
    %c512 = arith.constant 512 : index
    %64 = vector.load %arg2[%c0_48, %63, %c512] : memref<1x48x1536xbf16, #tpu.memory_space<vmem>>, vector<1x32x512xbf16>
    %65 = vector.shape_cast %64 : vector<1x32x512xbf16> to vector<32x512xbf16>
    %66 = arith.extf %65 : vector<32x512xbf16> to vector<32x512xf32>
    %c0_49 = arith.constant 0 : index
    %c0_50 = arith.constant 0 : index
    %c0_51 = arith.constant 0 : index
    %67 = vector.load %arg8[%c0_49, %c0_50, %c0_51] : memref<1x1x512xf32, #tpu.memory_space<vmem>>, vector<1x1x512xf32>
    %68 = vector.shape_cast %67 : vector<1x1x512xf32> to vector<1x512xf32>
    %cst_52 = arith.constant dense<0.000000e+00> : vector<512xf32>
    %69 = vector.multi_reduction <add>, %66, %cst_52 [0] : vector<32x512xf32> to vector<512xf32>
    %70 = vector.shape_cast %69 : vector<512xf32> to vector<1x512xf32>
    %71 = arith.addf %68, %70 : vector<1x512xf32>
    %c0_53 = arith.constant 0 : index
    %c0_54 = arith.constant 0 : index
    %c0_55 = arith.constant 0 : index
    %72 = vector.load %arg8[%c0_53, %c0_54, %c0_55] : memref<1x1x512xf32, #tpu.memory_space<vmem>>, vector<1x1x512xf32>
    %73 = vector.shape_cast %72 : vector<1x1x512xf32> to vector<1x512xf32>
    %74 = vector.shape_cast %71 : vector<1x512xf32> to vector<1x1x512xf32>
    tpu.vector_store %arg8[%c0_53, %c0_54, %c0_55], %74 {strides = array<i32>} : memref<1x1x512xf32, #tpu.memory_space<vmem>>, vector<1x1x512xf32>,
    return
  }
  func.func @transform_0(%arg0: i32, %arg1: i32) -> (i32, i32, i32) {
    %c0_i32 = arith.constant 0 : i32
    %c0_i32_0 = arith.constant 0 : i32
    %c0_i32_1 = arith.constant 0 : i32
    return %arg0, %c0_i32, %c0_i32_0 : i32, i32, i32
  }
  func.func @transform_1(%arg0: i32, %arg1: i32) -> (i32, i32, i32) {
    %c0_i32 = arith.constant 0 : i32
    %c0_i32_0 = arith.constant 0 : i32
    %c0_i32_1 = arith.constant 0 : i32
    %c0_i32_2 = arith.constant 0 : i32
    return %c0_i32, %c0_i32_0, %c0_i32_1 : i32, i32, i32
  }
  func.func @transform_2(%arg0: i32, %arg1: i32) -> (i32, i32) {
    %c0_i32 = arith.constant 0 : i32
    %c0_i32_0 = arith.constant 0 : i32
    %c0_i32_1 = arith.constant 0 : i32
    return %c0_i32, %c0_i32_0 : i32, i32
  }
  func.func @transform_3(%arg0: i32, %arg1: i32) -> (i32, i32) {
    %c0_i32 = arith.constant 0 : i32
    %c0_i32_0 = arith.constant 0 : i32
    %c0_i32_1 = arith.constant 0 : i32
    return %c0_i32, %c0_i32_0 : i32, i32
  }
  func.func @transform_4(%arg0: i32, %arg1: i32) -> (i32, i32, i32, i32) {
    %c0_i32 = arith.constant 0 : i32
    %c0_i32_0 = arith.constant 0 : i32
    %c0_i32_1 = arith.constant 0 : i32
    return %arg0, %arg1, %c0_i32, %c0_i32_0 : i32, i32, i32, i32
  }
  func.func @transform_5(%arg0: i32, %arg1: i32) -> (i32, i32, i32) {
    %c0_i32 = arith.constant 0 : i32
    %c0_i32_0 = arith.constant 0 : i32
    %c0_i32_1 = arith.constant 0 : i32
    return %arg0, %c0_i32, %c0_i32_0 : i32, i32, i32
  }
  func.func @transform_6(%arg0: i32, %arg1: i32) -> (i32, i32, i32) {
    %c0_i32 = arith.constant 0 : i32
    %c0_i32_0 = arith.constant 0 : i32
    %c0_i32_1 = arith.constant 0 : i32
    return %arg0, %c0_i32, %c0_i32_0 : i32, i32, i32
  }
}

module attributes {stable_mosaic.version = 11 : i64} {
  func.func @_arm_combine_kernel(%arg0: i32, %arg1: i32, %arg2: memref<1x16x128xf32, #tpu.memory_space<vmem>>, %arg3: memref<1x1x128xf32, #tpu.memory_space<vmem>>, %arg4: memref<1x1x128xf32, #tpu.memory_space<vmem>>, %arg5: memref<1x16x128xf32, #tpu.memory_space<vmem>>) attributes {dimension_semantics = [#tpu.dimension_semantics<parallel>, #tpu.dimension_semantics<parallel>], iteration_bounds = array<i64: 2, 1>, scalar_prefetch = 0 : i64, scratch_operands = 0 : i64, tpu.core_type = #tpu.core_type<tc>, window_params = [{transform_indices = @transform_0, window_bounds = array<i64: 1, 16, 128>}, {transform_indices = @transform_1, window_bounds = array<i64: 1, 1, 128>}, {transform_indices = @transform_2, window_bounds = array<i64: 1, 1, 128>}, {transform_indices = @transform_3, window_bounds = array<i64: 1, 16, 128>}]} {
    %c0 = arith.constant 0 : index
    %c0_0 = arith.constant 0 : index
    %c0_1 = arith.constant 0 : index
    %0 = vector.load %arg2[%c0, %c0_0, %c0_1] : memref<1x16x128xf32, #tpu.memory_space<vmem>>, vector<1x16x128xf32>
    %1 = vector.shape_cast %0 : vector<1x16x128xf32> to vector<16x128xf32>
    %c0_2 = arith.constant 0 : index
    %c0_3 = arith.constant 0 : index
    %c0_4 = arith.constant 0 : index
    %2 = vector.load %arg3[%c0_2, %c0_3, %c0_4] : memref<1x1x128xf32, #tpu.memory_space<vmem>>, vector<1x1x128xf32>
    %3 = vector.shape_cast %2 : vector<1x1x128xf32> to vector<1x128xf32>
    %4 = vector.broadcast %3 : vector<1x128xf32> to vector<16x128xf32>
    %5 = arith.mulf %1, %4 : vector<16x128xf32>
    %c0_5 = arith.constant 0 : index
    %c0_6 = arith.constant 0 : index
    %c0_7 = arith.constant 0 : index
    %6 = vector.load %arg4[%c0_5, %c0_6, %c0_7] : memref<1x1x128xf32, #tpu.memory_space<vmem>>, vector<1x1x128xf32>
    %7 = vector.shape_cast %6 : vector<1x1x128xf32> to vector<1x128xf32>
    %8 = vector.broadcast %7 : vector<1x128xf32> to vector<16x128xf32>
    %9 = arith.addf %5, %8 : vector<16x128xf32>
    %c0_8 = arith.constant 0 : index
    %c0_9 = arith.constant 0 : index
    %c0_10 = arith.constant 0 : index
    %10 = vector.load %arg5[%c0_8, %c0_9, %c0_10] : memref<1x16x128xf32, #tpu.memory_space<vmem>>, vector<1x16x128xf32>
    %11 = vector.shape_cast %10 : vector<1x16x128xf32> to vector<16x128xf32>
    %12 = vector.shape_cast %9 : vector<16x128xf32> to vector<1x16x128xf32>
    tpu.vector_store %arg5[%c0_8, %c0_9, %c0_10], %12 {strides = array<i32>} : memref<1x16x128xf32, #tpu.memory_space<vmem>>, vector<1x16x128xf32>,
    return
  }
  func.func @transform_0(%arg0: i32, %arg1: i32) -> (i32, i32, i32) {
    %c0_i32 = arith.constant 0 : i32
    %c0_i32_0 = arith.constant 0 : i32
    return %arg0, %arg1, %c0_i32 : i32, i32, i32
  }
  func.func @transform_1(%arg0: i32, %arg1: i32) -> (i32, i32, i32) {
    %c0_i32 = arith.constant 0 : i32
    %c0_i32_0 = arith.constant 0 : i32
    %c0_i32_1 = arith.constant 0 : i32
    return %arg0, %c0_i32, %c0_i32_0 : i32, i32, i32
  }
  func.func @transform_2(%arg0: i32, %arg1: i32) -> (i32, i32, i32) {
    %c0_i32 = arith.constant 0 : i32
    %c0_i32_0 = arith.constant 0 : i32
    %c0_i32_1 = arith.constant 0 : i32
    return %arg0, %c0_i32, %c0_i32_0 : i32, i32, i32
  }
  func.func @transform_3(%arg0: i32, %arg1: i32) -> (i32, i32, i32) {
    %c0_i32 = arith.constant 0 : i32
    %c0_i32_0 = arith.constant 0 : i32
    return %arg0, %arg1, %c0_i32 : i32, i32, i32
  }
}

module attributes {stable_mosaic.version = 11 : i64} {
  func.func @_conv3x3_bn_relu_kernel(%arg0: i32, %arg1: i32, %arg2: memref<1x80x384xbf16, #tpu.memory_space<vmem>>, %arg3: memref<3x384x128xbf16, #tpu.memory_space<vmem>>, %arg4: memref<1x128xf32, #tpu.memory_space<vmem>>, %arg5: memref<1x128xf32, #tpu.memory_space<vmem>>, %arg6: memref<1x8x8x128xf32, #tpu.memory_space<vmem>>, %arg7: memref<64x128xf32, #tpu.memory_space<vmem>>) attributes {dimension_semantics = [#tpu.dimension_semantics<parallel>, #tpu.dimension_semantics<arbitrary>], iteration_bounds = array<i64: 2, 1>, scalar_prefetch = 0 : i64, scratch_operands = 1 : i64, tpu.core_type = #tpu.core_type<tc>, window_params = [{transform_indices = @transform_0, window_bounds = array<i64: 1, 80, 384>}, {pipeline_mode = #tpu.pipeline_mode<synchronous>, transform_indices = @transform_1, window_bounds = array<i64: 3, 384, 128>}, {pipeline_mode = #tpu.pipeline_mode<synchronous>, transform_indices = @transform_2, window_bounds = array<i64: 1, 128>}, {pipeline_mode = #tpu.pipeline_mode<synchronous>, transform_indices = @transform_3, window_bounds = array<i64: 1, 128>}, {transform_indices = @transform_4, window_bounds = array<i64: 1, 8, 8, 128>}]} {
    %c8_i32 = arith.constant 8 : i32
    %0 = arith.muli %arg1, %c8_i32 : i32
    %c0_i32 = arith.constant 0 : i32
    %1 = arith.addi %0, %c0_i32 : i32
    %c8_i32_0 = arith.constant 8 : i32
    %2 = arith.muli %1, %c8_i32_0 : i32
    %3 = tpu.assume_multiple %2, 8 : i32
    %c0 = arith.constant 0 : index
    %4 = arith.index_cast %3 : i32 to index
    %c0_1 = arith.constant 0 : index
    %5 = vector.load %arg2[%c0, %4, %c0_1] : memref<1x80x384xbf16, #tpu.memory_space<vmem>>, vector<1x64x384xbf16>
    %6 = vector.shape_cast %5 : vector<1x64x384xbf16> to vector<64x384xbf16>
    %c0_2 = arith.constant 0 : index
    %c0_3 = arith.constant 0 : index
    %c0_4 = arith.constant 0 : index
    %7 = vector.load %arg3[%c0_2, %c0_3, %c0_4] : memref<3x384x128xbf16, #tpu.memory_space<vmem>>, vector<1x384x128xbf16>
    %8 = vector.shape_cast %7 : vector<1x384x128xbf16> to vector<384x128xbf16>
    %cst = arith.constant dense<0.000000e+00> : vector<64x128xf32>
    %9 = tpu.matmul %6, %8, %cst {dimension_numbers = #tpu.dot_dimension_numbers<[1], [0], [0], [1], [0, 0, 1, 1], [], []>} : vector<64x384xbf16>, vector<384x128xbf16>, vector<64x128xf32> -> vector<64x128xf32>
    %c0_5 = arith.constant 0 : index
    %c0_6 = arith.constant 0 : index
    %10 = vector.load %arg7[%c0_5, %c0_6] : memref<64x128xf32, #tpu.memory_space<vmem>>, vector<64x128xf32>
    tpu.vector_store %arg7[%c0_5, %c0_6], %9 {strides = array<i32>} : memref<64x128xf32, #tpu.memory_space<vmem>>, vector<64x128xf32>,
    %c0_7 = arith.constant 0 : index
    %c0_8 = arith.constant 0 : index
    %11 = vector.load %arg7[%c0_7, %c0_8] : memref<64x128xf32, #tpu.memory_space<vmem>>, vector<64x128xf32>
    %c1_i32 = arith.constant 1 : i32
    %12 = arith.addi %0, %c1_i32 : i32
    %c8_i32_9 = arith.constant 8 : i32
    %13 = arith.muli %12, %c8_i32_9 : i32
    %14 = tpu.assume_multiple %13, 8 : i32
    %c0_10 = arith.constant 0 : index
    %15 = arith.index_cast %14 : i32 to index
    %c0_11 = arith.constant 0 : index
    %16 = vector.load %arg2[%c0_10, %15, %c0_11] : memref<1x80x384xbf16, #tpu.memory_space<vmem>>, vector<1x64x384xbf16>
    %17 = vector.shape_cast %16 : vector<1x64x384xbf16> to vector<64x384xbf16>
    %c1 = arith.constant 1 : index
    %c0_12 = arith.constant 0 : index
    %c0_13 = arith.constant 0 : index
    %18 = vector.load %arg3[%c1, %c0_12, %c0_13] : memref<3x384x128xbf16, #tpu.memory_space<vmem>>, vector<1x384x128xbf16>
    %19 = vector.shape_cast %18 : vector<1x384x128xbf16> to vector<384x128xbf16>
    %cst_14 = arith.constant dense<0.000000e+00> : vector<64x128xf32>
    %20 = tpu.matmul %17, %19, %cst_14 {dimension_numbers = #tpu.dot_dimension_numbers<[1], [0], [0], [1], [0, 0, 1, 1], [], []>} : vector<64x384xbf16>, vector<384x128xbf16>, vector<64x128xf32> -> vector<64x128xf32>
    %21 = arith.addf %11, %20 : vector<64x128xf32>
    %c0_15 = arith.constant 0 : index
    %c0_16 = arith.constant 0 : index
    %22 = vector.load %arg7[%c0_15, %c0_16] : memref<64x128xf32, #tpu.memory_space<vmem>>, vector<64x128xf32>
    tpu.vector_store %arg7[%c0_15, %c0_16], %21 {strides = array<i32>} : memref<64x128xf32, #tpu.memory_space<vmem>>, vector<64x128xf32>,
    %c0_17 = arith.constant 0 : index
    %c0_18 = arith.constant 0 : index
    %23 = vector.load %arg7[%c0_17, %c0_18] : memref<64x128xf32, #tpu.memory_space<vmem>>, vector<64x128xf32>
    %c2_i32 = arith.constant 2 : i32
    %24 = arith.addi %0, %c2_i32 : i32
    %c8_i32_19 = arith.constant 8 : i32
    %25 = arith.muli %24, %c8_i32_19 : i32
    %26 = tpu.assume_multiple %25, 8 : i32
    %c0_20 = arith.constant 0 : index
    %27 = arith.index_cast %26 : i32 to index
    %c0_21 = arith.constant 0 : index
    %28 = vector.load %arg2[%c0_20, %27, %c0_21] : memref<1x80x384xbf16, #tpu.memory_space<vmem>>, vector<1x64x384xbf16>
    %29 = vector.shape_cast %28 : vector<1x64x384xbf16> to vector<64x384xbf16>
    %c2 = arith.constant 2 : index
    %c0_22 = arith.constant 0 : index
    %c0_23 = arith.constant 0 : index
    %30 = vector.load %arg3[%c2, %c0_22, %c0_23] : memref<3x384x128xbf16, #tpu.memory_space<vmem>>, vector<1x384x128xbf16>
    %31 = vector.shape_cast %30 : vector<1x384x128xbf16> to vector<384x128xbf16>
    %cst_24 = arith.constant dense<0.000000e+00> : vector<64x128xf32>
    %32 = tpu.matmul %29, %31, %cst_24 {dimension_numbers = #tpu.dot_dimension_numbers<[1], [0], [0], [1], [0, 0, 1, 1], [], []>} : vector<64x384xbf16>, vector<384x128xbf16>, vector<64x128xf32> -> vector<64x128xf32>
    %33 = arith.addf %23, %32 : vector<64x128xf32>
    %c0_25 = arith.constant 0 : index
    %c0_26 = arith.constant 0 : index
    %34 = vector.load %arg7[%c0_25, %c0_26] : memref<64x128xf32, #tpu.memory_space<vmem>>, vector<64x128xf32>
    tpu.vector_store %arg7[%c0_25, %c0_26], %33 {strides = array<i32>} : memref<64x128xf32, #tpu.memory_space<vmem>>, vector<64x128xf32>,
    %c0_27 = arith.constant 0 : index
    %c0_28 = arith.constant 0 : index
    %35 = vector.load %arg7[%c0_27, %c0_28] : memref<64x128xf32, #tpu.memory_space<vmem>>, vector<64x128xf32>
    %c0_29 = arith.constant 0 : index
    %c0_30 = arith.constant 0 : index
    %36 = vector.load %arg4[%c0_29, %c0_30] : memref<1x128xf32, #tpu.memory_space<vmem>>, vector<1x128xf32>
    %37 = vector.broadcast %36 : vector<1x128xf32> to vector<64x128xf32>
    %38 = arith.mulf %35, %37 : vector<64x128xf32>
    %c0_31 = arith.constant 0 : index
    %c0_32 = arith.constant 0 : index
    %39 = vector.load %arg5[%c0_31, %c0_32] : memref<1x128xf32, #tpu.memory_space<vmem>>, vector<1x128xf32>
    %40 = vector.broadcast %39 : vector<1x128xf32> to vector<64x128xf32>
    %41 = arith.addf %38, %40 : vector<64x128xf32>
    %cst_33 = arith.constant 0.000000e+00 : f32
    %42 = vector.broadcast %cst_33 : f32 to vector<64x128xf32>
    %43 = arith.maximumf %41, %42 : vector<64x128xf32>
    %44 = vector.shape_cast %43 : vector<64x128xf32> to vector<8x8x128xf32>
    %c0_34 = arith.constant 0 : index
    %c0_35 = arith.constant 0 : index
    %c0_36 = arith.constant 0 : index
    %c0_37 = arith.constant 0 : index
    %45 = vector.load %arg6[%c0_34, %c0_35, %c0_36, %c0_37] : memref<1x8x8x128xf32, #tpu.memory_space<vmem>>, vector<1x8x8x128xf32>
    %46 = vector.shape_cast %45 : vector<1x8x8x128xf32> to vector<8x8x128xf32>
    %47 = vector.shape_cast %44 : vector<8x8x128xf32> to vector<1x8x8x128xf32>
    tpu.vector_store %arg6[%c0_34, %c0_35, %c0_36, %c0_37], %47 {strides = array<i32>} : memref<1x8x8x128xf32, #tpu.memory_space<vmem>>, vector<1x8x8x128xf32>,
    return
  }
  func.func @transform_0(%arg0: i32, %arg1: i32) -> (i32, i32, i32) {
    %c0_i32 = arith.constant 0 : i32
    %c0_i32_0 = arith.constant 0 : i32
    %c0_i32_1 = arith.constant 0 : i32
    return %arg0, %c0_i32, %c0_i32_0 : i32, i32, i32
  }
  func.func @transform_1(%arg0: i32, %arg1: i32) -> (i32, i32, i32) {
    %c0_i32 = arith.constant 0 : i32
    %c0_i32_0 = arith.constant 0 : i32
    %c0_i32_1 = arith.constant 0 : i32
    %c0_i32_2 = arith.constant 0 : i32
    return %c0_i32, %c0_i32_0, %c0_i32_1 : i32, i32, i32
  }
  func.func @transform_2(%arg0: i32, %arg1: i32) -> (i32, i32) {
    %c0_i32 = arith.constant 0 : i32
    %c0_i32_0 = arith.constant 0 : i32
    %c0_i32_1 = arith.constant 0 : i32
    return %c0_i32, %c0_i32_0 : i32, i32
  }
  func.func @transform_3(%arg0: i32, %arg1: i32) -> (i32, i32) {
    %c0_i32 = arith.constant 0 : i32
    %c0_i32_0 = arith.constant 0 : i32
    %c0_i32_1 = arith.constant 0 : i32
    return %c0_i32, %c0_i32_0 : i32, i32
  }
  func.func @transform_4(%arg0: i32, %arg1: i32) -> (i32, i32, i32, i32) {
    %c0_i32 = arith.constant 0 : i32
    %c0_i32_0 = arith.constant 0 : i32
    %c0_i32_1 = arith.constant 0 : i32
    return %arg0, %arg1, %c0_i32, %c0_i32_0 : i32, i32, i32, i32
  }
}

module attributes {stable_mosaic.version = 11 : i64} {
  func.func @_conv3x3_bn_relu_kernel(%arg0: i32, %arg1: i32, %arg2: memref<1x80x768xbf16, #tpu.memory_space<vmem>>, %arg3: memref<3x768x128xbf16, #tpu.memory_space<vmem>>, %arg4: memref<1x128xf32, #tpu.memory_space<vmem>>, %arg5: memref<1x128xf32, #tpu.memory_space<vmem>>, %arg6: memref<1x8x8x128xf32, #tpu.memory_space<vmem>>, %arg7: memref<1x1x128xf32, #tpu.memory_space<vmem>>, %arg8: memref<1x1x256xf32, #tpu.memory_space<vmem>>, %arg9: memref<64x128xf32, #tpu.memory_space<vmem>>) attributes {dimension_semantics = [#tpu.dimension_semantics<parallel>, #tpu.dimension_semantics<arbitrary>], iteration_bounds = array<i64: 2, 1>, scalar_prefetch = 0 : i64, scratch_operands = 1 : i64, tpu.core_type = #tpu.core_type<tc>, window_params = [{transform_indices = @transform_0, window_bounds = array<i64: 1, 80, 768>}, {pipeline_mode = #tpu.pipeline_mode<synchronous>, transform_indices = @transform_1, window_bounds = array<i64: 3, 768, 128>}, {pipeline_mode = #tpu.pipeline_mode<synchronous>, transform_indices = @transform_2, window_bounds = array<i64: 1, 128>}, {pipeline_mode = #tpu.pipeline_mode<synchronous>, transform_indices = @transform_3, window_bounds = array<i64: 1, 128>}, {transform_indices = @transform_4, window_bounds = array<i64: 1, 8, 8, 128>}, {transform_indices = @transform_5, window_bounds = array<i64: 1, 1, 128>}, {transform_indices = @transform_6, window_bounds = array<i64: 1, 1, 256>}]} {
    %c8_i32 = arith.constant 8 : i32
    %0 = arith.muli %arg1, %c8_i32 : i32
    %c0_i32 = arith.constant 0 : i32
    %1 = arith.addi %0, %c0_i32 : i32
    %c8_i32_0 = arith.constant 8 : i32
    %2 = arith.muli %1, %c8_i32_0 : i32
    %3 = tpu.assume_multiple %2, 8 : i32
    %c0 = arith.constant 0 : index
    %4 = arith.index_cast %3 : i32 to index
    %c0_1 = arith.constant 0 : index
    %5 = vector.load %arg2[%c0, %4, %c0_1] : memref<1x80x768xbf16, #tpu.memory_space<vmem>>, vector<1x64x768xbf16>
    %6 = vector.shape_cast %5 : vector<1x64x768xbf16> to vector<64x768xbf16>
    %c0_2 = arith.constant 0 : index
    %c0_3 = arith.constant 0 : index
    %c0_4 = arith.constant 0 : index
    %7 = vector.load %arg3[%c0_2, %c0_3, %c0_4] : memref<3x768x128xbf16, #tpu.memory_space<vmem>>, vector<1x768x128xbf16>
    %8 = vector.shape_cast %7 : vector<1x768x128xbf16> to vector<768x128xbf16>
    %cst = arith.constant dense<0.000000e+00> : vector<64x128xf32>
    %9 = tpu.matmul %6, %8, %cst {dimension_numbers = #tpu.dot_dimension_numbers<[1], [0], [0], [1], [0, 0, 1, 1], [], []>} : vector<64x768xbf16>, vector<768x128xbf16>, vector<64x128xf32> -> vector<64x128xf32>
    %c0_5 = arith.constant 0 : index
    %c0_6 = arith.constant 0 : index
    %10 = vector.load %arg9[%c0_5, %c0_6] : memref<64x128xf32, #tpu.memory_space<vmem>>, vector<64x128xf32>
    tpu.vector_store %arg9[%c0_5, %c0_6], %9 {strides = array<i32>} : memref<64x128xf32, #tpu.memory_space<vmem>>, vector<64x128xf32>,
    %c0_7 = arith.constant 0 : index
    %c0_8 = arith.constant 0 : index
    %11 = vector.load %arg9[%c0_7, %c0_8] : memref<64x128xf32, #tpu.memory_space<vmem>>, vector<64x128xf32>
    %c1_i32 = arith.constant 1 : i32
    %12 = arith.addi %0, %c1_i32 : i32
    %c8_i32_9 = arith.constant 8 : i32
    %13 = arith.muli %12, %c8_i32_9 : i32
    %14 = tpu.assume_multiple %13, 8 : i32
    %c0_10 = arith.constant 0 : index
    %15 = arith.index_cast %14 : i32 to index
    %c0_11 = arith.constant 0 : index
    %16 = vector.load %arg2[%c0_10, %15, %c0_11] : memref<1x80x768xbf16, #tpu.memory_space<vmem>>, vector<1x64x768xbf16>
    %17 = vector.shape_cast %16 : vector<1x64x768xbf16> to vector<64x768xbf16>
    %c1 = arith.constant 1 : index
    %c0_12 = arith.constant 0 : index
    %c0_13 = arith.constant 0 : index
    %18 = vector.load %arg3[%c1, %c0_12, %c0_13] : memref<3x768x128xbf16, #tpu.memory_space<vmem>>, vector<1x768x128xbf16>
    %19 = vector.shape_cast %18 : vector<1x768x128xbf16> to vector<768x128xbf16>
    %cst_14 = arith.constant dense<0.000000e+00> : vector<64x128xf32>
    %20 = tpu.matmul %17, %19, %cst_14 {dimension_numbers = #tpu.dot_dimension_numbers<[1], [0], [0], [1], [0, 0, 1, 1], [], []>} : vector<64x768xbf16>, vector<768x128xbf16>, vector<64x128xf32> -> vector<64x128xf32>
    %21 = arith.addf %11, %20 : vector<64x128xf32>
    %c0_15 = arith.constant 0 : index
    %c0_16 = arith.constant 0 : index
    %22 = vector.load %arg9[%c0_15, %c0_16] : memref<64x128xf32, #tpu.memory_space<vmem>>, vector<64x128xf32>
    tpu.vector_store %arg9[%c0_15, %c0_16], %21 {strides = array<i32>} : memref<64x128xf32, #tpu.memory_space<vmem>>, vector<64x128xf32>,
    %c0_17 = arith.constant 0 : index
    %c0_18 = arith.constant 0 : index
    %23 = vector.load %arg9[%c0_17, %c0_18] : memref<64x128xf32, #tpu.memory_space<vmem>>, vector<64x128xf32>
    %c2_i32 = arith.constant 2 : i32
    %24 = arith.addi %0, %c2_i32 : i32
    %c8_i32_19 = arith.constant 8 : i32
    %25 = arith.muli %24, %c8_i32_19 : i32
    %26 = tpu.assume_multiple %25, 8 : i32
    %c0_20 = arith.constant 0 : index
    %27 = arith.index_cast %26 : i32 to index
    %c0_21 = arith.constant 0 : index
    %28 = vector.load %arg2[%c0_20, %27, %c0_21] : memref<1x80x768xbf16, #tpu.memory_space<vmem>>, vector<1x64x768xbf16>
    %29 = vector.shape_cast %28 : vector<1x64x768xbf16> to vector<64x768xbf16>
    %c2 = arith.constant 2 : index
    %c0_22 = arith.constant 0 : index
    %c0_23 = arith.constant 0 : index
    %30 = vector.load %arg3[%c2, %c0_22, %c0_23] : memref<3x768x128xbf16, #tpu.memory_space<vmem>>, vector<1x768x128xbf16>
    %31 = vector.shape_cast %30 : vector<1x768x128xbf16> to vector<768x128xbf16>
    %cst_24 = arith.constant dense<0.000000e+00> : vector<64x128xf32>
    %32 = tpu.matmul %29, %31, %cst_24 {dimension_numbers = #tpu.dot_dimension_numbers<[1], [0], [0], [1], [0, 0, 1, 1], [], []>} : vector<64x768xbf16>, vector<768x128xbf16>, vector<64x128xf32> -> vector<64x128xf32>
    %33 = arith.addf %23, %32 : vector<64x128xf32>
    %c0_25 = arith.constant 0 : index
    %c0_26 = arith.constant 0 : index
    %34 = vector.load %arg9[%c0_25, %c0_26] : memref<64x128xf32, #tpu.memory_space<vmem>>, vector<64x128xf32>
    tpu.vector_store %arg9[%c0_25, %c0_26], %33 {strides = array<i32>} : memref<64x128xf32, #tpu.memory_space<vmem>>, vector<64x128xf32>,
    %c0_27 = arith.constant 0 : index
    %c0_28 = arith.constant 0 : index
    %35 = vector.load %arg9[%c0_27, %c0_28] : memref<64x128xf32, #tpu.memory_space<vmem>>, vector<64x128xf32>
    %c0_29 = arith.constant 0 : index
    %c0_30 = arith.constant 0 : index
    %36 = vector.load %arg4[%c0_29, %c0_30] : memref<1x128xf32, #tpu.memory_space<vmem>>, vector<1x128xf32>
    %37 = vector.broadcast %36 : vector<1x128xf32> to vector<64x128xf32>
    %38 = arith.mulf %35, %37 : vector<64x128xf32>
    %c0_31 = arith.constant 0 : index
    %c0_32 = arith.constant 0 : index
    %39 = vector.load %arg5[%c0_31, %c0_32] : memref<1x128xf32, #tpu.memory_space<vmem>>, vector<1x128xf32>
    %40 = vector.broadcast %39 : vector<1x128xf32> to vector<64x128xf32>
    %41 = arith.addf %38, %40 : vector<64x128xf32>
    %cst_33 = arith.constant 0.000000e+00 : f32
    %42 = vector.broadcast %cst_33 : f32 to vector<64x128xf32>
    %43 = arith.maximumf %41, %42 : vector<64x128xf32>
    %44 = vector.shape_cast %43 : vector<64x128xf32> to vector<8x8x128xf32>
    %c0_34 = arith.constant 0 : index
    %c0_35 = arith.constant 0 : index
    %c0_36 = arith.constant 0 : index
    %c0_37 = arith.constant 0 : index
    %45 = vector.load %arg6[%c0_34, %c0_35, %c0_36, %c0_37] : memref<1x8x8x128xf32, #tpu.memory_space<vmem>>, vector<1x8x8x128xf32>
    %46 = vector.shape_cast %45 : vector<1x8x8x128xf32> to vector<8x8x128xf32>
    %47 = vector.shape_cast %44 : vector<8x8x128xf32> to vector<1x8x8x128xf32>
    tpu.vector_store %arg6[%c0_34, %c0_35, %c0_36, %c0_37], %47 {strides = array<i32>} : memref<1x8x8x128xf32, #tpu.memory_space<vmem>>, vector<1x8x8x128xf32>,
    %c0_i32_38 = arith.constant 0 : i32
    %48 = arith.cmpi eq, %arg1, %c0_i32_38 : i32
    %49 = arith.extui %48 : i1 to i32
    %c0_i32_39 = arith.constant 0 : i32
    %50 = arith.cmpi ne, %49, %c0_i32_39 : i32
    scf.if %50 {
      %cst_57 = arith.constant 0.000000e+00 : f32
      %74 = vector.broadcast %cst_57 : f32 to vector<1x128xf32>
      %c0_58 = arith.constant 0 : index
      %c0_59 = arith.constant 0 : index
      %c0_60 = arith.constant 0 : index
      %75 = vector.load %arg7[%c0_58, %c0_59, %c0_60] : memref<1x1x128xf32, #tpu.memory_space<vmem>>, vector<1x1x128xf32>
      %76 = vector.shape_cast %75 : vector<1x1x128xf32> to vector<1x128xf32>
      %77 = vector.shape_cast %74 : vector<1x128xf32> to vector<1x1x128xf32>
      tpu.vector_store %arg7[%c0_58, %c0_59, %c0_60], %77 {strides = array<i32>} : memref<1x1x128xf32, #tpu.memory_space<vmem>>, vector<1x1x128xf32>,
      %cst_61 = arith.constant 0.000000e+00 : f32
      %78 = vector.broadcast %cst_61 : f32 to vector<1x256xf32>
      %c0_62 = arith.constant 0 : index
      %c0_63 = arith.constant 0 : index
      %c0_64 = arith.constant 0 : index
      %79 = vector.load %arg8[%c0_62, %c0_63, %c0_64] : memref<1x1x256xf32, #tpu.memory_space<vmem>>, vector<1x1x256xf32>
      %80 = vector.shape_cast %79 : vector<1x1x256xf32> to vector<1x256xf32>
      %81 = vector.shape_cast %78 : vector<1x256xf32> to vector<1x1x256xf32>
      tpu.vector_store %arg8[%c0_62, %c0_63, %c0_64], %81 {strides = array<i32>} : memref<1x1x256xf32, #tpu.memory_space<vmem>>, vector<1x1x256xf32>,
    } else {
    }
    %c0_40 = arith.constant 0 : index
    %c0_41 = arith.constant 0 : index
    %c0_42 = arith.constant 0 : index
    %51 = vector.load %arg7[%c0_40, %c0_41, %c0_42] : memref<1x1x128xf32, #tpu.memory_space<vmem>>, vector<1x1x128xf32>
    %52 = vector.shape_cast %51 : vector<1x1x128xf32> to vector<1x128xf32>
    %cst_43 = arith.constant dense<0.000000e+00> : vector<128xf32>
    %53 = vector.multi_reduction <add>, %44, %cst_43 [0, 1] : vector<8x8x128xf32> to vector<128xf32>
    %54 = vector.shape_cast %53 : vector<128xf32> to vector<1x128xf32>
    %55 = arith.addf %52, %54 : vector<1x128xf32>
    %c0_44 = arith.constant 0 : index
    %c0_45 = arith.constant 0 : index
    %c0_46 = arith.constant 0 : index
    %56 = vector.load %arg7[%c0_44, %c0_45, %c0_46] : memref<1x1x128xf32, #tpu.memory_space<vmem>>, vector<1x1x128xf32>
    %57 = vector.shape_cast %56 : vector<1x1x128xf32> to vector<1x128xf32>
    %58 = vector.shape_cast %55 : vector<1x128xf32> to vector<1x1x128xf32>
    tpu.vector_store %arg7[%c0_44, %c0_45, %c0_46], %58 {strides = array<i32>} : memref<1x1x128xf32, #tpu.memory_space<vmem>>, vector<1x1x128xf32>,
    %c1_i32_47 = arith.constant 1 : i32
    %59 = arith.addi %0, %c1_i32_47 : i32
    %c8_i32_48 = arith.constant 8 : i32
    %60 = arith.muli %59, %c8_i32_48 : i32
    %61 = tpu.assume_multiple %60, 8 : i32
    %c0_49 = arith.constant 0 : index
    %62 = arith.index_cast %61 : i32 to index
    %c256 = arith.constant 256 : index
    %63 = vector.load %arg2[%c0_49, %62, %c256] : memref<1x80x768xbf16, #tpu.memory_space<vmem>>, vector<1x64x256xbf16>
    %64 = vector.shape_cast %63 : vector<1x64x256xbf16> to vector<64x256xbf16>
    %65 = arith.extf %64 : vector<64x256xbf16> to vector<64x256xf32>
    %c0_50 = arith.constant 0 : index
    %c0_51 = arith.constant 0 : index
    %c0_52 = arith.constant 0 : index
    %66 = vector.load %arg8[%c0_50, %c0_51, %c0_52] : memref<1x1x256xf32, #tpu.memory_space<vmem>>, vector<1x1x256xf32>
    %67 = vector.shape_cast %66 : vector<1x1x256xf32> to vector<1x256xf32>
    %cst_53 = arith.constant dense<0.000000e+00> : vector<256xf32>
    %68 = vector.multi_reduction <add>, %65, %cst_53 [0] : vector<64x256xf32> to vector<256xf32>
    %69 = vector.shape_cast %68 : vector<256xf32> to vector<1x256xf32>
    %70 = arith.addf %67, %69 : vector<1x256xf32>
    %c0_54 = arith.constant 0 : index
    %c0_55 = arith.constant 0 : index
    %c0_56 = arith.constant 0 : index
    %71 = vector.load %arg8[%c0_54, %c0_55, %c0_56] : memref<1x1x256xf32, #tpu.memory_space<vmem>>, vector<1x1x256xf32>
    %72 = vector.shape_cast %71 : vector<1x1x256xf32> to vector<1x256xf32>
    %73 = vector.shape_cast %70 : vector<1x256xf32> to vector<1x1x256xf32>
    tpu.vector_store %arg8[%c0_54, %c0_55, %c0_56], %73 {strides = array<i32>} : memref<1x1x256xf32, #tpu.memory_space<vmem>>, vector<1x1x256xf32>,
    return
  }
  func.func @transform_0(%arg0: i32, %arg1: i32) -> (i32, i32, i32) {
    %c0_i32 = arith.constant 0 : i32
    %c0_i32_0 = arith.constant 0 : i32
    %c0_i32_1 = arith.constant 0 : i32
    return %arg0, %c0_i32, %c0_i32_0 : i32, i32, i32
  }
  func.func @transform_1(%arg0: i32, %arg1: i32) -> (i32, i32, i32) {
    %c0_i32 = arith.constant 0 : i32
    %c0_i32_0 = arith.constant 0 : i32
    %c0_i32_1 = arith.constant 0 : i32
    %c0_i32_2 = arith.constant 0 : i32
    return %c0_i32, %c0_i32_0, %c0_i32_1 : i32, i32, i32
  }
  func.func @transform_2(%arg0: i32, %arg1: i32) -> (i32, i32) {
    %c0_i32 = arith.constant 0 : i32
    %c0_i32_0 = arith.constant 0 : i32
    %c0_i32_1 = arith.constant 0 : i32
    return %c0_i32, %c0_i32_0 : i32, i32
  }
  func.func @transform_3(%arg0: i32, %arg1: i32) -> (i32, i32) {
    %c0_i32 = arith.constant 0 : i32
    %c0_i32_0 = arith.constant 0 : i32
    %c0_i32_1 = arith.constant 0 : i32
    return %c0_i32, %c0_i32_0 : i32, i32
  }
  func.func @transform_4(%arg0: i32, %arg1: i32) -> (i32, i32, i32, i32) {
    %c0_i32 = arith.constant 0 : i32
    %c0_i32_0 = arith.constant 0 : i32
    %c0_i32_1 = arith.constant 0 : i32
    return %arg0, %arg1, %c0_i32, %c0_i32_0 : i32, i32, i32, i32
  }
  func.func @transform_5(%arg0: i32, %arg1: i32) -> (i32, i32, i32) {
    %c0_i32 = arith.constant 0 : i32
    %c0_i32_0 = arith.constant 0 : i32
    %c0_i32_1 = arith.constant 0 : i32
    return %arg0, %c0_i32, %c0_i32_0 : i32, i32, i32
  }
  func.func @transform_6(%arg0: i32, %arg1: i32) -> (i32, i32, i32) {
    %c0_i32 = arith.constant 0 : i32
    %c0_i32_0 = arith.constant 0 : i32
    %c0_i32_1 = arith.constant 0 : i32
    return %arg0, %c0_i32, %c0_i32_0 : i32, i32, i32
  }
}

module attributes {stable_mosaic.version = 11 : i64} {
  func.func @_vec_head_kernel(%arg0: memref<2x128xf32, #tpu.memory_space<vmem>>, %arg1: memref<128x128xf32, #tpu.memory_space<vmem>>, %arg2: memref<1x128xf32, #tpu.memory_space<vmem>>, %arg3: memref<1x128xf32, #tpu.memory_space<vmem>>, %arg4: memref<2x128xf32, #tpu.memory_space<vmem>>) attributes {dimension_semantics = [], scalar_prefetch = 0 : i64, scratch_operands = 0 : i64, tpu.core_type = #tpu.core_type<tc>} {
    %c0 = arith.constant 0 : index
    %c0_0 = arith.constant 0 : index
    %0 = vector.load %arg0[%c0, %c0_0] : memref<2x128xf32, #tpu.memory_space<vmem>>, vector<2x128xf32>
    %cst = arith.constant 1.562500e-02 : f32
    %1 = vector.broadcast %cst : f32 to vector<2x128xf32>
    %2 = arith.mulf %0, %1 : vector<2x128xf32>
    %c0_1 = arith.constant 0 : index
    %c0_2 = arith.constant 0 : index
    %3 = vector.load %arg1[%c0_1, %c0_2] : memref<128x128xf32, #tpu.memory_space<vmem>>, vector<128x128xf32>
    %cst_3 = arith.constant dense<0.000000e+00> : vector<2x128xf32>
    %4 = tpu.matmul %2, %3, %cst_3 {dimension_numbers = #tpu.dot_dimension_numbers<[1], [0], [0], [1], [0, 0, 1, 1], [], []>} : vector<2x128xf32>, vector<128x128xf32>, vector<2x128xf32> -> vector<2x128xf32>
    %c0_4 = arith.constant 0 : index
    %c0_5 = arith.constant 0 : index
    %5 = vector.load %arg2[%c0_4, %c0_5] : memref<1x128xf32, #tpu.memory_space<vmem>>, vector<1x128xf32>
    %6 = vector.broadcast %5 : vector<1x128xf32> to vector<2x128xf32>
    %7 = arith.mulf %4, %6 : vector<2x128xf32>
    %c0_6 = arith.constant 0 : index
    %c0_7 = arith.constant 0 : index
    %8 = vector.load %arg3[%c0_6, %c0_7] : memref<1x128xf32, #tpu.memory_space<vmem>>, vector<1x128xf32>
    %9 = vector.broadcast %8 : vector<1x128xf32> to vector<2x128xf32>
    %10 = arith.addf %7, %9 : vector<2x128xf32>
    %11 = arith.negf %10 : vector<2x128xf32>
    %12 = math.exp %11 : vector<2x128xf32>
    %cst_8 = arith.constant 1.000000e+00 : f32
    %13 = vector.broadcast %cst_8 : f32 to vector<2x128xf32>
    %14 = arith.addf %13, %12 : vector<2x128xf32>
    %15 = arith.divf %13, %14 : vector<2x128xf32>
    %c0_9 = arith.constant 0 : index
    %c0_10 = arith.constant 0 : index
    %16 = vector.load %arg4[%c0_9, %c0_10] : memref<2x128xf32, #tpu.memory_space<vmem>>, vector<2x128xf32>
    tpu.vector_store %arg4[%c0_9, %c0_10], %15 {strides = array<i32>} : memref<2x128xf32, #tpu.memory_space<vmem>>, vector<2x128xf32>,
    return
  }
}

module attributes {stable_mosaic.version = 11 : i64} {
  func.func @_arm_combine_kernel(%arg0: i32, %arg1: i32, %arg2: memref<1x64x128xf32, #tpu.memory_space<vmem>>, %arg3: memref<1x1x128xf32, #tpu.memory_space<vmem>>, %arg4: memref<1x64x128xf32, #tpu.memory_space<vmem>>, %arg5: memref<1x64x128xf32, #tpu.memory_space<vmem>>) attributes {dimension_semantics = [#tpu.dimension_semantics<parallel>, #tpu.dimension_semantics<parallel>], iteration_bounds = array<i64: 2, 1>, scalar_prefetch = 0 : i64, scratch_operands = 0 : i64, tpu.core_type = #tpu.core_type<tc>, window_params = [{transform_indices = @transform_0, window_bounds = array<i64: 1, 64, 128>}, {transform_indices = @transform_1, window_bounds = array<i64: 1, 1, 128>}, {transform_indices = @transform_2, window_bounds = array<i64: 1, 64, 128>}, {transform_indices = @transform_3, window_bounds = array<i64: 1, 64, 128>}]} {
    %c0 = arith.constant 0 : index
    %c0_0 = arith.constant 0 : index
    %c0_1 = arith.constant 0 : index
    %0 = vector.load %arg2[%c0, %c0_0, %c0_1] : memref<1x64x128xf32, #tpu.memory_space<vmem>>, vector<1x64x128xf32>
    %1 = vector.shape_cast %0 : vector<1x64x128xf32> to vector<64x128xf32>
    %c0_2 = arith.constant 0 : index
    %c0_3 = arith.constant 0 : index
    %c0_4 = arith.constant 0 : index
    %2 = vector.load %arg3[%c0_2, %c0_3, %c0_4] : memref<1x1x128xf32, #tpu.memory_space<vmem>>, vector<1x1x128xf32>
    %3 = vector.shape_cast %2 : vector<1x1x128xf32> to vector<1x128xf32>
    %4 = vector.broadcast %3 : vector<1x128xf32> to vector<64x128xf32>
    %5 = arith.mulf %1, %4 : vector<64x128xf32>
    %c0_5 = arith.constant 0 : index
    %c0_6 = arith.constant 0 : index
    %c0_7 = arith.constant 0 : index
    %6 = vector.load %arg4[%c0_5, %c0_6, %c0_7] : memref<1x64x128xf32, #tpu.memory_space<vmem>>, vector<1x64x128xf32>
    %7 = vector.shape_cast %6 : vector<1x64x128xf32> to vector<64x128xf32>
    %8 = arith.addf %5, %7 : vector<64x128xf32>
    %c0_8 = arith.constant 0 : index
    %c0_9 = arith.constant 0 : index
    %c0_10 = arith.constant 0 : index
    %9 = vector.load %arg5[%c0_8, %c0_9, %c0_10] : memref<1x64x128xf32, #tpu.memory_space<vmem>>, vector<1x64x128xf32>
    %10 = vector.shape_cast %9 : vector<1x64x128xf32> to vector<64x128xf32>
    %11 = vector.shape_cast %8 : vector<64x128xf32> to vector<1x64x128xf32>
    tpu.vector_store %arg5[%c0_8, %c0_9, %c0_10], %11 {strides = array<i32>} : memref<1x64x128xf32, #tpu.memory_space<vmem>>, vector<1x64x128xf32>,
    return
  }
  func.func @transform_0(%arg0: i32, %arg1: i32) -> (i32, i32, i32) {
    %c0_i32 = arith.constant 0 : i32
    %c0_i32_0 = arith.constant 0 : i32
    return %arg0, %arg1, %c0_i32 : i32, i32, i32
  }
  func.func @transform_1(%arg0: i32, %arg1: i32) -> (i32, i32, i32) {
    %c0_i32 = arith.constant 0 : i32
    %c0_i32_0 = arith.constant 0 : i32
    %c0_i32_1 = arith.constant 0 : i32
    return %arg0, %c0_i32, %c0_i32_0 : i32, i32, i32
  }
  func.func @transform_2(%arg0: i32, %arg1: i32) -> (i32, i32, i32) {
    %c0_i32 = arith.constant 0 : i32
    %c0_i32_0 = arith.constant 0 : i32
    return %arg0, %arg1, %c0_i32 : i32, i32, i32
  }
  func.func @transform_3(%arg0: i32, %arg1: i32) -> (i32, i32, i32) {
    %c0_i32 = arith.constant 0 : i32
    %c0_i32_0 = arith.constant 0 : i32
    return %arg0, %arg1, %c0_i32 : i32, i32, i32
  }
}

module attributes {stable_mosaic.version = 11 : i64} {
  func.func @_conv3x3_bn_relu_kernel(%arg0: i32, %arg1: i32, %arg2: memref<1x288x384xbf16, #tpu.memory_space<vmem>>, %arg3: memref<3x384x128xbf16, #tpu.memory_space<vmem>>, %arg4: memref<1x128xf32, #tpu.memory_space<vmem>>, %arg5: memref<1x128xf32, #tpu.memory_space<vmem>>, %arg6: memref<1x16x16x128xf32, #tpu.memory_space<vmem>>, %arg7: memref<256x128xf32, #tpu.memory_space<vmem>>) attributes {dimension_semantics = [#tpu.dimension_semantics<parallel>, #tpu.dimension_semantics<arbitrary>], iteration_bounds = array<i64: 2, 1>, scalar_prefetch = 0 : i64, scratch_operands = 1 : i64, tpu.core_type = #tpu.core_type<tc>, window_params = [{transform_indices = @transform_0, window_bounds = array<i64: 1, 288, 384>}, {pipeline_mode = #tpu.pipeline_mode<synchronous>, transform_indices = @transform_1, window_bounds = array<i64: 3, 384, 128>}, {pipeline_mode = #tpu.pipeline_mode<synchronous>, transform_indices = @transform_2, window_bounds = array<i64: 1, 128>}, {pipeline_mode = #tpu.pipeline_mode<synchronous>, transform_indices = @transform_3, window_bounds = array<i64: 1, 128>}, {transform_indices = @transform_4, window_bounds = array<i64: 1, 16, 16, 128>}]} {
    %c16_i32 = arith.constant 16 : i32
    %0 = arith.muli %arg1, %c16_i32 : i32
    %c0_i32 = arith.constant 0 : i32
    %1 = arith.addi %0, %c0_i32 : i32
    %c16_i32_0 = arith.constant 16 : i32
    %2 = arith.muli %1, %c16_i32_0 : i32
    %3 = tpu.assume_multiple %2, 8 : i32
    %c0 = arith.constant 0 : index
    %4 = arith.index_cast %3 : i32 to index
    %c0_1 = arith.constant 0 : index
    %5 = vector.load %arg2[%c0, %4, %c0_1] : memref<1x288x384xbf16, #tpu.memory_space<vmem>>, vector<1x256x384xbf16>
    %6 = vector.shape_cast %5 : vector<1x256x384xbf16> to vector<256x384xbf16>
    %c0_2 = arith.constant 0 : index
    %c0_3 = arith.constant 0 : index
    %c0_4 = arith.constant 0 : index
    %7 = vector.load %arg3[%c0_2, %c0_3, %c0_4] : memref<3x384x128xbf16, #tpu.memory_space<vmem>>, vector<1x384x128xbf16>
    %8 = vector.shape_cast %7 : vector<1x384x128xbf16> to vector<384x128xbf16>
    %cst = arith.constant dense<0.000000e+00> : vector<256x128xf32>
    %9 = tpu.matmul %6, %8, %cst {dimension_numbers = #tpu.dot_dimension_numbers<[1], [0], [0], [1], [0, 0, 1, 1], [], []>} : vector<256x384xbf16>, vector<384x128xbf16>, vector<256x128xf32> -> vector<256x128xf32>
    %c0_5 = arith.constant 0 : index
    %c0_6 = arith.constant 0 : index
    %10 = vector.load %arg7[%c0_5, %c0_6] : memref<256x128xf32, #tpu.memory_space<vmem>>, vector<256x128xf32>
    tpu.vector_store %arg7[%c0_5, %c0_6], %9 {strides = array<i32>} : memref<256x128xf32, #tpu.memory_space<vmem>>, vector<256x128xf32>,
    %c0_7 = arith.constant 0 : index
    %c0_8 = arith.constant 0 : index
    %11 = vector.load %arg7[%c0_7, %c0_8] : memref<256x128xf32, #tpu.memory_space<vmem>>, vector<256x128xf32>
    %c1_i32 = arith.constant 1 : i32
    %12 = arith.addi %0, %c1_i32 : i32
    %c16_i32_9 = arith.constant 16 : i32
    %13 = arith.muli %12, %c16_i32_9 : i32
    %14 = tpu.assume_multiple %13, 8 : i32
    %c0_10 = arith.constant 0 : index
    %15 = arith.index_cast %14 : i32 to index
    %c0_11 = arith.constant 0 : index
    %16 = vector.load %arg2[%c0_10, %15, %c0_11] : memref<1x288x384xbf16, #tpu.memory_space<vmem>>, vector<1x256x384xbf16>
    %17 = vector.shape_cast %16 : vector<1x256x384xbf16> to vector<256x384xbf16>
    %c1 = arith.constant 1 : index
    %c0_12 = arith.constant 0 : index
    %c0_13 = arith.constant 0 : index
    %18 = vector.load %arg3[%c1, %c0_12, %c0_13] : memref<3x384x128xbf16, #tpu.memory_space<vmem>>, vector<1x384x128xbf16>
    %19 = vector.shape_cast %18 : vector<1x384x128xbf16> to vector<384x128xbf16>
    %cst_14 = arith.constant dense<0.000000e+00> : vector<256x128xf32>
    %20 = tpu.matmul %17, %19, %cst_14 {dimension_numbers = #tpu.dot_dimension_numbers<[1], [0], [0], [1], [0, 0, 1, 1], [], []>} : vector<256x384xbf16>, vector<384x128xbf16>, vector<256x128xf32> -> vector<256x128xf32>
    %21 = arith.addf %11, %20 : vector<256x128xf32>
    %c0_15 = arith.constant 0 : index
    %c0_16 = arith.constant 0 : index
    %22 = vector.load %arg7[%c0_15, %c0_16] : memref<256x128xf32, #tpu.memory_space<vmem>>, vector<256x128xf32>
    tpu.vector_store %arg7[%c0_15, %c0_16], %21 {strides = array<i32>} : memref<256x128xf32, #tpu.memory_space<vmem>>, vector<256x128xf32>,
    %c0_17 = arith.constant 0 : index
    %c0_18 = arith.constant 0 : index
    %23 = vector.load %arg7[%c0_17, %c0_18] : memref<256x128xf32, #tpu.memory_space<vmem>>, vector<256x128xf32>
    %c2_i32 = arith.constant 2 : i32
    %24 = arith.addi %0, %c2_i32 : i32
    %c16_i32_19 = arith.constant 16 : i32
    %25 = arith.muli %24, %c16_i32_19 : i32
    %26 = tpu.assume_multiple %25, 8 : i32
    %c0_20 = arith.constant 0 : index
    %27 = arith.index_cast %26 : i32 to index
    %c0_21 = arith.constant 0 : index
    %28 = vector.load %arg2[%c0_20, %27, %c0_21] : memref<1x288x384xbf16, #tpu.memory_space<vmem>>, vector<1x256x384xbf16>
    %29 = vector.shape_cast %28 : vector<1x256x384xbf16> to vector<256x384xbf16>
    %c2 = arith.constant 2 : index
    %c0_22 = arith.constant 0 : index
    %c0_23 = arith.constant 0 : index
    %30 = vector.load %arg3[%c2, %c0_22, %c0_23] : memref<3x384x128xbf16, #tpu.memory_space<vmem>>, vector<1x384x128xbf16>
    %31 = vector.shape_cast %30 : vector<1x384x128xbf16> to vector<384x128xbf16>
    %cst_24 = arith.constant dense<0.000000e+00> : vector<256x128xf32>
    %32 = tpu.matmul %29, %31, %cst_24 {dimension_numbers = #tpu.dot_dimension_numbers<[1], [0], [0], [1], [0, 0, 1, 1], [], []>} : vector<256x384xbf16>, vector<384x128xbf16>, vector<256x128xf32> -> vector<256x128xf32>
    %33 = arith.addf %23, %32 : vector<256x128xf32>
    %c0_25 = arith.constant 0 : index
    %c0_26 = arith.constant 0 : index
    %34 = vector.load %arg7[%c0_25, %c0_26] : memref<256x128xf32, #tpu.memory_space<vmem>>, vector<256x128xf32>
    tpu.vector_store %arg7[%c0_25, %c0_26], %33 {strides = array<i32>} : memref<256x128xf32, #tpu.memory_space<vmem>>, vector<256x128xf32>,
    %c0_27 = arith.constant 0 : index
    %c0_28 = arith.constant 0 : index
    %35 = vector.load %arg7[%c0_27, %c0_28] : memref<256x128xf32, #tpu.memory_space<vmem>>, vector<256x128xf32>
    %c0_29 = arith.constant 0 : index
    %c0_30 = arith.constant 0 : index
    %36 = vector.load %arg4[%c0_29, %c0_30] : memref<1x128xf32, #tpu.memory_space<vmem>>, vector<1x128xf32>
    %37 = vector.broadcast %36 : vector<1x128xf32> to vector<256x128xf32>
    %38 = arith.mulf %35, %37 : vector<256x128xf32>
    %c0_31 = arith.constant 0 : index
    %c0_32 = arith.constant 0 : index
    %39 = vector.load %arg5[%c0_31, %c0_32] : memref<1x128xf32, #tpu.memory_space<vmem>>, vector<1x128xf32>
    %40 = vector.broadcast %39 : vector<1x128xf32> to vector<256x128xf32>
    %41 = arith.addf %38, %40 : vector<256x128xf32>
    %cst_33 = arith.constant 0.000000e+00 : f32
    %42 = vector.broadcast %cst_33 : f32 to vector<256x128xf32>
    %43 = arith.maximumf %41, %42 : vector<256x128xf32>
    %44 = vector.shape_cast %43 : vector<256x128xf32> to vector<16x16x128xf32>
    %c0_34 = arith.constant 0 : index
    %c0_35 = arith.constant 0 : index
    %c0_36 = arith.constant 0 : index
    %c0_37 = arith.constant 0 : index
    %45 = vector.load %arg6[%c0_34, %c0_35, %c0_36, %c0_37] : memref<1x16x16x128xf32, #tpu.memory_space<vmem>>, vector<1x16x16x128xf32>
    %46 = vector.shape_cast %45 : vector<1x16x16x128xf32> to vector<16x16x128xf32>
    %47 = vector.shape_cast %44 : vector<16x16x128xf32> to vector<1x16x16x128xf32>
    tpu.vector_store %arg6[%c0_34, %c0_35, %c0_36, %c0_37], %47 {strides = array<i32>} : memref<1x16x16x128xf32, #tpu.memory_space<vmem>>, vector<1x16x16x128xf32>,
    return
  }
  func.func @transform_0(%arg0: i32, %arg1: i32) -> (i32, i32, i32) {
    %c0_i32 = arith.constant 0 : i32
    %c0_i32_0 = arith.constant 0 : i32
    %c0_i32_1 = arith.constant 0 : i32
    return %arg0, %c0_i32, %c0_i32_0 : i32, i32, i32
  }
  func.func @transform_1(%arg0: i32, %arg1: i32) -> (i32, i32, i32) {
    %c0_i32 = arith.constant 0 : i32
    %c0_i32_0 = arith.constant 0 : i32
    %c0_i32_1 = arith.constant 0 : i32
    %c0_i32_2 = arith.constant 0 : i32
    return %c0_i32, %c0_i32_0, %c0_i32_1 : i32, i32, i32
  }
  func.func @transform_2(%arg0: i32, %arg1: i32) -> (i32, i32) {
    %c0_i32 = arith.constant 0 : i32
    %c0_i32_0 = arith.constant 0 : i32
    %c0_i32_1 = arith.constant 0 : i32
    return %c0_i32, %c0_i32_0 : i32, i32
  }
  func.func @transform_3(%arg0: i32, %arg1: i32) -> (i32, i32) {
    %c0_i32 = arith.constant 0 : i32
    %c0_i32_0 = arith.constant 0 : i32
    %c0_i32_1 = arith.constant 0 : i32
    return %c0_i32, %c0_i32_0 : i32, i32
  }
  func.func @transform_4(%arg0: i32, %arg1: i32) -> (i32, i32, i32, i32) {
    %c0_i32 = arith.constant 0 : i32
    %c0_i32_0 = arith.constant 0 : i32
    %c0_i32_1 = arith.constant 0 : i32
    return %arg0, %arg1, %c0_i32, %c0_i32_0 : i32, i32, i32, i32
  }
}

</mosaic_0001>

<bundles_post_ra>
// kernel: context_path_forward.11
= control target key start
LH: loop header
LB: loop body
LE: loop exit
PB: predicated region body
PF: predicated region fallthrough
CT: control target
= control target key end

     0   :  { %s181_s1 = inlined_call_operand.vmem [shape: f32[128,128], index: 1, kind: input, shape index: {}]   ;;  %s182_s2 = inlined_call_operand.vmem [shape: f32[1,128], index: 2, kind: input, shape index: {}]   ;;  %s183_s3 = inlined_call_operand.vmem [shape: f32[1,128], index: 3, kind: input, shape index: {}]   ;;  %s184_s0 = inlined_call_operand.vmem [shape: f32[2,128], index: 0, kind: input, shape index: {}]   ;;  %s185_s4 = inlined_call_operand.vmem [shape: f32[2,128], index: 4, kind: output, shape index: {}]  }
   0x1   :  { %v34_v0 = vld [vmem:[%s181_s1 + $0x78] sm:$0xff]  ;;  %v33_v1 = vld [vmem:[%s181_s1 + $0x70] sm:$0xff]  ;;  %v32_v2 = vld [vmem:[%s181_s1 + $0x68] sm:$0xff] }
   0x2   :  { %35 = vmatpush.msra.mxu0 %v34_v0  ;;  %v31_v3 = vld [vmem:[%s181_s1 + $0x60] sm:$0xff]  ;;  %v30_v4 = vld [vmem:[%s181_s1 + $0x58] sm:$0xff]  ;;  %v29_v5 = vld [vmem:[%s181_s1 + $0x50] sm:$0xff] }
   0x3   :  { %v28_v6 = vld [vmem:[%s181_s1 + $0x48] sm:$0xff]  ;;  %v27_v7 = vld [vmem:[%s181_s1 + $0x40] sm:$0xff]  ;;  %v26_v8 = vld [vmem:[%s181_s1 + $0x38] sm:$0xff] }
   0x4   :  { %36 = vmatpush.msra.mxu0 %v33_v1  ;;  %v25_v9 = vld [vmem:[%s181_s1 + $0x30] sm:$0xff]  ;;  %v24_v10 = vld [vmem:[%s181_s1 + $0x28] sm:$0xff]  ;;  %v23_v11 = vld [vmem:[%s181_s1 + $0x20] sm:$0xff] }
   0x5   :  { %v22_v12 = vld [vmem:[%s181_s1 + $0x18] sm:$0xff]  ;;  %v21_v13 = vld [vmem:[%s181_s1 + $0x10] sm:$0xff]  ;;  %v17_v14 = vld [vmem:[%s184_s0] sm:$0x3] }
   0x6   :  { %37 = vmatpush.msra.mxu0 %v32_v2  ;;  %v20_v15 = vld [vmem:[%s181_s1 + $0x8] sm:$0xff]  ;;  %v19_v16 = vld [vmem:[%s181_s1] sm:$0xff]  ;;  %v18_v17 = vmul.f32 0.0625, %v17_v14 }
   0x7   :  { %v90_v18 = vld [vmem:[%s182_s2] ss:$0 sm:$0xff] }
   0x8   :  { %38 = vmatpush.msra.mxu0 %v31_v3  ;;  %v91_v19 = vld [vmem:[%s183_s3] ss:$0 sm:$0xff] }
   0xa   :  { %39 = vmatpush.msra.mxu0 %v30_v4 }
   0xc   :  { %40 = vmatpush.msra.mxu0 %v29_v5 }
   0xe   :  { %41 = vmatpush.msra.mxu0 %v28_v6 }
  0x10   :  { %42 = vmatpush.msra.mxu0 %v27_v7 }
  0x12   :  { %43 = vmatpush.msra.mxu0 %v26_v8 }
  0x14   :  { %44 = vmatpush.msra.mxu0 %v25_v9 }
  0x16   :  { %45 = vmatpush.msra.mxu0 %v24_v10 }
  0x18   :  { %46 = vmatpush.msra.mxu0 %v23_v11 }
  0x1a   :  { %47 = vmatpush.msra.mxu0 %v22_v12 }
  0x1c   :  { %48 = vmatpush.msra.mxu0 %v21_v13 }
  0x1e   :  { %49 = vmatpush.msra.mxu0 %v20_v15 }
  0x20   :  { %50 = vmatpush.msra.mxu0 %v19_v16 }
  0x21   :  { %51 = vmatmul.f32.vlgmr.msra.gmra.mxu0 %v18_v17 }
  0x9e   :  { %v52_v20 = vpop.f32.mrf.mxu0 }
  0x9f   :  { %v59_v21 = vmul.f32 %v90_v18, %v52_v20 }
  0xa1   :  { %v64_v22 = vadd.f32 %v91_v19, %v59_v21 }
  0xa3   :  { %v89_v23 = vmul.f32 -1.442695, %v64_v22 }
  0xa5   :  { %92 = vpow2.f32 %v89_v23 }
  0xab   :  { %v93_v24 = vpop.eup %92 }
  0xac   :  { %v68_v25 = vadd.f32 1.0, %v93_v24 }
  0xae   :  { %94 = vrcp.f32 %v68_v25  ;;  %v80_v29 = vand.u32 2147483648, %v68_v25  ;;  %v78_v31 = vand.u32 2147483647, %v68_v25  ;;  %vm74_vm1 = vweird.f32 %v68_v25 }
  0xb0   :  { %v81_v33 = vor.u32 1.1754944e-38, %v80_v29  ;;  %vm79_vm3 = vcmp.eq.f32.partialorder %v78_v31, 8.507059e+37 }
  0xb4   :  { %v95_v26 = vpop.eup %94 }
  0xb5   :  { %v70_v27 = vmul.f32 %v95_v26, %v68_v25  ;;  %vm75_vm0 = vweird.f32 %v95_v26 }
  0xb6   :  { %vm76_vm2 = vmor %vm74_vm1, %vm75_vm0 }
  0xb7   :  { %v71_v28 = vsub.f32 1.0, %v70_v27 }
  0xb9   :  { %v72_v30 = vmul.f32 %v95_v26, %v71_v28 }
  0xbb   :  { %v73_v32 = vadd.f32 %v95_v26, %v72_v30 }
  0xbd   :  { %v77_v34 = vsel %vm76_vm2, %v95_v26, %v73_v32 }
  0xbe   :  { %v82_v35 = vsel %vm79_vm3, %v81_v33, %v77_v34 }
  0xbf   :  { %84 = vst [vmem:[%s185_s4] sm:$0x3] %v82_v35 }

// kernel: context_path_forward.10
= control target key start
LH: loop header
LB: loop body
LE: loop exit
PB: predicated region body
PF: predicated region fallthrough
CT: control target
= control target key end

     0   :  { %s420_s1 = inlined_call_operand.vmem [shape: f32[512,128], index: 1, kind: input, shape index: {}]   ;;  %s421_s0 = inlined_call_operand.vmem [shape: f32[2,512], index: 0, kind: input, shape index: {}]   ;;  %s422_s2 = inlined_call_operand.vmem [shape: f32[1,128], index: 2, kind: input, shape index: {}]   ;;  %s423_s3 = inlined_call_operand.vmem [shape: f32[1,128], index: 3, kind: input, shape index: {}]   ;;  %s424_s4 = inlined_call_operand.vmem [shape: f32[2,128], index: 4, kind: output, shape index: {}]  }
   0x1   :  { %v66_v0 = vld [vmem:[%s420_s1 + $0x178] sm:$0xff]  ;;  %v65_v1 = vld [vmem:[%s420_s1 + $0x170] sm:$0xff]  ;;  %v64_v5 = vld [vmem:[%s420_s1 + $0x168] sm:$0xff] }
   0x2   :  { %v82_v2 = vld [vmem:[%s420_s1 + $0x1f8] sm:$0xff]  ;;  %133 = vmatpush.msra.mxu2 %v66_v0  ;;  %v81_v6 = vld [vmem:[%s420_s1 + $0x1f0] sm:$0xff]  ;;  %v80_v9 = vld [vmem:[%s420_s1 + $0x1e8] sm:$0xff] }
   0x3   :  { %153 = vmatpush.msra.mxu3 %v82_v2  ;;  %v34_v3 = vld [vmem:[%s420_s1 + $0x78] sm:$0xff]  ;;  %v33_v7 = vld [vmem:[%s420_s1 + $0x70] sm:$0xff]  ;;  %v32_v10 = vld [vmem:[%s420_s1 + $0x68] sm:$0xff] }
   0x4   :  { %v50_v4 = vld [vmem:[%s420_s1 + $0xf8] sm:$0xff]  ;;  %93 = vmatpush.msra.mxu0 %v34_v3  ;;  %v49_v8 = vld [vmem:[%s420_s1 + $0xf0] sm:$0xff]  ;;  %134 = vmatpush.msra.mxu2 %v65_v1  ;;  %v63_v11 = vld [vmem:[%s420_s1 + $0x160] sm:$0xff] }
   0x5   :  { %113 = vmatpush.msra.mxu1 %v50_v4  ;;  %154 = vmatpush.msra.mxu3 %v81_v6  ;;  %v48_v12 = vld [vmem:[%s420_s1 + $0xe8] sm:$0xff]  ;;  %v79_v13 = vld [vmem:[%s420_s1 + $0x1e0] sm:$0xff]  ;;  %v62_v16 = vld [vmem:[%s420_s1 + $0x158] sm:$0xff] }
   0x6   :  { %94 = vmatpush.msra.mxu0 %v33_v7  ;;  %135 = vmatpush.msra.mxu2 %v64_v5  ;;  %v31_v14 = vld [vmem:[%s420_s1 + $0x60] sm:$0xff]  ;;  %v78_v17 = vld [vmem:[%s420_s1 + $0x1d8] sm:$0xff]  ;;  %v61_v20 = vld [vmem:[%s420_s1 + $0x150] sm:$0xff] }
   0x7   :  { %114 = vmatpush.msra.mxu1 %v49_v8  ;;  %155 = vmatpush.msra.mxu3 %v80_v9  ;;  %v47_v15 = vld [vmem:[%s420_s1 + $0xe0] sm:$0xff]  ;;  %v30_v18 = vld [vmem:[%s420_s1 + $0x58] sm:$0xff]  ;;  %v77_v21 = vld [vmem:[%s420_s1 + $0x1d0] sm:$0xff] }
   0x8   :  { %95 = vmatpush.msra.mxu0 %v32_v10  ;;  %136 = vmatpush.msra.mxu2 %v63_v11  ;;  %v46_v19 = vld [vmem:[%s420_s1 + $0xd8] sm:$0xff]  ;;  %v29_v22 = vld [vmem:[%s420_s1 + $0x50] sm:$0xff]  ;;  %v60_v24 = vld [vmem:[%s420_s1 + $0x148] sm:$0xff] }
   0x9   :  { %115 = vmatpush.msra.mxu1 %v48_v12  ;;  %156 = vmatpush.msra.mxu3 %v79_v13  ;;  %v45_v23 = vld [vmem:[%s420_s1 + $0xd0] sm:$0xff]  ;;  %v76_v25 = vld [vmem:[%s420_s1 + $0x1c8] sm:$0xff]  ;;  %v59_v28 = vld [vmem:[%s420_s1 + $0x140] sm:$0xff] }
   0xa   :  { %96 = vmatpush.msra.mxu0 %v31_v14  ;;  %137 = vmatpush.msra.mxu2 %v62_v16  ;;  %v28_v26 = vld [vmem:[%s420_s1 + $0x48] sm:$0xff]  ;;  %v75_v29 = vld [vmem:[%s420_s1 + $0x1c0] sm:$0xff]  ;;  %v58_v32 = vld [vmem:[%s420_s1 + $0x138] sm:$0xff] }
   0xb   :  { %116 = vmatpush.msra.mxu1 %v47_v15  ;;  %157 = vmatpush.msra.mxu3 %v78_v17  ;;  %v44_v27 = vld [vmem:[%s420_s1 + $0xc8] sm:$0xff]  ;;  %v27_v30 = vld [vmem:[%s420_s1 + $0x40] sm:$0xff]  ;;  %v74_v33 = vld [vmem:[%s420_s1 + $0x1b8] sm:$0xff] }
   0xc   :  { %97 = vmatpush.msra.mxu0 %v30_v18  ;;  %138 = vmatpush.msra.mxu2 %v61_v20  ;;  %v43_v31 = vld [vmem:[%s420_s1 + $0xc0] sm:$0xff]  ;;  %v26_v34 = vld [vmem:[%s420_s1 + $0x38] sm:$0xff]  ;;  %v57_v36 = vld [vmem:[%s420_s1 + $0x130] sm:$0xff] }
   0xd   :  { %117 = vmatpush.msra.mxu1 %v46_v19  ;;  %158 = vmatpush.msra.mxu3 %v77_v21  ;;  %v42_v35 = vld [vmem:[%s420_s1 + $0xb8] sm:$0xff]  ;;  %v73_v37 = vld [vmem:[%s420_s1 + $0x1b0] sm:$0xff]  ;;  %v56_v40 = vld [vmem:[%s420_s1 + $0x128] sm:$0xff] }
   0xe   :  { %98 = vmatpush.msra.mxu0 %v29_v22  ;;  %139 = vmatpush.msra.mxu2 %v60_v24  ;;  %v25_v38 = vld [vmem:[%s420_s1 + $0x30] sm:$0xff]  ;;  %v72_v41 = vld [vmem:[%s420_s1 + $0x1a8] sm:$0xff]  ;;  %v17_v44 = vld [vmem:[%s421_s0] sm:$0xff] }
   0xf   :  { %118 = vmatpush.msra.mxu1 %v45_v23  ;;  %159 = vmatpush.msra.mxu3 %v76_v25  ;;  %v41_v39 = vld [vmem:[%s420_s1 + $0xb0] sm:$0xff]  ;;  %v24_v42 = vld [vmem:[%s420_s1 + $0x28] sm:$0xff]  ;;  %v55_v45 = vld [vmem:[%s420_s1 + $0x120] sm:$0xff]  ;;  %v18_v47 = vmul.f32 0.0625, %v17_v44 }
  0x10   :  { %99 = vmatpush.msra.mxu0 %v28_v26  ;;  %140 = vmatpush.msra.mxu2 %v59_v28  ;;  %v40_v43 = vld [vmem:[%s420_s1 + $0xa8] sm:$0xff]  ;;  %v71_v46 = vld [vmem:[%s420_s1 + $0x1a0] sm:$0xff]  ;;  %v54_v50 = vld [vmem:[%s420_s1 + $0x118] sm:$0xff] }
  0x11   :  { %119 = vmatpush.msra.mxu1 %v44_v27  ;;  %160 = vmatpush.msra.mxu3 %v75_v29  ;;  %v23_v48 = vld [vmem:[%s420_s1 + $0x20] sm:$0xff]  ;;  %v70_v51 = vld [vmem:[%s420_s1 + $0x198] sm:$0xff]  ;;  %84 = vst [vmem:[#allocation1] ss:$4 sm:$0xff] %v18_v47  ;;  %v53_v54 = vld [vmem:[%s420_s1 + $0x110] sm:$0xff] }
  0x12   :  { %100 = vmatpush.msra.mxu0 %v27_v30  ;;  %141 = vmatpush.msra.mxu2 %v58_v32  ;;  %v39_v49 = vld [vmem:[%s420_s1 + $0xa0] sm:$0xff]  ;;  %v22_v52 = vld [vmem:[%s420_s1 + $0x18] sm:$0xff]  ;;  %v69_v55 = vld [vmem:[%s420_s1 + $0x190] sm:$0xff] }
  0x13   :  { %120 = vmatpush.msra.mxu1 %v43_v31  ;;  %161 = vmatpush.msra.mxu3 %v74_v33  ;;  %v38_v53 = vld [vmem:[%s420_s1 + $0x98] sm:$0xff]  ;;  %v21_v56 = vld [vmem:[%s420_s1 + $0x10] sm:$0xff]  ;;  %v52_v58 = vld [vmem:[%s420_s1 + $0x108] sm:$0xff] }
  0x14   :  { %101 = vmatpush.msra.mxu0 %v26_v34  ;;  %142 = vmatpush.msra.mxu2 %v57_v36  ;;  %v37_v57 = vld [vmem:[%s420_s1 + $0x90] sm:$0xff]  ;;  %v68_v59 = vld [vmem:[%s420_s1 + $0x188] sm:$0xff]  ;;  %v51_v62 = vld [vmem:[%s420_s1 + $0x100] sm:$0xff] }
  0x15   :  { %121 = vmatpush.msra.mxu1 %v42_v35  ;;  %162 = vmatpush.msra.mxu3 %v73_v37  ;;  %v20_v60 = vld [vmem:[%s420_s1 + $0x8] sm:$0xff]  ;;  %v67_v63 = vld [vmem:[%s420_s1 + $0x180] sm:$0xff] }
  0x16   :  { %102 = vmatpush.msra.mxu0 %v25_v38  ;;  %143 = vmatpush.msra.mxu2 %v56_v40  ;;  %v36_v61 = vld [vmem:[%s420_s1 + $0x88] sm:$0xff]  ;;  %v19_v2 = vld [vmem:[%s420_s1] sm:$0xff] }
  0x17   :  { %122 = vmatpush.msra.mxu1 %v41_v39  ;;  %163 = vmatpush.msra.mxu3 %v72_v41  ;;  %v35_v3 = vld [vmem:[%s420_s1 + $0x80] sm:$0xff] }
  0x18   :  { %103 = vmatpush.msra.mxu0 %v24_v42  ;;  %144 = vmatpush.msra.mxu2 %v55_v45  ;;  %v87_v0 = vld.sshfl [vmem:[#allocation1 + $0x10] sm:$0xff pattern:$0x73625140]  ;;  %v88_v1 = vld.sshfl [vmem:[#allocation1 + $0x18] sm:$0xff pattern:$0x73625140] }
  0x19   :  { %123 = vmatpush.msra.mxu1 %v40_v43  ;;  %164 = vmatpush.msra.mxu3 %v71_v46  ;;  %v85_v4 = vld.sshfl [vmem:[#allocation1] sm:$0xff pattern:$0x73625140]  ;;  %v86_v5 = vld.sshfl [vmem:[#allocation1 + $0x8] sm:$0xff pattern:$0x73625140] }
  0x1a   :  { %104 = vmatpush.msra.mxu0 %v23_v48  ;;  %145 = vmatpush.msra.mxu2 %v54_v50  ;;  %v189_v12 = vld [vmem:[%s422_s2] ss:$0 sm:$0xff] }
  0x1b   :  { %124 = vmatpush.msra.mxu1 %v39_v49  ;;  %165 = vmatpush.msra.mxu3 %v70_v51  ;;  %v190_v14 = vld [vmem:[%s423_s3] ss:$0 sm:$0xff] }
  0x1c   :  { %105 = vmatpush.msra.mxu0 %v22_v52  ;;  %146 = vmatpush.msra.mxu2 %v53_v54 }
  0x1d   :  { %125 = vmatpush.msra.mxu1 %v38_v53  ;;  %166 = vmatpush.msra.mxu3 %v69_v55 }
  0x1e   :  { %106 = vmatpush.msra.mxu0 %v21_v56  ;;  %147 = vmatpush.msra.mxu2 %v52_v58 }
  0x1f   :  { %126 = vmatpush.msra.mxu1 %v37_v57  ;;  %167 = vmatpush.msra.mxu3 %v68_v59 }
  0x20   :  { %107 = vmatpush.msra.mxu0 %v20_v60  ;;  %148 = vmatpush.msra.mxu2 %v51_v62 }
  0x21   :  { %127 = vmatpush.msra.mxu1 %v36_v61  ;;  %168 = vmatpush.msra.mxu3 %v67_v63 }
  0x22   :  { %149 = vmatmul.f32.vlgmr.msra.gmra.mxu2 %v87_v0  ;;  %169 = vmatmul.f32.vlgmr.msra.gmra.mxu3 %v88_v1 }
  0x23   :  { %108 = vmatpush.msra.mxu0 %v19_v2  ;;  %128 = vmatpush.msra.mxu1 %v35_v3 }
  0x24   :  { %109 = vmatmul.f32.vlgmr.msra.gmra.mxu0 %v85_v4  ;;  %129 = vmatmul.f32.vlgmr.msra.gmra.mxu1 %v86_v5 }
  0xa1   :  { %v110_v6 = vpop.f32.mrf.mxu0  ;;  %v130_v7 = vpop.f32.mrf.mxu1 }
  0xa2   :  { %v131_v8 = vadd.f32 %v130_v7, %v110_v6 }
  0xa5   :  { %v150_v9 = vpop.f32.mrf.mxu2  ;;  %v170_v10 = vpop.f32.mrf.mxu3 }
  0xa6   :  { %v151_v11 = vadd.f32 %v150_v9, %v131_v8 }
  0xa8   :  { %v171_v13 = vadd.f32 %v170_v10, %v151_v11 }
  0xaa   :  { %v177_v15 = vmul.f32 %v189_v12, %v171_v13 }
  0xac   :  { %v182_v16 = vadd.f32 %v190_v14, %v177_v15 }
  0xae   :  { %v183_v17 = vmax.f32 %v182_v16, 0.0 }
  0xb0   :  { %184 = vst [vmem:[%s424_s4] sm:$0x3] %v183_v17 }

// kernel: context_path_forward.12
= control target key start
LH: loop header
LB: loop body
LE: loop exit
PB: predicated region body
PF: predicated region fallthrough
CT: control target
= control target key end

     0   :  { %s442_s12 = smov 0   ;;  %s444_s13 = smov 0   ;;  %s474_s0 = inlined_call_operand.vmem [shape: f32[2,16,128], index: 0, kind: input, shape index: {}]   ;;  %s475_s1 = inlined_call_operand.vmem [shape: f32[2,1,128], index: 1, kind: input, shape index: {}]   ;;  %s476_s2 = inlined_call_operand.vmem [shape: f32[2,1,128], index: 2, kind: input, shape index: {}]   ;;  %s477_s3 = inlined_call_operand.vmem [shape: f32[2,16,128], index: 3, kind: output, shape index: {}]  }
   0x1   :  { %s446_s14 = smov 0  }
   0x2 LB: > { %s25_s15 = sadd.s32 1, %s416_s13  ;;  %p363_p0 = scmp.ge.s32.totalorder %s420_s14, 1  ;;  %s420_s14 = sphi %s446_s14, %s13_s14   ;;  %s416_s13 = sphi %s444_s13, %s479_s13   ;;  %s412_s12 = sphi %s442_s12, %s478_s12  }
   0x3   : > { %p27_p1 = scmp.ge.s32.totalorder %s25_s15, 2  ;;  %p174_p2 = scmp.lt.s32.totalorder %s420_s14, 3 }
   0x5   : > { %s481_s15 = smov (%p27_p1, %s25_s15), 0  ;;  %p175_p3 = pnand %p363_p0, %p174_p2 }
   0x6   : > { %p213_p4 = scmp.lt.s32.totalorder (!%p175_p3), %s412_s12, 1 }
   0x7   : > { %178 = sbr.rel (%p175_p3) target bundleno = 22 (0x16), region = 32 }
   0xc   : > { %s483_s12 = smov (!%p213_p4, %s412_s12), 1 }
   0xd   : > { %s370_s16 = sshll.u32 %s483_s12, 4  ;;  %s224_s19 = scalar_lea.vmem %s475_s1, %s483_s12 }
   0xe   : > { %s220_s22 = scalar_lea.vmem %s474_s0, %s370_s16  ;;  %s227_s25 = scalar_lea.vmem %s476_s2, %s483_s12  ;;  %v396_v0 = vld [vmem:[%s224_s19] ss:$0 sm:$0xff] }
   0xf   : > { %v238_v1 = vld [vmem:[%s220_s22] sm:$0xff]  ;;  %v239_v2 = vld [vmem:[%s220_s22 + $0x8] sm:$0xff]  ;;  %s236_s28 = scalar_lea.vmem %s477_s3, %s370_s16 }
  0x10   : > { %v244_v3 = vmul.f32 %v396_v0, %v238_v1  ;;  %v397_v4 = vld [vmem:[%s227_s25] ss:$0 sm:$0xff]  ;;  %v245_v5 = vmul.f32 %v396_v0, %v239_v2 }
  0x12   : > { %v250_v6 = vadd.f32 %v397_v4, %v244_v3  ;;  %v251_v7 = vadd.f32 %v397_v4, %v245_v5 }
  0x14   : > { %252 = vst [vmem:[%s236_s28] sm:$0xff] %v250_v6 }
  0x15   : > { %253 = vst [vmem:[%s236_s28 + $0x8] sm:$0xff] %v251_v7 }
  0x16 PF: > { %s13_s14 = sadd.s32 1, %s420_s14   ;;  %s478_s12 = smov %s416_s13 }
  0x17   : > { %p10_p5 = scmp.ge.s32.totalorder %s13_s14, 4   ;;  %s479_s13 = smov %s481_s15 }
  0x19   :  { %12 = sbr.rel (!%p10_p5) target bundleno = 2 (0x2), region = 68 }

// kernel: context_path_forward.13
= control target key start
LH: loop header
LB: loop body
LE: loop exit
PB: predicated region body
PF: predicated region fallthrough
CT: control target
= control target key end

     0   :  { %s2283_s15 = smov 0   ;;  %s2285_s16 = smov 0   ;;  %s2704_s0 = inlined_call_operand.vmem [shape: bf16[2,80,384], index: 0, kind: input, shape index: {}]   ;;  %s2705_s1 = inlined_call_operand.vmem [shape: bf16[3,384,128], index: 1, kind: input, shape index: {}]   ;;  %s2706_s2 = inlined_call_operand.vmem [shape: f32[1,128], index: 2, kind: input, shape index: {}]   ;;  %s2707_s3 = inlined_call_operand.vmem [shape: f32[1,128], index: 3, kind: input, shape index: {}]   ;;  %s2708_s4 = inlined_call_operand.vmem [shape: f32[2,8,8,128], index: 4, kind: output, shape index: {}]  }
   0x1   :  { %s2287_s17 = smov 0  }
   0x2 LB: > { %s26_s18 = sadd.s32 1, %s2252_s16  ;;  %p1516_p0 = scmp.ge.s32.totalorder %s2256_s17, 1  ;;  %s2256_s17 = sphi %s2287_s17, %s14_s17   ;;  %s2252_s16 = sphi %s2285_s16, %s2710_s16   ;;  %s2248_s15 = sphi %s2283_s15, %s2709_s15  }
   0x3   : > { %p28_p1 = scmp.ge.s32.totalorder %s26_s18, 2  ;;  %p176_p2 = scmp.lt.s32.totalorder %s2256_s17, 3 }
   0x5   : > { %s2712_s18 = smov (%p28_p1, %s26_s18), 0  ;;  %p177_p3 = pnand %p1516_p0, %p176_p2 }
   0x6   : > { %p206_p4 = scmp.lt.s32.totalorder (!%p177_p3), %s2248_s15, 1 }
   0x7   : > { %180 = sbr.rel (%p177_p3) target bundleno = 336 (0x150), region = 36 }
   0xc   : > { %v2102_v0 = vld [vmem:[%s2705_s1 + $0x38] sm:$0xff]  ;;  %v2101_v3 = vld [vmem:[%s2705_s1 + $0x30] sm:$0xff]  ;;  %v2100_v6 = vld [vmem:[%s2705_s1 + $0x28] sm:$0xff]  ;;  %s2714_s15 = smov (!%p206_p4, %s2248_s15), 1 }
   0xd   : > { %v2118_v1 = vld [vmem:[%s2705_s1 + $0xb8] sm:$0xff]  ;;  %500 = vmatpush.bf16.msra.mxu0 %v2102_v0  ;;  %2191 = vmatpush.bf16.msra.mxu1 %v2102_v0  ;;  %v2117_v4 = vld [vmem:[%s2705_s1 + $0xb0] sm:$0xff]  ;;  %v2116_v7 = vld [vmem:[%s2705_s1 + $0xa8] sm:$0xff]  ;;  %s2207_s29 = smul.u32 120, %s2714_s15  ;;  %s2082_s21 = sshll.u32 %s2714_s15, 6 }
   0xe   : > { %v2138_v2 = vld [vmem:[%s2705_s1 + $0xf8] sm:$0xff]  ;;  %558 = vmatpush.bf16.msra.mxu2 %v2118_v1  ;;  %v2137_v5 = vld [vmem:[%s2705_s1 + $0xf0] sm:$0xff]  ;;  %v2136_v8 = vld [vmem:[%s2705_s1 + $0xe8] sm:$0xff]  ;;  %s2654_s24 = scalar_lea.vmem %s2708_s4, %s2082_s21 }
   0xf   : > { %883 = vmatpush.bf16.msra.mxu3 %v2138_v2  ;;  %v2099_v9 = vld [vmem:[%s2705_s1 + $0x20] sm:$0xff]  ;;  %v2098_v12 = vld [vmem:[%s2705_s1 + $0x18] sm:$0xff]  ;;  %v2097_v15 = vld [vmem:[%s2705_s1 + $0x10] sm:$0xff]  ;;  %s2368_s12 = scalar_lea.vmem %s2704_s0, %s2207_s29 }
  0x10   : > { %v2115_v10 = vld [vmem:[%s2705_s1 + $0xa0] sm:$0xff]  ;;  %v2114_v13 = vld [vmem:[%s2705_s1 + $0x98] sm:$0xff]  ;;  %v2113_v16 = vld [vmem:[%s2705_s1 + $0x90] sm:$0xff] }
  0x11   : > { %501 = vmatpush.bf16.msra.mxu0 %v2101_v3  ;;  %2192 = vmatpush.bf16.msra.mxu1 %v2101_v3  ;;  %v2135_v11 = vld [vmem:[%s2705_s1 + $0xe0] sm:$0xff]  ;;  %v2134_v14 = vld [vmem:[%s2705_s1 + $0xd8] sm:$0xff]  ;;  %v2133_v17 = vld [vmem:[%s2705_s1 + $0xd0] sm:$0xff] }
  0x12   : > { %559 = vmatpush.bf16.msra.mxu2 %v2117_v4  ;;  %v2096_v18 = vld [vmem:[%s2705_s1 + $0x8] sm:$0xff]  ;;  %v2095_v21 = vld [vmem:[%s2705_s1] sm:$0xff]  ;;  %v1546_v25 = vld [vmem:[%s2368_s12 + $0x30] sm:$0xf] }
  0x13   : > { %884 = vmatpush.bf16.msra.mxu3 %v2137_v5  ;;  %v2112_v19 = vld [vmem:[%s2705_s1 + $0x88] sm:$0xff]  ;;  %v2111_v22 = vld [vmem:[%s2705_s1 + $0x80] sm:$0xff]  ;;  %v2090_v26 = vld [vmem:[%s2368_s12 + $0x38] sm:$0xf0] }
  0x14   : > { %v2132_v20 = vld [vmem:[%s2705_s1 + $0xc8] sm:$0xff]  ;;  %v1522_v23 = vld [vmem:[%s2368_s12] sm:$0xf]  ;;  %v2110_v27 = vld [vmem:[%s2705_s1 + $0x78] sm:$0xff]  ;;  %v1547_v35 = vor.u32 %v2090_v26, %v1546_v25 }
  0x15   : > { %502 = vmatpush.bf16.msra.mxu0 %v2100_v6  ;;  %2193 = vmatpush.bf16.msra.mxu1 %v2100_v6  ;;  %v2084_v24 = vld [vmem:[%s2368_s12 + $0x8] sm:$0xf0]  ;;  %v1530_v28 = vld [vmem:[%s2368_s12 + $0x8] sm:$0xf]  ;;  %v2085_v29 = vld [vmem:[%s2368_s12 + $0x10] sm:$0xf0] }
  0x16   : > { %560 = vmatpush.bf16.msra.mxu2 %v2116_v7  ;;  %v2131_v30 = vld [vmem:[%s2705_s1 + $0xc0] sm:$0xff]  ;;  %v2146_v31 = vld [vmem:[%s2705_s1 + $0x138] sm:$0xff]  ;;  %v1730_v32 = vld [vmem:[%s2368_s12 + $0xc] sm:$0xf]  ;;  %v1523_v34 = vor.u32 %v2084_v24, %v1522_v23  ;;  %v1531_v36 = vor.u32 %v2085_v29, %v1530_v28 }
  0x17   : > { %885 = vmatpush.bf16.msra.mxu3 %v2136_v8  ;;  %v2120_v33 = vld [vmem:[%s2368_s12 + $0x14] sm:$0xf0]  ;;  %v2109_v38 = vld [vmem:[%s2705_s1 + $0x70] sm:$0xff]  ;;  %v2108_v43 = vld [vmem:[%s2705_s1 + $0x68] sm:$0xff] }
  0x18   : > { %v2182_v37 = vld [vmem:[%s2705_s1 + $0x1f8] sm:$0xff]  ;;  %v1731_v39 = vor.u32 %v2120_v33, %v1730_v32  ;;  %v2145_v40 = vld [vmem:[%s2705_s1 + $0x130] sm:$0xff]  ;;  %v2144_v44 = vld [vmem:[%s2705_s1 + $0x128] sm:$0xff] }
  0x19   : > { %503 = vmatpush.bf16.msra.mxu0 %v2099_v9  ;;  %2194 = vmatpush.bf16.msra.mxu1 %v2099_v9  ;;  %v2174_v41 = vld [vmem:[%s2705_s1 + $0x1b8] sm:$0xff]  ;;  %v2181_v42 = vld [vmem:[%s2705_s1 + $0x1f0] sm:$0xff]  ;;  %v2180_v46 = vld [vmem:[%s2705_s1 + $0x1e8] sm:$0xff] }
  0x1a   : > { %561 = vmatpush.bf16.msra.mxu2 %v2115_v10  ;;  %v2173_v45 = vld [vmem:[%s2705_s1 + $0x1b0] sm:$0xff]  ;;  %v2107_v47 = vld [vmem:[%s2705_s1 + $0x60] sm:$0xff]  ;;  %v2172_v49 = vld [vmem:[%s2705_s1 + $0x1a8] sm:$0xff] }
  0x1b   : > { %886 = vmatpush.bf16.msra.mxu3 %v2135_v11  ;;  %v2143_v48 = vld [vmem:[%s2705_s1 + $0x120] sm:$0xff]  ;;  %v1534_v50 = vld [vmem:[%s2368_s12 + $0x18] sm:$0xf]  ;;  %v1558_v52 = vld [vmem:[%s2368_s12 + $0x48] sm:$0xf] }
  0x1c   : > { %v2087_v51 = vld [vmem:[%s2368_s12 + $0x20] sm:$0xf0]  ;;  %v2093_v53 = vld [vmem:[%s2368_s12 + $0x50] sm:$0xf0]  ;;  %v1542_v54 = vld [vmem:[%s2368_s12 + $0x20] sm:$0xf] }
  0x1d   : > { %504 = vmatpush.bf16.msra.mxu0 %v2098_v12  ;;  %2195 = vmatpush.bf16.msra.mxu1 %v2098_v12  ;;  %v2106_v55 = vld [vmem:[%s2705_s1 + $0x58] sm:$0xff]  ;;  %v2088_v56 = vld [vmem:[%s2368_s12 + $0x28] sm:$0xf0]  ;;  %v1742_v58 = vld [vmem:[%s2368_s12 + $0x24] sm:$0xf]  ;;  %v1535_v61 = vor.u32 %v2087_v51, %v1534_v50  ;;  %v1559_v62 = vor.u32 %v2093_v53, %v1558_v52 }
  0x1e   : > { %562 = vmatpush.bf16.msra.mxu2 %v2114_v13  ;;  %v2142_v57 = vld [vmem:[%s2705_s1 + $0x118] sm:$0xff]  ;;  %v2123_v59 = vld [vmem:[%s2368_s12 + $0x2c] sm:$0xf0]  ;;  %v2171_v60 = vld [vmem:[%s2705_s1 + $0x1a0] sm:$0xff]  ;;  %v1543_v63 = vor.u32 %v2088_v56, %v1542_v54 }
  0x1f   : > { %887 = vmatpush.bf16.msra.mxu3 %v2134_v14  ;;  %v2105_v0 = vld [vmem:[%s2705_s1 + $0x50] sm:$0xff]  ;;  %v1743_v1 = vor.u32 %v2123_v59, %v1742_v58  ;;  %v2170_v3 = vld [vmem:[%s2705_s1 + $0x198] sm:$0xff]  ;;  %v2179_v4 = vld [vmem:[%s2705_s1 + $0x1e0] sm:$0xff] }
  0x20   : > { %v2141_v2 = vld [vmem:[%s2705_s1 + $0x110] sm:$0xff]  ;;  %v2104_v5 = vld [vmem:[%s2705_s1 + $0x48] sm:$0xff]  ;;  %v2178_v8 = vld [vmem:[%s2705_s1 + $0x1d8] sm:$0xff] }
  0x21   : > { %505 = vmatpush.bf16.msra.mxu0 %v2097_v15  ;;  %2196 = vmatpush.bf16.msra.mxu1 %v2097_v15  ;;  %v2140_v6 = vld [vmem:[%s2705_s1 + $0x108] sm:$0xff]  ;;  %v2169_v7 = vld [vmem:[%s2705_s1 + $0x190] sm:$0xff]  ;;  %v2103_v9 = vld [vmem:[%s2705_s1 + $0x40] sm:$0xff] }
  0x22   : > { %563 = vmatpush.bf16.msra.mxu2 %v2113_v16  ;;  %v2139_v10 = vld [vmem:[%s2705_s1 + $0x100] sm:$0xff]  ;;  %v2154_v12 = vld [vmem:[%s2705_s1 + $0x178] sm:$0xff]  ;;  %v1524_v13 = vld [vmem:[%s2368_s12 + $0xc] sm:$0xf0] }
  0x23   : > { %888 = vmatpush.bf16.msra.mxu3 %v2133_v17  ;;  %v2083_v11 = vld [vmem:[%s2368_s12 + $0x4] sm:$0xf]  ;;  %v2190_v14 = vld [vmem:[%s2705_s1 + $0x238] sm:$0xff]  ;;  %v2168_v15 = vld [vmem:[%s2705_s1 + $0x188] sm:$0xff] }
  0x24   : > { %v2119_v16 = vld [vmem:[%s2368_s12 + $0x10] sm:$0xf]  ;;  %v1732_v17 = vld [vmem:[%s2368_s12 + $0x18] sm:$0xf0]  ;;  %v1527_v24 = vor.u32 %v2083_v11, %v1524_v13  ;;  %v2167_v29 = vld [vmem:[%s2705_s1 + $0x180] sm:$0xff] }
  0x25   : > { %506 = vmatpush.bf16.msra.mxu0 %v2096_v18  ;;  %2197 = vmatpush.bf16.msra.mxu1 %v2096_v18  ;;  %v2177_v18 = vld [vmem:[%s2705_s1 + $0x1d0] sm:$0xff]  ;;  %v1735_v25 = vor.u32 %v2119_v16, %v1732_v17  ;;  %v2188_v32 = vld [vmem:[%s2705_s1 + $0x228] sm:$0xff]  ;;  %v2151_v33 = vld [vmem:[%s2705_s1 + $0x160] sm:$0xff] }
  0x26   : > { %564 = vmatpush.bf16.msra.mxu2 %v2112_v19  ;;  %v1554_v19 = vld [vmem:[%s2368_s12 + $0x38] sm:$0xf]  ;;  %v2153_v23 = vld [vmem:[%s2705_s1 + $0x170] sm:$0xff]  ;;  %v2148_v50 = vld [vmem:[%s2705_s1 + $0x148] sm:$0xff] }
  0x27   : > { %889 = vmatpush.bf16.msra.mxu3 %v2132_v20  ;;  %v2091_v20 = vld [vmem:[%s2368_s12 + $0x40] sm:$0xf0]  ;;  %v2186_v51 = vld [vmem:[%s2705_s1 + $0x218] sm:$0xff]  ;;  %v2185_v52 = vld [vmem:[%s2705_s1 + $0x210] sm:$0xff] }
  0x28   : > { %v1555_v26 = vor.u32 %v2091_v20, %v1554_v19  ;;  %v2147_v53 = vld [vmem:[%s2705_s1 + $0x140] sm:$0xff]  ;;  %v2184_v54 = vld [vmem:[%s2705_s1 + $0x208] sm:$0xff]  ;;  %v1938_v59 = vld [vmem:[%s2368_s12 + $0x18] sm:$0xf] }
  0x29   : > { %507 = vmatpush.bf16.msra.mxu0 %v2095_v21  ;;  %2198 = vmatpush.bf16.msra.mxu1 %v2095_v21  ;;  %v1754_v21 = vld [vmem:[%s2368_s12 + $0x3c] sm:$0xf]  ;;  %v1548_v56 = vld [vmem:[%s2368_s12 + $0x3c] sm:$0xf0]  ;;  %v1756_v58 = vld [vmem:[%s2368_s12 + $0x48] sm:$0xf0] }
  0x2a   : > { %565 = vmatpush.bf16.msra.mxu2 %v2111_v22  ;;  %v2126_v22 = vld [vmem:[%s2368_s12 + $0x44] sm:$0xf0]  ;;  %v1952_v11 = vld [vmem:[%s2368_s12 + $0x3c] sm:$0xf0]  ;;  %v1738_v16 = vld [vmem:[%s2368_s12 + $0x14] sm:$0xf] }
  0x2b   : > { %890 = vmatpush.bf16.msra.mxu3 %v2131_v30  ;;  %v1755_v28 = vor.u32 %v2126_v22, %v1754_v21  ;;  %v2152_v30 = vld [vmem:[%s2705_s1 + $0x168] sm:$0xff]  ;;  %v2121_v17 = vld [vmem:[%s2368_s12 + $0x1c] sm:$0xf0]  ;;  %v2162_v21 = vld [vmem:[%s2368_s12 + $0x50] sm:$0xf0] }
  0x2c   : > { %508 = vmatmul.bf16.vlgmr.msra.gmra.mxu0 %v1523_v34  ;;  %518 = vmatmul.bf16.vlgmr.msra.gmra.mxu1 %v1547_v35  ;;  %v2175_v34 = vld [vmem:[%s2705_s1 + $0x1c0] sm:$0xff]  ;;  %v2157_v19 = vld [vmem:[%s2368_s12 + $0x28] sm:$0xf0]  ;;  %v1962_v20 = vld [vmem:[%s2368_s12 + $0x48] sm:$0xf] }
  0x2d   : > { %529 = vmatpush.bf16.msrb.mxu1 %v2110_v27  ;;  %912 = vmatpush.bf16.msrb.mxu0 %v2146_v31  ;;  %v2189_v27 = vld [vmem:[%s2705_s1 + $0x230] sm:$0xff]  ;;  %v2176_v31 = vld [vmem:[%s2705_s1 + $0x1c8] sm:$0xff]  ;;  %v2187_v35 = vld [vmem:[%s2705_s1 + $0x220] sm:$0xff] }
  0x2e   : > { %566 = vmatmul.bf16.vlgmr.msra.gmra.mxu2 %v1531_v36  ;;  %891 = vmatmul.bf16.vlgmr.msra.gmra.mxu3 %v1731_v39  ;;  %v2150_v36 = vld [vmem:[%s2705_s1 + $0x158] sm:$0xff]  ;;  %v2122_v39 = vld [vmem:[%s2368_s12 + $0x28] sm:$0xf]  ;;  %v2161_v22 = vld [vmem:[%s2368_s12 + $0x4c] sm:$0xf] }
  0x2f   : > { %1303 = vmatpush.bf16.msrb.mxu3 %v2182_v37  ;;  %1274 = vmatpush.bf16.msrb.mxu2 %v2174_v41  ;;  %v2086_v37 = vld [vmem:[%s2368_s12 + $0x1c] sm:$0xf]  ;;  %v1566_v41 = vld [vmem:[%s2368_s12 + $0x50] sm:$0xf] }
  0x31   : > { %530 = vmatpush.bf16.msrb.mxu1 %v2109_v38  ;;  %913 = vmatpush.bf16.msrb.mxu0 %v2145_v40  ;;  %v1536_v38 = vld [vmem:[%s2368_s12 + $0x24] sm:$0xf0]  ;;  %v1744_v40 = vld [vmem:[%s2368_s12 + $0x30] sm:$0xf0] }
  0x33   : > { %1304 = vmatpush.bf16.msrb.mxu3 %v2181_v42  ;;  %1275 = vmatpush.bf16.msrb.mxu2 %v2173_v45  ;;  %v2094_v42 = vld [vmem:[%s2368_s12 + $0x58] sm:$0xf0]  ;;  %v2149_v45 = vld [vmem:[%s2705_s1 + $0x150] sm:$0xff] }
  0x35   : > { %531 = vmatpush.bf16.msrb.mxu1 %v2108_v43  ;;  %914 = vmatpush.bf16.msrb.mxu0 %v2144_v44  ;;  %v1766_v43 = vld [vmem:[%s2368_s12 + $0x54] sm:$0xf]  ;;  %v2129_v44 = vld [vmem:[%s2368_s12 + $0x5c] sm:$0xf0] }
  0x37   : > { %1305 = vmatpush.bf16.msrb.mxu3 %v2180_v46  ;;  %1276 = vmatpush.bf16.msrb.mxu2 %v2172_v49  ;;  %v1539_v46 = vor.u32 %v2086_v37, %v1536_v38  ;;  %v1767_v49 = vor.u32 %v2129_v44, %v1766_v43  ;;  %v2163_v43 = vld [vmem:[%s2368_s12 + $0x58] sm:$0xf0]  ;;  %v1982_v44 = vld [vmem:[%s2368_s12 + $0x68] sm:$0xf] }
  0x39   : > { %532 = vmatpush.bf16.msrb.mxu1 %v2107_v47  ;;  %915 = vmatpush.bf16.msrb.mxu0 %v2143_v48  ;;  %v1747_v47 = vor.u32 %v2122_v39, %v1744_v40  ;;  %v1567_v48 = vor.u32 %v2094_v42, %v1566_v41  ;;  %v1762_v40 = vld [vmem:[%s2368_s12 + $0x44] sm:$0xf]  ;;  %v2127_v41 = vld [vmem:[%s2368_s12 + $0x4c] sm:$0xf0] }
  0x3a   : > { %v1970_v42 = vld [vmem:[%s2368_s12 + $0x50] sm:$0xf] }
  0x3b   : > { %1277 = vmatpush.bf16.msrb.mxu2 %v2171_v60  ;;  %1306 = vmatpush.bf16.msrb.mxu3 %v2179_v4  ;;  %v2156_v60 = vld [vmem:[%s2368_s12 + $0x20] sm:$0xf0]  ;;  %v2092_v4 = vld [vmem:[%s2368_s12 + $0x4c] sm:$0xf] }
  0x3c   : > { %513 = vmatmul.bf16.gmra.mxu0 %v1535_v61  ;;  %523 = vmatmul.bf16.gmra.mxu1 %v1559_v62  ;;  %v2183_v61 = vld [vmem:[%s2705_s1 + $0x200] sm:$0xff]  ;;  %v2155_v62 = vld [vmem:[%s2368_s12 + $0x1c] sm:$0xf] }
  0x3d   : > { %533 = vmatpush.bf16.msrb.mxu1 %v2106_v55  ;;  %916 = vmatpush.bf16.msrb.mxu0 %v2142_v57  ;;  %v2089_v55 = vld [vmem:[%s2368_s12 + $0x34] sm:$0xf]  ;;  %v2125_v57 = vld [vmem:[%s2368_s12 + $0x40] sm:$0xf] }
  0x3e   : > { %571 = vmatmul.bf16.gmra.mxu2 %v1543_v63  ;;  %896 = vmatmul.bf16.gmra.mxu3 %v1743_v1  ;;  %v1940_v63 = vld [vmem:[%s2368_s12 + $0x24] sm:$0xf0]  ;;  %v1759_v1 = vor.u32 %v2125_v57, %v1756_v58 }
  0x3f   : > { %1278 = vmatpush.bf16.msrb.mxu2 %v2170_v3  ;;  %1307 = vmatpush.bf16.msrb.mxu3 %v2178_v8  ;;  %v1943_v3 = vor.u32 %v2155_v62, %v1940_v63  ;;  %v1950_v8 = vld [vmem:[%s2368_s12 + $0x30] sm:$0xf] }
  0x41   : > { %534 = vmatpush.bf16.msrb.mxu1 %v2105_v0  ;;  %917 = vmatpush.bf16.msrb.mxu0 %v2141_v2  ;;  %v1551_v0 = vor.u32 %v2089_v55, %v1548_v56  ;;  %v1939_v2 = vor.u32 %v2156_v60, %v1938_v59  ;;  %v1774_v55 = vld [vmem:[%s2368_s12 + $0x5c] sm:$0xf]  ;;  %v2130_v56 = vld [vmem:[%s2368_s12 + $0x64] sm:$0xf0] }
  0x42   : > { %v1775_v58 = vor.u32 %v2130_v56, %v1774_v55 }
  0x43   : > { %1279 = vmatpush.bf16.msrb.mxu2 %v2169_v7  ;;  %1308 = vmatpush.bf16.msrb.mxu3 %v2177_v18  ;;  %v1768_v7 = vld [vmem:[%s2368_s12 + $0x60] sm:$0xf0]  ;;  %v1946_v18 = vld [vmem:[%s2368_s12 + $0x20] sm:$0xf] }
  0x45   : > { %535 = vmatpush.bf16.msrb.mxu1 %v2104_v5  ;;  %918 = vmatpush.bf16.msrb.mxu0 %v2140_v6  ;;  %v1560_v5 = vld [vmem:[%s2368_s12 + $0x54] sm:$0xf0] }
  0x46   : > { %v2128_v6 = vld [vmem:[%s2368_s12 + $0x58] sm:$0xf] }
  0x47   : > { %1280 = vmatpush.bf16.msrb.mxu2 %v2168_v15  ;;  %1309 = vmatpush.bf16.msrb.mxu3 %v2176_v31  ;;  %v1771_v13 = vor.u32 %v2128_v6, %v1768_v7  ;;  %v2160_v31 = vld [vmem:[%s2368_s12 + $0x40] sm:$0xf0] }
  0x49   : > { %536 = vmatpush.bf16.msrb.mxu1 %v2103_v9  ;;  %919 = vmatpush.bf16.msrb.mxu0 %v2139_v10  ;;  %v2159_v9 = vld [vmem:[%s2368_s12 + $0x38] sm:$0xf0]  ;;  %v2158_v10 = vld [vmem:[%s2368_s12 + $0x34] sm:$0xf] }
  0x4a   : > { %v1955_v15 = vor.u32 %v2158_v10, %v1952_v11 }
  0x4b   : > { %1281 = vmatpush.bf16.msrb.mxu2 %v2167_v29  ;;  %1310 = vmatpush.bf16.msrb.mxu3 %v2175_v34  ;;  %v2124_v29 = vld [vmem:[%s2368_s12 + $0x34] sm:$0xf0]  ;;  %v2164_v34 = vld [vmem:[%s2368_s12 + $0x64] sm:$0xf] }
  0x4c   : > { %537 = vmatmul.bf16.vlgmr.msrb.gmra.mxu1 %v1527_v24  ;;  %920 = vmatmul.bf16.vlgmr.msrb.gmra.mxu0 %v1735_v25  ;;  %v1739_v24 = vor.u32 %v2121_v17, %v1738_v16  ;;  %v1947_v25 = vor.u32 %v2157_v19, %v1946_v18 }
  0x4d   : > { %941 = vmatpush.bf16.msra.mxu1 %v2154_v12  ;;  %1332 = vmatpush.bf16.msra.mxu0 %v2190_v14  ;;  %v1563_v12 = vor.u32 %v2092_v4, %v1560_v5 }
  0x4e   : > { %576 = vmatmul.bf16.gmra.mxu2 %v1555_v26  ;;  %901 = vmatmul.bf16.gmra.mxu3 %v1755_v28  ;;  %v1963_v26 = vor.u32 %v2162_v21, %v1962_v20  ;;  %v1750_v28 = vld [vmem:[%s2368_s12 + $0x2c] sm:$0xf] }
  0x4f   : > { %2199 = vmatpush.bf16.msra.mxu2 %v2190_v14  ;;  %v1951_v14 = vor.u32 %v2159_v9, %v1950_v8 }
  0x51   : > { %942 = vmatpush.bf16.msra.mxu1 %v2153_v23  ;;  %1333 = vmatpush.bf16.msra.mxu0 %v2189_v27  ;;  %v1964_v23 = vld [vmem:[%s2368_s12 + $0x54] sm:$0xf0] }
  0x53   : > { %2200 = vmatpush.bf16.msra.mxu2 %v2189_v27  ;;  %v1967_v27 = vor.u32 %v2161_v22, %v1964_v23 }
  0x55   : > { %943 = vmatpush.bf16.msra.mxu1 %v2152_v30  ;;  %1334 = vmatpush.bf16.msra.mxu0 %v2188_v32  ;;  %v1958_v30 = vld [vmem:[%s2368_s12 + $0x38] sm:$0xf] }
  0x56   : > { %v1959_v37 = vor.u32 %v2160_v31, %v1958_v30 }
  0x57   : > { %2201 = vmatpush.bf16.msra.mxu2 %v2188_v32  ;;  %v1974_v32 = vld [vmem:[%s2368_s12 + $0x60] sm:$0xf] }
  0x59   : > { %944 = vmatpush.bf16.msra.mxu1 %v2151_v33  ;;  %1335 = vmatpush.bf16.msra.mxu0 %v2187_v35  ;;  %v2165_v33 = vld [vmem:[%s2368_s12 + $0x68] sm:$0xf0] }
  0x5a   : > { %v1975_v38 = vor.u32 %v2165_v33, %v1974_v32 }
  0x5b   : > { %2202 = vmatpush.bf16.msra.mxu2 %v2187_v35  ;;  %v1976_v35 = vld [vmem:[%s2368_s12 + $0x6c] sm:$0xf0] }
  0x5c   : > { %542 = vmatmul.bf16.gmra.mxu1 %v1539_v46  ;;  %925 = vmatmul.bf16.gmra.mxu0 %v1747_v47  ;;  %v1979_v39 = vor.u32 %v2164_v34, %v1976_v35  ;;  %v1763_v46 = vor.u32 %v2127_v41, %v1762_v40  ;;  %v1971_v47 = vor.u32 %v2163_v43, %v1970_v42 }
  0x5d   : > { %945 = vmatpush.bf16.msra.mxu1 %v2150_v36  ;;  %1336 = vmatpush.bf16.msra.mxu0 %v2186_v51  ;;  %v1751_v36 = vor.u32 %v2124_v29, %v1750_v28 }
  0x5e   : > { %581 = vmatmul.bf16.gmra.mxu2 %v1567_v48  ;;  %906 = vmatmul.bf16.gmra.mxu3 %v1767_v49 }
  0x5f   : > { %2203 = vmatpush.bf16.msra.mxu2 %v2186_v51 }
  0x61   : > { %946 = vmatpush.bf16.msra.mxu1 %v2149_v45  ;;  %1337 = vmatpush.bf16.msra.mxu0 %v2185_v52  ;;  %v2166_v45 = vld [vmem:[%s2368_s12 + $0x70] sm:$0xf0] }
  0x63   : > { %2204 = vmatpush.bf16.msra.mxu2 %v2185_v52 }
  0x65   : > { %947 = vmatpush.bf16.msra.mxu1 %v2148_v50  ;;  %1338 = vmatpush.bf16.msra.mxu0 %v2184_v54  ;;  %v1983_v50 = vor.u32 %v2166_v45, %v1982_v44 }
  0x67   : > { %2205 = vmatpush.bf16.msra.mxu2 %v2184_v54 }
  0x69   : > { %948 = vmatpush.bf16.msra.mxu1 %v2147_v53  ;;  %1339 = vmatpush.bf16.msra.mxu0 %v2183_v61 }
  0x6b   : > { %2206 = vmatpush.bf16.msra.mxu2 %v2183_v61 }
  0x6c   : > { %547 = vmatmul.bf16.gmra.mxu1 %v1551_v0  ;;  %930 = vmatmul.bf16.gmra.mxu0 %v1759_v1 }
  0x6e   : > { %1282 = vmatmul.bf16.vlgmr.msrb.gmra.mxu2 %v1939_v2  ;;  %1311 = vmatmul.bf16.vlgmr.msrb.gmra.mxu3 %v1943_v3 }
  0x7c   : > { %552 = vmatmul.bf16.gmra.mxu1 %v1563_v12  ;;  %935 = vmatmul.bf16.gmra.mxu0 %v1771_v13 }
  0x7e   : > { %1287 = vmatmul.bf16.gmra.mxu2 %v1951_v14  ;;  %1316 = vmatmul.bf16.gmra.mxu3 %v1955_v15 }
  0x8c   : > { %949 = vmatmul.bf16.vlgmr.msra.gmra.mxu1 %v1739_v24  ;;  %1340 = vmatmul.bf16.vlgmr.msra.gmra.mxu0 %v1947_v25 }
  0x8e   : > { %1292 = vmatmul.bf16.gmra.mxu2 %v1963_v26  ;;  %1321 = vmatmul.bf16.gmra.mxu3 %v1967_v27 }
  0x9c   : > { %954 = vmatmul.bf16.gmra.mxu1 %v1751_v36  ;;  %1345 = vmatmul.bf16.gmra.mxu0 %v1959_v37 }
  0x9e   : > { %1297 = vmatmul.bf16.gmra.mxu2 %v1975_v38  ;;  %1326 = vmatmul.bf16.gmra.mxu3 %v1979_v39 }
  0xa9   : > { %v509_v48 = vpop.f32.mrf.mxu0  ;;  %v519_v49 = vpop.f32.mrf.mxu1 }
  0xac   : > { %959 = vmatmul.bf16.gmra.mxu1 %v1763_v46  ;;  %1350 = vmatmul.bf16.gmra.mxu0 %v1971_v47 }
  0xae   : > { %1355 = vmatmul.bf16.vlgmr.msra.gmra.mxu2 %v1983_v50 }
  0xb1   : > { %v567_v51 = vpop.f32.mrf.mxu2  ;;  %v511_v52 = vpop.f32.mrf.mxu0 }
  0xb2   : > { %v521_v53 = vpop.f32.mrf.mxu1  ;;  %v892_v54 = vpop.f32.mrf.mxu3 }
  0xb9   : > { %v569_v57 = vpop.f32.mrf.mxu2  ;;  %v514_v59 = vpop.f32.mrf.mxu0 }
  0xba   : > { %v524_v60 = vpop.f32.mrf.mxu1  ;;  %v2601_v61 = vpop.f32.mrf.mxu3 }
  0xbc   : > { %964 = vmatmul.bf16.gmra.mxu1 %v1775_v58 }
  0xc1   : > { %v572_v62 = vpop.f32.mrf.mxu2  ;;  %v516_v63 = vpop.f32.mrf.mxu0 }
  0xc2   : > { %v526_v0 = vpop.f32.mrf.mxu1  ;;  %v2603_v1 = vpop.f32.mrf.mxu3 }
  0xc9   : > { %v574_v2 = vpop.f32.mrf.mxu2  ;;  %v921_v4 = vpop.f32.mrf.mxu0 }
  0xca   : > { %v538_v3 = vpop.f32.mrf.mxu1  ;;  %v2605_v6 = vpop.f32.mrf.mxu3 }
  0xcb   : > { %v539_v5 = vadd.f32 %v538_v3, %v509_v48 }
  0xcd   : > { %v568_v7 = vadd.f32 %v567_v51, %v539_v5 }
  0xd1   : > { %v577_v8 = vpop.f32.mrf.mxu2  ;;  %v923_v10 = vpop.f32.mrf.mxu0 }
  0xd2   : > { %v540_v9 = vpop.f32.mrf.mxu1  ;;  %v2607_v12 = vpop.f32.mrf.mxu3 }
  0xd3   : > { %v541_v11 = vadd.f32 %v540_v9, %v511_v52 }
  0xd5   : > { %v570_v13 = vadd.f32 %v569_v57, %v541_v11 }
  0xd9   : > { %v579_v14 = vpop.f32.mrf.mxu2  ;;  %v926_v16 = vpop.f32.mrf.mxu0 }
  0xda   : > { %v543_v15 = vpop.f32.mrf.mxu1  ;;  %v2609_v18 = vpop.f32.mrf.mxu3 }
  0xdb   : > { %v544_v17 = vadd.f32 %v543_v15, %v514_v59  ;;  %v2640_v59 = vld [vmem:[%s2706_s2] ss:$0 sm:$0xff] }
  0xdd   : > { %v2611_v19 = vadd.f32 %v572_v62, %v544_v17  ;;  %v2645_v62 = vld [vmem:[%s2707_s3] ss:$0 sm:$0xff] }
  0xe1   : > { %v582_v20 = vpop.f32.mrf.mxu2  ;;  %v2613_v22 = vpop.f32.mrf.mxu0 }
  0xe2   : > { %v545_v21 = vpop.f32.mrf.mxu1  ;;  %v2617_v25 = vpop.f32.mrf.mxu3 }
  0xe3   : > { %v546_v23 = vadd.f32 %v545_v21, %v516_v63 }
  0xe5   : > { %v2615_v24 = vadd.f32 %v574_v2, %v546_v23 }
  0xe9   : > { %v584_v26 = vpop.f32.mrf.mxu2  ;;  %v2619_v28 = vpop.f32.mrf.mxu0 }
  0xea   : > { %v548_v27 = vpop.f32.mrf.mxu1  ;;  %v2623_v31 = vpop.f32.mrf.mxu3 }
  0xeb   : > { %v549_v29 = vadd.f32 %v548_v27, %v519_v49  ;;  %v922_v49 = vadd.f32 %v921_v4, %v892_v54  ;;  %v924_v54 = vadd.f32 %v923_v10, %v2601_v61 }
  0xed   : > { %v2621_v30 = vadd.f32 %v577_v8, %v549_v29 }
  0xf1   : > { %v1283_v32 = vpop.f32.mrf.mxu2  ;;  %v2625_v34 = vpop.f32.mrf.mxu0 }
  0xf2   : > { %v550_v33 = vpop.f32.mrf.mxu1  ;;  %v1312_v37 = vpop.f32.mrf.mxu3 }
  0xf3   : > { %v551_v35 = vadd.f32 %v550_v33, %v521_v53  ;;  %v1313_v53 = vadd.f32 %v1312_v37, %v1283_v32 }
  0xf5   : > { %v2627_v36 = vadd.f32 %v579_v14, %v551_v35  ;;  %v927_v14 = vadd.f32 %v926_v16, %v2603_v1  ;;  %v929_v35 = vadd.f32 %v2613_v22, %v2605_v6  ;;  %v932_v6 = vadd.f32 %v2619_v28, %v2607_v12 }
  0xf6   : > { %v934_v12 = vadd.f32 %v2625_v34, %v2609_v18 }
  0xf9   : > { %v1285_v38 = vpop.f32.mrf.mxu2  ;;  %v2629_v40 = vpop.f32.mrf.mxu0 }
  0xfa   : > { %v553_v39 = vpop.f32.mrf.mxu1  ;;  %v1314_v46 = vpop.f32.mrf.mxu3  ;;  %v937_v18 = vadd.f32 %v2629_v40, %v2617_v25 }
  0xfb   : > { %v554_v41 = vadd.f32 %v553_v39, %v524_v60  ;;  %v1315_v4 = vadd.f32 %v1314_v46, %v1285_v38 }
  0xfd   : > { %v2631_v42 = vadd.f32 %v582_v20, %v554_v41 }
 0x101   : > { %v1288_v43 = vpop.f32.mrf.mxu2  ;;  %v2633_v45 = vpop.f32.mrf.mxu0 }
 0x102   : > { %v555_v44 = vpop.f32.mrf.mxu1  ;;  %v1317_v56 = vpop.f32.mrf.mxu3 }
 0x103   : > { %v556_v47 = vadd.f32 %v555_v44, %v526_v0  ;;  %v1318_v23 = vadd.f32 %v1317_v56, %v1288_v43 }
 0x105   : > { %v2635_v48 = vadd.f32 %v584_v26, %v556_v47 }
 0x109   : > { %v1290_v50 = vpop.f32.mrf.mxu2  ;;  %v1341_v52 = vpop.f32.mrf.mxu0 }
 0x10a   : > { %v950_v51 = vpop.f32.mrf.mxu1  ;;  %v1342_v58 = vadd.f32 %v1341_v52, %v1313_v53  ;;  %v1319_v10 = vpop.f32.mrf.mxu3 }
 0x10b   : > { %v951_v55 = vadd.f32 %v950_v51, %v922_v49  ;;  %v1320_v39 = vadd.f32 %v1319_v10, %v1290_v50 }
 0x10d   : > { %v970_v57 = vadd.f32 %v951_v55, %v568_v7 }
 0x10f   : > { %v1361_v60 = vadd.f32 %v1342_v58, %v970_v57 }
 0x111   : > { %v1389_v63 = vmul.f32 %v2640_v59, %v1361_v60  ;;  %v1293_v0 = vpop.f32.mrf.mxu2  ;;  %v1343_v3 = vpop.f32.mrf.mxu0 }
 0x112   : > { %v952_v2 = vpop.f32.mrf.mxu1  ;;  %v1344_v61 = vadd.f32 %v1343_v3, %v1315_v4  ;;  %v1322_v1 = vpop.f32.mrf.mxu3 }
 0x113   : > { %v1401_v5 = vadd.f32 %v2645_v62, %v1389_v63  ;;  %v953_v7 = vadd.f32 %v952_v2, %v924_v54  ;;  %v1323_v53 = vadd.f32 %v1322_v1, %v1293_v0 }
 0x115   : > { %v1409_v8 = vmax.f32 %v1401_v5, 0.0  ;;  %v971_v9 = vadd.f32 %v953_v7, %v570_v13 }
 0x117   : > { %1417 = vst [vmem:[%s2654_s24] sm:$0xff] %v1409_v8  ;;  %v1362_v11 = vadd.f32 %v1344_v61, %v971_v9 }
 0x119   : > { %v1390_v15 = vmul.f32 %v2640_v59, %v1362_v11  ;;  %v1295_v17 = vpop.f32.mrf.mxu2  ;;  %v1346_v21 = vpop.f32.mrf.mxu0 }
 0x11a   : > { %v955_v20 = vpop.f32.mrf.mxu1  ;;  %v1347_v13 = vadd.f32 %v1346_v21, %v1318_v23  ;;  %v1324_v56 = vpop.f32.mrf.mxu3 }
 0x11b   : > { %v1402_v26 = vadd.f32 %v2645_v62, %v1390_v15  ;;  %v956_v27 = vadd.f32 %v955_v20, %v927_v14  ;;  %v1325_v0 = vadd.f32 %v1324_v56, %v1295_v17 }
 0x11d   : > { %v1410_v29 = vmax.f32 %v1402_v26, 0.0  ;;  %v972_v32 = vadd.f32 %v956_v27, %v2611_v19  ;;  %v939_v26 = vadd.f32 %v2633_v45, %v2623_v31 }
 0x11f   : > { %1418 = vst [vmem:[%s2654_s24 + $0x8] sm:$0xff] %v1410_v29  ;;  %v1363_v33 = vadd.f32 %v1347_v13, %v972_v32 }
 0x121   : > { %v1391_v16 = vmul.f32 %v2640_v59, %v1363_v33  ;;  %v1348_v38 = vpop.f32.mrf.mxu0  ;;  %v1298_v44 = vpop.f32.mrf.mxu2 }
 0x122   : > { %v957_v37 = vpop.f32.mrf.mxu1  ;;  %v1349_v47 = vadd.f32 %v1348_v38, %v1320_v39  ;;  %v1327_v8 = vpop.f32.mrf.mxu3 }
 0x123   : > { %v1403_v41 = vadd.f32 %v2645_v62, %v1391_v16  ;;  %v958_v43 = vadd.f32 %v957_v37, %v929_v35  ;;  %v1328_v11 = vadd.f32 %v1327_v8, %v1298_v44 }
 0x125   : > { %v1411_v46 = vmax.f32 %v1403_v41, 0.0  ;;  %v973_v19 = vadd.f32 %v958_v43, %v2615_v24 }
 0x127   : > { %1419 = vst [vmem:[%s2654_s24 + $0x10] sm:$0xff] %v1411_v46  ;;  %v1364_v49 = vadd.f32 %v1349_v47, %v973_v19 }
 0x129   : > { %v1392_v22 = vmul.f32 %v2640_v59, %v1364_v49  ;;  %v1351_v52 = vpop.f32.mrf.mxu0  ;;  %v1300_v60 = vpop.f32.mrf.mxu2 }
 0x12a   : > { %v960_v51 = vpop.f32.mrf.mxu1  ;;  %v1352_v24 = vadd.f32 %v1351_v52, %v1323_v53  ;;  %v1329_v23 = vpop.f32.mrf.mxu3 }
 0x12b   : > { %v1404_v50 = vadd.f32 %v2645_v62, %v1392_v22  ;;  %v961_v55 = vadd.f32 %v960_v51, %v932_v6  ;;  %v1330_v29 = vadd.f32 %v1329_v23, %v1300_v60 }
 0x12d   : > { %v1412_v57 = vmax.f32 %v1404_v50, 0.0  ;;  %v974_v58 = vadd.f32 %v961_v55, %v2621_v30 }
 0x12f   : > { %1420 = vst [vmem:[%s2654_s24 + $0x18] sm:$0xff] %v1412_v57  ;;  %v1365_v54 = vadd.f32 %v1352_v24, %v974_v58 }
 0x131   : > { %v1393_v28 = vmul.f32 %v2640_v59, %v1365_v54  ;;  %v1353_v2 = vpop.f32.mrf.mxu0  ;;  %v1356_v61 = vpop.f32.mrf.mxu2 }
 0x132   : > { %v962_v63 = vpop.f32.mrf.mxu1  ;;  %v1354_v7 = vadd.f32 %v1353_v2, %v1325_v0  ;;  %v1357_v17 = vadd.f32 %v1356_v61, %v1328_v11 }
 0x133   : > { %v1405_v3 = vadd.f32 %v2645_v62, %v1393_v28  ;;  %v963_v4 = vadd.f32 %v962_v63, %v934_v12 }
 0x135   : > { %v1413_v5 = vmax.f32 %v1405_v3, 0.0  ;;  %v975_v30 = vadd.f32 %v963_v4, %v2627_v36 }
 0x137   : > { %1421 = vst [vmem:[%s2654_s24 + $0x20] sm:$0xff] %v1413_v5  ;;  %v1366_v9 = vadd.f32 %v1354_v7, %v975_v30 }
 0x139   : > { %v1394_v34 = vmul.f32 %v2640_v59, %v1366_v9  ;;  %v1358_v40 = vpop.f32.mrf.mxu2 }
 0x13a   : > { %v965_v10 = vpop.f32.mrf.mxu1  ;;  %v1359_v33 = vadd.f32 %v1358_v40, %v1330_v29 }
 0x13b   : > { %v1406_v14 = vadd.f32 %v2645_v62, %v1394_v34  ;;  %v966_v15 = vadd.f32 %v965_v10, %v937_v18 }
 0x13d   : > { %v1414_v20 = vmax.f32 %v1406_v14, 0.0  ;;  %v976_v36 = vadd.f32 %v966_v15, %v2631_v42 }
 0x13f   : > { %1422 = vst [vmem:[%s2654_s24 + $0x28] sm:$0xff] %v1414_v20  ;;  %v1367_v21 = vadd.f32 %v1357_v17, %v976_v36 }
 0x141   : > { %v1395_v25 = vmul.f32 %v2640_v59, %v1367_v21 }
 0x142   : > { %v967_v27 = vpop.f32.mrf.mxu1 }
 0x143   : > { %v1407_v32 = vadd.f32 %v2645_v62, %v1395_v25  ;;  %v968_v13 = vadd.f32 %v967_v27, %v939_v26 }
 0x145   : > { %v1415_v35 = vmax.f32 %v1407_v32, 0.0  ;;  %v977_v1 = vadd.f32 %v968_v13, %v2635_v48 }
 0x147   : > { %1423 = vst [vmem:[%s2654_s24 + $0x30] sm:$0xff] %v1415_v35  ;;  %v1368_v42 = vadd.f32 %v1359_v33, %v977_v1 }
 0x149   : > { %v1396_v16 = vmul.f32 %v2640_v59, %v1368_v42 }
 0x14b   : > { %v1408_v37 = vadd.f32 %v2645_v62, %v1396_v16 }
 0x14d   : > { %v1416_v38 = vmax.f32 %v1408_v37, 0.0 }
 0x14f   : > { %1424 = vst [vmem:[%s2654_s24 + $0x38] sm:$0xff] %v1416_v38 }
 0x150 PF: > { %s14_s17 = sadd.s32 1, %s2256_s17   ;;  %s2709_s15 = smov %s2252_s16 }
 0x151   : > { %p11_p5 = scmp.ge.s32.totalorder %s14_s17, 4   ;;  %s2710_s16 = smov %s2712_s18 }
 0x153   :  { %13 = sbr.rel (!%p11_p5) target bundleno = 2 (0x2), region = 71 }

// kernel: context_path_forward.9
= control target key start
LH: loop header
LB: loop body
LE: loop exit
PB: predicated region body
PF: predicated region fallthrough
CT: control target
= control target key end

     0   :  { %s6384_s21 = smov 0   ;;  %s6386_s22 = smov 0   ;;  %s7569_s0 = inlined_call_operand.vmem [shape: bf16[2,48,1536], index: 0, kind: input, shape index: {}]   ;;  %s7570_s1 = inlined_call_operand.vmem [shape: bf16[3,1536,128], index: 1, kind: input, shape index: {}]   ;;  %s7571_s2 = inlined_call_operand.vmem [shape: f32[1,128], index: 2, kind: input, shape index: {}]   ;;  %s7572_s3 = inlined_call_operand.vmem [shape: f32[1,128], index: 3, kind: input, shape index: {}]   ;;  %s7573_s4 = inlined_call_operand.vmem [shape: f32[2,4,4,128], index: 4, kind: output, shape index: {0}]   ;;  %s7574_s5 = inlined_call_operand.vmem [shape: f32[2,1,128], index: 5, kind: output, shape index: {1}]   ;;  %s7575_s6 = inlined_call_operand.vmem [shape: f32[2,1,512], index: 6, kind: output, shape index: {2}]  }
   0x1   :  { %s6388_s23 = smov 0  }
   0x2 LB: > { %s29_s24 = sadd.s32 1, %s6342_s22  ;;  %p4048_p0 = scmp.ge.s32.totalorder %s6346_s23, 1  ;;  %s6346_s23 = sphi %s6388_s23, %s17_s23   ;;  %s6342_s22 = sphi %s6386_s22, %s7579_s22   ;;  %s6338_s21 = sphi %s6384_s21, %s7578_s21  }
   0x3   : > { %p31_p1 = scmp.ge.s32.totalorder %s29_s24, 2  ;;  %p231_p2 = scmp.lt.s32.totalorder %s6346_s23, 3 }
   0x5   : > { %s7581_s24 = smov (%p31_p1, %s29_s24), 0  ;;  %p232_p3 = pnand %p4048_p0, %p231_p2 }
   0x6   : > { %p272_p4 = scmp.lt.s32.totalorder (!%p232_p3), %s6338_s21, 1 }
   0x7   : > { %235 = sbr.rel (%p232_p3) target bundleno = 488 (0x1e8), region = 36 }
   0xc   : > { %v5967_v0 = vld [vmem:[%s7570_s1 + $0x38] sm:$0xff]  ;;  %v5966_v4 = vld [vmem:[%s7570_s1 + $0x30] sm:$0xff]  ;;  %v5965_v8 = vld [vmem:[%s7570_s1 + $0x28] sm:$0xff]  ;;  %s7583_s21 = smov (!%p272_p4, %s6338_s21), 1  ;;  %vm3804_vm1 = vcmask 1043456   ;;  %vm3888_vm2 = vcmask 1040384  }
   0xd   : > { %v5975_v1 = vld [vmem:[%s7570_s1 + $0x78] sm:$0xff]  ;;  %1213 = vmatpush.bf16.msra.mxu0 %v5967_v0  ;;  %v5974_v5 = vld [vmem:[%s7570_s1 + $0x70] sm:$0xff]  ;;  %v5973_v9 = vld [vmem:[%s7570_s1 + $0x68] sm:$0xff]  ;;  %s6296_s25 = smul.u32 288, %s7583_s21  ;;  %s4052_s8 = sshll.u32 %s7583_s21, 2  ;;  %vm3890_vm3 = vcmask 1042434  }
   0xe   : > { %v5983_v2 = vld [vmem:[%s7570_s1 + $0xb8] sm:$0xff]  ;;  %1232 = vmatpush.bf16.msra.mxu1 %v5975_v1  ;;  %v5982_v6 = vld [vmem:[%s7570_s1 + $0xb0] sm:$0xff]  ;;  %v5981_v10 = vld [vmem:[%s7570_s1 + $0xa8] sm:$0xff]  ;;  %s7501_s13 = scalar_lea.vmem %s7574_s5, %s7583_s21  ;;  %s7514_s18 = scalar_lea.vmem %s7575_s6, %s4052_s8  ;;  %vm3892_vm4 = vcmask 1041408  }
   0xf   : > { %v5991_v3 = vld [vmem:[%s7570_s1 + $0xf8] sm:$0xff]  ;;  %1251 = vmatpush.bf16.msra.mxu2 %v5983_v2  ;;  %v5990_v7 = vld [vmem:[%s7570_s1 + $0xf0] sm:$0xff]  ;;  %v5989_v11 = vld [vmem:[%s7570_s1 + $0xe8] sm:$0xff]  ;;  %s6484_s12 = scalar_lea.vmem %s7569_s0, %s6296_s25  ;;  %s5935_s19 = sshll.u32 %s7583_s21, 4 }
  0x10   : > { %1270 = vmatpush.bf16.msra.mxu3 %v5991_v3  ;;  %v5964_v12 = vld [vmem:[%s7570_s1 + $0x20] sm:$0xff]  ;;  %v5963_v16 = vld [vmem:[%s7570_s1 + $0x18] sm:$0xff]  ;;  %v5962_v20 = vld [vmem:[%s7570_s1 + $0x10] sm:$0xff]  ;;  %s7533_s25 = scalar_lea.vmem %s7573_s4, %s5935_s19 }
  0x11   : > { %1214 = vmatpush.bf16.msra.mxu0 %v5966_v4  ;;  %v5972_v13 = vld [vmem:[%s7570_s1 + $0x60] sm:$0xff]  ;;  %v5971_v17 = vld [vmem:[%s7570_s1 + $0x58] sm:$0xff]  ;;  %v5970_v21 = vld [vmem:[%s7570_s1 + $0x50] sm:$0xff] }
  0x12   : > { %1233 = vmatpush.bf16.msra.mxu1 %v5974_v5  ;;  %v5980_v14 = vld [vmem:[%s7570_s1 + $0xa0] sm:$0xff]  ;;  %v5979_v18 = vld [vmem:[%s7570_s1 + $0x98] sm:$0xff]  ;;  %v5978_v22 = vld [vmem:[%s7570_s1 + $0x90] sm:$0xff] }
  0x13   : > { %1252 = vmatpush.bf16.msra.mxu2 %v5982_v6  ;;  %v5988_v15 = vld [vmem:[%s7570_s1 + $0xe0] sm:$0xff]  ;;  %v5987_v19 = vld [vmem:[%s7570_s1 + $0xd8] sm:$0xff]  ;;  %v5986_v23 = vld [vmem:[%s7570_s1 + $0xd0] sm:$0xff] }
  0x14   : > { %1271 = vmatpush.bf16.msra.mxu3 %v5990_v7  ;;  %v5961_v24 = vld [vmem:[%s7570_s1 + $0x8] sm:$0xff]  ;;  %v5960_v28 = vld [vmem:[%s7570_s1] sm:$0xff]  ;;  %v5942_v33 = vld [vmem:[%s6484_s12 + $0x2c] sm:$0xf0] }
  0x15   : > { %1215 = vmatpush.bf16.msra.mxu0 %v5965_v8  ;;  %v5969_v25 = vld [vmem:[%s7570_s1 + $0x48] sm:$0xff]  ;;  %v5968_v29 = vld [vmem:[%s7570_s1 + $0x40] sm:$0xff]  ;;  %v4057_v35 = vld [vmem:[%s6484_s12 + $0x30] sm:$0xf0] }
  0x16   : > { %1234 = vmatpush.bf16.msra.mxu1 %v5973_v9  ;;  %v5977_v26 = vld [vmem:[%s7570_s1 + $0x88] sm:$0xff]  ;;  %v4055_v30 = vld [vmem:[%s6484_s12] sm:$0xf]  ;;  %v5936_v34 = vld [vmem:[%s6484_s12 + $0x4] sm:$0xf] }
  0x17   : > { %1253 = vmatpush.bf16.msra.mxu2 %v5981_v10  ;;  %v5985_v27 = vld [vmem:[%s7570_s1 + $0xc8] sm:$0xff]  ;;  %v5976_v31 = vld [vmem:[%s7570_s1 + $0x80] sm:$0xff]  ;;  %v5943_v37 = vld [vmem:[%s6484_s12 + $0x34] sm:$0xf0]  ;;  %v4056_v42 = vor.u32 %v5942_v33, %v4055_v30  ;;  %v4060_v43 = vor.u32 %v5936_v34, %v4057_v35 }
  0x18   : > { %1272 = vmatpush.bf16.msra.mxu3 %v5989_v11  ;;  %v5984_v32 = vld [vmem:[%s7570_s1 + $0xc0] sm:$0xff]  ;;  %v4063_v36 = vld [vmem:[%s6484_s12 + $0x8] sm:$0xf]  ;;  %v5937_v38 = vld [vmem:[%s6484_s12 + $0xc] sm:$0xf] }
  0x19   : > { %1216 = vmatpush.bf16.msra.mxu0 %v5964_v12  ;;  %v4065_v39 = vld [vmem:[%s6484_s12 + $0x38] sm:$0xf0]  ;;  %v4064_v44 = vor.u32 %v5943_v37, %v4063_v36  ;;  %v6014_v48 = vld [vmem:[%s7570_s1 + $0x1b0] sm:$0xff]  ;;  %v6013_v52 = vld [vmem:[%s7570_s1 + $0x1a8] sm:$0xff] }
  0x1a   : > { %1235 = vmatpush.bf16.msra.mxu1 %v5972_v13  ;;  %v6015_v40 = vld [vmem:[%s7570_s1 + $0x1b8] sm:$0xff]  ;;  %v4068_v45 = vor.u32 %v5937_v38, %v4065_v39  ;;  %v5998_v49 = vld [vmem:[%s7570_s1 + $0x130] sm:$0xff]  ;;  %v5997_v53 = vld [vmem:[%s7570_s1 + $0x128] sm:$0xff] }
  0x1b   : > { %1254 = vmatpush.bf16.msra.mxu2 %v5980_v14  ;;  %v5999_v41 = vld [vmem:[%s7570_s1 + $0x138] sm:$0xff]  ;;  %v6006_v50 = vld [vmem:[%s7570_s1 + $0x170] sm:$0xff]  ;;  %v6005_v54 = vld [vmem:[%s7570_s1 + $0x168] sm:$0xff] }
  0x1c   : > { %1273 = vmatpush.bf16.msra.mxu3 %v5988_v15  ;;  %v6007_v46 = vld [vmem:[%s7570_s1 + $0x178] sm:$0xff]  ;;  %v6022_v51 = vld [vmem:[%s7570_s1 + $0x1f0] sm:$0xff]  ;;  %v6021_v55 = vld [vmem:[%s7570_s1 + $0x1e8] sm:$0xff] }
  0x1d   : > { %1217 = vmatpush.bf16.msra.mxu0 %v5963_v16  ;;  %v6023_v47 = vld [vmem:[%s7570_s1 + $0x1f8] sm:$0xff]  ;;  %v6012_v56 = vld [vmem:[%s7570_s1 + $0x1a0] sm:$0xff]  ;;  %v5954_v61 = vld [vmem:[%s6484_s12 + $0x8c] sm:$0xf0] }
  0x1e   : > { %1236 = vmatpush.bf16.msra.mxu1 %v5971_v17  ;;  %v5996_v57 = vld [vmem:[%s7570_s1 + $0x120] sm:$0xff]  ;;  %v4105_v63 = vld [vmem:[%s6484_s12 + $0x90] sm:$0xf0]  ;;  %v4111_v0 = vld [vmem:[%s6484_s12 + $0x68] sm:$0xf] }
  0x1f   : > { %1255 = vmatpush.bf16.msra.mxu2 %v5979_v18  ;;  %v6004_v58 = vld [vmem:[%s7570_s1 + $0x160] sm:$0xff]  ;;  %v5955_v1 = vld [vmem:[%s6484_s12 + $0x94] sm:$0xf0]  ;;  %v5949_v2 = vld [vmem:[%s6484_s12 + $0x6c] sm:$0xf] }
  0x20   : > { %1274 = vmatpush.bf16.msra.mxu3 %v5987_v19  ;;  %v6020_v59 = vld [vmem:[%s7570_s1 + $0x1e0] sm:$0xff]  ;;  %v4113_v3 = vld [vmem:[%s6484_s12 + $0x98] sm:$0xf0]  ;;  %v4112_v8 = vor.u32 %v5955_v1, %v4111_v0  ;;  %v6010_v12 = vld [vmem:[%s7570_s1 + $0x190] sm:$0xff] }
  0x21   : > { %1218 = vmatpush.bf16.msra.mxu0 %v5962_v20  ;;  %v4103_v60 = vld [vmem:[%s6484_s12 + $0x60] sm:$0xf]  ;;  %v5948_v62 = vld [vmem:[%s6484_s12 + $0x64] sm:$0xf]  ;;  %v6011_v4 = vld [vmem:[%s7570_s1 + $0x198] sm:$0xff]  ;;  %v4116_v9 = vor.u32 %v5949_v2, %v4113_v3 }
  0x22   : > { %1237 = vmatpush.bf16.msra.mxu1 %v5970_v21  ;;  %v5995_v5 = vld [vmem:[%s7570_s1 + $0x118] sm:$0xff]  ;;  %v4104_v6 = vor.u32 %v5954_v61, %v4103_v60  ;;  %v4108_v7 = vor.u32 %v5948_v62, %v4105_v63  ;;  %v5994_v13 = vld [vmem:[%s7570_s1 + $0x110] sm:$0xff]  ;;  %v6009_v16 = vld [vmem:[%s7570_s1 + $0x188] sm:$0xff] }
  0x23   : > { %1256 = vmatpush.bf16.msra.mxu2 %v5978_v22  ;;  %v6003_v10 = vld [vmem:[%s7570_s1 + $0x158] sm:$0xff]  ;;  %v6002_v14 = vld [vmem:[%s7570_s1 + $0x150] sm:$0xff]  ;;  %v5993_v17 = vld [vmem:[%s7570_s1 + $0x108] sm:$0xff] }
  0x24   : > { %1275 = vmatpush.bf16.msra.mxu3 %v5986_v23  ;;  %v6019_v11 = vld [vmem:[%s7570_s1 + $0x1d8] sm:$0xff]  ;;  %v6018_v15 = vld [vmem:[%s7570_s1 + $0x1d0] sm:$0xff]  ;;  %v6001_v18 = vld [vmem:[%s7570_s1 + $0x148] sm:$0xff] }
  0x25   : > { %1219 = vmatpush.bf16.msra.mxu0 %v5961_v24  ;;  %v6017_v19 = vld [vmem:[%s7570_s1 + $0x1c8] sm:$0xff]  ;;  %v6008_v20 = vld [vmem:[%s7570_s1 + $0x180] sm:$0xff]  ;;  %v4071_v24 = vld [vmem:[%s6484_s12 + $0x10] sm:$0xf] }
  0x26   : > { %1238 = vmatpush.bf16.msra.mxu1 %v5969_v25  ;;  %v5992_v21 = vld [vmem:[%s7570_s1 + $0x100] sm:$0xff]  ;;  %v6047_v25 = vld [vmem:[%s7570_s1 + $0x2b8] sm:$0xff]  ;;  %v4081_v33 = vld [vmem:[%s6484_s12 + $0x48] sm:$0xf0] }
  0x27   : > { %1257 = vmatpush.bf16.msra.mxu2 %v5977_v26  ;;  %v6000_v22 = vld [vmem:[%s7570_s1 + $0x140] sm:$0xff]  ;;  %v6031_v26 = vld [vmem:[%s7570_s1 + $0x238] sm:$0xff]  ;;  %v6046_v37 = vld [vmem:[%s7570_s1 + $0x2b0] sm:$0xff] }
  0x28   : > { %1276 = vmatpush.bf16.msra.mxu3 %v5985_v27  ;;  %v6016_v23 = vld [vmem:[%s7570_s1 + $0x1c0] sm:$0xff]  ;;  %v4079_v30 = vld [vmem:[%s6484_s12 + $0x18] sm:$0xf]  ;;  %v4129_v61 = vld [vmem:[%s6484_s12 + $0xa8] sm:$0xf0] }
  0x29   : > { %1220 = vmatpush.bf16.msra.mxu0 %v5960_v28  ;;  %v5944_v27 = vld [vmem:[%s6484_s12 + $0x3c] sm:$0xf0]  ;;  %v5938_v28 = vld [vmem:[%s6484_s12 + $0x14] sm:$0xf]  ;;  %v6039_v34 = vld [vmem:[%s7570_s1 + $0x278] sm:$0xff] }
  0x2a   : > { %1239 = vmatpush.bf16.msra.mxu1 %v5968_v29  ;;  %v4073_v29 = vld [vmem:[%s6484_s12 + $0x40] sm:$0xf0]  ;;  %v6055_v35 = vld [vmem:[%s7570_s1 + $0x2f8] sm:$0xff]  ;;  %v4072_v36 = vor.u32 %v5944_v27, %v4071_v24  ;;  %v6042_v1 = vld [vmem:[%s7570_s1 + $0x290] sm:$0xff] }
  0x2b   : > { %1258 = vmatpush.bf16.msra.mxu2 %v5976_v31  ;;  %v5945_v31 = vld [vmem:[%s6484_s12 + $0x44] sm:$0xf0]  ;;  %v4076_v38 = vor.u32 %v5938_v28, %v4073_v29  ;;  %v6027_v60 = vld [vmem:[%s7570_s1 + $0x218] sm:$0xff]  ;;  %v4089_v24 = vld [vmem:[%s6484_s12 + $0x50] sm:$0xf0] }
  0x2c   : > { %1277 = vmatpush.bf16.msra.mxu3 %v5984_v32  ;;  %1221 = vmatmul.bf16.vlgmr.msra.gmra.mxu0 %v4056_v42  ;;  %v5939_v32 = vld [vmem:[%s6484_s12 + $0x1c] sm:$0xf]  ;;  %v4080_v39 = vor.u32 %v5945_v31, %v4079_v30  ;;  %v6038_v42 = vld [vmem:[%s7570_s1 + $0x270] sm:$0xff]  ;;  %v5941_v27 = vld [vmem:[%s6484_s12 + $0x2c] sm:$0xf] }
  0x2d   : > { %1289 = vmatpush.bf16.msrb.mxu0 %v5999_v41  ;;  %1240 = vmatmul.bf16.vlgmr.msra.gmra.mxu1 %v4060_v43  ;;  %v6030_v41 = vld [vmem:[%s7570_s1 + $0x230] sm:$0xff]  ;;  %v6035_v62 = vld [vmem:[%s7570_s1 + $0x258] sm:$0xff] }
  0x2e   : > { %1259 = vmatmul.bf16.vlgmr.msra.gmra.mxu2 %v4064_v44  ;;  %1308 = vmatpush.bf16.msrb.mxu1 %v6007_v46  ;;  %v6054_v43 = vld [vmem:[%s7570_s1 + $0x2f0] sm:$0xff]  ;;  %v6045_v44 = vld [vmem:[%s7570_s1 + $0x2a8] sm:$0xff]  ;;  %v6051_v63 = vld [vmem:[%s7570_s1 + $0x2d8] sm:$0xff] }
  0x2f   : > { %1327 = vmatpush.bf16.msrb.mxu2 %v6015_v40  ;;  %1278 = vmatmul.bf16.vlgmr.msra.gmra.mxu3 %v4068_v45  ;;  %v4084_v40 = vor.u32 %v5939_v32, %v4081_v33  ;;  %v6029_v45 = vld [vmem:[%s7570_s1 + $0x228] sm:$0xff]  ;;  %v4097_v28 = vld [vmem:[%s6484_s12 + $0x58] sm:$0xf0]  ;;  %v6094_v30 = vld [vmem:[%s7570_s1 + $0x370] sm:$0xff] }
  0x30   : > { %1346 = vmatpush.bf16.msrb.mxu3 %v6023_v47  ;;  %v6037_v46 = vld [vmem:[%s7570_s1 + $0x268] sm:$0xff]  ;;  %v4100_v33 = vor.u32 %v5941_v27, %v4097_v28 }
  0x31   : > { %1290 = vmatpush.bf16.msrb.mxu0 %v5998_v49  ;;  %v6053_v47 = vld [vmem:[%s7570_s1 + $0x2e8] sm:$0xff]  ;;  %v6028_v49 = vld [vmem:[%s7570_s1 + $0x220] sm:$0xff] }
  0x32   : > { %1309 = vmatpush.bf16.msrb.mxu1 %v6006_v50  ;;  %v6036_v50 = vld [vmem:[%s7570_s1 + $0x260] sm:$0xff]  ;;  %v6133_v28 = vld [vmem:[%s7570_s1 + $0x4a8] sm:$0xff] }
  0x33   : > { %1328 = vmatpush.bf16.msrb.mxu2 %v6014_v48  ;;  %v6044_v48 = vld [vmem:[%s7570_s1 + $0x2a0] sm:$0xff] }
  0x34   : > { %1347 = vmatpush.bf16.msrb.mxu3 %v6022_v51  ;;  %v6052_v51 = vld [vmem:[%s7570_s1 + $0x2e0] sm:$0xff] }
  0x35   : > { %1291 = vmatpush.bf16.msrb.mxu0 %v5997_v53  ;;  %v5956_v53 = vld [vmem:[%s6484_s12 + $0x9c] sm:$0xf0] }
  0x36   : > { %1310 = vmatpush.bf16.msrb.mxu1 %v6005_v54  ;;  %v6043_v54 = vld [vmem:[%s7570_s1 + $0x298] sm:$0xff] }
  0x37   : > { %1329 = vmatpush.bf16.msrb.mxu2 %v6013_v52  ;;  %v4119_v52 = vld [vmem:[%s6484_s12 + $0x70] sm:$0xf] }
  0x38   : > { %1348 = vmatpush.bf16.msrb.mxu3 %v6021_v55  ;;  %v5950_v55 = vld [vmem:[%s6484_s12 + $0x74] sm:$0xf]  ;;  %v4120_v0 = vor.u32 %v5956_v53, %v4119_v52  ;;  %v5953_v52 = vld [vmem:[%s6484_s12 + $0x8c] sm:$0xf]  ;;  %v6083_v53 = vld [vmem:[%s7570_s1 + $0x318] sm:$0xff] }
  0x39   : > { %1292 = vmatpush.bf16.msrb.mxu0 %v5996_v57  ;;  %v4127_v57 = vld [vmem:[%s6484_s12 + $0x78] sm:$0xf] }
  0x3a   : > { %1311 = vmatpush.bf16.msrb.mxu1 %v6004_v58  ;;  %v5957_v58 = vld [vmem:[%s6484_s12 + $0xa4] sm:$0xf0] }
  0x3b   : > { %1330 = vmatpush.bf16.msrb.mxu2 %v6012_v56  ;;  %v4121_v56 = vld [vmem:[%s6484_s12 + $0xa0] sm:$0xf0]  ;;  %v4128_v3 = vor.u32 %v5957_v58, %v4127_v57  ;;  %v6090_v58 = vld [vmem:[%s7570_s1 + $0x350] sm:$0xff] }
  0x3c   : > { %1349 = vmatpush.bf16.msrb.mxu3 %v6020_v59  ;;  %1226 = vmatmul.bf16.gmra.mxu0 %v4104_v6  ;;  %v5951_v59 = vld [vmem:[%s6484_s12 + $0x7c] sm:$0xf]  ;;  %v4124_v2 = vor.u32 %v5950_v55, %v4121_v56  ;;  %v6034_v6 = vld [vmem:[%s7570_s1 + $0x250] sm:$0xff] }
  0x3d   : > { %1293 = vmatpush.bf16.msrb.mxu0 %v5995_v5  ;;  %1245 = vmatmul.bf16.gmra.mxu1 %v4108_v7  ;;  %v6026_v5 = vld [vmem:[%s7570_s1 + $0x210] sm:$0xff]  ;;  %v6107_v55 = vld [vmem:[%s7570_s1 + $0x3d8] sm:$0xff] }
  0x3e   : > { %1264 = vmatmul.bf16.gmra.mxu2 %v4112_v8  ;;  %1312 = vmatpush.bf16.msrb.mxu1 %v6003_v10  ;;  %v6050_v7 = vld [vmem:[%s7570_s1 + $0x2d0] sm:$0xff]  ;;  %v6041_v8 = vld [vmem:[%s7570_s1 + $0x288] sm:$0xff] }
  0x3f   : > { %1331 = vmatpush.bf16.msrb.mxu2 %v6011_v4  ;;  %1283 = vmatmul.bf16.gmra.mxu3 %v4116_v9  ;;  %v4132_v4 = vor.u32 %v5951_v59, %v4129_v61  ;;  %v6025_v9 = vld [vmem:[%s7570_s1 + $0x208] sm:$0xff]  ;;  %v6098_v56 = vld [vmem:[%s7570_s1 + $0x390] sm:$0xff] }
  0x40   : > { %1350 = vmatpush.bf16.msrb.mxu3 %v6019_v11  ;;  %v6033_v10 = vld [vmem:[%s7570_s1 + $0x248] sm:$0xff] }
  0x41   : > { %1294 = vmatpush.bf16.msrb.mxu0 %v5994_v13  ;;  %v6049_v11 = vld [vmem:[%s7570_s1 + $0x2c8] sm:$0xff]  ;;  %v6103_v13 = vld [vmem:[%s7570_s1 + $0x3b8] sm:$0xff] }
  0x42   : > { %1313 = vmatpush.bf16.msrb.mxu1 %v6002_v14  ;;  %v6024_v14 = vld [vmem:[%s7570_s1 + $0x200] sm:$0xff] }
  0x43   : > { %1332 = vmatpush.bf16.msrb.mxu2 %v6010_v12  ;;  %v6040_v12 = vld [vmem:[%s7570_s1 + $0x280] sm:$0xff] }
  0x44   : > { %1351 = vmatpush.bf16.msrb.mxu3 %v6018_v15  ;;  %v6032_v15 = vld [vmem:[%s7570_s1 + $0x240] sm:$0xff] }
  0x45   : > { %1295 = vmatpush.bf16.msrb.mxu0 %v5993_v17  ;;  %v4087_v17 = vld [vmem:[%s6484_s12 + $0x20] sm:$0xf] }
  0x46   : > { %1314 = vmatpush.bf16.msrb.mxu1 %v6001_v18  ;;  %v5946_v18 = vld [vmem:[%s6484_s12 + $0x4c] sm:$0xf0] }
  0x47   : > { %1333 = vmatpush.bf16.msrb.mxu2 %v6009_v16  ;;  %v6048_v16 = vld [vmem:[%s7570_s1 + $0x2c0] sm:$0xff]  ;;  %v4088_v29 = vor.u32 %v5946_v18, %v4087_v17  ;;  %v4759_v18 = vld [vmem:[%s6484_s12 + $0x38] sm:$0xf] }
  0x48   : > { %1352 = vmatpush.bf16.msrb.mxu3 %v6017_v19  ;;  %v6087_v19 = vld [vmem:[%s7570_s1 + $0x338] sm:$0xff]  ;;  %v4753_v17 = vld [vmem:[%s6484_s12 + $0x60] sm:$0xf0] }
  0x49   : > { %1296 = vmatpush.bf16.msrb.mxu0 %v5992_v21  ;;  %v5940_v21 = vld [vmem:[%s6484_s12 + $0x24] sm:$0xf] }
  0x4a   : > { %1315 = vmatpush.bf16.msrb.mxu1 %v6000_v22  ;;  %v6111_v22 = vld [vmem:[%s7570_s1 + $0x3f8] sm:$0xff]  ;;  %v4092_v31 = vor.u32 %v5940_v21, %v4089_v24  ;;  %v4761_v21 = vld [vmem:[%s6484_s12 + $0x68] sm:$0xf0]  ;;  %v6142_v24 = vld [vmem:[%s7570_s1 + $0x4f0] sm:$0xff] }
  0x4b   : > { %1334 = vmatpush.bf16.msrb.mxu2 %v6008_v20  ;;  %v6095_v20 = vld [vmem:[%s7570_s1 + $0x378] sm:$0xff] }
  0x4c   : > { %1353 = vmatpush.bf16.msrb.mxu3 %v6016_v23  ;;  %1297 = vmatmul.bf16.vlgmr.msrb.gmra.mxu0 %v4072_v36  ;;  %v6102_v23 = vld [vmem:[%s7570_s1 + $0x3b0] sm:$0xff]  ;;  %v6101_v36 = vld [vmem:[%s7570_s1 + $0x3a8] sm:$0xff] }
  0x4d   : > { %1365 = vmatpush.bf16.msra.mxu0 %v6031_v26  ;;  %1316 = vmatmul.bf16.vlgmr.msrb.gmra.mxu1 %v4076_v38  ;;  %v5947_v26 = vld [vmem:[%s6484_s12 + $0x54] sm:$0xf0]  ;;  %v6085_v38 = vld [vmem:[%s7570_s1 + $0x328] sm:$0xff] }
  0x4e   : > { %1384 = vmatpush.bf16.msra.mxu1 %v6039_v34  ;;  %1335 = vmatmul.bf16.vlgmr.msrb.gmra.mxu2 %v4080_v39  ;;  %v6086_v34 = vld [vmem:[%s7570_s1 + $0x330] sm:$0xff]  ;;  %v6109_v39 = vld [vmem:[%s7570_s1 + $0x3e8] sm:$0xff] }
  0x4f   : > { %1403 = vmatpush.bf16.msra.mxu2 %v6047_v25  ;;  %1354 = vmatmul.bf16.vlgmr.msrb.gmra.mxu3 %v4084_v40  ;;  %v4095_v25 = vld [vmem:[%s6484_s12 + $0x28] sm:$0xf]  ;;  %v6100_v40 = vld [vmem:[%s7570_s1 + $0x3a0] sm:$0xff] }
  0x50   : > { %1422 = vmatpush.bf16.msra.mxu3 %v6055_v35  ;;  %v4096_v32 = vor.u32 %v5947_v26, %v4095_v25  ;;  %v6110_v35 = vld [vmem:[%s7570_s1 + $0x3f0] sm:$0xff] }
  0x51   : > { %1366 = vmatpush.bf16.msra.mxu0 %v6030_v41  ;;  %v6092_v41 = vld [vmem:[%s7570_s1 + $0x360] sm:$0xff] }
  0x52   : > { %1385 = vmatpush.bf16.msra.mxu1 %v6038_v42  ;;  %v6084_v42 = vld [vmem:[%s7570_s1 + $0x320] sm:$0xff] }
  0x53   : > { %1404 = vmatpush.bf16.msra.mxu2 %v6046_v37  ;;  %v6093_v37 = vld [vmem:[%s7570_s1 + $0x368] sm:$0xff] }
  0x54   : > { %1423 = vmatpush.bf16.msra.mxu3 %v6054_v43  ;;  %v6108_v43 = vld [vmem:[%s7570_s1 + $0x3e0] sm:$0xff] }
  0x55   : > { %1367 = vmatpush.bf16.msra.mxu0 %v6029_v45  ;;  %v4135_v45 = vld [vmem:[%s6484_s12 + $0x80] sm:$0xf] }
  0x56   : > { %1386 = vmatpush.bf16.msra.mxu1 %v6037_v46  ;;  %v5958_v46 = vld [vmem:[%s6484_s12 + $0xac] sm:$0xf0] }
  0x57   : > { %1405 = vmatpush.bf16.msra.mxu2 %v6045_v44  ;;  %v6099_v44 = vld [vmem:[%s7570_s1 + $0x398] sm:$0xff]  ;;  %v4136_v57 = vor.u32 %v5958_v46, %v4135_v45  ;;  %v6075_v45 = vld [vmem:[%s6484_s12 + $0xc4] sm:$0xf0] }
  0x58   : > { %1424 = vmatpush.bf16.msra.mxu3 %v6053_v47  ;;  %v6091_v47 = vld [vmem:[%s7570_s1 + $0x358] sm:$0xff] }
  0x59   : > { %1368 = vmatpush.bf16.msra.mxu0 %v6028_v49  ;;  %v4137_v49 = vld [vmem:[%s6484_s12 + $0xb0] sm:$0xf0]  ;;  %v6069_v46 = vld [vmem:[%s6484_s12 + $0x9c] sm:$0xf] }
  0x5a   : > { %1387 = vmatpush.bf16.msra.mxu1 %v6036_v50  ;;  %v4143_v50 = vld [vmem:[%s6484_s12 + $0x88] sm:$0xf] }
  0x5b   : > { %1406 = vmatpush.bf16.msra.mxu2 %v6044_v48  ;;  %v5952_v48 = vld [vmem:[%s6484_s12 + $0x84] sm:$0xf] }
  0x5c   : > { %1425 = vmatpush.bf16.msra.mxu3 %v6052_v51  ;;  %1302 = vmatmul.bf16.gmra.mxu0 %v4120_v0  ;;  %v5959_v51 = vld [vmem:[%s6484_s12 + $0xb4] sm:$0xf0]  ;;  %v4140_v59 = vor.u32 %v5952_v48, %v4137_v49  ;;  %v6097_v0 = vld [vmem:[%s7570_s1 + $0x388] sm:$0xff]  ;;  %v6114_v49 = vld [vmem:[%s7570_s1 + $0x410] sm:$0xff] }
  0x5d   : > { %1369 = vmatpush.bf16.msra.mxu0 %v6027_v60  ;;  %1321 = vmatmul.bf16.gmra.mxu1 %v4124_v2  ;;  %v4144_v60 = vor.u32 %v5959_v51, %v4143_v50  ;;  %v6081_v2 = vld [vmem:[%s7570_s1 + $0x308] sm:$0xff]  ;;  %v6122_v50 = vld [vmem:[%s7570_s1 + $0x450] sm:$0xff] }
  0x5e   : > { %1388 = vmatpush.bf16.msra.mxu1 %v6035_v62  ;;  %1340 = vmatmul.bf16.gmra.mxu2 %v4128_v3  ;;  %v6082_v62 = vld [vmem:[%s7570_s1 + $0x310] sm:$0xff]  ;;  %v6105_v3 = vld [vmem:[%s7570_s1 + $0x3c8] sm:$0xff] }
  0x5f   : > { %1407 = vmatpush.bf16.msra.mxu2 %v6043_v54  ;;  %1359 = vmatmul.bf16.gmra.mxu3 %v4132_v4  ;;  %v4145_v54 = vld [vmem:[%s6484_s12 + $0xb8] sm:$0xf0]  ;;  %v6096_v4 = vld [vmem:[%s7570_s1 + $0x380] sm:$0xff]  ;;  %v4809_v48 = vld [vmem:[%s6484_s12 + $0xc8] sm:$0xf0] }
  0x60   : > { %1426 = vmatpush.bf16.msra.mxu3 %v6051_v63  ;;  %v4148_v61 = vor.u32 %v5953_v52, %v4145_v54  ;;  %v6106_v63 = vld [vmem:[%s7570_s1 + $0x3d0] sm:$0xff] }
  0x61   : > { %1370 = vmatpush.bf16.msra.mxu0 %v6026_v5  ;;  %v6088_v5 = vld [vmem:[%s7570_s1 + $0x340] sm:$0xff]  ;;  %v6138_v52 = vld [vmem:[%s7570_s1 + $0x4d0] sm:$0xff] }
  0x62   : > { %1389 = vmatpush.bf16.msra.mxu1 %v6034_v6  ;;  %v6135_v6 = vld [vmem:[%s7570_s1 + $0x4b8] sm:$0xff] }
  0x63   : > { %1408 = vmatpush.bf16.msra.mxu2 %v6042_v1  ;;  %v6089_v1 = vld [vmem:[%s7570_s1 + $0x348] sm:$0xff] }
  0x64   : > { %1427 = vmatpush.bf16.msra.mxu3 %v6050_v7  ;;  %v6127_v7 = vld [vmem:[%s7570_s1 + $0x478] sm:$0xff] }
  0x65   : > { %1371 = vmatpush.bf16.msra.mxu0 %v6025_v9  ;;  %v6104_v9 = vld [vmem:[%s7570_s1 + $0x3c0] sm:$0xff] }
  0x66   : > { %1390 = vmatpush.bf16.msra.mxu1 %v6033_v10  ;;  %v6119_v10 = vld [vmem:[%s7570_s1 + $0x438] sm:$0xff] }
  0x67   : > { %1409 = vmatpush.bf16.msra.mxu2 %v6041_v8  ;;  %v6080_v8 = vld [vmem:[%s7570_s1 + $0x300] sm:$0xff] }
  0x68   : > { %1428 = vmatpush.bf16.msra.mxu3 %v6049_v11  ;;  %v4751_v11 = vld [vmem:[%s6484_s12 + $0x30] sm:$0xf] }
  0x69   : > { %1372 = vmatpush.bf16.msra.mxu0 %v6024_v14  ;;  %v6062_v14 = vld [vmem:[%s6484_s12 + $0x5c] sm:$0xf0] }
  0x6a   : > { %1391 = vmatpush.bf16.msra.mxu1 %v6032_v15  ;;  %v6056_v15 = vld [vmem:[%s6484_s12 + $0x34] sm:$0xf] }
  0x6b   : > { %1410 = vmatpush.bf16.msra.mxu2 %v6040_v12  ;;  %v6143_v12 = vld [vmem:[%s7570_s1 + $0x4f8] sm:$0xff]  ;;  %v4756_v25 = vor.u32 %v6056_v15, %v4753_v17  ;;  %v6165_v17 = vld [vmem:[%s7570_s1 + $0x5a8] sm:$0xff] }
  0x6c   : > { %1429 = vmatpush.bf16.msra.mxu3 %v6048_v16  ;;  %1373 = vmatmul.bf16.vlgmr.msra.gmra.mxu0 %v4088_v29  ;;  %v6126_v16 = vld [vmem:[%s7570_s1 + $0x470] sm:$0xff]  ;;  %v6117_v29 = vld [vmem:[%s7570_s1 + $0x428] sm:$0xff]  ;;  %v4777_v15 = vld [vmem:[%s6484_s12 + $0x78] sm:$0xf0] }
  0x6d   : > { %2369 = vmatpush.bf16.msrb.mxu0 %v6087_v19  ;;  %1392 = vmatmul.bf16.vlgmr.msra.gmra.mxu1 %v4092_v31  ;;  %v6063_v19 = vld [vmem:[%s6484_s12 + $0x64] sm:$0xf0] }
  0x6e   : > { %2388 = vmatpush.bf16.msrb.mxu1 %v6095_v20  ;;  %1411 = vmatmul.bf16.vlgmr.msra.gmra.mxu2 %v4096_v32  ;;  %v6057_v20 = vld [vmem:[%s6484_s12 + $0x3c] sm:$0xf]  ;;  %v4760_v26 = vor.u32 %v6063_v19, %v4759_v18  ;;  %v6141_v31 = vld [vmem:[%s7570_s1 + $0x4e8] sm:$0xff]  ;;  %v6132_v32 = vld [vmem:[%s7570_s1 + $0x4a0] sm:$0xff] }
  0x6f   : > { %2407 = vmatpush.bf16.msrb.mxu2 %v6103_v13  ;;  %1430 = vmatmul.bf16.vlgmr.msra.gmra.mxu3 %v4100_v33  ;;  %v6134_v13 = vld [vmem:[%s7570_s1 + $0x4b0] sm:$0xff]  ;;  %v4764_v27 = vor.u32 %v6057_v20, %v4761_v21  ;;  %v6116_v33 = vld [vmem:[%s7570_s1 + $0x420] sm:$0xff] }
  0x70   : > { %2426 = vmatpush.bf16.msrb.mxu3 %v6111_v22  ;;  %v6118_v22 = vld [vmem:[%s7570_s1 + $0x430] sm:$0xff] }
  0x71   : > { %2370 = vmatpush.bf16.msrb.mxu0 %v6086_v34  ;;  %v6124_v34 = vld [vmem:[%s7570_s1 + $0x460] sm:$0xff] }
  0x72   : > { %2389 = vmatpush.bf16.msrb.mxu1 %v6094_v30  ;;  %v6125_v30 = vld [vmem:[%s7570_s1 + $0x468] sm:$0xff] }
  0x73   : > { %2408 = vmatpush.bf16.msrb.mxu2 %v6102_v23  ;;  %v4752_v23 = vor.u32 %v6062_v14, %v4751_v11  ;;  %v4775_v11 = vld [vmem:[%s6484_s12 + $0x48] sm:$0xf]  ;;  %v6059_v14 = vld [vmem:[%s6484_s12 + $0x4c] sm:$0xf] }
  0x74   : > { %2427 = vmatpush.bf16.msrb.mxu3 %v6110_v35  ;;  %v6140_v35 = vld [vmem:[%s7570_s1 + $0x4e0] sm:$0xff] }
  0x75   : > { %2371 = vmatpush.bf16.msrb.mxu0 %v6085_v38  ;;  %v6123_v38 = vld [vmem:[%s7570_s1 + $0x458] sm:$0xff] }
  0x76   : > { %2390 = vmatpush.bf16.msrb.mxu1 %v6093_v37  ;;  %v6115_v37 = vld [vmem:[%s7570_s1 + $0x418] sm:$0xff] }
  0x77   : > { %2409 = vmatpush.bf16.msrb.mxu2 %v6101_v36  ;;  %v6131_v36 = vld [vmem:[%s7570_s1 + $0x498] sm:$0xff] }
  0x78   : > { %2428 = vmatpush.bf16.msrb.mxu3 %v6109_v39  ;;  %v4799_v39 = vld [vmem:[%s6484_s12 + $0x90] sm:$0xf] }
  0x79   : > { %2372 = vmatpush.bf16.msrb.mxu0 %v6084_v42  ;;  %v6068_v42 = vld [vmem:[%s6484_s12 + $0x94] sm:$0xf] }
  0x7a   : > { %2391 = vmatpush.bf16.msrb.mxu1 %v6092_v41  ;;  %v6139_v41 = vld [vmem:[%s7570_s1 + $0x4d8] sm:$0xff] }
  0x7b   : > { %2410 = vmatpush.bf16.msrb.mxu2 %v6100_v40  ;;  %v6074_v40 = vld [vmem:[%s6484_s12 + $0xbc] sm:$0xf0] }
  0x7c   : > { %2429 = vmatpush.bf16.msrb.mxu3 %v6108_v43  ;;  %1378 = vmatmul.bf16.gmra.mxu0 %v4136_v57  ;;  %v4801_v43 = vld [vmem:[%s6484_s12 + $0xc0] sm:$0xf0]  ;;  %v4800_v51 = vor.u32 %v6074_v40, %v4799_v39  ;;  %v6113_v57 = vld [vmem:[%s7570_s1 + $0x408] sm:$0xff]  ;;  %v6155_v40 = vld [vmem:[%s7570_s1 + $0x558] sm:$0xff] }
  0x7d   : > { %2373 = vmatpush.bf16.msrb.mxu0 %v6083_v53  ;;  %1397 = vmatmul.bf16.gmra.mxu1 %v4140_v59  ;;  %v4804_v53 = vor.u32 %v6068_v42, %v4801_v43  ;;  %v6137_v59 = vld [vmem:[%s7570_s1 + $0x4c8] sm:$0xff]  ;;  %v4815_v42 = vld [vmem:[%s6484_s12 + $0xa0] sm:$0xf]  ;;  %v6076_v43 = vld [vmem:[%s6484_s12 + $0xcc] sm:$0xf0] }
  0x7e   : > { %2392 = vmatpush.bf16.msrb.mxu1 %v6091_v47  ;;  %1416 = vmatmul.bf16.gmra.mxu2 %v4144_v60  ;;  %v6130_v47 = vld [vmem:[%s7570_s1 + $0x490] sm:$0xff]  ;;  %v6128_v60 = vld [vmem:[%s7570_s1 + $0x480] sm:$0xff] }
  0x7f   : > { %2411 = vmatpush.bf16.msrb.mxu2 %v6099_v44  ;;  %1435 = vmatmul.bf16.gmra.mxu3 %v4148_v61  ;;  %v4807_v44 = vld [vmem:[%s6484_s12 + $0x98] sm:$0xf]  ;;  %v6112_v61 = vld [vmem:[%s7570_s1 + $0x400] sm:$0xff] }
  0x80   : > { %2430 = vmatpush.bf16.msrb.mxu3 %v6107_v55  ;;  %v4808_v54 = vor.u32 %v6075_v45, %v4807_v44  ;;  %v4812_v55 = vor.u32 %v6069_v46, %v4809_v48  ;;  %v6162_v44 = vld [vmem:[%s7570_s1 + $0x590] sm:$0xff]  ;;  %v6070_v45 = vld [vmem:[%s6484_s12 + $0xa4] sm:$0xf]  ;;  %v6077_v48 = vld [vmem:[%s6484_s12 + $0xd4] sm:$0xf0] }
  0x81   : > { %2374 = vmatpush.bf16.msrb.mxu0 %v6082_v62  ;;  %v6120_v62 = vld [vmem:[%s7570_s1 + $0x440] sm:$0xff]  ;;  %v4817_v46 = vld [vmem:[%s6484_s12 + $0xd0] sm:$0xf0] }
  0x82   : > { %2393 = vmatpush.bf16.msrb.mxu1 %v6090_v58  ;;  %v6121_v58 = vld [vmem:[%s7570_s1 + $0x448] sm:$0xff] }
  0x83   : > { %2412 = vmatpush.bf16.msrb.mxu2 %v6098_v56  ;;  %v6129_v56 = vld [vmem:[%s7570_s1 + $0x488] sm:$0xff] }
  0x84   : > { %2431 = vmatpush.bf16.msrb.mxu3 %v6106_v63  ;;  %v6136_v63 = vld [vmem:[%s7570_s1 + $0x4c0] sm:$0xff] }
  0x85   : > { %2375 = vmatpush.bf16.msrb.mxu0 %v6081_v2  ;;  %v6159_v2 = vld [vmem:[%s7570_s1 + $0x578] sm:$0xff] }
  0x86   : > { %2394 = vmatpush.bf16.msrb.mxu1 %v6089_v1  ;;  %v6151_v1 = vld [vmem:[%s7570_s1 + $0x538] sm:$0xff] }
  0x87   : > { %2413 = vmatpush.bf16.msrb.mxu2 %v6097_v0  ;;  %v6167_v0 = vld [vmem:[%s7570_s1 + $0x5b8] sm:$0xff] }
  0x88   : > { %2432 = vmatpush.bf16.msrb.mxu3 %v6105_v3  ;;  %v6175_v3 = vld [vmem:[%s7570_s1 + $0x5f8] sm:$0xff] }
  0x89   : > { %2376 = vmatpush.bf16.msrb.mxu0 %v6080_v8  ;;  %v4769_v8 = vld [vmem:[%s6484_s12 + $0x70] sm:$0xf0] }
  0x8a   : > { %2395 = vmatpush.bf16.msrb.mxu1 %v6088_v5  ;;  %v6064_v5 = vld [vmem:[%s6484_s12 + $0x6c] sm:$0xf0] }
  0x8b   : > { %2414 = vmatpush.bf16.msrb.mxu2 %v6096_v4  ;;  %v4767_v4 = vld [vmem:[%s6484_s12 + $0x40] sm:$0xf] }
  0x8c   : > { %2433 = vmatpush.bf16.msrb.mxu3 %v6104_v9  ;;  %2377 = vmatmul.bf16.vlgmr.msrb.gmra.mxu0 %v4752_v23  ;;  %v6150_v9 = vld [vmem:[%s7570_s1 + $0x530] sm:$0xff]  ;;  %v4780_v23 = vor.u32 %v6059_v14, %v4777_v15 }
  0x8d   : > { %2445 = vmatpush.bf16.msra.mxu0 %v6119_v10  ;;  %2396 = vmatmul.bf16.vlgmr.msrb.gmra.mxu1 %v4756_v25  ;;  %v6158_v10 = vld [vmem:[%s7570_s1 + $0x570] sm:$0xff]  ;;  %v6157_v25 = vld [vmem:[%s7570_s1 + $0x568] sm:$0xff] }
  0x8e   : > { %2464 = vmatpush.bf16.msra.mxu1 %v6127_v7  ;;  %2415 = vmatmul.bf16.vlgmr.msrb.gmra.mxu2 %v4760_v26  ;;  %v6166_v7 = vld [vmem:[%s7570_s1 + $0x5b0] sm:$0xff]  ;;  %v6173_v26 = vld [vmem:[%s7570_s1 + $0x5e8] sm:$0xff] }
  0x8f   : > { %2483 = vmatpush.bf16.msra.mxu2 %v6135_v6  ;;  %2434 = vmatmul.bf16.vlgmr.msrb.gmra.mxu3 %v4764_v27  ;;  %v6058_v6 = vld [vmem:[%s6484_s12 + $0x44] sm:$0xf] }
  0x90   : > { %2502 = vmatpush.bf16.msra.mxu3 %v6143_v12  ;;  %v6065_v12 = vld [vmem:[%s6484_s12 + $0x74] sm:$0xf0]  ;;  %v4772_v20 = vor.u32 %v6058_v6, %v4769_v8  ;;  %v6164_v27 = vld [vmem:[%s7570_s1 + $0x5a0] sm:$0xff] }
  0x91   : > { %2446 = vmatpush.bf16.msra.mxu0 %v6118_v22  ;;  %v4776_v21 = vor.u32 %v6065_v12, %v4775_v11  ;;  %v6223_v6 = vld [vmem:[%s7570_s1 + $0x6b8] sm:$0xff]  ;;  %v6152_v8 = vld [vmem:[%s7570_s1 + $0x540] sm:$0xff] }
  0x92   : > { %2465 = vmatpush.bf16.msra.mxu1 %v6126_v16  ;;  %v4768_v16 = vor.u32 %v6064_v5, %v4767_v4  ;;  %v6169_v4 = vld [vmem:[%s7570_s1 + $0x5c8] sm:$0xff]  ;;  %v6160_v5 = vld [vmem:[%s7570_s1 + $0x580] sm:$0xff]  ;;  %v6207_v12 = vld [vmem:[%s7570_s1 + $0x638] sm:$0xff] }
  0x93   : > { %2484 = vmatpush.bf16.msra.mxu2 %v6134_v13  ;;  %v6174_v13 = vld [vmem:[%s7570_s1 + $0x5f0] sm:$0xff] }
  0x94   : > { %2503 = vmatpush.bf16.msra.mxu3 %v6142_v24  ;;  %v6149_v24 = vld [vmem:[%s7570_s1 + $0x528] sm:$0xff] }
  0x95   : > { %2447 = vmatpush.bf16.msra.mxu0 %v6117_v29  ;;  %v6156_v29 = vld [vmem:[%s7570_s1 + $0x560] sm:$0xff] }
  0x96   : > { %2466 = vmatpush.bf16.msra.mxu1 %v6125_v30  ;;  %v6172_v30 = vld [vmem:[%s7570_s1 + $0x5e0] sm:$0xff] }
  0x97   : > { %2485 = vmatpush.bf16.msra.mxu2 %v6133_v28  ;;  %v6148_v28 = vld [vmem:[%s7570_s1 + $0x520] sm:$0xff] }
  0x98   : > { %2504 = vmatpush.bf16.msra.mxu3 %v6141_v31 }
  0x99   : > { %2448 = vmatpush.bf16.msra.mxu0 %v6116_v33  ;;  %v6163_v33 = vld [vmem:[%s7570_s1 + $0x598] sm:$0xff] }
  0x9a   : > { %2467 = vmatpush.bf16.msra.mxu1 %v6124_v34 }
  0x9b   : > { %2486 = vmatpush.bf16.msra.mxu2 %v6132_v32 }
  0x9c   : > { %2505 = vmatpush.bf16.msra.mxu3 %v6140_v35  ;;  %2382 = vmatmul.bf16.gmra.mxu0 %v4800_v51  ;;  %v4825_v51 = vld [vmem:[%s6484_s12 + $0xd8] sm:$0xf0] }
  0x9d   : > { %2449 = vmatpush.bf16.msra.mxu0 %v6115_v37  ;;  %2401 = vmatmul.bf16.gmra.mxu1 %v4804_v53  ;;  %v6170_v53 = vld [vmem:[%s7570_s1 + $0x5d0] sm:$0xff] }
  0x9e   : > { %2468 = vmatpush.bf16.msra.mxu1 %v6123_v38  ;;  %2420 = vmatmul.bf16.gmra.mxu2 %v4808_v54  ;;  %v6147_v38 = vld [vmem:[%s7570_s1 + $0x518] sm:$0xff] }
  0x9f   : > { %2487 = vmatpush.bf16.msra.mxu2 %v6131_v36  ;;  %2439 = vmatmul.bf16.gmra.mxu3 %v4812_v55 }
  0xa0   : > { %2506 = vmatpush.bf16.msra.mxu3 %v6139_v41  ;;  %v6171_v41 = vld [vmem:[%s7570_s1 + $0x5d8] sm:$0xff] }
  0xa1   : > { %2450 = vmatpush.bf16.msra.mxu0 %v6114_v49  ;;  %v6071_v49 = vld [vmem:[%s6484_s12 + $0xac] sm:$0xf] }
  0xa2   : > { %2469 = vmatpush.bf16.msra.mxu1 %v6122_v50  ;;  %v6146_v50 = vld [vmem:[%s7570_s1 + $0x510] sm:$0xff] }
  0xa3   : > { %2488 = vmatpush.bf16.msra.mxu2 %v6130_v47  ;;  %v4823_v47 = vld [vmem:[%s6484_s12 + $0xa8] sm:$0xf] }
  0xa4   : > { %2507 = vmatpush.bf16.msra.mxu3 %v6138_v52  ;;  %v6154_v52 = vld [vmem:[%s7570_s1 + $0x550] sm:$0xff] }
  0xa5   : > { %2451 = vmatpush.bf16.msra.mxu0 %v6113_v57  ;;  %v6161_v57 = vld [vmem:[%s7570_s1 + $0x588] sm:$0xff] }
  0xa6   : > { %2470 = vmatpush.bf16.msra.mxu1 %v6121_v58 }
  0xa7   : > { %2489 = vmatpush.bf16.msra.mxu2 %v6129_v56  ;;  %v4816_v56 = vor.u32 %v6076_v43, %v4815_v42 }
  0xa8   : > { %2508 = vmatpush.bf16.msra.mxu3 %v6137_v59 }
  0xa9   : > { %2452 = vmatpush.bf16.msra.mxu0 %v6112_v61  ;;  %v1222_v18 = vpop.f32.mrf.mxu0  ;;  %v4820_v61 = vor.u32 %v6070_v45, %v4817_v46  ;;  %v6205_v45 = vld [vmem:[%s7570_s1 + $0x628] sm:$0xff] }
  0xaa   : > { %2471 = vmatpush.bf16.msra.mxu1 %v6120_v62  ;;  %v1241_v19 = vpop.f32.mrf.mxu1  ;;  %v4824_v62 = vor.u32 %v6077_v48, %v4823_v47  ;;  %v6229_v47 = vld [vmem:[%s7570_s1 + $0x6e8] sm:$0xff]  ;;  %v6220_v48 = vld [vmem:[%s7570_s1 + $0x6a0] sm:$0xff] }
  0xab   : > { %2490 = vmatpush.bf16.msra.mxu2 %v6128_v60  ;;  %v1242_v22 = vadd.f32 %v1241_v19, %v1222_v18  ;;  %v6222_v18 = vld [vmem:[%s7570_s1 + $0x6b0] sm:$0xff] }
  0xac   : > { %2509 = vmatpush.bf16.msra.mxu3 %v6136_v63  ;;  %2453 = vmatmul.bf16.vlgmr.msra.gmra.mxu0 %v4768_v16 }
  0xad   : > { %2521 = vmatpush.bf16.msrb.mxu0 %v6151_v1  ;;  %2472 = vmatmul.bf16.vlgmr.msra.gmra.mxu1 %v4772_v20  ;;  %v6145_v1 = vld [vmem:[%s7570_s1 + $0x508] sm:$0xff] }
  0xae   : > { %2540 = vmatpush.bf16.msrb.mxu1 %v6159_v2  ;;  %2491 = vmatmul.bf16.vlgmr.msra.gmra.mxu2 %v4776_v21  ;;  %v4783_v21 = vld [vmem:[%s6484_s12 + $0x50] sm:$0xf] }
  0xaf   : > { %2559 = vmatpush.bf16.msrb.mxu2 %v6167_v0  ;;  %2510 = vmatmul.bf16.vlgmr.msra.gmra.mxu3 %v4780_v23  ;;  %v4828_v0 = vor.u32 %v6071_v49, %v4825_v51  ;;  %v6206_v23 = vld [vmem:[%s7570_s1 + $0x630] sm:$0xff]  ;;  %v6228_v51 = vld [vmem:[%s7570_s1 + $0x6e0] sm:$0xff] }
  0xb0   : > { %2578 = vmatpush.bf16.msrb.mxu3 %v6175_v3  ;;  %v6153_v3 = vld [vmem:[%s7570_s1 + $0x548] sm:$0xff] }
  0xb1   : > { %2522 = vmatpush.bf16.msrb.mxu0 %v6150_v9  ;;  %v1260_v31 = vpop.f32.mrf.mxu2  ;;  %v1224_v35 = vpop.f32.mrf.mxu0  ;;  %v6168_v9 = vld [vmem:[%s7570_s1 + $0x5c0] sm:$0xff] }
  0xb2   : > { %2541 = vmatpush.bf16.msrb.mxu1 %v6158_v10  ;;  %v1279_v32 = vpop.f32.mrf.mxu3  ;;  %v1261_v34 = vadd.f32 %v1260_v31, %v1242_v22  ;;  %v1243_v36 = vpop.f32.mrf.mxu1  ;;  %v6066_v22 = vld [vmem:[%s6484_s12 + $0x7c] sm:$0xf0]  ;;  %v6061_v31 = vld [vmem:[%s6484_s12 + $0x5c] sm:$0xf] }
  0xb3   : > { %2560 = vmatpush.bf16.msrb.mxu2 %v6166_v7  ;;  %v1244_v37 = vadd.f32 %v1243_v36, %v1224_v35  ;;  %v6144_v7 = vld [vmem:[%s7570_s1 + $0x500] sm:$0xff]  ;;  %v4784_v35 = vor.u32 %v6066_v22, %v4783_v21  ;;  %v6213_v36 = vld [vmem:[%s7570_s1 + $0x668] sm:$0xff] }
  0xb4   : > { %2579 = vmatpush.bf16.msrb.mxu3 %v6174_v13  ;;  %v7020_v39 = vadd.f32 %v1279_v32, %v1261_v34  ;;  %v6215_v13 = vld [vmem:[%s7570_s1 + $0x678] sm:$0xff]  ;;  %v4793_v32 = vld [vmem:[%s6484_s12 + $0x88] sm:$0xf0] }
  0xb5   : > { %2523 = vmatpush.bf16.msrb.mxu0 %v6149_v24  ;;  %v6214_v24 = vld [vmem:[%s7570_s1 + $0x670] sm:$0xff] }
  0xb6   : > { %2542 = vmatpush.bf16.msrb.mxu1 %v6157_v25  ;;  %v6060_v25 = vld [vmem:[%s6484_s12 + $0x54] sm:$0xf] }
  0xb7   : > { %2561 = vmatpush.bf16.msrb.mxu2 %v6165_v17  ;;  %v6231_v17 = vld [vmem:[%s7570_s1 + $0x6f8] sm:$0xff] }
  0xb8   : > { %2580 = vmatpush.bf16.msrb.mxu3 %v6173_v26  ;;  %v6230_v26 = vld [vmem:[%s7570_s1 + $0x6f0] sm:$0xff] }
  0xb9   : > { %2524 = vmatpush.bf16.msrb.mxu0 %v6148_v28  ;;  %v1262_v54 = vpop.f32.mrf.mxu2  ;;  %v1227_v59 = vpop.f32.mrf.mxu0  ;;  %v4785_v28 = vld [vmem:[%s6484_s12 + $0x80] sm:$0xf0] }
  0xba   : > { %2543 = vmatpush.bf16.msrb.mxu1 %v6156_v29  ;;  %v1281_v55 = vpop.f32.mrf.mxu3  ;;  %v1263_v58 = vadd.f32 %v1262_v54, %v1244_v37  ;;  %v1246_v60 = vpop.f32.mrf.mxu1  ;;  %v4791_v29 = vld [vmem:[%s6484_s12 + $0x58] sm:$0xf] }
  0xbb   : > { %2562 = vmatpush.bf16.msrb.mxu2 %v6164_v27  ;;  %v1247_v63 = vadd.f32 %v1246_v60, %v1227_v59  ;;  %v6221_v27 = vld [vmem:[%s7570_s1 + $0x6a8] sm:$0xff]  ;;  %v6211_v54 = vld [vmem:[%s7570_s1 + $0x658] sm:$0xff] }
  0xbc   : > { %2581 = vmatpush.bf16.msrb.mxu3 %v6172_v30  ;;  %v7054_v2 = vadd.f32 %v1281_v55, %v1263_v58  ;;  %2458 = vmatmul.bf16.gmra.mxu0 %v4816_v56  ;;  %v6067_v30 = vld [vmem:[%s6484_s12 + $0x84] sm:$0xf0]  ;;  %v6203_v60 = vld [vmem:[%s7570_s1 + $0x618] sm:$0xff] }
  0xbd   : > { %2525 = vmatpush.bf16.msrb.mxu0 %v6147_v38  ;;  %2477 = vmatmul.bf16.gmra.mxu1 %v4820_v61 }
  0xbe   : > { %2544 = vmatpush.bf16.msrb.mxu1 %v6155_v40  ;;  %2496 = vmatmul.bf16.gmra.mxu2 %v4824_v62  ;;  %v4788_v40 = vor.u32 %v6060_v25, %v4785_v28  ;;  %v6227_v62 = vld [vmem:[%s7570_s1 + $0x6d8] sm:$0xff]  ;;  %v6201_v25 = vld [vmem:[%s7570_s1 + $0x608] sm:$0xff]  ;;  %v6216_v28 = vld [vmem:[%s7570_s1 + $0x680] sm:$0xff] }
  0xbf   : > { %2563 = vmatpush.bf16.msrb.mxu2 %v6163_v33  ;;  %2515 = vmatmul.bf16.gmra.mxu3 %v4828_v0 }
  0xc0   : > { %2582 = vmatpush.bf16.msrb.mxu3 %v6171_v41  ;;  %v4792_v41 = vor.u32 %v6067_v30, %v4791_v29  ;;  %v6208_v29 = vld [vmem:[%s7570_s1 + $0x640] sm:$0xff]  ;;  %v6255_v30 = vld [vmem:[%s7570_s1 + $0x7b8] sm:$0xff] }
  0xc1   : > { %2526 = vmatpush.bf16.msrb.mxu0 %v6146_v50  ;;  %v1265_v10 = vpop.f32.mrf.mxu2  ;;  %v1229_v15 = vpop.f32.mrf.mxu0  ;;  %v6204_v50 = vld [vmem:[%s7570_s1 + $0x620] sm:$0xff] }
  0xc2   : > { %2545 = vmatpush.bf16.msrb.mxu1 %v6154_v52  ;;  %v1284_v11 = vpop.f32.mrf.mxu3  ;;  %v1266_v14 = vadd.f32 %v1265_v10, %v1247_v63  ;;  %v1248_v16 = vpop.f32.mrf.mxu1  ;;  %v6219_v52 = vld [vmem:[%s7570_s1 + $0x698] sm:$0xff]  ;;  %v6218_v63 = vld [vmem:[%s7570_s1 + $0x690] sm:$0xff]  ;;  %v4841_v10 = vld [vmem:[%s6484_s12 + $0xe8] sm:$0xf0] }
  0xc3   : > { %2564 = vmatpush.bf16.msrb.mxu2 %v6162_v44  ;;  %v1249_v19 = vadd.f32 %v1248_v16, %v1229_v15  ;;  %v4796_v44 = vor.u32 %v6061_v31, %v4793_v32  ;;  %v6209_v15 = vld [vmem:[%s7570_s1 + $0x648] sm:$0xff]  ;;  %v6247_v31 = vld [vmem:[%s7570_s1 + $0x778] sm:$0xff]  ;;  %v6200_v32 = vld [vmem:[%s7570_s1 + $0x600] sm:$0xff] }
  0xc4   : > { %2583 = vmatpush.bf16.msrb.mxu3 %v6170_v53  ;;  %v7089_v20 = vadd.f32 %v1284_v11, %v1266_v14  ;;  %v6226_v11 = vld [vmem:[%s7570_s1 + $0x6d0] sm:$0xff] }
  0xc5   : > { %2527 = vmatpush.bf16.msrb.mxu0 %v6145_v1  ;;  %v4831_v1 = vld [vmem:[%s6484_s12 + $0xb0] sm:$0xf] }
  0xc6   : > { %2546 = vmatpush.bf16.msrb.mxu1 %v6153_v3  ;;  %v6210_v3 = vld [vmem:[%s7570_s1 + $0x650] sm:$0xff] }
  0xc7   : > { %2565 = vmatpush.bf16.msrb.mxu2 %v6161_v57 }
  0xc8   : > { %2584 = vmatpush.bf16.msrb.mxu3 %v6169_v4  ;;  %v6072_v4 = vld [vmem:[%s6484_s12 + $0xb4] sm:$0xf] }
  0xc9   : > { %2528 = vmatpush.bf16.msrb.mxu0 %v6144_v7  ;;  %v1267_v33 = vpop.f32.mrf.mxu2  ;;  %v1298_v38 = vpop.f32.mrf.mxu0  ;;  %v6079_v7 = vld [vmem:[%s6484_s12 + $0xe4] sm:$0xf0] }
  0xca   : > { %2547 = vmatpush.bf16.msrb.mxu1 %v6152_v8  ;;  %v1286_v34 = vpop.f32.mrf.mxu3  ;;  %v1268_v37 = vadd.f32 %v1267_v33, %v1249_v19  ;;  %v1299_v42 = vadd.f32 %v1298_v38, %v7020_v39  ;;  %v1317_v43 = vpop.f32.mrf.mxu1  ;;  %v6212_v39 = vld [vmem:[%s7570_s1 + $0x660] sm:$0xff]  ;;  %v6073_v8 = vld [vmem:[%s6484_s12 + $0xbc] sm:$0xf] }
  0xcb   : > { %2566 = vmatpush.bf16.msrb.mxu2 %v6160_v5  ;;  %v4833_v5 = vld [vmem:[%s6484_s12 + $0xe0] sm:$0xf0] }
  0xcc   : > { %2585 = vmatpush.bf16.msrb.mxu3 %v6168_v9  ;;  %v7118_v46 = vadd.f32 %v1286_v34, %v1268_v37  ;;  %v1318_v49 = vadd.f32 %v1317_v43, %v1299_v42  ;;  %2529 = vmatmul.bf16.vlgmr.msrb.gmra.mxu0 %v4784_v35  ;;  %v6202_v9 = vld [vmem:[%s7570_s1 + $0x610] sm:$0xff]  ;;  %v4836_v19 = vor.u32 %v6072_v4, %v4833_v5  ;;  %v6224_v33 = vld [vmem:[%s7570_s1 + $0x6c0] sm:$0xff]  ;;  %v6239_v34 = vld [vmem:[%s7570_s1 + $0x738] sm:$0xff] }
  0xcd   : > { %3529 = vmatpush.bf16.msra.mxu0 %v6207_v12  ;;  %2548 = vmatmul.bf16.vlgmr.msrb.gmra.mxu1 %v4788_v40  ;;  %v6217_v12 = vld [vmem:[%s7570_s1 + $0x688] sm:$0xff]  ;;  %v6254_v37 = vld [vmem:[%s7570_s1 + $0x7b0] sm:$0xff] }
  0xce   : > { %3548 = vmatpush.bf16.msra.mxu1 %v6215_v13  ;;  %2567 = vmatmul.bf16.vlgmr.msrb.gmra.mxu2 %v4792_v41  ;;  %v6246_v42 = vld [vmem:[%s7570_s1 + $0x770] sm:$0xff] }
  0xcf   : > { %3567 = vmatpush.bf16.msra.mxu2 %v6223_v6  ;;  %2586 = vmatmul.bf16.vlgmr.msrb.gmra.mxu3 %v4796_v44  ;;  %v4839_v6 = vld [vmem:[%s6484_s12 + $0xb8] sm:$0xf] }
  0xd0   : > { %3586 = vmatpush.bf16.msra.mxu3 %v6231_v17  ;;  %v4840_v21 = vor.u32 %v6079_v7, %v4839_v6  ;;  %v6252_v7 = vld [vmem:[%s7570_s1 + $0x7a0] sm:$0xff] }
  0xd1   : > { %3530 = vmatpush.bf16.msra.mxu0 %v6206_v23  ;;  %v1336_v53 = vpop.f32.mrf.mxu2  ;;  %v1300_v57 = vpop.f32.mrf.mxu0 }
  0xd2   : > { %3549 = vmatpush.bf16.msra.mxu1 %v6214_v24  ;;  %v1337_v55 = vadd.f32 %v1336_v53, %v1318_v49  ;;  %v1355_v56 = vpop.f32.mrf.mxu3  ;;  %v1301_v58 = vadd.f32 %v1300_v57, %v7054_v2  ;;  %v1319_v59 = vpop.f32.mrf.mxu1  ;;  %v6078_v2 = vld [vmem:[%s6484_s12 + $0xdc] sm:$0xf0]  ;;  %v4844_v24 = vor.u32 %v6073_v8, %v4841_v10  ;;  %v5449_v53 = vld [vmem:[%s6484_s12 + $0x90] sm:$0xf0]  ;;  %v5457_v57 = vld [vmem:[%s6484_s12 + $0x98] sm:$0xf0] }
  0xd3   : > { %3568 = vmatpush.bf16.msra.mxu2 %v6222_v18  ;;  %v4832_v14 = vor.u32 %v6078_v2, %v4831_v1  ;;  %v5447_v49 = vld [vmem:[%s6484_s12 + $0x60] sm:$0xf] }
  0xd4   : > { %3587 = vmatpush.bf16.msra.mxu3 %v6230_v26  ;;  %v7145_v61 = vadd.f32 %v1355_v56, %v1337_v55  ;;  %v1320_v0 = vadd.f32 %v1319_v59, %v1301_v58  ;;  %v6183_v55 = vld [vmem:[%s6484_s12 + $0x94] sm:$0xf0]  ;;  %v6177_v56 = vld [vmem:[%s6484_s12 + $0x6c] sm:$0xf]  ;;  %v6244_v10 = vld [vmem:[%s7570_s1 + $0x760] sm:$0xff] }
  0xd5   : > { %3531 = vmatpush.bf16.msra.mxu0 %v6205_v45  ;;  %v6237_v58 = vld [vmem:[%s7570_s1 + $0x728] sm:$0xff]  ;;  %v5460_v6 = vor.u32 %v6177_v56, %v5457_v57  ;;  %v6287_v56 = vld [vmem:[%s7570_s1 + $0x8b8] sm:$0xff] }
  0xd6   : > { %3550 = vmatpush.bf16.msra.mxu1 %v6213_v36  ;;  %v6263_v36 = vld [vmem:[%s7570_s1 + $0x7f8] sm:$0xff] }
  0xd7   : > { %3569 = vmatpush.bf16.msra.mxu2 %v6221_v27  ;;  %v6225_v27 = vld [vmem:[%s7570_s1 + $0x6c8] sm:$0xff]  ;;  %v6271_v57 = vld [vmem:[%s7570_s1 + $0x838] sm:$0xff] }
  0xd8   : > { %3588 = vmatpush.bf16.msra.mxu3 %v6229_v47  ;;  %v6238_v47 = vld [vmem:[%s7570_s1 + $0x730] sm:$0xff] }
  0xd9   : > { %3532 = vmatpush.bf16.msra.mxu0 %v6204_v50  ;;  %v1338_v13 = vpop.f32.mrf.mxu2  ;;  %v1303_v18 = vpop.f32.mrf.mxu0  ;;  %v6182_v50 = vld [vmem:[%s6484_s12 + $0x8c] sm:$0xf0] }
  0xda   : > { %3551 = vmatpush.bf16.msra.mxu1 %v6212_v39  ;;  %v1339_v16 = vadd.f32 %v1338_v13, %v1320_v0  ;;  %v1357_v17 = vpop.f32.mrf.mxu3  ;;  %v1304_v22 = vadd.f32 %v1303_v18, %v7089_v20  ;;  %v1322_v23 = vpop.f32.mrf.mxu1  ;;  %v6253_v39 = vld [vmem:[%s7570_s1 + $0x7a8] sm:$0xff]  ;;  %v6235_v13 = vld [vmem:[%s7570_s1 + $0x718] sm:$0xff] }
  0xdb   : > { %3570 = vmatpush.bf16.msra.mxu2 %v6220_v48 }
  0xdc   : > { %3589 = vmatpush.bf16.msra.mxu3 %v6228_v51  ;;  %v7180_v26 = vadd.f32 %v1357_v17, %v1339_v16  ;;  %v1323_v20 = vadd.f32 %v1322_v23, %v1304_v22  ;;  %2534 = vmatmul.bf16.gmra.mxu0 %v4832_v14  ;;  %v6176_v51 = vld [vmem:[%s6484_s12 + $0x64] sm:$0xf]  ;;  %v6243_v14 = vld [vmem:[%s7570_s1 + $0x758] sm:$0xff]  ;;  %v6250_v23 = vld [vmem:[%s7570_s1 + $0x790] sm:$0xff] }
  0xdd   : > { %3533 = vmatpush.bf16.msra.mxu0 %v6203_v60  ;;  %2553 = vmatmul.bf16.gmra.mxu1 %v4836_v19  ;;  %v5448_v60 = vor.u32 %v6182_v50, %v5447_v49  ;;  %v5452_v2 = vor.u32 %v6176_v51, %v5449_v53  ;;  %v6259_v16 = vld [vmem:[%s7570_s1 + $0x7d8] sm:$0xff]  ;;  %v6248_v51 = vld [vmem:[%s7570_s1 + $0x780] sm:$0xff] }
  0xde   : > { %3552 = vmatpush.bf16.msra.mxu1 %v6211_v54  ;;  %2572 = vmatmul.bf16.gmra.mxu2 %v4840_v21  ;;  %v5455_v54 = vld [vmem:[%s6484_s12 + $0x68] sm:$0xf]  ;;  %v6232_v53 = vld [vmem:[%s7570_s1 + $0x700] sm:$0xff] }
  0xdf   : > { %3571 = vmatpush.bf16.msra.mxu2 %v6219_v52  ;;  %2591 = vmatmul.bf16.gmra.mxu3 %v4844_v24  ;;  %v6245_v52 = vld [vmem:[%s7570_s1 + $0x768] sm:$0xff] }
  0xe0   : > { %3590 = vmatpush.bf16.msra.mxu3 %v6227_v62  ;;  %v6261_v62 = vld [vmem:[%s7570_s1 + $0x7e8] sm:$0xff] }
  0xe1   : > { %3534 = vmatpush.bf16.msra.mxu0 %v6202_v9  ;;  %v1341_v35 = vpop.f32.mrf.mxu2  ;;  %v1305_v41 = vpop.f32.mrf.mxu0  ;;  %v6236_v9 = vld [vmem:[%s7570_s1 + $0x720] sm:$0xff] }
  0xe2   : > { %3553 = vmatpush.bf16.msra.mxu1 %v6210_v3  ;;  %v1342_v38 = vadd.f32 %v1341_v35, %v1323_v20  ;;  %v1360_v40 = vpop.f32.mrf.mxu3  ;;  %v1306_v43 = vadd.f32 %v1305_v41, %v7118_v46  ;;  %v1324_v44 = vpop.f32.mrf.mxu1  ;;  %v6262_v46 = vld [vmem:[%s7570_s1 + $0x7f0] sm:$0xff]  ;;  %v5456_v3 = vor.u32 %v6183_v55, %v5455_v54  ;;  %v6249_v35 = vld [vmem:[%s7570_s1 + $0x788] sm:$0xff]  ;;  %v6240_v54 = vld [vmem:[%s7570_s1 + $0x740] sm:$0xff] }
  0xe3   : > { %3572 = vmatpush.bf16.msra.mxu2 %v6218_v63  ;;  %v6194_v20 = vld [vmem:[%s6484_s12 + $0xec] sm:$0xf0]  ;;  %v6256_v55 = vld [vmem:[%s7570_s1 + $0x7c0] sm:$0xff] }
  0xe4   : > { %3591 = vmatpush.bf16.msra.mxu3 %v6226_v11  ;;  %v7216_v45 = vadd.f32 %v1360_v40, %v1342_v38  ;;  %v1325_v48 = vadd.f32 %v1324_v44, %v1306_v43  ;;  %v6241_v38 = vld [vmem:[%s7570_s1 + $0x748] sm:$0xff] }
  0xe5   : > { %3535 = vmatpush.bf16.msra.mxu0 %v6201_v25  ;;  %v6234_v25 = vld [vmem:[%s7570_s1 + $0x710] sm:$0xff] }
  0xe6   : > { %3554 = vmatpush.bf16.msra.mxu1 %v6209_v15 }
  0xe7   : > { %3573 = vmatpush.bf16.msra.mxu2 %v6217_v12  ;;  %v6251_v12 = vld [vmem:[%s7570_s1 + $0x798] sm:$0xff] }
  0xe8   : > { %3592 = vmatpush.bf16.msra.mxu3 %v6225_v27 }
  0xe9   : > { %3536 = vmatpush.bf16.msra.mxu0 %v6200_v32  ;;  %v1343_v59 = vpop.f32.mrf.mxu2  ;;  %v1374_v1 = vpop.f32.mrf.mxu0  ;;  %v5503_v32 = vld [vmem:[%s6484_s12 + $0xc8] sm:$0xf] }
  0xea   : > { %3555 = vmatpush.bf16.msra.mxu1 %v6208_v29  ;;  %v1344_v63 = vadd.f32 %v1343_v59, %v1325_v48  ;;  %v1362_v0 = vpop.f32.mrf.mxu3  ;;  %v1375_v4 = vadd.f32 %v1374_v1, %v7145_v61  ;;  %v1393_v5 = vpop.f32.mrf.mxu1  ;;  %v6260_v61 = vld [vmem:[%s7570_s1 + $0x7e0] sm:$0xff]  ;;  %v6258_v29 = vld [vmem:[%s7570_s1 + $0x7d0] sm:$0xff]  ;;  %v6295_v59 = vld [vmem:[%s7570_s1 + $0x8f8] sm:$0xff] }
  0xeb   : > { %3574 = vmatpush.bf16.msra.mxu2 %v6216_v28  ;;  %v5495_v28 = vld [vmem:[%s6484_s12 + $0xc0] sm:$0xf] }
  0xec   : > { %3593 = vmatpush.bf16.msra.mxu3 %v6224_v33  ;;  %v7248_v8 = vadd.f32 %v1362_v0, %v1344_v63  ;;  %v1394_v11 = vadd.f32 %v1393_v5, %v1375_v4  ;;  %3537 = vmatmul.bf16.vlgmr.msra.gmra.mxu0 %v5448_v60  ;;  %v6195_v33 = vld [vmem:[%s6484_s12 + $0xf4] sm:$0xf0]  ;;  %v5496_v41 = vor.u32 %v6194_v20, %v5495_v28 }
  0xed   : > { %3605 = vmatpush.bf16.msrb.mxu0 %v6239_v34  ;;  %3556 = vmatmul.bf16.vlgmr.msra.gmra.mxu1 %v5452_v2  ;;  %v6189_v34 = vld [vmem:[%s6484_s12 + $0xcc] sm:$0xf]  ;;  %v5504_v49 = vor.u32 %v6195_v33, %v5503_v32  ;;  %v6270_v2 = vld [vmem:[%s7570_s1 + $0x830] sm:$0xff] }
  0xee   : > { %3624 = vmatpush.bf16.msrb.mxu1 %v6247_v31  ;;  %3575 = vmatmul.bf16.vlgmr.msra.gmra.mxu2 %v5456_v3  ;;  %v5497_v31 = vld [vmem:[%s6484_s12 + $0xf0] sm:$0xf0] }
  0xef   : > { %3643 = vmatpush.bf16.msrb.mxu2 %v6255_v30  ;;  %3594 = vmatmul.bf16.vlgmr.msra.gmra.mxu3 %v5460_v6  ;;  %v6188_v30 = vld [vmem:[%s6484_s12 + $0xc4] sm:$0xf]  ;;  %v6278_v3 = vld [vmem:[%s7570_s1 + $0x870] sm:$0xff] }
  0xf0   : > { %3662 = vmatpush.bf16.msrb.mxu3 %v6263_v36  ;;  %v5505_v36 = vld [vmem:[%s6484_s12 + $0xf8] sm:$0xf0]  ;;  %v5500_v48 = vor.u32 %v6188_v30, %v5497_v31  ;;  %v6294_v6 = vld [vmem:[%s7570_s1 + $0x8f0] sm:$0xff]  ;;  %v6268_v31 = vld [vmem:[%s7570_s1 + $0x820] sm:$0xff] }
  0xf1   : > { %3606 = vmatpush.bf16.msrb.mxu0 %v6238_v47  ;;  %v1412_v15 = vpop.f32.mrf.mxu2  ;;  %v1376_v19 = vpop.f32.mrf.mxu0  ;;  %v5508_v50 = vor.u32 %v6189_v34, %v5505_v36  ;;  %v6276_v34 = vld [vmem:[%s7570_s1 + $0x860] sm:$0xff]  ;;  %v6283_v36 = vld [vmem:[%s7570_s1 + $0x898] sm:$0xff] }
  0xf2   : > { %3625 = vmatpush.bf16.msrb.mxu1 %v6246_v42  ;;  %v1413_v17 = vadd.f32 %v1412_v15, %v1394_v11  ;;  %v1431_v18 = vpop.f32.mrf.mxu3  ;;  %v1377_v21 = vadd.f32 %v1376_v19, %v7180_v26  ;;  %v1395_v22 = vpop.f32.mrf.mxu1  ;;  %v6242_v26 = vld [vmem:[%s7570_s1 + $0x750] sm:$0xff]  ;;  %v6257_v42 = vld [vmem:[%s7570_s1 + $0x7c8] sm:$0xff]  ;;  %v6184_v11 = vld [vmem:[%s6484_s12 + $0x9c] sm:$0xf0] }
  0xf3   : > { %3644 = vmatpush.bf16.msrb.mxu2 %v6254_v37  ;;  %v6233_v37 = vld [vmem:[%s7570_s1 + $0x708] sm:$0xff]  ;;  %v5471_v15 = vld [vmem:[%s6484_s12 + $0x78] sm:$0xf] }
  0xf4   : > { %3663 = vmatpush.bf16.msrb.mxu3 %v6262_v46  ;;  %v7275_v24 = vadd.f32 %v1431_v18, %v1413_v17  ;;  %v1396_v27 = vadd.f32 %v1395_v22, %v1377_v21  ;;  %v6293_v17 = vld [vmem:[%s7570_s1 + $0x8e8] sm:$0xff]  ;;  %v6179_v18 = vld [vmem:[%s6484_s12 + $0x7c] sm:$0xf] }
  0xf5   : > { %3607 = vmatpush.bf16.msrb.mxu0 %v6237_v58  ;;  %v6279_v58 = vld [vmem:[%s7570_s1 + $0x878] sm:$0xff]  ;;  %v5473_v19 = vld [vmem:[%s6484_s12 + $0xa8] sm:$0xf0] }
  0xf6   : > { %3626 = vmatpush.bf16.msrb.mxu1 %v6245_v52  ;;  %v5476_v30 = vor.u32 %v6179_v18, %v5473_v19 }
  0xf7   : > { %3645 = vmatpush.bf16.msrb.mxu2 %v6253_v39 }
  0xf8   : > { %3664 = vmatpush.bf16.msrb.mxu3 %v6261_v62  ;;  %v6286_v62 = vld [vmem:[%s7570_s1 + $0x8b0] sm:$0xff] }
  0xf9   : > { %3608 = vmatpush.bf16.msrb.mxu0 %v6236_v9  ;;  %v1414_v40 = vpop.f32.mrf.mxu2  ;;  %v1379_v47 = vpop.f32.mrf.mxu0  ;;  %v5463_v9 = vld [vmem:[%s6484_s12 + $0x70] sm:$0xf] }
  0xfa   : > { %3627 = vmatpush.bf16.msrb.mxu1 %v6244_v10  ;;  %v1415_v43 = vadd.f32 %v1414_v40, %v1396_v27  ;;  %v1433_v44 = vpop.f32.mrf.mxu3  ;;  %v1380_v46 = vadd.f32 %v1379_v47, %v7216_v45  ;;  %v1398_v39 = vpop.f32.mrf.mxu1  ;;  %v5464_v22 = vor.u32 %v6184_v11, %v5463_v9  ;;  %v6291_v40 = vld [vmem:[%s7570_s1 + $0x8d8] sm:$0xff] }
  0xfb   : > { %3646 = vmatpush.bf16.msrb.mxu2 %v6252_v7 }
  0xfc   : > { %3665 = vmatpush.bf16.msrb.mxu3 %v6260_v61  ;;  %v7310_v52 = vadd.f32 %v1433_v44, %v1415_v43  ;;  %v1399_v45 = vadd.f32 %v1398_v39, %v1380_v46  ;;  %3542 = vmatmul.bf16.gmra.mxu0 %v5496_v41  ;;  %v6178_v61 = vld [vmem:[%s6484_s12 + $0x74] sm:$0xf] }
  0xfd   : > { %3609 = vmatpush.bf16.msrb.mxu0 %v6235_v13  ;;  %3561 = vmatmul.bf16.gmra.mxu1 %v5500_v48  ;;  %v6269_v13 = vld [vmem:[%s7570_s1 + $0x828] sm:$0xff] }
  0xfe   : > { %3628 = vmatpush.bf16.msrb.mxu1 %v6243_v14  ;;  %3580 = vmatmul.bf16.gmra.mxu2 %v5504_v49  ;;  %v6277_v14 = vld [vmem:[%s7570_s1 + $0x868] sm:$0xff]  ;;  %v6266_v49 = vld [vmem:[%s7570_s1 + $0x810] sm:$0xff] }
  0xff   : > { %3647 = vmatpush.bf16.msrb.mxu2 %v6251_v12  ;;  %3599 = vmatmul.bf16.gmra.mxu3 %v5508_v50  ;;  %v5465_v12 = vld [vmem:[%s6484_s12 + $0xa0] sm:$0xf0]  ;;  %v6274_v50 = vld [vmem:[%s7570_s1 + $0x850] sm:$0xff] }
 0x100   : > { %3666 = vmatpush.bf16.msrb.mxu3 %v6259_v16  ;;  %v6185_v16 = vld [vmem:[%s6484_s12 + $0xa4] sm:$0xf0]  ;;  %v5468_v28 = vor.u32 %v6178_v61, %v5465_v12 }
 0x101   : > { %3610 = vmatpush.bf16.msrb.mxu0 %v6234_v25  ;;  %v1417_v60 = vpop.f32.mrf.mxu2  ;;  %v1381_v1 = vpop.f32.mrf.mxu0  ;;  %v5472_v20 = vor.u32 %v6185_v16, %v5471_v15  ;;  %v6288_v15 = vld [vmem:[%s7570_s1 + $0x8c0] sm:$0xff] }
 0x102   : > { %3629 = vmatpush.bf16.msrb.mxu1 %v6242_v26  ;;  %v1418_v63 = vadd.f32 %v1417_v60, %v1399_v45  ;;  %v1436_v0 = vpop.f32.mrf.mxu3  ;;  %v1382_v4 = vadd.f32 %v1381_v1, %v7248_v8  ;;  %v1400_v5 = vpop.f32.mrf.mxu1  ;;  %v6285_v8 = vld [vmem:[%s7570_s1 + $0x8a8] sm:$0xff] }
 0x103   : > { %3648 = vmatpush.bf16.msrb.mxu2 %v6250_v23  ;;  %v6284_v23 = vld [vmem:[%s7570_s1 + $0x8a0] sm:$0xff]  ;;  %v6281_v45 = vld [vmem:[%s7570_s1 + $0x888] sm:$0xff] }
 0x104   : > { %3667 = vmatpush.bf16.msrb.mxu3 %v6258_v29  ;;  %v7346_v7 = vadd.f32 %v1436_v0, %v1418_v63  ;;  %v1401_v10 = vadd.f32 %v1400_v5, %v1382_v4  ;;  %v6265_v60 = vld [vmem:[%s7570_s1 + $0x808] sm:$0xff] }
 0x105   : > { %3611 = vmatpush.bf16.msrb.mxu0 %v6233_v37  ;;  %v6267_v37 = vld [vmem:[%s7570_s1 + $0x818] sm:$0xff]  ;;  %v6273_v63 = vld [vmem:[%s7570_s1 + $0x848] sm:$0xff] }
 0x106   : > { %3630 = vmatpush.bf16.msrb.mxu1 %v6241_v38  ;;  %v6275_v38 = vld [vmem:[%s7570_s1 + $0x858] sm:$0xff]  ;;  %v6289_v0 = vld [vmem:[%s7570_s1 + $0x8c8] sm:$0xff] }
 0x107   : > { %3649 = vmatpush.bf16.msrb.mxu2 %v6249_v35  ;;  %v6292_v35 = vld [vmem:[%s7570_s1 + $0x8e0] sm:$0xff] }
 0x108   : > { %3668 = vmatpush.bf16.msrb.mxu3 %v6257_v42  ;;  %v6282_v42 = vld [vmem:[%s7570_s1 + $0x890] sm:$0xff] }
 0x109   : > { %3612 = vmatpush.bf16.msrb.mxu0 %v6232_v53  ;;  %v1419_v21 = vpop.f32.mrf.mxu2  ;;  %v2378_v27 = vpop.f32.mrf.mxu0  ;;  %v5511_v53 = vld [vmem:[%s6484_s12 + $0xd0] sm:$0xf] }
 0x10a   : > { %3631 = vmatpush.bf16.msrb.mxu1 %v6240_v54  ;;  %v1420_v25 = vadd.f32 %v1419_v21, %v1401_v10  ;;  %v1438_v26 = vpop.f32.mrf.mxu3  ;;  %v2397_v29 = vpop.f32.mrf.mxu1  ;;  %v6196_v54 = vld [vmem:[%s6484_s12 + $0xfc] sm:$0xf0] }
 0x10b   : > { %3650 = vmatpush.bf16.msrb.mxu2 %v6248_v51  ;;  %v2398_v33 = vadd.f32 %v2397_v29, %v2378_v27  ;;  %v6290_v51 = vld [vmem:[%s7570_s1 + $0x8d0] sm:$0xff]  ;;  %v6180_v27 = vld [vmem:[%s6484_s12 + $0x84] sm:$0xf]  ;;  %v6187_v29 = vld [vmem:[%s6484_s12 + $0xb4] sm:$0xf0] }
 0x10c   : > { %3669 = vmatpush.bf16.msrb.mxu3 %v6256_v55  ;;  %v7374_v32 = vadd.f32 %v1438_v26, %v1420_v25  ;;  %3613 = vmatmul.bf16.vlgmr.msrb.gmra.mxu0 %v5464_v22  ;;  %v6190_v55 = vld [vmem:[%s6484_s12 + $0xd4] sm:$0xf]  ;;  %v5479_v25 = vld [vmem:[%s6484_s12 + $0x80] sm:$0xf]  ;;  %v6186_v26 = vld [vmem:[%s6484_s12 + $0xac] sm:$0xf0] }
 0x10d   : > { %3681 = vmatpush.bf16.msra.mxu0 %v6271_v57  ;;  %3632 = vmatmul.bf16.vlgmr.msrb.gmra.mxu1 %v5468_v28  ;;  %v5519_v57 = vld [vmem:[%s6484_s12 + $0xd8] sm:$0xf]  ;;  %v5481_v28 = vld [vmem:[%s6484_s12 + $0xb0] sm:$0xf0] }
 0x10e   : > { %3700 = vmatpush.bf16.msra.mxu1 %v6279_v58  ;;  %3651 = vmatmul.bf16.vlgmr.msrb.gmra.mxu2 %v5472_v20  ;;  %v6197_v58 = vld [vmem:[%s6484_s12 + $0x104] sm:$0xf0] }
 0x10f   : > { %3719 = vmatpush.bf16.msra.mxu2 %v6287_v56  ;;  %3670 = vmatmul.bf16.vlgmr.msrb.gmra.mxu3 %v5476_v30  ;;  %v5513_v56 = vld [vmem:[%s6484_s12 + $0x100] sm:$0xf0]  ;;  %v5520_v10 = vor.u32 %v6197_v58, %v5519_v57  ;;  %v5487_v20 = vld [vmem:[%s6484_s12 + $0x88] sm:$0xf]  ;;  %v6181_v30 = vld [vmem:[%s6484_s12 + $0x8c] sm:$0xf] }
 0x110   : > { %3738 = vmatpush.bf16.msra.mxu3 %v6295_v59  ;;  %v6191_v59 = vld [vmem:[%s6484_s12 + $0xdc] sm:$0xf]  ;;  %v5516_v9 = vor.u32 %v6190_v55, %v5513_v56  ;;  %v6198_v55 = vld [vmem:[%s6484_s12 + $0x10c] sm:$0xf0]  ;;  %v6192_v56 = vld [vmem:[%s6484_s12 + $0xe4] sm:$0xf] }
 0x111   : > { %3682 = vmatpush.bf16.msra.mxu0 %v6270_v2  ;;  %v2416_v41 = vpop.f32.mrf.mxu2  ;;  %v2380_v47 = vpop.f32.mrf.mxu0  ;;  %v5512_v2 = vor.u32 %v6196_v54, %v5511_v53  ;;  %v5529_v57 = vld [vmem:[%s6484_s12 + $0x110] sm:$0xf0]  ;;  %v5535_v58 = vld [vmem:[%s6484_s12 + $0xe8] sm:$0xf] }
 0x112   : > { %3701 = vmatpush.bf16.msra.mxu1 %v6278_v3  ;;  %v2417_v43 = vadd.f32 %v2416_v41, %v2398_v33  ;;  %v2435_v44 = vpop.f32.mrf.mxu3  ;;  %v2399_v48 = vpop.f32.mrf.mxu1  ;;  %v6280_v3 = vld [vmem:[%s7570_s1 + $0x880] sm:$0xff] }
 0x113   : > { %3720 = vmatpush.bf16.msra.mxu2 %v6286_v62  ;;  %v2400_v39 = vadd.f32 %v2399_v48, %v2380_v47  ;;  %v5521_v62 = vld [vmem:[%s6484_s12 + $0x108] sm:$0xf0] }
 0x114   : > { %3739 = vmatpush.bf16.msra.mxu3 %v6294_v6  ;;  %v7400_v46 = vadd.f32 %v2435_v44, %v2417_v43  ;;  %v5524_v61 = vor.u32 %v6191_v59, %v5521_v62  ;;  %v6199_v59 = vld [vmem:[%s6484_s12 + $0x114] sm:$0xf0]  ;;  %v5537_v62 = vld [vmem:[%s6484_s12 + $0x118] sm:$0xf0] }
 0x115   : > { %3683 = vmatpush.bf16.msra.mxu0 %v6269_v13 }
 0x116   : > { %3702 = vmatpush.bf16.msra.mxu1 %v6277_v14  ;;  %v6272_v14 = vld [vmem:[%s7570_s1 + $0x840] sm:$0xff] }
 0x117   : > { %3721 = vmatpush.bf16.msra.mxu2 %v6285_v8  ;;  %v6264_v8 = vld [vmem:[%s7570_s1 + $0x800] sm:$0xff] }
 0x118   : > { %3740 = vmatpush.bf16.msra.mxu3 %v6293_v17 }
 0x119   : > { %3684 = vmatpush.bf16.msra.mxu0 %v6268_v31  ;;  %v2418_v1 = vpop.f32.mrf.mxu2  ;;  %v2383_v6 = vpop.f32.mrf.mxu0  ;;  %v5489_v31 = vld [vmem:[%s6484_s12 + $0xb8] sm:$0xf0] }
 0x11a   : > { %3703 = vmatpush.bf16.msra.mxu1 %v6276_v34  ;;  %v2419_v4 = vadd.f32 %v2418_v1, %v2400_v39  ;;  %v2437_v5 = vpop.f32.mrf.mxu3  ;;  %v2402_v11 = vpop.f32.mrf.mxu1  ;;  %v5480_v34 = vor.u32 %v6186_v26, %v5479_v25  ;;  %v5492_v43 = vor.u32 %v6181_v30, %v5489_v31 }
 0x11b   : > { %3722 = vmatpush.bf16.msra.mxu2 %v6284_v23  ;;  %v2403_v13 = vadd.f32 %v2402_v11, %v2383_v6 }
 0x11c   : > { %3741 = vmatpush.bf16.msra.mxu3 %v6292_v35  ;;  %v2438_v12 = vadd.f32 %v2437_v5, %v2419_v4  ;;  %3618 = vmatmul.bf16.gmra.mxu0 %v5512_v2  ;;  %v5532_v4 = vor.u32 %v6192_v56, %v5529_v57  ;;  %v5536_v5 = vor.u32 %v6199_v59, %v5535_v58 }
 0x11d   : > { %3685 = vmatpush.bf16.msra.mxu0 %v6267_v37  ;;  %3637 = vmatmul.bf16.gmra.mxu1 %v5516_v9 }
 0x11e   : > { %3704 = vmatpush.bf16.msra.mxu1 %v6275_v38  ;;  %3656 = vmatmul.bf16.gmra.mxu2 %v5520_v10  ;;  %v5484_v38 = vor.u32 %v6180_v27, %v5481_v28 }
 0x11f   : > { %3723 = vmatpush.bf16.msra.mxu2 %v6283_v36  ;;  %3675 = vmatmul.bf16.gmra.mxu3 %v5524_v61 }
 0x120   : > { %3742 = vmatpush.bf16.msra.mxu3 %v6291_v40  ;;  %v5488_v40 = vor.u32 %v6187_v29, %v5487_v20 }
 0x121   : > { %3686 = vmatpush.bf16.msra.mxu0 %v6266_v49  ;;  %v2421_v16 = vpop.f32.mrf.mxu2  ;;  %v2385_v19 = vpop.f32.mrf.mxu0 }
 0x122   : > { %3705 = vmatpush.bf16.msra.mxu1 %v6274_v50  ;;  %v2422_v17 = vadd.f32 %v2421_v16, %v2403_v13  ;;  %v2440_v18 = vpop.f32.mrf.mxu3  ;;  %v2404_v21 = vpop.f32.mrf.mxu1 }
 0x123   : > { %3724 = vmatpush.bf16.msra.mxu2 %v6282_v42  ;;  %v2405_v23 = vadd.f32 %v2404_v21, %v2385_v19 }
 0x124   : > { %3743 = vmatpush.bf16.msra.mxu3 %v6290_v51  ;;  %v2441_v22 = vadd.f32 %v2440_v18, %v2422_v17 }
 0x125   : > { %3687 = vmatpush.bf16.msra.mxu0 %v6265_v60  ;;  %v6193_v60 = vld [vmem:[%s6484_s12 + $0xec] sm:$0xf] }
 0x126   : > { %3706 = vmatpush.bf16.msra.mxu1 %v6273_v63  ;;  %v5540_v10 = vor.u32 %v6193_v60, %v5537_v62 }
 0x127   : > { %3725 = vmatpush.bf16.msra.mxu2 %v6281_v45  ;;  %v5527_v45 = vld [vmem:[%s6484_s12 + $0xe0] sm:$0xf] }
 0x128   : > { %3744 = vmatpush.bf16.msra.mxu3 %v6289_v0  ;;  %v5528_v0 = vor.u32 %v6198_v55, %v5527_v45 }
 0x129   : > { %3688 = vmatpush.bf16.msra.mxu0 %v6264_v8  ;;  %v2423_v33 = vpop.f32.mrf.mxu2  ;;  %v2454_v37 = vpop.f32.mrf.mxu0 }
 0x12a   : > { %3707 = vmatpush.bf16.msra.mxu1 %v6272_v14  ;;  %v2424_v35 = vadd.f32 %v2423_v33, %v2405_v23  ;;  %v2442_v36 = vpop.f32.mrf.mxu3  ;;  %v2455_v41 = vadd.f32 %v2454_v37, %v7400_v46  ;;  %v2473_v42 = vpop.f32.mrf.mxu1 }
 0x12b   : > { %3726 = vmatpush.bf16.msra.mxu2 %v6280_v3 }
 0x12c   : > { %3745 = vmatpush.bf16.msra.mxu3 %v6288_v15  ;;  %v2443_v44 = vadd.f32 %v2442_v36, %v2424_v35  ;;  %v2474_v47 = vadd.f32 %v2473_v42, %v2455_v41  ;;  %3689 = vmatmul.bf16.vlgmr.msra.gmra.mxu0 %v5480_v34 }
 0x12d   : > { %3708 = vmatmul.bf16.vlgmr.msra.gmra.mxu1 %v5484_v38 }
 0x12e   : > { %3727 = vmatmul.bf16.vlgmr.msra.gmra.mxu2 %v5488_v40 }
 0x12f   : > { %3746 = vmatmul.bf16.vlgmr.msra.gmra.mxu3 %v5492_v43 }
 0x131   : > { %v2492_v48 = vpop.f32.mrf.mxu2  ;;  %v2456_v46 = vpop.f32.mrf.mxu0 }
 0x132   : > { %v2493_v49 = vadd.f32 %v2492_v48, %v2474_v47  ;;  %v2511_v39 = vpop.f32.mrf.mxu3  ;;  %v2457_v50 = vadd.f32 %v2456_v46, %v2438_v12  ;;  %v2475_v51 = vpop.f32.mrf.mxu1 }
 0x134   : > { %v2512_v53 = vadd.f32 %v2511_v39, %v2493_v49  ;;  %v2476_v54 = vadd.f32 %v2475_v51, %v2457_v50 }
 0x139   : > { %v2494_v63 = vpop.f32.mrf.mxu2  ;;  %v2459_v3 = vpop.f32.mrf.mxu0 }
 0x13a   : > { %v2495_v1 = vadd.f32 %v2494_v63, %v2476_v54  ;;  %v2513_v2 = vpop.f32.mrf.mxu3  ;;  %v2460_v6 = vadd.f32 %v2459_v3, %v2441_v22  ;;  %v2478_v9 = vpop.f32.mrf.mxu1 }
 0x13c   : > { %v2514_v11 = vadd.f32 %v2513_v2, %v2495_v1  ;;  %v2479_v61 = vadd.f32 %v2478_v9, %v2460_v6  ;;  %3694 = vmatmul.bf16.gmra.mxu0 %v5528_v0 }
 0x13d   : > { %3713 = vmatmul.bf16.gmra.mxu1 %v5532_v4 }
 0x13e   : > { %3732 = vmatmul.bf16.gmra.mxu2 %v5536_v5 }
 0x13f   : > { %3751 = vmatmul.bf16.gmra.mxu3 %v5540_v10 }
 0x141   : > { %v2497_v8 = vpop.f32.mrf.mxu2  ;;  %v2461_v14 = vpop.f32.mrf.mxu0 }
 0x142   : > { %v2498_v12 = vadd.f32 %v2497_v8, %v2479_v61  ;;  %v2516_v13 = vpop.f32.mrf.mxu3  ;;  %v2462_v15 = vadd.f32 %v2461_v14, %v2443_v44  ;;  %v2480_v16 = vpop.f32.mrf.mxu1 }
 0x144   : > { %v2517_v17 = vadd.f32 %v2516_v13, %v2498_v12  ;;  %v2481_v18 = vadd.f32 %v2480_v16, %v2462_v15 }
 0x149   : > { %v2499_v19 = vpop.f32.mrf.mxu2  ;;  %v2530_v22 = vpop.f32.mrf.mxu0 }
 0x14a   : > { %v2500_v21 = vadd.f32 %v2499_v19, %v2481_v18  ;;  %v2518_v23 = vpop.f32.mrf.mxu3  ;;  %v2531_v25 = vadd.f32 %v2530_v22, %v2512_v53  ;;  %v2549_v26 = vpop.f32.mrf.mxu1 }
 0x14c   : > { %v2519_v27 = vadd.f32 %v2518_v23, %v2500_v21  ;;  %v2550_v28 = vadd.f32 %v2549_v26, %v2531_v25 }
 0x151   : > { %v2568_v20 = vpop.f32.mrf.mxu2  ;;  %v2532_v31 = vpop.f32.mrf.mxu0 }
 0x152   : > { %v2569_v29 = vadd.f32 %v2568_v20, %v2550_v28  ;;  %v2587_v30 = vpop.f32.mrf.mxu3  ;;  %v2533_v33 = vadd.f32 %v2532_v31, %v2514_v11  ;;  %v2551_v34 = vpop.f32.mrf.mxu1 }
 0x154   : > { %v2588_v35 = vadd.f32 %v2587_v30, %v2569_v29  ;;  %v2552_v36 = vadd.f32 %v2551_v34, %v2533_v33 }
 0x156   : > { %v7458_v37 = vadd.f32 %v2588_v35, %v7275_v24 }
 0x159   : > { %v2570_v38 = vpop.f32.mrf.mxu2  ;;  %v2535_v42 = vpop.f32.mrf.mxu0 }
 0x15a   : > { %v2571_v40 = vadd.f32 %v2570_v38, %v2552_v36  ;;  %v2589_v41 = vpop.f32.mrf.mxu3  ;;  %v2536_v43 = vadd.f32 %v2535_v42, %v2517_v17  ;;  %v2554_v44 = vpop.f32.mrf.mxu1 }
 0x15c   : > { %v2590_v47 = vadd.f32 %v2589_v41, %v2571_v40  ;;  %v2555_v48 = vadd.f32 %v2554_v44, %v2536_v43 }
 0x15e   : > { %v7461_v49 = vadd.f32 %v2590_v47, %v7310_v52 }
 0x161   : > { %v2573_v39 = vpop.f32.mrf.mxu2  ;;  %v2537_v51 = vpop.f32.mrf.mxu0 }
 0x162   : > { %v2574_v46 = vadd.f32 %v2573_v39, %v2555_v48  ;;  %v2592_v50 = vpop.f32.mrf.mxu3  ;;  %v2538_v53 = vadd.f32 %v2537_v51, %v2519_v27  ;;  %v2556_v54 = vpop.f32.mrf.mxu1 }
 0x164   : > { %v2593_v45 = vadd.f32 %v2592_v50, %v2574_v46  ;;  %v2557_v24 = vadd.f32 %v2556_v54, %v2538_v53 }
 0x166   : > { %v7464_v55 = vadd.f32 %v2593_v45, %v7346_v7 }
 0x169   : > { %v2575_v56 = vpop.f32.mrf.mxu2  ;;  %v3538_v59 = vpop.f32.mrf.mxu0 }
 0x16a   : > { %v2576_v57 = vadd.f32 %v2575_v56, %v2557_v24  ;;  %v2594_v58 = vpop.f32.mrf.mxu3  ;;  %v3557_v60 = vpop.f32.mrf.mxu1  ;;  %v5925_v24 = vld [vmem:[%s6484_s12 + $0x40] sm:$0xff]  ;;  %v5926_v56 = vld [vmem:[%s6484_s12 + $0x48] sm:$0xff] }
 0x16b   : > { %v3558_v17 = vadd.f32 %v3557_v60, %v3538_v59  ;;  %v3829_v59 = vunpack.c.h.bf16 %v5925_v24  ;;  %v3830_v60 = vunpack.c.l.bf16 %v5926_v56 }
 0x16c   : > { %v2595_v62 = vadd.f32 %v2594_v58, %v2576_v57  ;;  %v5927_v57 = vld [vmem:[%s6484_s12 + $0x70] sm:$0xff]  ;;  %v5928_v58 = vld [vmem:[%s6484_s12 + $0x78] sm:$0xff] }
 0x16e   : > { %v7467_v52 = vadd.f32 %v2595_v62, %v7374_v32  ;;  %v3831_v62 = vunpack.c.h.bf16 %v5926_v56 }
 0x171   : > { %v3576_v63 = vpop.f32.mrf.mxu2  ;;  %v3540_v1 = vpop.f32.mrf.mxu0 }
 0x172   : > { %v3595_v0 = vpop.f32.mrf.mxu3  ;;  %v3559_v2 = vpop.f32.mrf.mxu1  ;;  %v3577_v18 = vadd.f32 %v3576_v63, %v3558_v17  ;;  %v3833_v63 = vunpack.c.h.bf16 %v5927_v57 }
 0x173   : > { %v3560_v22 = vadd.f32 %v3559_v2, %v3540_v1  ;;  %v5929_v2 = vld [vmem:[%s6484_s12 + $0xa0] sm:$0xff] }
 0x174   : > { %v3596_v26 = vadd.f32 %v3595_v0, %v3577_v18 }
 0x179   : > { %v3578_v3 = vpop.f32.mrf.mxu2  ;;  %v3543_v5 = vpop.f32.mrf.mxu0 }
 0x17a   : > { %v3597_v4 = vpop.f32.mrf.mxu3  ;;  %v3562_v6 = vpop.f32.mrf.mxu1  ;;  %v3579_v27 = vadd.f32 %v3578_v3, %v3560_v22  ;;  %v5930_v3 = vld [vmem:[%s6484_s12 + $0xa8] sm:$0xff] }
 0x17b   : > { %v3563_v33 = vadd.f32 %v3562_v6, %v3543_v5  ;;  %v3835_v5 = vunpack.c.h.bf16 %v5928_v58  ;;  %v3828_v6 = vunpack.c.l.bf16 %v5925_v24 }
 0x17c   : > { %v3598_v20 = vadd.f32 %v3597_v4, %v3579_v27  ;;  %v3834_v4 = vunpack.c.l.bf16 %v5928_v58 }
 0x181   : > { %v3581_v9 = vpop.f32.mrf.mxu2  ;;  %v3545_v10 = vpop.f32.mrf.mxu0 }
 0x182   : > { %v3600_v7 = vpop.f32.mrf.mxu3  ;;  %v3564_v11 = vpop.f32.mrf.mxu1  ;;  %v3582_v38 = vadd.f32 %v3581_v9, %v3563_v33  ;;  %v3832_v9 = vunpack.c.l.bf16 %v5927_v57  ;;  %v7495_v33 = vld [vmem:[%s7571_s2] ss:$0 sm:$0xff] }
 0x183   : > { %v3565_v46 = vadd.f32 %v3564_v11, %v3545_v10  ;;  %v3838_v10 = vunpack.c.l.bf16 %v5930_v3 }
 0x184   : > { %v3601_v42 = vadd.f32 %v3600_v7, %v3582_v38  ;;  %v3837_v7 = vunpack.c.h.bf16 %v5929_v2  ;;  %v3845_v27 = vadd.f32 %v3832_v9, %v3828_v6 }
 0x189   : > { %v3583_v61 = vpop.f32.mrf.mxu2  ;;  %v3614_v12 = vpop.f32.mrf.mxu0 }
 0x18a   : > { %v7469_v8 = vpop.f32.mrf.mxu3  ;;  %v3633_v13 = vpop.f32.mrf.mxu1  ;;  %v3615_v28 = vadd.f32 %v3614_v12, %v3596_v26  ;;  %v3584_v54 = vadd.f32 %v3583_v61, %v3565_v46  ;;  %v5931_v61 = vld [vmem:[%s6484_s12 + $0xd0] sm:$0xff]  ;;  %v5932_v12 = vld [vmem:[%s6484_s12 + $0xd8] sm:$0xff]  ;;  %v3798_v46 = vlaneseq }
 0x18b   : > { %v3843_v26 = vunpack.c.h.bf16 %v5932_v12 }
 0x18c   : > { %v3634_v34 = vadd.f32 %v3633_v13, %v3615_v28  ;;  %v3839_v13 = vunpack.c.h.bf16 %v5930_v3  ;;  %vm7520_vm0 = vcmp.lt.s32.totalorder %v3798_v46, 512 }
 0x191   : > { %v3652_v14 = vpop.f32.mrf.mxu2  ;;  %v3616_v15 = vpop.f32.mrf.mxu0 }
 0x192   : > { %v3671_v32 = vpop.f32.mrf.mxu3  ;;  %v3635_v16 = vpop.f32.mrf.mxu1  ;;  %v3617_v35 = vadd.f32 %v3616_v15, %v3598_v20  ;;  %v3653_v40 = vadd.f32 %v3652_v14, %v3634_v34  ;;  %v3854_v14 = vadd.f32 %v3833_v63, %v3829_v59  ;;  %v3872_v15 = vadd.f32 %v3835_v5, %v3831_v62 }
 0x193   : > { %v3840_v34 = vunpack.c.l.bf16 %v5931_v61 }
 0x194   : > { %v3636_v41 = vadd.f32 %v3635_v16, %v3617_v35  ;;  %v3672_v43 = vadd.f32 %v3671_v32, %v3653_v40  ;;  %v3863_v32 = vadd.f32 %v3834_v4, %v3830_v60  ;;  %v3855_v28 = vadd.f32 %v3854_v14, %v3837_v7 }
 0x195   : > { %v3873_v38 = vadd.f32 %v3872_v15, %v3839_v13  ;;  %v3603_v40 = vadd.f32 %v7469_v8, %v3584_v54 }
 0x196   : > { %v3864_v35 = vadd.f32 %v3863_v32, %v3838_v10 }
 0x199   : > { %v3654_v19 = vpop.f32.mrf.mxu2  ;;  %v3619_v23 = vpop.f32.mrf.mxu0 }
 0x19a   : > { %v3673_v21 = vpop.f32.mrf.mxu3  ;;  %v3638_v25 = vpop.f32.mrf.mxu1  ;;  %v3655_v44 = vadd.f32 %v3654_v19, %v3636_v41  ;;  %v3620_v50 = vadd.f32 %v3619_v23, %v3601_v42  ;;  %v3836_v19 = vunpack.c.l.bf16 %v5929_v2  ;;  %v3842_v23 = vunpack.c.l.bf16 %v5932_v12 }
 0x19c   : > { %v3674_v45 = vadd.f32 %v3673_v21, %v3655_v44  ;;  %v3639_v0 = vadd.f32 %v3638_v25, %v3620_v50  ;;  %v3841_v21 = vunpack.c.h.bf16 %v5931_v61  ;;  %v3846_v42 = vadd.f32 %v3845_v27, %v3836_v19 }
 0x19d   : > { %v3865_v50 = vadd.f32 %v3864_v35, %v3842_v23 }
 0x19f   : > { %v3866_v56 = vrot.slane %v3865_v50, 4 }
 0x1a1   : > { %v7471_v29 = vpop.f32.mrf.mxu2  ;;  %v7475_v31 = vpop.f32.mrf.mxu0  ;;  %v3867_v2 = vadd.f32 %v3866_v56, %v3865_v50 }
 0x1a2   : > { %v7473_v30 = vpop.f32.mrf.mxu3  ;;  %v7477_v36 = vpop.f32.mrf.mxu1  ;;  %v3658_v41 = vadd.f32 %v7471_v29, %v3639_v0  ;;  %v3622_v8 = vadd.f32 %v7475_v31, %v3603_v40  ;;  %v6348_v29 = vmov 0.0  }
 0x1a3   : > { %3797 = vst [vmem:[%s7501_s13] sm:$0x1] %v6348_v29  ;;  %v3868_v10 = vrot.slane %v3867_v2, 2 }
 0x1a4   : > { %3802 = vst.msk [vmem:[%s7514_s18] sm:$0xf] %vm7520_vm0, %v6348_v29  ;;  %v3677_v60 = vadd.f32 %v7473_v30, %v3658_v41  ;;  %v3641_v3 = vadd.f32 %v7477_v36, %v3622_v8 }
 0x1a5   : > { %v3869_v32 = vadd.f32 %v3868_v10, %v3867_v2 }
 0x1a9   : > { %v7479_v47 = vpop.f32.mrf.mxu2  ;;  %v3690_v39 = vpop.f32.mrf.mxu0 }
 0x1aa   : > { %v7481_v48 = vpop.f32.mrf.mxu3  ;;  %v3691_v51 = vadd.f32 %v3690_v39, %v3672_v43  ;;  %v3709_v53 = vpop.f32.mrf.mxu1  ;;  %v3856_v43 = vadd.f32 %v3855_v28, %v3841_v21  ;;  %v7509_v39 = vld [vmem:[%s7572_s3] ss:$0 sm:$0xff]  ;;  %v3870_v21 = vrot.slane %v3869_v32, 1 }
 0x1ac   : > { %v3710_v1 = vadd.f32 %v3709_v53, %v3691_v51  ;;  %v3847_v51 = vadd.f32 %v3846_v42, %v3840_v34  ;;  %v3857_v53 = vrot.slane %v3856_v43, 4  ;;  %v3871_v34 = vadd.f32 %v3870_v21, %v3869_v32 }
 0x1ae   : > { %v3848_v58 = vrot.slane %v3847_v51, 4  ;;  %v3858_v31 = vadd.f32 %v3857_v53, %v3856_v43 }
 0x1b0   : > { %v3849_v4 = vadd.f32 %v3848_v58, %v3847_v51  ;;  %v3859_v5 = vrot.slane %v3858_v31, 2  ;;  %v3844_v51 = vld [vmem:[%s7514_s18] sm:$0xf] }
 0x1b1   : > { %v3728_v11 = vpop.f32.mrf.mxu2  ;;  %v3692_v18 = vpop.f32.mrf.mxu0 }
 0x1b2   : > { %v3729_v16 = vadd.f32 %v3728_v11, %v3710_v1  ;;  %v3747_v17 = vpop.f32.mrf.mxu3  ;;  %v3693_v22 = vadd.f32 %v3692_v18, %v3674_v45  ;;  %v3711_v25 = vpop.f32.mrf.mxu1  ;;  %v3660_v11 = vadd.f32 %v7479_v47, %v3641_v3  ;;  %v3850_v12 = vrot.slane %v3849_v4, 2 }
 0x1b3   : > { %v3860_v13 = vadd.f32 %v3859_v5, %v3858_v31 }
 0x1b4   : > { %v3748_v20 = vadd.f32 %v3747_v17, %v3729_v16  ;;  %v3712_v45 = vadd.f32 %v3711_v25, %v3693_v22  ;;  %v3851_v15 = vadd.f32 %v3850_v12, %v3849_v4  ;;  %v3679_v23 = vadd.f32 %v7481_v48, %v3660_v11 }
 0x1b5   : > { %v3861_v16 = vrot.slane %v3860_v13, 1  ;;  %v3886_v48 = vrot.slane %v3871_v34, 6 }
 0x1b6   : > { %v3757_v44 = vadd.f32 %v3748_v20, %v7458_v37  ;;  %v3874_v37 = vadd.f32 %v3873_v38, %v3843_v26  ;;  %v3852_v25 = vrot.slane %v3851_v15, 1 }
 0x1b7   : > { %v3862_v47 = vadd.f32 %v3861_v16, %v3860_v13 }
 0x1b8   : > { %v3773_v54 = vmul.f32 %v7495_v33, %v3757_v44  ;;  %v3875_v59 = vrot.slane %v3874_v37, 4  ;;  %v3853_v38 = vadd.f32 %v3852_v25, %v3851_v15 }
 0x1b9   : > { %v3730_v57 = vpop.f32.mrf.mxu2  ;;  %v3695_v1 = vpop.f32.mrf.mxu0  ;;  %v3885_v41 = vrot.slane %v3862_v47, 7 }
 0x1ba   : > { %v3781_v62 = vadd.f32 %v7509_v39, %v3773_v54  ;;  %v3731_v63 = vadd.f32 %v3730_v57, %v3712_v45  ;;  %v3749_v0 = vpop.f32.mrf.mxu3  ;;  %v3876_v6 = vadd.f32 %v3875_v59, %v3874_v37  ;;  %v3696_v30 = vadd.f32 %v3695_v1, %v3677_v60  ;;  %v3714_v61 = vpop.f32.mrf.mxu1 }
 0x1bb   : > { %v3889_v50 = vsel %vm3888_vm2, %v3853_v38, %v3885_v41 }
 0x1bc   : > { %v3785_v9 = vmax.f32 %v3781_v62, 0.0  ;;  %v3750_v7 = vadd.f32 %v3749_v0, %v3731_v63  ;;  %v3877_v14 = vrot.slane %v3876_v6, 2  ;;  %v3715_v19 = vadd.f32 %v3714_v61, %v3696_v30  ;;  %v3803_v61 = vld [vmem:[%s7501_s13] sm:$0x1] }
 0x1be   : > { %3789 = vst [vmem:[%s7533_s25] sm:$0xf] %v3785_v9  ;;  %v3758_v36 = vadd.f32 %v3750_v7, %v7461_v49  ;;  %v3878_v17 = vadd.f32 %v3877_v14, %v3876_v6  ;;  %v3805_v44 = vsel %vm3804_vm1, %v3785_v9, 0.0 }
 0x1c0   : > { %v3774_v18 = vmul.f32 %v7495_v33, %v3758_v36  ;;  %v3879_v26 = vrot.slane %v3878_v17, 1 }
 0x1c1   : > { %v3733_v22 = vpop.f32.mrf.mxu2  ;;  %v3697_v20 = vpop.f32.mrf.mxu0 }
 0x1c2   : > { %v3782_v27 = vadd.f32 %v7509_v39, %v3774_v18  ;;  %v3734_v28 = vadd.f32 %v3733_v22, %v3715_v19  ;;  %v3752_v49 = vpop.f32.mrf.mxu3  ;;  %v3698_v35 = vadd.f32 %v3697_v20, %v3679_v23  ;;  %v3880_v40 = vadd.f32 %v3879_v26, %v3878_v17  ;;  %v3716_v37 = vpop.f32.mrf.mxu1 }
 0x1c4   : > { %v3786_v42 = vmax.f32 %v3782_v27, 0.0  ;;  %v3753_v43 = vadd.f32 %v3752_v49, %v3734_v28  ;;  %v3887_v46 = vrot.slane %v3880_v40, 5  ;;  %v3717_v56 = vadd.f32 %v3716_v37, %v3698_v35 }
 0x1c6   : > { %3790 = vst [vmem:[%s7533_s25 + $0x4] sm:$0xf] %v3786_v42  ;;  %v3806_v8 = vsel %vm3804_vm1, %v3786_v42, 0.0  ;;  %v3759_v29 = vadd.f32 %v3753_v43, %v7464_v55  ;;  %v3891_v54 = vsel %vm3890_vm3, %v3886_v48, %v3887_v46 }
 0x1c7   : > { %v3807_v53 = vadd.f32 %v3806_v8, %v3805_v44  ;;  %v3893_v57 = vsel %vm3892_vm4, %v3889_v50, %v3891_v54 }
 0x1c8   : > { %v3775_v45 = vmul.f32 %v7495_v33, %v3759_v29  ;;  %v3895_v31 = vadd.f32 %v3893_v57, %v3844_v51 }
 0x1c9   : > { %v3735_v58 = vpop.f32.mrf.mxu2 }
 0x1ca   : > { %v3783_v59 = vadd.f32 %v7509_v39, %v3775_v45  ;;  %v3736_v60 = vadd.f32 %v3735_v58, %v3717_v56  ;;  %v3754_v62 = vpop.f32.mrf.mxu3  ;;  %3900 = vst.msk [vmem:[%s7514_s18] sm:$0xf] %vm7520_vm0, %v3895_v31 }
 0x1cc   : > { %v3787_v55 = vmax.f32 %v3783_v59, 0.0  ;;  %v3755_v63 = vadd.f32 %v3754_v62, %v3736_v60 }
 0x1ce   : > { %3791 = vst [vmem:[%s7533_s25 + $0x8] sm:$0xf] %v3787_v55  ;;  %v3808_v0 = vsel %vm3804_vm1, %v3787_v55, 0.0  ;;  %v3760_v1 = vadd.f32 %v3755_v63, %v7467_v52 }
 0x1cf   : > { %v3809_v2 = vadd.f32 %v3808_v0, %v3807_v53 }
 0x1d0   : > { %v3776_v3 = vmul.f32 %v7495_v33, %v3760_v1 }
 0x1d2   : > { %v3784_v4 = vadd.f32 %v7509_v39, %v3776_v3 }
 0x1d4   : > { %v3788_v5 = vmax.f32 %v3784_v4, 0.0 }
 0x1d6   : > { %3792 = vst [vmem:[%s7533_s25 + $0xc] sm:$0xf] %v3788_v5  ;;  %v3810_v6 = vsel %vm3804_vm1, %v3788_v5, 0.0 }
 0x1d7   : > { %v3811_v24 = vadd.f32 %v3810_v6, %v3809_v2 }
 0x1d9   : > { %v3812_v9 = vrot.slane %v3811_v24, 4 }
 0x1db   : > { %v3813_v7 = vadd.f32 %v3812_v9, %v3811_v24 }
 0x1dd   : > { %v3814_v30 = vrot.slane %v3813_v7, 2 }
 0x1df   : > { %v3815_v10 = vadd.f32 %v3814_v30, %v3813_v7 }
 0x1e1   : > { %v3816_v11 = vrot.slane %v3815_v10, 1 }
 0x1e3   : > { %v3817_v12 = vadd.f32 %v3816_v11, %v3815_v10 }
 0x1e5   : > { %v3818_v13 = vadd.f32 %v3817_v12, %v3803_v61 }
 0x1e7   : > { %3819 = vst [vmem:[%s7501_s13] sm:$0x1] %v3818_v13 }
 0x1e8 PF: > { %s17_s23 = sadd.s32 1, %s6346_s23   ;;  %s7578_s21 = smov %s6342_s22 }
 0x1e9   : > { %p14_p5 = scmp.ge.s32.totalorder %s17_s23, 4   ;;  %s7579_s22 = smov %s7581_s24 }
 0x1eb   :  { %16 = sbr.rel (!%p14_p5) target bundleno = 2 (0x2), region = 99 }

// kernel: context_path_forward.15
= control target key start
LH: loop header
LB: loop body
LE: loop exit
PB: predicated region body
PF: predicated region fallthrough
CT: control target
= control target key end

     0   :  { %s181_s1 = inlined_call_operand.vmem [shape: f32[128,128], index: 1, kind: input, shape index: {}]   ;;  %s182_s2 = inlined_call_operand.vmem [shape: f32[1,128], index: 2, kind: input, shape index: {}]   ;;  %s183_s3 = inlined_call_operand.vmem [shape: f32[1,128], index: 3, kind: input, shape index: {}]   ;;  %s184_s0 = inlined_call_operand.vmem [shape: f32[2,128], index: 0, kind: input, shape index: {}]   ;;  %s185_s4 = inlined_call_operand.vmem [shape: f32[2,128], index: 4, kind: output, shape index: {}]  }
   0x1   :  { %v34_v0 = vld [vmem:[%s181_s1 + $0x78] sm:$0xff]  ;;  %v33_v1 = vld [vmem:[%s181_s1 + $0x70] sm:$0xff]  ;;  %v32_v2 = vld [vmem:[%s181_s1 + $0x68] sm:$0xff] }
   0x2   :  { %35 = vmatpush.msra.mxu0 %v34_v0  ;;  %v31_v3 = vld [vmem:[%s181_s1 + $0x60] sm:$0xff]  ;;  %v30_v4 = vld [vmem:[%s181_s1 + $0x58] sm:$0xff]  ;;  %v29_v5 = vld [vmem:[%s181_s1 + $0x50] sm:$0xff] }
   0x3   :  { %v28_v6 = vld [vmem:[%s181_s1 + $0x48] sm:$0xff]  ;;  %v27_v7 = vld [vmem:[%s181_s1 + $0x40] sm:$0xff]  ;;  %v26_v8 = vld [vmem:[%s181_s1 + $0x38] sm:$0xff] }
   0x4   :  { %36 = vmatpush.msra.mxu0 %v33_v1  ;;  %v25_v9 = vld [vmem:[%s181_s1 + $0x30] sm:$0xff]  ;;  %v24_v10 = vld [vmem:[%s181_s1 + $0x28] sm:$0xff]  ;;  %v23_v11 = vld [vmem:[%s181_s1 + $0x20] sm:$0xff] }
   0x5   :  { %v22_v12 = vld [vmem:[%s181_s1 + $0x18] sm:$0xff]  ;;  %v21_v13 = vld [vmem:[%s181_s1 + $0x10] sm:$0xff]  ;;  %v17_v14 = vld [vmem:[%s184_s0] sm:$0x3] }
   0x6   :  { %37 = vmatpush.msra.mxu0 %v32_v2  ;;  %v20_v15 = vld [vmem:[%s181_s1 + $0x8] sm:$0xff]  ;;  %v19_v16 = vld [vmem:[%s181_s1] sm:$0xff]  ;;  %v18_v17 = vmul.f32 0.015625, %v17_v14 }
   0x7   :  { %v90_v18 = vld [vmem:[%s182_s2] ss:$0 sm:$0xff] }
   0x8   :  { %38 = vmatpush.msra.mxu0 %v31_v3  ;;  %v91_v19 = vld [vmem:[%s183_s3] ss:$0 sm:$0xff] }
   0xa   :  { %39 = vmatpush.msra.mxu0 %v30_v4 }
   0xc   :  { %40 = vmatpush.msra.mxu0 %v29_v5 }
   0xe   :  { %41 = vmatpush.msra.mxu0 %v28_v6 }
  0x10   :  { %42 = vmatpush.msra.mxu0 %v27_v7 }
  0x12   :  { %43 = vmatpush.msra.mxu0 %v26_v8 }
  0x14   :  { %44 = vmatpush.msra.mxu0 %v25_v9 }
  0x16   :  { %45 = vmatpush.msra.mxu0 %v24_v10 }
  0x18   :  { %46 = vmatpush.msra.mxu0 %v23_v11 }
  0x1a   :  { %47 = vmatpush.msra.mxu0 %v22_v12 }
  0x1c   :  { %48 = vmatpush.msra.mxu0 %v21_v13 }
  0x1e   :  { %49 = vmatpush.msra.mxu0 %v20_v15 }
  0x20   :  { %50 = vmatpush.msra.mxu0 %v19_v16 }
  0x21   :  { %51 = vmatmul.f32.vlgmr.msra.gmra.mxu0 %v18_v17 }
  0x9e   :  { %v52_v20 = vpop.f32.mrf.mxu0 }
  0x9f   :  { %v59_v21 = vmul.f32 %v90_v18, %v52_v20 }
  0xa1   :  { %v64_v22 = vadd.f32 %v91_v19, %v59_v21 }
  0xa3   :  { %v89_v23 = vmul.f32 -1.442695, %v64_v22 }
  0xa5   :  { %92 = vpow2.f32 %v89_v23 }
  0xab   :  { %v93_v24 = vpop.eup %92 }
  0xac   :  { %v68_v25 = vadd.f32 1.0, %v93_v24 }
  0xae   :  { %94 = vrcp.f32 %v68_v25  ;;  %v80_v29 = vand.u32 2147483648, %v68_v25  ;;  %v78_v31 = vand.u32 2147483647, %v68_v25  ;;  %vm74_vm1 = vweird.f32 %v68_v25 }
  0xb0   :  { %v81_v33 = vor.u32 1.1754944e-38, %v80_v29  ;;  %vm79_vm3 = vcmp.eq.f32.partialorder %v78_v31, 8.507059e+37 }
  0xb4   :  { %v95_v26 = vpop.eup %94 }
  0xb5   :  { %v70_v27 = vmul.f32 %v95_v26, %v68_v25  ;;  %vm75_vm0 = vweird.f32 %v95_v26 }
  0xb6   :  { %vm76_vm2 = vmor %vm74_vm1, %vm75_vm0 }
  0xb7   :  { %v71_v28 = vsub.f32 1.0, %v70_v27 }
  0xb9   :  { %v72_v30 = vmul.f32 %v95_v26, %v71_v28 }
  0xbb   :  { %v73_v32 = vadd.f32 %v95_v26, %v72_v30 }
  0xbd   :  { %v77_v34 = vsel %vm76_vm2, %v95_v26, %v73_v32 }
  0xbe   :  { %v82_v35 = vsel %vm79_vm3, %v81_v33, %v77_v34 }
  0xbf   :  { %84 = vst [vmem:[%s185_s4] sm:$0x3] %v82_v35 }

// kernel: context_path_forward.16
= control target key start
LH: loop header
LB: loop body
LE: loop exit
PB: predicated region body
PF: predicated region fallthrough
CT: control target
= control target key end

     0   :  { %s503_s12 = smov 0   ;;  %s505_s13 = smov 0   ;;  %s562_s0 = inlined_call_operand.vmem [shape: f32[2,64,128], index: 0, kind: input, shape index: {}]   ;;  %s563_s1 = inlined_call_operand.vmem [shape: f32[2,1,128], index: 1, kind: input, shape index: {}]   ;;  %s564_s2 = inlined_call_operand.vmem [shape: f32[2,64,128], index: 2, kind: input, shape index: {}]   ;;  %s565_s3 = inlined_call_operand.vmem [shape: f32[2,64,128], index: 3, kind: output, shape index: {}]  }
   0x1   :  { %s507_s14 = smov 0  }
   0x2 LB: > { %s25_s15 = sadd.s32 1, %s477_s13  ;;  %p422_p0 = scmp.ge.s32.totalorder %s481_s14, 1  ;;  %s481_s14 = sphi %s507_s14, %s13_s14   ;;  %s477_s13 = sphi %s505_s13, %s567_s13   ;;  %s473_s12 = sphi %s503_s12, %s566_s12  }
   0x3   : > { %p27_p1 = scmp.ge.s32.totalorder %s25_s15, 2  ;;  %p183_p2 = scmp.lt.s32.totalorder %s481_s14, 3 }
   0x5   : > { %s569_s15 = smov (%p27_p1, %s25_s15), 0  ;;  %p184_p3 = pnand %p422_p0, %p183_p2 }
   0x6   : > { %p228_p4 = scmp.lt.s32.totalorder (!%p184_p3), %s473_s12, 1 }
   0x7   : > { %187 = sbr.rel (%p184_p3) target bundleno = 28 (0x1c), region = 32 }
   0xc   : > { %s571_s12 = smov (!%p228_p4, %s473_s12), 1 }
   0xd   : > { %s431_s16 = sshll.u32 %s571_s12, 6  ;;  %s239_s19 = scalar_lea.vmem %s563_s1, %s571_s12 }
   0xe   : > { %s235_s22 = scalar_lea.vmem %s562_s0, %s431_s16  ;;  %s530_s25 = scalar_lea.vmem %s564_s2, %s431_s16  ;;  %v458_v0 = vld [vmem:[%s239_s19] ss:$0 sm:$0xff] }
   0xf   : > { %v260_v1 = vld [vmem:[%s235_s22] sm:$0xff]  ;;  %v261_v3 = vld [vmem:[%s235_s22 + $0x8] sm:$0xff]  ;;  %v262_v7 = vld [vmem:[%s235_s22 + $0x10] sm:$0xff]  ;;  %s538_s28 = scalar_lea.vmem %s565_s3, %s431_s16 }
  0x10   : > { %v280_v2 = vld [vmem:[%s530_s25] sm:$0xff]  ;;  %v272_v4 = vmul.f32 %v458_v0, %v260_v1  ;;  %v273_v5 = vmul.f32 %v458_v0, %v261_v3  ;;  %v281_v6 = vld [vmem:[%s530_s25 + $0x8] sm:$0xff]  ;;  %v282_v8 = vld [vmem:[%s530_s25 + $0x10] sm:$0xff]  ;;  %v274_v9 = vmul.f32 %v458_v0, %v262_v7 }
  0x11   : > { %v263_v10 = vld [vmem:[%s235_s22 + $0x18] sm:$0xff]  ;;  %v264_v12 = vld [vmem:[%s235_s22 + $0x20] sm:$0xff]  ;;  %v265_v18 = vld [vmem:[%s235_s22 + $0x28] sm:$0xff] }
  0x12   : > { %v283_v11 = vld [vmem:[%s530_s25 + $0x18] sm:$0xff]  ;;  %v288_v13 = vadd.f32 %v280_v2, %v272_v4  ;;  %v289_v14 = vadd.f32 %v281_v6, %v273_v5  ;;  %v275_v15 = vmul.f32 %v458_v0, %v263_v10  ;;  %v276_v16 = vmul.f32 %v458_v0, %v264_v12  ;;  %v284_v17 = vld [vmem:[%s530_s25 + $0x20] sm:$0xff]  ;;  %v285_v19 = vld [vmem:[%s530_s25 + $0x28] sm:$0xff] }
  0x13   : > { %v290_v20 = vadd.f32 %v282_v8, %v274_v9  ;;  %v277_v21 = vmul.f32 %v458_v0, %v265_v18  ;;  %v266_v22 = vld [vmem:[%s235_s22 + $0x30] sm:$0xff]  ;;  %v267_v24 = vld [vmem:[%s235_s22 + $0x38] sm:$0xff] }
  0x14   : > { %v286_v23 = vld [vmem:[%s530_s25 + $0x30] sm:$0xff]  ;;  %296 = vst [vmem:[%s538_s28] sm:$0xff] %v288_v13  ;;  %v291_v25 = vadd.f32 %v283_v11, %v275_v15  ;;  %v292_v26 = vadd.f32 %v284_v17, %v276_v16  ;;  %v278_v27 = vmul.f32 %v458_v0, %v266_v22  ;;  %v279_v28 = vmul.f32 %v458_v0, %v267_v24  ;;  %v287_v29 = vld [vmem:[%s530_s25 + $0x38] sm:$0xff] }
  0x15   : > { %297 = vst [vmem:[%s538_s28 + $0x8] sm:$0xff] %v289_v14  ;;  %v293_v30 = vadd.f32 %v285_v19, %v277_v21 }
  0x16   : > { %298 = vst [vmem:[%s538_s28 + $0x10] sm:$0xff] %v290_v20  ;;  %v294_v31 = vadd.f32 %v286_v23, %v278_v27  ;;  %v295_v32 = vadd.f32 %v287_v29, %v279_v28 }
  0x17   : > { %299 = vst [vmem:[%s538_s28 + $0x18] sm:$0xff] %v291_v25 }
  0x18   : > { %300 = vst [vmem:[%s538_s28 + $0x20] sm:$0xff] %v292_v26 }
  0x19   : > { %301 = vst [vmem:[%s538_s28 + $0x28] sm:$0xff] %v293_v30 }
  0x1a   : > { %302 = vst [vmem:[%s538_s28 + $0x30] sm:$0xff] %v294_v31 }
  0x1b   : > { %303 = vst [vmem:[%s538_s28 + $0x38] sm:$0xff] %v295_v32 }
  0x1c PF: > { %s13_s14 = sadd.s32 1, %s481_s14   ;;  %s566_s12 = smov %s477_s13 }
  0x1d   : > { %p10_p5 = scmp.ge.s32.totalorder %s13_s14, 4   ;;  %s567_s13 = smov %s569_s15 }
  0x1f   :  { %12 = sbr.rel (!%p10_p5) target bundleno = 2 (0x2), region = 68 }

// kernel: context_path_forward.14
= control target key start
LH: loop header
LB: loop body
LE: loop exit
PB: predicated region body
PF: predicated region fallthrough
CT: control target
= control target key end

     0   :  { %12 = vsyncpa [#allocation4], 0  ;;  %s5189_s0 = inlined_call_operand.vmem [shape: bf16[2,80,768], index: 0, kind: input, shape index: {}]   ;;  %s5190_s1 = inlined_call_operand.vmem [shape: bf16[3,768,128], index: 1, kind: input, shape index: {}]   ;;  %s5191_s2 = inlined_call_operand.vmem [shape: f32[1,128], index: 2, kind: input, shape index: {}]   ;;  %s5192_s3 = inlined_call_operand.vmem [shape: f32[1,128], index: 3, kind: input, shape index: {}]   ;;  %s5193_s4 = inlined_call_operand.vmem [shape: f32[2,8,8,128], index: 4, kind: output, shape index: {0}]   ;;  %s5194_s5 = inlined_call_operand.vmem [shape: f32[2,1,128], index: 5, kind: output, shape index: {1}]   ;;  %s5195_s6 = inlined_call_operand.hbm [shape: f32[2,1,256], index: 6, kind: output, shape index: {2}]  }
   0x1   :  { %14 = vsyncpa [#allocation4 + $0x1], 0  ;;  %s4313_s21 = smov 0   ;;  %s4315_s22 = smov 0  }
   0x2   :  { %s4317_s23 = smov 0   ;;  %s4319_s24 = smov 0  }
   0x3   :  { %s4321_s25 = smov 0   ;;  %s4323_s26 = smov 0  }
   0x4 LB: > { %s2780_s27 = sadd.s32 4294967295, %s4275_s26   ;;  %s2781_s28 = sadd.s32 4294967294, %s4275_s26   ;;  %s4275_s26 = sphi %s4323_s26, %s20_s26   ;;  %s4271_s25 = sphi %s4321_s25, %s5204_s25   ;;  %s4267_s24 = sphi %s4319_s24, %s5203_s24   ;;  %s4263_s23 = sphi %s4317_s23, %s5202_s23   ;;  %s4259_s22 = sphi %s4315_s22, %s5201_s22   ;;  %s4255_s21 = sphi %s4313_s21, %s5200_s21  }
   0x5   : > { %s32_s29 = sadd.s32 1, %s4271_s25  ;;  %s182_s30 = sadd.s32 1, %s4263_s23 }
   0x6   : > { %p34_p0 = scmp.ge.s32.totalorder %s32_s29, 2  ;;  %p192_p1 = scmp.ne.s32.totalorder %s4263_s23, %s4259_s22 }
   0x7   : > { %p193_p2 = scmp.eq.s32.totalorder %s2780_s27, 1  ;;  %p198_p3 = scmp.ne.s32.totalorder %s4259_s22, %s4255_s21 }
   0x8   : > { %s5206_s29 = smov (%p34_p0, %s32_s29), 0  ;;  %p199_p5 = scmp.eq.s32.totalorder %s2781_s28, 1 }
   0x9   : > { %p4353_p4 = por %p193_p2, %p192_p1  ;;  %s179_s8 = ssub.s32 %s4271_s25, %s5206_s29 }
   0xa   : > { %p2784_p6 = scmp.ge.s32.totalorder %s4275_s26, 1  ;;  %p180_p7 = scmp.eq.s32.totalorder %s179_s8, 0 }
   0xb   : > { %p4360_p8 = por %p199_p5, %p198_p3  ;;  %p234_p9 = scmp.lt.s32.totalorder %s4275_s26, 3 }
   0xc   : > { %s4366_s10 = scalar_select %p180_p7, %s4263_s23, %s182_s30  }
   0xd   : > { %p235_p10 = pnand %p2784_p6, %p234_p9 }
   0xe   : > { %p276_p11 = scmp.lt.s32.totalorder (!%p235_p10), %s4267_s24, 1  ;;  %s273_s27 = sand.u32 (!%p235_p10), 1, %s4259_s22  }
   0xf   : > { %238 = sbr.rel (%p235_p10) target bundleno = 498 (0x1f2), region = 36  ;;  %s3902_s11 = sshll.u32 (!%p235_p10), %s4267_s24, 1 }
  0x10   : > { %s2646_s14 = scalar_lea.hbm (!%p235_p10), %s5195_s6, %s3902_s11  ;;  %s2629_s18 = scalar_lea.sflag (!%p235_p10), [#allocation4], %s273_s27 }
  0x11   : > { %s4217_s11 = scalar_lea.hbm (!%p235_p10), %s5195_s6, 4 }
  0x14   : > { %v3937_v0 = vld [vmem:[%s5190_s1 + $0x38] sm:$0xff]  ;;  %v3936_v2 = vld [vmem:[%s5190_s1 + $0x30] sm:$0xff]  ;;  %v3935_v4 = vld [vmem:[%s5190_s1 + $0x28] sm:$0xff]  ;;  %s4400_s17 = scalar_select %p276_p11, %s4267_s24, 1  ;;  %vm2607_vm1 = vcmask 1040384  }
  0x15   : > { %v3945_v1 = vld [vmem:[%s5190_s1 + $0x78] sm:$0xff]  ;;  %4122 = vmatpush.bf16.msra.mxu2 %v3937_v0  ;;  %v3944_v3 = vld [vmem:[%s5190_s1 + $0x70] sm:$0xff]  ;;  %829 = vmatpush.bf16.msra.mxu0 %v3937_v0  ;;  %v3943_v5 = vld [vmem:[%s5190_s1 + $0x68] sm:$0xff] }
  0x16   : > { %4130 = vmatpush.bf16.msra.mxu3 %v3945_v1  ;;  %858 = vmatpush.bf16.msra.mxu1 %v3945_v1  ;;  %v3934_v6 = vld [vmem:[%s5190_s1 + $0x20] sm:$0xff]  ;;  %v3933_v8 = vld [vmem:[%s5190_s1 + $0x18] sm:$0xff]  ;;  %v3932_v10 = vld [vmem:[%s5190_s1 + $0x10] sm:$0xff]  ;;  %s4138_s28 = smul.u32 240, %s4400_s17  ;;  %s3905_s16 = sshll.u32 %s4400_s17, 6 }
  0x17   : > { %v3942_v7 = vld [vmem:[%s5190_s1 + $0x60] sm:$0xff]  ;;  %v3941_v9 = vld [vmem:[%s5190_s1 + $0x58] sm:$0xff]  ;;  %v3940_v11 = vld [vmem:[%s5190_s1 + $0x50] sm:$0xff]  ;;  %s5074_s20 = scalar_lea.vmem %s5193_s4, %s3905_s16  ;;  %s5114_s8 = scalar_lea.vmem %s5194_s5, %s4400_s17 }
  0x18   : > { %v3931_v12 = vld [vmem:[%s5190_s1 + $0x8] sm:$0xff]  ;;  %s4418_s15 = scalar_lea.vmem %s5189_s0, %s4138_s28  ;;  %v3930_v14 = vld [vmem:[%s5190_s1] sm:$0xff]  ;;  %v3953_v24 = vld [vmem:[%s5190_s1 + $0xb8] sm:$0xff]  ;;  %s2650_s16 = sshll.u32 %s2646_s14, 4  ;;  %s2651_s16 = int_to_ptr.hbm [resolvable:$true] %s2650_s16 }
  0x19   : > { %4123 = vmatpush.bf16.msra.mxu2 %v3936_v2  ;;  %830 = vmatpush.bf16.msra.mxu0 %v3936_v2  ;;  %v3939_v13 = vld [vmem:[%s5190_s1 + $0x48] sm:$0xff]  ;;  %v3938_v15 = vld [vmem:[%s5190_s1 + $0x40] sm:$0xff]  ;;  %v3921_v17 = vld [vmem:[%s4418_s15 + $0x74] sm:$0xf0]  ;;  %s4211_s19 = sshra.s32 %s2651_s16, 4  ;;  %s4212_s19 = int_to_ptr.hbm [resolvable:$true] %s4211_s19 }
  0x1a   : > { %4131 = vmatpush.bf16.msra.mxu3 %v3944_v3  ;;  %859 = vmatpush.bf16.msra.mxu1 %v3944_v3  ;;  %v2839_v16 = vld [vmem:[%s4418_s15 + $0x60] sm:$0xf]  ;;  %v3918_v18 = vld [vmem:[%s4418_s15 + $0x64] sm:$0xf]  ;;  %v2841_v19 = vld [vmem:[%s4418_s15 + $0x78] sm:$0xf0]  ;;  %p4218_p1 = scmp.lt.s32.totalorder %s4212_s19, %s5195_s6 }
  0x1b   : > { %v2791_v20 = vld [vmem:[%s4418_s15] sm:$0xf]  ;;  %v3909_v21 = vld [vmem:[%s4418_s15 + $0x14] sm:$0xf0]  ;;  %v3906_v22 = vld [vmem:[%s4418_s15 + $0x4] sm:$0xf]  ;;  %v2840_v26 = vor.u32 %v3921_v17, %v2839_v16  ;;  %v2844_v27 = vor.u32 %v3918_v18, %v2841_v19 }
  0x1c   : > { %v2793_v23 = vld [vmem:[%s4418_s15 + $0x18] sm:$0xf0]  ;;  %v2792_v28 = vor.u32 %v3909_v21, %v2791_v20  ;;  %v3952_v32 = vld [vmem:[%s5190_s1 + $0xb0] sm:$0xff]  ;;  %v3951_v36 = vld [vmem:[%s5190_s1 + $0xa8] sm:$0xff] }
  0x1d   : > { %4124 = vmatpush.bf16.msra.mxu2 %v3935_v4  ;;  %831 = vmatpush.bf16.msra.mxu0 %v3935_v4  ;;  %v3961_v25 = vld [vmem:[%s5190_s1 + $0xf8] sm:$0xff]  ;;  %v2796_v29 = vor.u32 %v3906_v22, %v2793_v23  ;;  %v3960_v33 = vld [vmem:[%s5190_s1 + $0xf0] sm:$0xff]  ;;  %v3959_v37 = vld [vmem:[%s5190_s1 + $0xe8] sm:$0xff] }
  0x1e   : > { %4132 = vmatpush.bf16.msra.mxu3 %v3943_v5  ;;  %860 = vmatpush.bf16.msra.mxu1 %v3943_v5  ;;  %v3969_v30 = vld [vmem:[%s5190_s1 + $0x138] sm:$0xff]  ;;  %v3968_v34 = vld [vmem:[%s5190_s1 + $0x130] sm:$0xff]  ;;  %v3967_v38 = vld [vmem:[%s5190_s1 + $0x128] sm:$0xff] }
  0x1f   : > { %v3977_v31 = vld [vmem:[%s5190_s1 + $0x178] sm:$0xff]  ;;  %v3976_v35 = vld [vmem:[%s5190_s1 + $0x170] sm:$0xff]  ;;  %v3975_v39 = vld [vmem:[%s5190_s1 + $0x168] sm:$0xff] }
  0x20   : > { %v3950_v40 = vld [vmem:[%s5190_s1 + $0xa0] sm:$0xff]  ;;  %v2863_v44 = vld [vmem:[%s4418_s15 + $0x90] sm:$0xf]  ;;  %v3927_v45 = vld [vmem:[%s4418_s15 + $0xa4] sm:$0xf0] }
  0x21   : > { %4125 = vmatpush.bf16.msra.mxu2 %v3934_v6  ;;  %832 = vmatpush.bf16.msra.mxu0 %v3934_v6  ;;  %v3958_v41 = vld [vmem:[%s5190_s1 + $0xe0] sm:$0xff]  ;;  %v3924_v46 = vld [vmem:[%s4418_s15 + $0x94] sm:$0xf]  ;;  %v2865_v47 = vld [vmem:[%s4418_s15 + $0xa8] sm:$0xf0]  ;;  %v2864_v54 = vor.u32 %v3927_v45, %v2863_v44 }
  0x22   : > { %4133 = vmatpush.bf16.msra.mxu3 %v3942_v7  ;;  %861 = vmatpush.bf16.msra.mxu1 %v3942_v7  ;;  %v3966_v42 = vld [vmem:[%s5190_s1 + $0x120] sm:$0xff]  ;;  %v2815_v48 = vld [vmem:[%s4418_s15 + $0x30] sm:$0xf]  ;;  %v3915_v49 = vld [vmem:[%s4418_s15 + $0x44] sm:$0xf0]  ;;  %v2868_v55 = vor.u32 %v3924_v46, %v2865_v47 }
  0x23   : > { %v3974_v43 = vld [vmem:[%s5190_s1 + $0x160] sm:$0xff]  ;;  %v3912_v50 = vld [vmem:[%s4418_s15 + $0x34] sm:$0xf]  ;;  %v2817_v51 = vld [vmem:[%s4418_s15 + $0x48] sm:$0xf0]  ;;  %v2816_v56 = vor.u32 %v3915_v49, %v2815_v48 }
  0x24   : > { %v3949_v52 = vld [vmem:[%s5190_s1 + $0x98] sm:$0xff]  ;;  %v2820_v57 = vor.u32 %v3912_v50, %v2817_v51  ;;  %v3948_v60 = vld [vmem:[%s5190_s1 + $0x90] sm:$0xff]  ;;  %v3947_v0 = vld [vmem:[%s5190_s1 + $0x88] sm:$0xff] }
  0x25   : > { %4126 = vmatpush.bf16.msra.mxu2 %v3933_v8  ;;  %833 = vmatpush.bf16.msra.mxu0 %v3933_v8  ;;  %v3957_v53 = vld [vmem:[%s5190_s1 + $0xd8] sm:$0xff]  ;;  %v3956_v61 = vld [vmem:[%s5190_s1 + $0xd0] sm:$0xff]  ;;  %v3955_v1 = vld [vmem:[%s5190_s1 + $0xc8] sm:$0xff] }
  0x26   : > { %4134 = vmatpush.bf16.msra.mxu3 %v3941_v9  ;;  %862 = vmatpush.bf16.msra.mxu1 %v3941_v9  ;;  %v3965_v58 = vld [vmem:[%s5190_s1 + $0x118] sm:$0xff]  ;;  %v3964_v62 = vld [vmem:[%s5190_s1 + $0x110] sm:$0xff]  ;;  %v3963_v2 = vld [vmem:[%s5190_s1 + $0x108] sm:$0xff] }
  0x27   : > { %v3973_v59 = vld [vmem:[%s5190_s1 + $0x158] sm:$0xff]  ;;  %v3972_v63 = vld [vmem:[%s5190_s1 + $0x150] sm:$0xff]  ;;  %v3971_v3 = vld [vmem:[%s5190_s1 + $0x148] sm:$0xff] }
  0x28   : > { %v3946_v4 = vld [vmem:[%s5190_s1 + $0x80] sm:$0xff]  ;;  %v2799_v6 = vld [vmem:[%s4418_s15 + $0x8] sm:$0xf]  ;;  %v3908_v16 = vld [vmem:[%s4418_s15 + $0x14] sm:$0xf] }
  0x29   : > { %4127 = vmatpush.bf16.msra.mxu2 %v3932_v10  ;;  %834 = vmatpush.bf16.msra.mxu0 %v3932_v10  ;;  %v3954_v5 = vld [vmem:[%s5190_s1 + $0xc0] sm:$0xff]  ;;  %v4009_v10 = vld [vmem:[%s5190_s1 + $0x1b8] sm:$0xff]  ;;  %v2809_v17 = vld [vmem:[%s4418_s15 + $0x28] sm:$0xf0] }
  0x2a   : > { %4135 = vmatpush.bf16.msra.mxu3 %v3940_v11  ;;  %863 = vmatpush.bf16.msra.mxu1 %v3940_v11  ;;  %v3962_v7 = vld [vmem:[%s5190_s1 + $0x100] sm:$0xff]  ;;  %v4017_v11 = vld [vmem:[%s5190_s1 + $0x1f8] sm:$0xff]  ;;  %v2812_v23 = vor.u32 %v3908_v16, %v2809_v17  ;;  %v4048_v17 = vld [vmem:[%s5190_s1 + $0x2f0] sm:$0xff] }
  0x2b   : > { %v3970_v8 = vld [vmem:[%s5190_s1 + $0x140] sm:$0xff]  ;;  %v4025_v18 = vld [vmem:[%s5190_s1 + $0x238] sm:$0xff] }
  0x2c   : > { %v3910_v9 = vld [vmem:[%s4418_s15 + $0x1c] sm:$0xf0]  ;;  %v4033_v19 = vld [vmem:[%s5190_s1 + $0x278] sm:$0xff] }
  0x2d   : > { %4128 = vmatpush.bf16.msra.mxu2 %v3931_v12  ;;  %835 = vmatpush.bf16.msra.mxu0 %v3931_v12  ;;  %v3907_v12 = vld [vmem:[%s4418_s15 + $0xc] sm:$0xf]  ;;  %v2800_v20 = vor.u32 %v3910_v9, %v2799_v6  ;;  %v4005_v44 = vld [vmem:[%s5190_s1 + $0x198] sm:$0xff]  ;;  %v3920_v6 = vld [vmem:[%s4418_s15 + $0x74] sm:$0xf] }
  0x2e   : > { %4136 = vmatpush.bf16.msra.mxu3 %v3939_v13  ;;  %864 = vmatpush.bf16.msra.mxu1 %v3939_v13  ;;  %v2801_v13 = vld [vmem:[%s4418_s15 + $0x20] sm:$0xf0]  ;;  %v4013_v45 = vld [vmem:[%s5190_s1 + $0x1d8] sm:$0xff] }
  0x2f   : > { %v2804_v21 = vor.u32 %v3907_v12, %v2801_v13  ;;  %v4021_v46 = vld [vmem:[%s5190_s1 + $0x218] sm:$0xff] }
  0x30   : > { %v4029_v47 = vld [vmem:[%s5190_s1 + $0x258] sm:$0xff] }
  0x31   : > { %4129 = vmatpush.bf16.msra.mxu2 %v3930_v14  ;;  %836 = vmatpush.bf16.msra.mxu0 %v3930_v14  ;;  %v2807_v14 = vld [vmem:[%s4418_s15 + $0x10] sm:$0xf]  ;;  %v4041_v12 = vld [vmem:[%s5190_s1 + $0x2b8] sm:$0xff] }
  0x32   : > { %4137 = vmatpush.bf16.msra.mxu3 %v3938_v15  ;;  %865 = vmatpush.bf16.msra.mxu1 %v3938_v15  ;;  %v3911_v15 = vld [vmem:[%s4418_s15 + $0x24] sm:$0xf0]  ;;  %v4049_v13 = vld [vmem:[%s5190_s1 + $0x2f8] sm:$0xff] }
  0x33   : > { %v2808_v22 = vor.u32 %v3911_v15, %v2807_v14  ;;  %v4040_v14 = vld [vmem:[%s5190_s1 + $0x2b0] sm:$0xff]  ;;  %v4081_v15 = vld [vmem:[%s5190_s1 + $0x338] sm:$0xff] }
  0x34   : > { %847 = vmatmul.bf16.vlgmr.msra.gmra.mxu2 %v2840_v26  ;;  %837 = vmatmul.bf16.vlgmr.msra.gmra.mxu0 %v2792_v28  ;;  %v4024_v26 = vld [vmem:[%s5190_s1 + $0x230] sm:$0xff]  ;;  %v4007_v28 = vld [vmem:[%s5190_s1 + $0x1a8] sm:$0xff]  ;;  %v4089_v16 = vld [vmem:[%s5190_s1 + $0x378] sm:$0xff] }
  0x35   : > { %887 = vmatpush.bf16.msrb.mxu2 %v3953_v24  ;;  %876 = vmatmul.bf16.vlgmr.msra.gmra.mxu3 %v2844_v27  ;;  %v4008_v24 = vld [vmem:[%s5190_s1 + $0x1b0] sm:$0xff] }
  0x36   : > { %916 = vmatpush.bf16.msrb.mxu3 %v3961_v25  ;;  %866 = vmatmul.bf16.vlgmr.msra.gmra.mxu1 %v2796_v29  ;;  %v4016_v25 = vld [vmem:[%s5190_s1 + $0x1f0] sm:$0xff]  ;;  %v4015_v29 = vld [vmem:[%s5190_s1 + $0x1e8] sm:$0xff] }
  0x37   : > { %945 = vmatpush.bf16.msrb.mxu0 %v3969_v30  ;;  %974 = vmatpush.bf16.msrb.mxu1 %v3977_v31  ;;  %v4032_v27 = vld [vmem:[%s5190_s1 + $0x270] sm:$0xff]  ;;  %v4023_v30 = vld [vmem:[%s5190_s1 + $0x228] sm:$0xff] }
  0x38   : > { %v4031_v31 = vld [vmem:[%s5190_s1 + $0x268] sm:$0xff] }
  0x39   : > { %888 = vmatpush.bf16.msrb.mxu2 %v3952_v32  ;;  %v4006_v32 = vld [vmem:[%s5190_s1 + $0x1a0] sm:$0xff] }
  0x3a   : > { %917 = vmatpush.bf16.msrb.mxu3 %v3960_v33  ;;  %v4014_v33 = vld [vmem:[%s5190_s1 + $0x1e0] sm:$0xff] }
  0x3b   : > { %946 = vmatpush.bf16.msrb.mxu0 %v3968_v34  ;;  %975 = vmatpush.bf16.msrb.mxu1 %v3976_v35  ;;  %v2823_v34 = vld [vmem:[%s4418_s15 + $0x38] sm:$0xf]  ;;  %v4022_v35 = vld [vmem:[%s5190_s1 + $0x220] sm:$0xff] }
  0x3d   : > { %889 = vmatpush.bf16.msrb.mxu2 %v3951_v36  ;;  %v4030_v36 = vld [vmem:[%s5190_s1 + $0x260] sm:$0xff] }
  0x3e   : > { %918 = vmatpush.bf16.msrb.mxu3 %v3959_v37  ;;  %v3916_v37 = vld [vmem:[%s4418_s15 + $0x4c] sm:$0xf0] }
  0x3f   : > { %947 = vmatpush.bf16.msrb.mxu0 %v3967_v38  ;;  %976 = vmatpush.bf16.msrb.mxu1 %v3975_v39  ;;  %v3913_v38 = vld [vmem:[%s4418_s15 + $0x3c] sm:$0xf]  ;;  %v2825_v39 = vld [vmem:[%s4418_s15 + $0x50] sm:$0xf0]  ;;  %v2824_v48 = vor.u32 %v3916_v37, %v2823_v34  ;;  %v4038_v34 = vld [vmem:[%s5190_s1 + $0x2a0] sm:$0xff] }
  0x40   : > { %v2828_v49 = vor.u32 %v3913_v38, %v2825_v39  ;;  %v4087_v37 = vld [vmem:[%s5190_s1 + $0x368] sm:$0xff]  ;;  %v3199_v38 = vld [vmem:[%s4418_s15 + $0x18] sm:$0xf]  ;;  %v3981_v39 = vld [vmem:[%s4418_s15 + $0x2c] sm:$0xf0] }
  0x41   : > { %890 = vmatpush.bf16.msrb.mxu2 %v3950_v40  ;;  %v2831_v40 = vld [vmem:[%s4418_s15 + $0x40] sm:$0xf] }
  0x42   : > { %919 = vmatpush.bf16.msrb.mxu3 %v3958_v41  ;;  %v3917_v41 = vld [vmem:[%s4418_s15 + $0x54] sm:$0xf0] }
  0x43   : > { %948 = vmatpush.bf16.msrb.mxu0 %v3966_v42  ;;  %977 = vmatpush.bf16.msrb.mxu1 %v3974_v43  ;;  %v3914_v42 = vld [vmem:[%s4418_s15 + $0x44] sm:$0xf]  ;;  %v2833_v43 = vld [vmem:[%s4418_s15 + $0x58] sm:$0xf0]  ;;  %v2832_v50 = vor.u32 %v3917_v41, %v2831_v40  ;;  %v3201_v41 = vld [vmem:[%s4418_s15 + $0x30] sm:$0xf0] }
  0x44   : > { %852 = vmatmul.bf16.gmra.mxu2 %v2864_v54  ;;  %842 = vmatmul.bf16.gmra.mxu0 %v2816_v56  ;;  %v2836_v51 = vor.u32 %v3914_v42, %v2833_v43  ;;  %v4020_v54 = vld [vmem:[%s5190_s1 + $0x210] sm:$0xff]  ;;  %v4003_v56 = vld [vmem:[%s5190_s1 + $0x188] sm:$0xff]  ;;  %v3978_v40 = vld [vmem:[%s4418_s15 + $0x1c] sm:$0xf] }
  0x45   : > { %891 = vmatpush.bf16.msrb.mxu2 %v3949_v52  ;;  %881 = vmatmul.bf16.gmra.mxu3 %v2868_v55  ;;  %v4004_v52 = vld [vmem:[%s5190_s1 + $0x190] sm:$0xff]  ;;  %v3207_v42 = vld [vmem:[%s4418_s15 + $0x20] sm:$0xf]  ;;  %v3982_v43 = vld [vmem:[%s4418_s15 + $0x34] sm:$0xf0] }
  0x46   : > { %920 = vmatpush.bf16.msrb.mxu3 %v3957_v53  ;;  %871 = vmatmul.bf16.gmra.mxu1 %v2820_v57  ;;  %v4012_v53 = vld [vmem:[%s5190_s1 + $0x1d0] sm:$0xff]  ;;  %v4011_v57 = vld [vmem:[%s5190_s1 + $0x1c8] sm:$0xff] }
  0x47   : > { %949 = vmatpush.bf16.msrb.mxu0 %v3965_v58  ;;  %978 = vmatpush.bf16.msrb.mxu1 %v3973_v59  ;;  %v4028_v55 = vld [vmem:[%s5190_s1 + $0x250] sm:$0xff]  ;;  %v4019_v58 = vld [vmem:[%s5190_s1 + $0x208] sm:$0xff] }
  0x48   : > { %v4027_v59 = vld [vmem:[%s5190_s1 + $0x248] sm:$0xff] }
  0x49   : > { %892 = vmatpush.bf16.msrb.mxu2 %v3948_v60  ;;  %v4002_v60 = vld [vmem:[%s5190_s1 + $0x180] sm:$0xff] }
  0x4a   : > { %921 = vmatpush.bf16.msrb.mxu3 %v3956_v61  ;;  %v4010_v61 = vld [vmem:[%s5190_s1 + $0x1c0] sm:$0xff] }
  0x4b   : > { %950 = vmatpush.bf16.msrb.mxu0 %v3964_v62  ;;  %979 = vmatpush.bf16.msrb.mxu1 %v3972_v63  ;;  %v4018_v62 = vld [vmem:[%s5190_s1 + $0x200] sm:$0xff] }
  0x4c   : > { %v4026_v63 = vld [vmem:[%s5190_s1 + $0x240] sm:$0xff] }
  0x4d   : > { %893 = vmatpush.bf16.msrb.mxu2 %v3947_v0  ;;  %v2847_v0 = vld [vmem:[%s4418_s15 + $0x68] sm:$0xf] }
  0x4e   : > { %922 = vmatpush.bf16.msrb.mxu3 %v3955_v1  ;;  %v3922_v1 = vld [vmem:[%s4418_s15 + $0x7c] sm:$0xf0] }
  0x4f   : > { %951 = vmatpush.bf16.msrb.mxu0 %v3963_v2  ;;  %980 = vmatpush.bf16.msrb.mxu1 %v3971_v3  ;;  %v3919_v2 = vld [vmem:[%s4418_s15 + $0x6c] sm:$0xf]  ;;  %v2849_v3 = vld [vmem:[%s4418_s15 + $0x80] sm:$0xf0] }
  0x50   : > { %v2852_v9 = vor.u32 %v3919_v2, %v2849_v3  ;;  %v4085_v3 = vld [vmem:[%s5190_s1 + $0x358] sm:$0xff] }
  0x51   : > { %894 = vmatpush.bf16.msrb.mxu2 %v3946_v4  ;;  %v2855_v4 = vld [vmem:[%s4418_s15 + $0x70] sm:$0xf] }
  0x52   : > { %923 = vmatpush.bf16.msrb.mxu3 %v3954_v5  ;;  %v3923_v5 = vld [vmem:[%s4418_s15 + $0x84] sm:$0xf0] }
  0x53   : > { %952 = vmatpush.bf16.msrb.mxu0 %v3962_v7  ;;  %981 = vmatpush.bf16.msrb.mxu1 %v3970_v8  ;;  %v2857_v7 = vld [vmem:[%s4418_s15 + $0x88] sm:$0xf0]  ;;  %v2848_v8 = vor.u32 %v3922_v1, %v2847_v0 }
  0x54   : > { %895 = vmatmul.bf16.vlgmr.msrb.gmra.mxu2 %v2800_v20  ;;  %v3925_v20 = vld [vmem:[%s4418_s15 + $0x9c] sm:$0xf]  ;;  %v3233_v0 = vld [vmem:[%s4418_s15 + $0x68] sm:$0xf0] }
  0x55   : > { %1555 = vmatpush.bf16.msra.mxu2 %v4009_v10  ;;  %924 = vmatmul.bf16.vlgmr.msrb.gmra.mxu3 %v2804_v21  ;;  %v2856_v10 = vor.u32 %v3923_v5, %v2855_v4  ;;  %v2873_v21 = vld [vmem:[%s4418_s15 + $0xb0] sm:$0xf0] }
  0x56   : > { %1584 = vmatpush.bf16.msra.mxu3 %v4017_v11  ;;  %953 = vmatmul.bf16.vlgmr.msrb.gmra.mxu0 %v2808_v22  ;;  %v2860_v11 = vor.u32 %v3920_v6, %v2857_v7  ;;  %v2879_v22 = vld [vmem:[%s4418_s15 + $0xa0] sm:$0xf]  ;;  %v4035_v6 = vld [vmem:[%s5190_s1 + $0x288] sm:$0xff] }
  0x57   : > { %1613 = vmatpush.bf16.msra.mxu0 %v4025_v18  ;;  %1642 = vmatpush.bf16.msra.mxu1 %v4033_v19  ;;  %v2871_v18 = vld [vmem:[%s4418_s15 + $0x98] sm:$0xf]  ;;  %v3928_v19 = vld [vmem:[%s4418_s15 + $0xac] sm:$0xf0]  ;;  %v4043_v7 = vld [vmem:[%s5190_s1 + $0x2c8] sm:$0xff] }
  0x58   : > { %982 = vmatmul.bf16.vlgmr.msrb.gmra.mxu1 %v2812_v23  ;;  %v3929_v23 = vld [vmem:[%s4418_s15 + $0xb4] sm:$0xf0] }
  0x59   : > { %1556 = vmatpush.bf16.msra.mxu2 %v4008_v24  ;;  %v3926_v24 = vld [vmem:[%s4418_s15 + $0xa4] sm:$0xf] }
  0x5a   : > { %1585 = vmatpush.bf16.msra.mxu3 %v4016_v25  ;;  %v2881_v25 = vld [vmem:[%s4418_s15 + $0xb8] sm:$0xf0] }
  0x5b   : > { %1614 = vmatpush.bf16.msra.mxu0 %v4024_v26  ;;  %1643 = vmatpush.bf16.msra.mxu1 %v4032_v27  ;;  %v2872_v26 = vor.u32 %v3928_v19, %v2871_v18  ;;  %v2876_v27 = vor.u32 %v3925_v20, %v2873_v21  ;;  %v4083_v18 = vld [vmem:[%s5190_s1 + $0x348] sm:$0xff]  ;;  %v3994_v19 = vld [vmem:[%s4418_s15 + $0x94] sm:$0xf0]  ;;  %v3991_v20 = vld [vmem:[%s4418_s15 + $0x84] sm:$0xf] }
  0x5c   : > { %v3257_v21 = vld [vmem:[%s4418_s15 + $0x98] sm:$0xf0] }
  0x5d   : > { %1557 = vmatpush.bf16.msra.mxu2 %v4007_v28  ;;  %v2880_v28 = vor.u32 %v3929_v23, %v2879_v22 }
  0x5e   : > { %1586 = vmatpush.bf16.msra.mxu3 %v4015_v29  ;;  %v2884_v29 = vor.u32 %v3926_v24, %v2881_v25  ;;  %v3260_v25 = vor.u32 %v3991_v20, %v3257_v21 }
  0x5f   : > { %1615 = vmatpush.bf16.msra.mxu0 %v4023_v30  ;;  %1644 = vmatpush.bf16.msra.mxu1 %v4031_v31  ;;  %v4039_v30 = vld [vmem:[%s5190_s1 + $0x2a8] sm:$0xff] }
  0x60   : > { %v4047_v31 = vld [vmem:[%s5190_s1 + $0x2e8] sm:$0xff] }
  0x61   : > { %1558 = vmatpush.bf16.msra.mxu2 %v4006_v32  ;;  %v4080_v32 = vld [vmem:[%s5190_s1 + $0x330] sm:$0xff] }
  0x62   : > { %1587 = vmatpush.bf16.msra.mxu3 %v4014_v33  ;;  %v4088_v33 = vld [vmem:[%s5190_s1 + $0x370] sm:$0xff] }
  0x63   : > { %1616 = vmatpush.bf16.msra.mxu0 %v4022_v35  ;;  %1645 = vmatpush.bf16.msra.mxu1 %v4030_v36  ;;  %v4046_v35 = vld [vmem:[%s5190_s1 + $0x2e0] sm:$0xff]  ;;  %v4079_v36 = vld [vmem:[%s5190_s1 + $0x328] sm:$0xff] }
  0x64   : > { %900 = vmatmul.bf16.gmra.mxu2 %v2824_v48  ;;  %v3208_v48 = vor.u32 %v3982_v43, %v3207_v42  ;;  %v4104_v42 = vld [vmem:[%s5190_s1 + $0x3f0] sm:$0xff]  ;;  %v4113_v43 = vld [vmem:[%s5190_s1 + $0x438] sm:$0xff] }
  0x65   : > { %1559 = vmatpush.bf16.msra.mxu2 %v4005_v44  ;;  %929 = vmatmul.bf16.gmra.mxu3 %v2828_v49  ;;  %v3979_v44 = vld [vmem:[%s4418_s15 + $0x24] sm:$0xf] }
  0x66   : > { %1588 = vmatpush.bf16.msra.mxu3 %v4013_v45  ;;  %958 = vmatmul.bf16.gmra.mxu0 %v2832_v50  ;;  %v3209_v45 = vld [vmem:[%s4418_s15 + $0x38] sm:$0xf0] }
  0x67   : > { %1617 = vmatpush.bf16.msra.mxu0 %v4021_v46  ;;  %1646 = vmatpush.bf16.msra.mxu1 %v4029_v47  ;;  %v3200_v46 = vor.u32 %v3981_v39, %v3199_v38  ;;  %v3204_v47 = vor.u32 %v3978_v40, %v3201_v41  ;;  %v3212_v49 = vor.u32 %v3979_v44, %v3209_v45  ;;  %v4037_v50 = vld [vmem:[%s5190_s1 + $0x298] sm:$0xff]  ;;  %v3271_v39 = vld [vmem:[%s4418_s15 + $0xa8] sm:$0xf]  ;;  %v3999_v40 = vld [vmem:[%s4418_s15 + $0xbc] sm:$0xf0] }
  0x68   : > { %987 = vmatmul.bf16.gmra.mxu1 %v2836_v51  ;;  %v4045_v51 = vld [vmem:[%s5190_s1 + $0x2d8] sm:$0xff]  ;;  %v4096_v41 = vld [vmem:[%s5190_s1 + $0x3b0] sm:$0xff]  ;;  %v3996_v44 = vld [vmem:[%s4418_s15 + $0xac] sm:$0xf] }
  0x69   : > { %1560 = vmatpush.bf16.msra.mxu2 %v4004_v52  ;;  %v4078_v52 = vld [vmem:[%s5190_s1 + $0x320] sm:$0xff] }
  0x6a   : > { %1589 = vmatpush.bf16.msra.mxu3 %v4012_v53  ;;  %v4086_v53 = vld [vmem:[%s5190_s1 + $0x360] sm:$0xff] }
  0x6b   : > { %1618 = vmatpush.bf16.msra.mxu0 %v4020_v54  ;;  %1647 = vmatpush.bf16.msra.mxu1 %v4028_v55  ;;  %v4036_v54 = vld [vmem:[%s5190_s1 + $0x290] sm:$0xff]  ;;  %v3273_v45 = vld [vmem:[%s4418_s15 + $0xc0] sm:$0xf0] }
  0x6c   : > { %v4044_v55 = vld [vmem:[%s5190_s1 + $0x2d0] sm:$0xff] }
  0x6d   : > { %1561 = vmatpush.bf16.msra.mxu2 %v4003_v56  ;;  %v4077_v56 = vld [vmem:[%s5190_s1 + $0x318] sm:$0xff] }
  0x6e   : > { %1590 = vmatpush.bf16.msra.mxu3 %v4011_v57  ;;  %v3223_v57 = vld [vmem:[%s4418_s15 + $0x48] sm:$0xf] }
  0x6f   : > { %1619 = vmatpush.bf16.msra.mxu0 %v4019_v58  ;;  %1648 = vmatpush.bf16.msra.mxu1 %v4027_v59  ;;  %v3987_v58 = vld [vmem:[%s4418_s15 + $0x5c] sm:$0xf0]  ;;  %v3984_v59 = vld [vmem:[%s4418_s15 + $0x4c] sm:$0xf] }
  0x70   : > { %v3224_v1 = vor.u32 %v3987_v58, %v3223_v57 }
  0x71   : > { %1562 = vmatpush.bf16.msra.mxu2 %v4002_v60  ;;  %v3225_v60 = vld [vmem:[%s4418_s15 + $0x60] sm:$0xf0] }
  0x72   : > { %1591 = vmatpush.bf16.msra.mxu3 %v4010_v61  ;;  %v3231_v61 = vld [vmem:[%s4418_s15 + $0x50] sm:$0xf]  ;;  %v3228_v2 = vor.u32 %v3984_v59, %v3225_v60  ;;  %v4121_v60 = vld [vmem:[%s5190_s1 + $0x478] sm:$0xff] }
  0x73   : > { %1620 = vmatpush.bf16.msra.mxu0 %v4018_v62  ;;  %1649 = vmatpush.bf16.msra.mxu1 %v4026_v63  ;;  %v3988_v62 = vld [vmem:[%s4418_s15 + $0x64] sm:$0xf0]  ;;  %v3985_v63 = vld [vmem:[%s4418_s15 + $0x54] sm:$0xf] }
  0x74   : > { %905 = vmatmul.bf16.gmra.mxu2 %v2848_v8  ;;  %v3232_v4 = vor.u32 %v3988_v62, %v3231_v61  ;;  %v3236_v5 = vor.u32 %v3985_v63, %v3233_v0  ;;  %v4076_v8 = vld [vmem:[%s5190_s1 + $0x310] sm:$0xff]  ;;  %v4095_v61 = vld [vmem:[%s5190_s1 + $0x3a8] sm:$0xff] }
  0x75   : > { %934 = vmatmul.bf16.gmra.mxu3 %v2852_v9  ;;  %1671 = vmatpush.bf16.msrb.mxu2 %v4041_v12  ;;  %v4084_v9 = vld [vmem:[%s5190_s1 + $0x350] sm:$0xff]  ;;  %v4075_v12 = vld [vmem:[%s5190_s1 + $0x308] sm:$0xff] }
  0x76   : > { %963 = vmatmul.bf16.gmra.mxu0 %v2856_v10  ;;  %1700 = vmatpush.bf16.msrb.mxu3 %v4049_v13  ;;  %v4034_v10 = vld [vmem:[%s5190_s1 + $0x280] sm:$0xff]  ;;  %v3247_v13 = vld [vmem:[%s4418_s15 + $0x78] sm:$0xf]  ;;  %v4103_v62 = vld [vmem:[%s5190_s1 + $0x3e8] sm:$0xff] }
  0x77   : > { %2289 = vmatpush.bf16.msrb.mxu0 %v4081_v15  ;;  %2318 = vmatpush.bf16.msrb.mxu1 %v4089_v16  ;;  %v3990_v15 = vld [vmem:[%s4418_s15 + $0x7c] sm:$0xf]  ;;  %v3249_v16 = vld [vmem:[%s4418_s15 + $0x90] sm:$0xf0] }
  0x78   : > { %992 = vmatmul.bf16.gmra.mxu1 %v2860_v11  ;;  %v4042_v11 = vld [vmem:[%s5190_s1 + $0x2c0] sm:$0xff]  ;;  %v3252_v23 = vor.u32 %v3990_v15, %v3249_v16  ;;  %v4112_v63 = vld [vmem:[%s5190_s1 + $0x430] sm:$0xff]  ;;  %v4053_v15 = vld [vmem:[%s4418_s15 + $0x44] sm:$0xf0] }
  0x79   : > { %1672 = vmatpush.bf16.msrb.mxu2 %v4040_v14  ;;  %v3993_v14 = vld [vmem:[%s4418_s15 + $0x8c] sm:$0xf0]  ;;  %v4050_v16 = vld [vmem:[%s4418_s15 + $0x34] sm:$0xf] }
  0x7a   : > { %1701 = vmatpush.bf16.msrb.mxu3 %v4048_v17  ;;  %v3255_v17 = vld [vmem:[%s4418_s15 + $0x80] sm:$0xf]  ;;  %v3248_v22 = vor.u32 %v3993_v14, %v3247_v13  ;;  %v3607_v13 = vld [vmem:[%s4418_s15 + $0x30] sm:$0xf]  ;;  %v4111_v14 = vld [vmem:[%s5190_s1 + $0x428] sm:$0xff] }
  0x7b   : > { %2290 = vmatpush.bf16.msrb.mxu0 %v4080_v32  ;;  %2319 = vmatpush.bf16.msrb.mxu1 %v4088_v33  ;;  %v3256_v24 = vor.u32 %v3994_v19, %v3255_v17  ;;  %v4105_v32 = vld [vmem:[%s5190_s1 + $0x3f8] sm:$0xff]  ;;  %v3609_v17 = vld [vmem:[%s4418_s15 + $0x48] sm:$0xf0] }
  0x7d   : > { %1673 = vmatpush.bf16.msrb.mxu2 %v4039_v30 }
  0x7e   : > { %1702 = vmatpush.bf16.msrb.mxu3 %v4047_v31  ;;  %v4097_v31 = vld [vmem:[%s5190_s1 + $0x3b8] sm:$0xff] }
  0x7f   : > { %2291 = vmatpush.bf16.msrb.mxu0 %v4079_v36  ;;  %2320 = vmatpush.bf16.msrb.mxu1 %v4087_v37 }
  0x81   : > { %1674 = vmatpush.bf16.msrb.mxu2 %v4038_v34 }
  0x82   : > { %1703 = vmatpush.bf16.msrb.mxu3 %v4046_v35 }
  0x83   : > { %2292 = vmatpush.bf16.msrb.mxu0 %v4078_v52  ;;  %2321 = vmatpush.bf16.msrb.mxu1 %v4086_v53  ;;  %v3272_v53 = vor.u32 %v3999_v40, %v3271_v39  ;;  %v3239_v40 = vld [vmem:[%s4418_s15 + $0x58] sm:$0xf] }
  0x84   : > { %910 = vmatmul.bf16.gmra.mxu2 %v2872_v26  ;;  %v4074_v26 = vld [vmem:[%s5190_s1 + $0x300] sm:$0xff] }
  0x85   : > { %939 = vmatmul.bf16.gmra.mxu3 %v2876_v27  ;;  %1675 = vmatpush.bf16.msrb.mxu2 %v4037_v50  ;;  %v4082_v27 = vld [vmem:[%s5190_s1 + $0x340] sm:$0xff] }
  0x86   : > { %968 = vmatmul.bf16.gmra.mxu0 %v2880_v28  ;;  %1704 = vmatpush.bf16.msrb.mxu3 %v4045_v51 }
  0x87   : > { %2293 = vmatpush.bf16.msrb.mxu0 %v4077_v56  ;;  %2322 = vmatpush.bf16.msrb.mxu1 %v4085_v3 }
  0x88   : > { %997 = vmatmul.bf16.gmra.mxu1 %v2884_v29 }
  0x89   : > { %1676 = vmatpush.bf16.msrb.mxu2 %v4036_v54  ;;  %v3276_v54 = vor.u32 %v3996_v44, %v3273_v45  ;;  %v4118_v44 = vld [vmem:[%s5190_s1 + $0x460] sm:$0xff]  ;;  %v4092_v45 = vld [vmem:[%s5190_s1 + $0x390] sm:$0xff] }
  0x8a   : > { %1705 = vmatpush.bf16.msrb.mxu3 %v4044_v55 }
  0x8b   : > { %2294 = vmatpush.bf16.msrb.mxu0 %v4076_v8  ;;  %2323 = vmatpush.bf16.msrb.mxu1 %v4084_v9  ;;  %v3980_v8 = vld [vmem:[%s4418_s15 + $0x2c] sm:$0xf]  ;;  %v4120_v9 = vld [vmem:[%s5190_s1 + $0x470] sm:$0xff] }
  0x8d   : > { %1677 = vmatpush.bf16.msrb.mxu2 %v4035_v6  ;;  %v3215_v6 = vld [vmem:[%s4418_s15 + $0x28] sm:$0xf] }
  0x8e   : > { %1706 = vmatpush.bf16.msrb.mxu3 %v4043_v7  ;;  %v3983_v7 = vld [vmem:[%s4418_s15 + $0x3c] sm:$0xf0] }
  0x8f   : > { %2295 = vmatpush.bf16.msrb.mxu0 %v4075_v12  ;;  %2324 = vmatpush.bf16.msrb.mxu1 %v4083_v18  ;;  %v3217_v12 = vld [vmem:[%s4418_s15 + $0x40] sm:$0xf0]  ;;  %v3216_v21 = vor.u32 %v3983_v7, %v3215_v6  ;;  %v4108_v6 = vld [vmem:[%s5190_s1 + $0x410] sm:$0xff] }
  0x91   : > { %1678 = vmatpush.bf16.msrb.mxu2 %v4034_v10  ;;  %v4094_v10 = vld [vmem:[%s5190_s1 + $0x3a0] sm:$0xff] }
  0x92   : > { %1707 = vmatpush.bf16.msrb.mxu3 %v4042_v11  ;;  %v4102_v11 = vld [vmem:[%s5190_s1 + $0x3e0] sm:$0xff] }
  0x93   : > { %2296 = vmatpush.bf16.msrb.mxu0 %v4074_v26  ;;  %2325 = vmatpush.bf16.msrb.mxu1 %v4082_v27  ;;  %v4119_v27 = vld [vmem:[%s5190_s1 + $0x468] sm:$0xff] }
  0x94   : > { %1563 = vmatmul.bf16.vlgmr.msra.gmra.mxu2 %v3200_v46  ;;  %v3279_v46 = vld [vmem:[%s4418_s15 + $0xb0] sm:$0xf] }
  0x95   : > { %1592 = vmatmul.bf16.vlgmr.msra.gmra.mxu3 %v3204_v47  ;;  %2347 = vmatpush.bf16.msra.mxu2 %v4097_v31  ;;  %v4000_v47 = vld [vmem:[%s4418_s15 + $0xc4] sm:$0xf0]  ;;  %v4110_v31 = vld [vmem:[%s5190_s1 + $0x420] sm:$0xff] }
  0x96   : > { %1621 = vmatmul.bf16.vlgmr.msra.gmra.mxu0 %v3208_v48  ;;  %2376 = vmatpush.bf16.msra.mxu3 %v4105_v32  ;;  %v3997_v48 = vld [vmem:[%s4418_s15 + $0xb4] sm:$0xf]  ;;  %v3280_v55 = vor.u32 %v4000_v47, %v3279_v46  ;;  %v3631_v47 = vld [vmem:[%s4418_s15 + $0x60] sm:$0xf] }
  0x97   : > { %2405 = vmatpush.bf16.msra.mxu0 %v4113_v43  ;;  %v3241_v46 = vld [vmem:[%s4418_s15 + $0x70] sm:$0xf0] }
  0x98   : > { %1650 = vmatmul.bf16.vlgmr.msra.gmra.mxu1 %v3212_v49  ;;  %v3281_v49 = vld [vmem:[%s4418_s15 + $0xc8] sm:$0xf0] }
  0x99   : > { %2348 = vmatpush.bf16.msra.mxu2 %v4096_v41  ;;  %v3284_v56 = vor.u32 %v3997_v48, %v3281_v49  ;;  %2434 = vmatpush.bf16.msra.mxu1 %v4121_v60  ;;  %v3989_v41 = vld [vmem:[%s4418_s15 + $0x6c] sm:$0xf0]  ;;  %v4109_v48 = vld [vmem:[%s5190_s1 + $0x418] sm:$0xff] }
  0x9a   : > { %2377 = vmatpush.bf16.msra.mxu3 %v4104_v42  ;;  %v3986_v42 = vld [vmem:[%s4418_s15 + $0x5c] sm:$0xf]  ;;  %v4059_v49 = vld [vmem:[%s4418_s15 + $0x74] sm:$0xf0] }
  0x9b   : > { %2406 = vmatpush.bf16.msra.mxu0 %v4112_v63  ;;  %v3632_v60 = vor.u32 %v4059_v49, %v3631_v47 }
  0x9d   : > { %2349 = vmatpush.bf16.msra.mxu2 %v4095_v61  ;;  %2435 = vmatpush.bf16.msra.mxu1 %v4120_v9 }
  0x9e   : > { %2378 = vmatpush.bf16.msra.mxu3 %v4103_v62 }
  0x9f   : > { %2407 = vmatpush.bf16.msra.mxu0 %v4111_v14  ;;  %v3263_v14 = vld [vmem:[%s4418_s15 + $0x88] sm:$0xf] }
  0xa1   : > { %2350 = vmatpush.bf16.msra.mxu2 %v4094_v10  ;;  %2436 = vmatpush.bf16.msra.mxu1 %v4119_v27 }
  0xa2   : > { %2379 = vmatpush.bf16.msra.mxu3 %v4102_v11 }
  0xa3   : > { %2408 = vmatpush.bf16.msra.mxu0 %v4110_v31  ;;  %v4115_v31 = vld [vmem:[%s5190_s1 + $0x448] sm:$0xff] }
  0xa4   : > { %1568 = vmatmul.bf16.gmra.mxu2 %v3224_v1 }
  0xa5   : > { %1597 = vmatmul.bf16.gmra.mxu3 %v3228_v2  ;;  %2437 = vmatpush.bf16.msra.mxu1 %v4118_v44 }
  0xa6   : > { %1626 = vmatmul.bf16.gmra.mxu0 %v3232_v4 }
  0xa7   : > { %2409 = vmatpush.bf16.msra.mxu0 %v4109_v48 }
  0xa8   : > { %1655 = vmatmul.bf16.gmra.mxu1 %v3236_v5 }
  0xab   : > { %2410 = vmatpush.bf16.msra.mxu0 %v4108_v6 }
  0xb1   : > { %v838_v28 = vpop.f32.mrf.mxu0 }
  0xb3   : > { %v867_v29 = vpop.f32.mrf.mxu1 }
  0xb4   : > { %v4786_v30 = vadd.f32 %v867_v29, %v838_v28  ;;  %1573 = vmatmul.bf16.gmra.mxu2 %v3248_v22  ;;  %v3220_v22 = vor.u32 %v3980_v8, %v3217_v12  ;;  %v4093_v28 = vld [vmem:[%s5190_s1 + $0x398] sm:$0xff] }
  0xb5   : > { %1602 = vmatmul.bf16.gmra.mxu3 %v3252_v23  ;;  %v3608_v23 = vor.u32 %v4053_v15, %v3607_v13  ;;  %v4101_v29 = vld [vmem:[%s5190_s1 + $0x3d8] sm:$0xff]  ;;  %2351 = vmatpush.bf16.msra.mxu2 %v4093_v28  ;;  %v3995_v15 = vld [vmem:[%s4418_s15 + $0x9c] sm:$0xf0] }
  0xb6   : > { %1631 = vmatmul.bf16.gmra.mxu0 %v3256_v24  ;;  %v3612_v24 = vor.u32 %v4050_v16, %v3609_v17  ;;  %2380 = vmatpush.bf16.msra.mxu3 %v4101_v29  ;;  %v4116_v16 = vld [vmem:[%s5190_s1 + $0x450] sm:$0xff] }
  0xb7   : > { %v848_v33 = vpop.f32.mrf.mxu2 }
  0xb8   : > { %1660 = vmatmul.bf16.gmra.mxu1 %v3260_v25  ;;  %v877_v34 = vpop.f32.mrf.mxu3 }
  0xb9   : > { %v4794_v35 = vadd.f32 %v877_v34, %v848_v33  ;;  %v840_v36 = vpop.f32.mrf.mxu0  ;;  %2352 = vmatpush.bf16.msra.mxu2 %v4092_v45 }
  0xbb   : > { %v869_v37 = vpop.f32.mrf.mxu1 }
  0xbc   : > { %v4796_v38 = vadd.f32 %v869_v37, %v840_v36 }
  0xbf   : > { %v850_v50 = vpop.f32.mrf.mxu2 }
  0xc0   : > { %v879_v51 = vpop.f32.mrf.mxu3 }
  0xc1   : > { %v4815_v52 = vadd.f32 %v879_v51, %v850_v50  ;;  %v843_v57 = vpop.f32.mrf.mxu0  ;;  %v4056_v50 = vld [vmem:[%s4418_s15 + $0x64] sm:$0xf]  ;;  %v3633_v51 = vld [vmem:[%s4418_s15 + $0x78] sm:$0xf0] }
  0xc2   : > { %v3636_v61 = vor.u32 %v4056_v50, %v3633_v51  ;;  %v3287_v51 = vld [vmem:[%s4418_s15 + $0xb8] sm:$0xf] }
  0xc3   : > { %v872_v58 = vpop.f32.mrf.mxu1 }
  0xc4   : > { %v4817_v59 = vadd.f32 %v872_v58, %v843_v57  ;;  %1578 = vmatmul.bf16.gmra.mxu2 %v3272_v53  ;;  %v3240_v57 = vor.u32 %v3989_v41, %v3239_v40  ;;  %v3244_v58 = vor.u32 %v3986_v42, %v3241_v46 }
  0xc5   : > { %1607 = vmatmul.bf16.gmra.mxu3 %v3276_v54 }
  0xc6   : > { %1636 = vmatmul.bf16.gmra.mxu0 %v3280_v55 }
  0xc7   : > { %v853_v0 = vpop.f32.mrf.mxu2 }
  0xc8   : > { %1665 = vmatmul.bf16.gmra.mxu1 %v3284_v56  ;;  %v882_v1 = vpop.f32.mrf.mxu3 }
  0xc9   : > { %v4831_v2 = vadd.f32 %v882_v1, %v853_v0  ;;  %v845_v3 = vpop.f32.mrf.mxu0 }
  0xcb   : > { %v874_v4 = vpop.f32.mrf.mxu1 }
  0xcc   : > { %v4833_v5 = vadd.f32 %v874_v4, %v845_v3  ;;  %v4117_v3 = vld [vmem:[%s5190_s1 + $0x458] sm:$0xff]  ;;  %v4091_v4 = vld [vmem:[%s5190_s1 + $0x388] sm:$0xff] }
  0xcd   : > { %2438 = vmatpush.bf16.msra.mxu1 %v4117_v3  ;;  %2353 = vmatpush.bf16.msra.mxu2 %v4091_v4 }
  0xcf   : > { %v855_v18 = vpop.f32.mrf.mxu2 }
  0xd0   : > { %v884_v19 = vpop.f32.mrf.mxu3 }
  0xd1   : > { %v4855_v20 = vadd.f32 %v884_v19, %v855_v18  ;;  %v4090_v18 = vld [vmem:[%s5190_s1 + $0x380] sm:$0xff]  ;;  %v4107_v19 = vld [vmem:[%s5190_s1 + $0x408] sm:$0xff]  ;;  %2439 = vmatpush.bf16.msra.mxu1 %v4116_v16 }
  0xd2   : > { %2354 = vmatpush.bf16.msra.mxu2 %v4090_v18  ;;  %2411 = vmatpush.bf16.msra.mxu0 %v4107_v19  ;;  %v3615_v18 = vld [vmem:[%s4418_s15 + $0x38] sm:$0xf]  ;;  %v4051_v19 = vld [vmem:[%s4418_s15 + $0x3c] sm:$0xf] }
  0xd3   : > { %v954_v25 = vpop.f32.mrf.mxu0 }
  0xd4   : > { %1679 = vmatmul.bf16.vlgmr.msrb.gmra.mxu2 %v3216_v21  ;;  %v3992_v21 = vld [vmem:[%s4418_s15 + $0x8c] sm:$0xf] }
  0xd5   : > { %v983_v26 = vpop.f32.mrf.mxu1  ;;  %1708 = vmatmul.bf16.vlgmr.msrb.gmra.mxu3 %v3220_v22  ;;  %v3265_v22 = vld [vmem:[%s4418_s15 + $0xa0] sm:$0xf0]  ;;  %2440 = vmatpush.bf16.msra.mxu1 %v4115_v31 }
  0xd6   : > { %2297 = vmatmul.bf16.vlgmr.msrb.gmra.mxu0 %v3608_v23  ;;  %v3655_v23 = vld [vmem:[%s4418_s15 + $0x90] sm:$0xf] }
  0xd7   : > { %v896_v32 = vpop.f32.mrf.mxu2 }
  0xd8   : > { %2326 = vmatmul.bf16.vlgmr.msrb.gmra.mxu1 %v3612_v24  ;;  %v925_v33 = vpop.f32.mrf.mxu3  ;;  %v897_v34 = vadd.f32 %v896_v32, %v4786_v30  ;;  %v4100_v30 = vld [vmem:[%s5190_s1 + $0x3d0] sm:$0xff]  ;;  %v4065_v24 = vld [vmem:[%s4418_s15 + $0xa4] sm:$0xf0] }
  0xd9   : > { %2381 = vmatpush.bf16.msra.mxu3 %v4100_v30 }
  0xda   : > { %v926_v36 = vadd.f32 %v925_v33, %v897_v34  ;;  %v3264_v33 = vor.u32 %v3995_v15, %v3263_v14  ;;  %v3268_v34 = vor.u32 %v3992_v21, %v3265_v22  ;;  %v3617_v21 = vld [vmem:[%s4418_s15 + $0x50] sm:$0xf0]  ;;  %v3623_v22 = vld [vmem:[%s4418_s15 + $0x40] sm:$0xf] }
  0xdb   : > { %v956_v37 = vpop.f32.mrf.mxu0 }
  0xdc   : > { %v955_v43 = vadd.f32 %v954_v25, %v926_v36  ;;  %v4062_v25 = vld [vmem:[%s4418_s15 + $0x94] sm:$0xf]  ;;  %v3656_v36 = vor.u32 %v4065_v24, %v3655_v23  ;;  %v4055_v23 = vld [vmem:[%s4418_s15 + $0x54] sm:$0xf0]  ;;  %v4052_v24 = vld [vmem:[%s4418_s15 + $0x44] sm:$0xf] }
  0xdd   : > { %v985_v39 = vpop.f32.mrf.mxu1 }
  0xde   : > { %v4890_v53 = vadd.f32 %v983_v26, %v955_v43  ;;  %v3657_v26 = vld [vmem:[%s4418_s15 + $0xa8] sm:$0xf0]  ;;  %v4114_v43 = vld [vmem:[%s5190_s1 + $0x440] sm:$0xff] }
  0xdf   : > { %v898_v54 = vpop.f32.mrf.mxu2  ;;  %2441 = vmatpush.bf16.msra.mxu1 %v4114_v43 }
  0xe0   : > { %v927_v55 = vpop.f32.mrf.mxu3  ;;  %v899_v56 = vadd.f32 %v898_v54, %v4796_v38  ;;  %v4099_v38 = vld [vmem:[%s5190_s1 + $0x3c8] sm:$0xff]  ;;  %v4001_v54 = vld [vmem:[%s4418_s15 + $0xcc] sm:$0xf0] }
  0xe1   : > { %2382 = vmatpush.bf16.msra.mxu3 %v4099_v38  ;;  %v3288_v3 = vor.u32 %v4001_v54, %v3287_v51  ;;  %v3647_v51 = vld [vmem:[%s4418_s15 + $0x70] sm:$0xf]  ;;  %v4061_v54 = vld [vmem:[%s4418_s15 + $0x84] sm:$0xf0] }
  0xe2   : > { %v928_v62 = vadd.f32 %v927_v55, %v899_v56  ;;  %v3998_v55 = vld [vmem:[%s4418_s15 + $0xbc] sm:$0xf]  ;;  %v3289_v56 = vld [vmem:[%s4418_s15 + $0xd0] sm:$0xf0] }
  0xe3   : > { %v959_v63 = vpop.f32.mrf.mxu0 }
  0xe4   : > { %v957_v1 = vadd.f32 %v956_v37, %v928_v62  ;;  %1684 = vmatmul.bf16.gmra.mxu2 %v3240_v57  ;;  %v3660_v37 = vor.u32 %v4062_v25, %v3657_v26  ;;  %v3679_v57 = vld [vmem:[%s4418_s15 + $0xc0] sm:$0xf]  ;;  %v3625_v25 = vld [vmem:[%s4418_s15 + $0x58] sm:$0xf0] }
  0xe5   : > { %v988_v0 = vpop.f32.mrf.mxu1  ;;  %1713 = vmatmul.bf16.gmra.mxu3 %v3244_v58  ;;  %v4071_v58 = vld [vmem:[%s4418_s15 + $0xd4] sm:$0xf0] }
  0xe6   : > { %2302 = vmatmul.bf16.gmra.mxu0 %v3632_v60  ;;  %v4905_v7 = vadd.f32 %v985_v39, %v957_v1  ;;  %v4106_v39 = vld [vmem:[%s5190_s1 + $0x400] sm:$0xff]  ;;  %v3680_v4 = vor.u32 %v4071_v58, %v3679_v57 }
  0xe7   : > { %v901_v8 = vpop.f32.mrf.mxu2  ;;  %2412 = vmatpush.bf16.msra.mxu0 %v4106_v39  ;;  %v4068_v60 = vld [vmem:[%s4418_s15 + $0xc4] sm:$0xf] }
  0xe8   : > { %2331 = vmatmul.bf16.gmra.mxu1 %v3636_v61  ;;  %v930_v9 = vpop.f32.mrf.mxu3  ;;  %v902_v10 = vadd.f32 %v901_v8, %v4817_v59  ;;  %v4098_v59 = vld [vmem:[%s5190_s1 + $0x3c0] sm:$0xff]  ;;  %v3681_v61 = vld [vmem:[%s4418_s15 + $0xd8] sm:$0xf0] }
  0xe9   : > { %2383 = vmatpush.bf16.msra.mxu3 %v4098_v59  ;;  %v3684_v38 = vor.u32 %v4068_v60, %v3681_v61  ;;  %v4054_v59 = vld [vmem:[%s4418_s15 + $0x4c] sm:$0xf0] }
  0xea   : > { %v931_v11 = vadd.f32 %v930_v9, %v902_v10 }
  0xeb   : > { %v961_v12 = vpop.f32.mrf.mxu0 }
  0xec   : > { %v960_v17 = vadd.f32 %v959_v63, %v931_v11 }
  0xed   : > { %v990_v13 = vpop.f32.mrf.mxu1 }
  0xee   : > { %v4928_v27 = vadd.f32 %v988_v0, %v960_v17 }
  0xef   : > { %v903_v28 = vpop.f32.mrf.mxu2 }
  0xf0   : > { %v932_v29 = vpop.f32.mrf.mxu3  ;;  %v904_v32 = vadd.f32 %v903_v28, %v4833_v5 }
  0xf2   : > { %v933_v40 = vadd.f32 %v932_v29, %v904_v32  ;;  %v3616_v32 = vor.u32 %v4054_v59, %v3615_v18  ;;  %v3671_v18 = vld [vmem:[%s4418_s15 + $0xa0] sm:$0xf]  ;;  %v4067_v59 = vld [vmem:[%s4418_s15 + $0xb4] sm:$0xf0] }
  0xf3   : > { %v964_v41 = vpop.f32.mrf.mxu0 }
  0xf4   : > { %v962_v5 = vadd.f32 %v961_v12, %v933_v40  ;;  %1689 = vmatmul.bf16.gmra.mxu2 %v3264_v33  ;;  %v3624_v33 = vor.u32 %v4055_v23, %v3623_v22 }
  0xf5   : > { %v993_v42 = vpop.f32.mrf.mxu1  ;;  %1718 = vmatmul.bf16.gmra.mxu3 %v3268_v34  ;;  %v3628_v34 = vor.u32 %v4052_v24, %v3625_v25 }
  0xf6   : > { %2307 = vmatmul.bf16.gmra.mxu0 %v3656_v36  ;;  %v4940_v44 = vadd.f32 %v990_v13, %v962_v5 }
  0xf7   : > { %v906_v45 = vpop.f32.mrf.mxu2 }
  0xf8   : > { %2336 = vmatmul.bf16.gmra.mxu1 %v3660_v37  ;;  %v935_v30 = vpop.f32.mrf.mxu3  ;;  %v907_v46 = vadd.f32 %v906_v45, %v4794_v35  ;;  %v3292_v35 = vor.u32 %v3998_v55, %v3289_v56  ;;  %v4058_v55 = vld [vmem:[%s4418_s15 + $0x74] sm:$0xf]  ;;  %v3649_v56 = vld [vmem:[%s4418_s15 + $0x88] sm:$0xf0] }
  0xfa   : > { %v936_v47 = vadd.f32 %v935_v30, %v907_v46  ;;  %v3639_v46 = vld [vmem:[%s4418_s15 + $0x68] sm:$0xf] }
  0xfb   : > { %v966_v48 = vpop.f32.mrf.mxu0 }
  0xfc   : > { %v965_v50 = vadd.f32 %v964_v41, %v936_v47  ;;  %v4060_v47 = vld [vmem:[%s4418_s15 + $0x7c] sm:$0xf0] }
  0xfd   : > { %v995_v49 = vpop.f32.mrf.mxu1  ;;  %v3640_v61 = vor.u32 %v4060_v47, %v3639_v46  ;;  %v3689_v46 = vld [vmem:[%s4418_s15 + $0xe0] sm:$0xf0]  ;;  %v3695_v47 = vld [vmem:[%s4418_s15 + $0xd0] sm:$0xf] }
  0xfe   : > { %v4951_v62 = vadd.f32 %v993_v42, %v965_v50  ;;  %v3641_v50 = vld [vmem:[%s4418_s15 + $0x80] sm:$0xf0] }
  0xff   : > { %v908_v63 = vpop.f32.mrf.mxu2 }
 0x100   : > { %v937_v0 = vpop.f32.mrf.mxu3  ;;  %v909_v1 = vadd.f32 %v908_v63, %v4815_v52 }
 0x102   : > { %v938_v6 = vadd.f32 %v937_v0, %v909_v1  ;;  %v3648_v0 = vor.u32 %v4061_v54, %v3647_v51  ;;  %v3652_v1 = vor.u32 %v4058_v55, %v3649_v56  ;;  %v3697_v51 = vld [vmem:[%s4418_s15 + $0xe8] sm:$0xf0] }
 0x103   : > { %v969_v8 = vpop.f32.mrf.mxu0 }
 0x104   : > { %v967_v10 = vadd.f32 %v966_v48, %v938_v6  ;;  %1694 = vmatmul.bf16.gmra.mxu2 %v3288_v3 }
 0x105   : > { %v998_v9 = vpop.f32.mrf.mxu1  ;;  %1723 = vmatmul.bf16.gmra.mxu3 %v3292_v35 }
 0x106   : > { %2312 = vmatmul.bf16.gmra.mxu0 %v3680_v4  ;;  %v4954_v52 = vadd.f32 %v995_v49, %v967_v10  ;;  %v4057_v49 = vld [vmem:[%s4418_s15 + $0x6c] sm:$0xf] }
 0x107   : > { %v911_v11 = vpop.f32.mrf.mxu2  ;;  %v3644_v63 = vor.u32 %v4057_v49, %v3641_v50  ;;  %v4073_v49 = vld [vmem:[%s4418_s15 + $0xe4] sm:$0xf0]  ;;  %v4070_v50 = vld [vmem:[%s4418_s15 + $0xd4] sm:$0xf] }
 0x108   : > { %2341 = vmatmul.bf16.gmra.mxu1 %v3684_v38  ;;  %v940_v12 = vpop.f32.mrf.mxu3  ;;  %v912_v13 = vadd.f32 %v911_v11, %v4831_v2  ;;  %v3620_v2 = vor.u32 %v4051_v19, %v3617_v21  ;;  %v4064_v19 = vld [vmem:[%s4418_s15 + $0xa4] sm:$0xf]  ;;  %v3673_v21 = vld [vmem:[%s4418_s15 + $0xb8] sm:$0xf0] }
 0x10a   : > { %v941_v14 = vadd.f32 %v940_v12, %v912_v13  ;;  %v3663_v13 = vld [vmem:[%s4418_s15 + $0x98] sm:$0xf] }
 0x10b   : > { %v971_v15 = vpop.f32.mrf.mxu0 }
 0x10c   : > { %v970_v17 = vadd.f32 %v969_v8, %v941_v14  ;;  %v4066_v14 = vld [vmem:[%s4418_s15 + $0xac] sm:$0xf0] }
 0x10d   : > { %v1000_v16 = vpop.f32.mrf.mxu1  ;;  %v3664_v25 = vor.u32 %v4066_v14, %v3663_v13 }
 0x10e   : > { %v4965_v26 = vadd.f32 %v998_v9, %v970_v17  ;;  %v3665_v17 = vld [vmem:[%s4418_s15 + $0xb0] sm:$0xf0] }
 0x10f   : > { %v913_v28 = vpop.f32.mrf.mxu2 }
 0x110   : > { %v942_v29 = vpop.f32.mrf.mxu3  ;;  %v914_v31 = vadd.f32 %v913_v28, %v4855_v20 }
 0x112   : > { %v943_v36 = vadd.f32 %v942_v29, %v914_v31  ;;  %v3672_v29 = vor.u32 %v4067_v59, %v3671_v18  ;;  %v3676_v31 = vor.u32 %v4064_v19, %v3673_v21 }
 0x113   : > { %v1622_v37 = vpop.f32.mrf.mxu0 }
 0x114   : > { %v972_v40 = vadd.f32 %v971_v15, %v943_v36  ;;  %2355 = vmatmul.bf16.vlgmr.msra.gmra.mxu2 %v3616_v32 }
 0x115   : > { %v1651_v39 = vpop.f32.mrf.mxu1  ;;  %2384 = vmatmul.bf16.vlgmr.msra.gmra.mxu3 %v3620_v2 }
 0x116   : > { %2413 = vmatmul.bf16.vlgmr.msra.gmra.mxu0 %v3624_v33  ;;  %v4968_v20 = vadd.f32 %v1000_v16, %v972_v40  ;;  %v4063_v16 = vld [vmem:[%s4418_s15 + $0x9c] sm:$0xf] }
 0x117   : > { %v1564_v41 = vpop.f32.mrf.mxu2  ;;  %v3668_v28 = vor.u32 %v4063_v16, %v3665_v17 }
 0x118   : > { %2442 = vmatmul.bf16.vlgmr.msra.gmra.mxu1 %v3628_v34  ;;  %v1593_v42 = vpop.f32.mrf.mxu3 }
 0x119   : > { %v1594_v43 = vadd.f32 %v1593_v42, %v1564_v41 }
 0x11b   : > { %v1623_v5 = vadd.f32 %v1622_v37, %v1594_v43  ;;  %v1624_v45 = vpop.f32.mrf.mxu0  ;;  %v3687_v43 = vld [vmem:[%s4418_s15 + $0xc8] sm:$0xf] }
 0x11d   : > { %v1653_v30 = vpop.f32.mrf.mxu1  ;;  %v4972_v48 = vadd.f32 %v1651_v39, %v1623_v5  ;;  %v4072_v5 = vld [vmem:[%s4418_s15 + $0xdc] sm:$0xf0] }
 0x11f   : > { %v1566_v57 = vpop.f32.mrf.mxu2 }
 0x120   : > { %v1595_v58 = vpop.f32.mrf.mxu3 }
 0x121   : > { %v1596_v60 = vadd.f32 %v1595_v58, %v1566_v57  ;;  %v3688_v57 = vor.u32 %v4072_v5, %v3687_v43 }
 0x123   : > { %v1625_v3 = vadd.f32 %v1624_v45, %v1596_v60  ;;  %v1627_v35 = vpop.f32.mrf.mxu0  ;;  %v3696_v60 = vor.u32 %v4073_v49, %v3695_v47 }
 0x124   : > { %2360 = vmatmul.bf16.gmra.mxu2 %v3640_v61  ;;  %v3700_v61 = vor.u32 %v4070_v50, %v3697_v51 }
 0x125   : > { %v1656_v4 = vpop.f32.mrf.mxu1  ;;  %2389 = vmatmul.bf16.gmra.mxu3 %v3644_v63  ;;  %v4980_v38 = vadd.f32 %v1653_v30, %v1625_v3  ;;  %v4069_v30 = vld [vmem:[%s4418_s15 + $0xcc] sm:$0xf] }
 0x126   : > { %2418 = vmatmul.bf16.gmra.mxu0 %v3648_v0  ;;  %v3692_v58 = vor.u32 %v4069_v30, %v3689_v46 }
 0x127   : > { %v1569_v6 = vpop.f32.mrf.mxu2 }
 0x128   : > { %2447 = vmatmul.bf16.gmra.mxu1 %v3652_v1  ;;  %v1598_v8 = vpop.f32.mrf.mxu3 }
 0x129   : > { %v1599_v9 = vadd.f32 %v1598_v8, %v1569_v6 }
 0x12b   : > { %v1628_v10 = vadd.f32 %v1627_v35, %v1599_v9  ;;  %v1629_v11 = vpop.f32.mrf.mxu0 }
 0x12d   : > { %v1658_v12 = vpop.f32.mrf.mxu1  ;;  %v4984_v15 = vadd.f32 %v1656_v4, %v1628_v10 }
 0x12f   : > { %v1571_v22 = vpop.f32.mrf.mxu2 }
 0x130   : > { %v1600_v23 = vpop.f32.mrf.mxu3 }
 0x131   : > { %v1601_v24 = vadd.f32 %v1600_v23, %v1571_v22 }
 0x133   : > { %v1630_v32 = vadd.f32 %v1629_v11, %v1601_v24  ;;  %v1632_v2 = vpop.f32.mrf.mxu0 }
 0x134   : > { %2365 = vmatmul.bf16.gmra.mxu2 %v3664_v25 }
 0x135   : > { %v1661_v33 = vpop.f32.mrf.mxu1  ;;  %2394 = vmatmul.bf16.gmra.mxu3 %v3668_v28  ;;  %v4992_v34 = vadd.f32 %v1658_v12, %v1630_v32 }
 0x136   : > { %2423 = vmatmul.bf16.gmra.mxu0 %v3672_v29 }
 0x137   : > { %v1574_v36 = vpop.f32.mrf.mxu2 }
 0x138   : > { %2452 = vmatmul.bf16.gmra.mxu1 %v3676_v31  ;;  %v1603_v37 = vpop.f32.mrf.mxu3 }
 0x139   : > { %v1604_v39 = vadd.f32 %v1603_v37, %v1574_v36 }
 0x13b   : > { %v1633_v40 = vadd.f32 %v1632_v2, %v1604_v39  ;;  %v1634_v41 = vpop.f32.mrf.mxu0 }
 0x13d   : > { %v1663_v42 = vpop.f32.mrf.mxu1  ;;  %v4996_v45 = vadd.f32 %v1661_v33, %v1633_v40 }
 0x13f   : > { %v1576_v54 = vpop.f32.mrf.mxu2 }
 0x140   : > { %v1605_v55 = vpop.f32.mrf.mxu3 }
 0x141   : > { %v1606_v56 = vadd.f32 %v1605_v55, %v1576_v54 }
 0x143   : > { %v1635_v63 = vadd.f32 %v1634_v41, %v1606_v56  ;;  %v1637_v0 = vpop.f32.mrf.mxu0 }
 0x144   : > { %2370 = vmatmul.bf16.gmra.mxu2 %v3688_v57 }
 0x145   : > { %v1666_v1 = vpop.f32.mrf.mxu1  ;;  %2399 = vmatmul.bf16.gmra.mxu3 %v3692_v58  ;;  %v1664_v3 = vadd.f32 %v1663_v42, %v1635_v63 }
 0x146   : > { %2428 = vmatmul.bf16.gmra.mxu0 %v3696_v60 }
 0x147   : > { %v1579_v35 = vpop.f32.mrf.mxu2 }
 0x148   : > { %2457 = vmatmul.bf16.gmra.mxu1 %v3700_v61  ;;  %v1608_v4 = vpop.f32.mrf.mxu3 }
 0x149   : > { %v1609_v6 = vadd.f32 %v1608_v4, %v1579_v35 }
 0x14b   : > { %v1638_v8 = vadd.f32 %v1637_v0, %v1609_v6  ;;  %v1639_v9 = vpop.f32.mrf.mxu0 }
 0x14d   : > { %v1668_v10 = vpop.f32.mrf.mxu1  ;;  %v1667_v11 = vadd.f32 %v1666_v1, %v1638_v8 }
 0x14f   : > { %v1581_v12 = vpop.f32.mrf.mxu2 }
 0x150   : > { %v1610_v13 = vpop.f32.mrf.mxu3 }
 0x151   : > { %v1611_v14 = vadd.f32 %v1610_v13, %v1581_v12 }
 0x153   : > { %v1640_v16 = vadd.f32 %v1639_v9, %v1611_v14  ;;  %v2298_v17 = vpop.f32.mrf.mxu0 }
 0x155   : > { %v2327_v18 = vpop.f32.mrf.mxu1  ;;  %v1669_v59 = vadd.f32 %v1668_v10, %v1640_v16 }
 0x156   : > { %v2328_v14 = vadd.f32 %v2327_v18, %v2298_v17  ;;  %v5066_v17 = vld [vmem:[%s5192_s3] ss:$0 sm:$0xff] }
 0x157   : > { %v1680_v19 = vpop.f32.mrf.mxu2 }
 0x158   : > { %v1709_v21 = vpop.f32.mrf.mxu3  ;;  %v1681_v22 = vadd.f32 %v1680_v19, %v4972_v48 }
 0x15a   : > { %v1710_v23 = vadd.f32 %v1709_v21, %v1681_v22 }
 0x15b   : > { %v2300_v24 = vpop.f32.mrf.mxu0 }
 0x15c   : > { %v5006_v28 = vadd.f32 %v1710_v23, %v4890_v53 }
 0x15d   : > { %v2329_v25 = vpop.f32.mrf.mxu1 }
 0x15f   : > { %v1682_v29 = vpop.f32.mrf.mxu2 }
 0x160   : > { %v1711_v31 = vpop.f32.mrf.mxu3  ;;  %v1683_v32 = vadd.f32 %v1682_v29, %v4980_v38 }
 0x162   : > { %v1712_v2 = vadd.f32 %v1711_v31, %v1683_v32 }
 0x163   : > { %v5009_v33 = vpop.f32.mrf.mxu0 }
 0x164   : > { %v5014_v37 = vadd.f32 %v1712_v2, %v4905_v7 }
 0x165   : > { %v5011_v36 = vpop.f32.mrf.mxu1 }
 0x167   : > { %v1685_v39 = vpop.f32.mrf.mxu2 }
 0x168   : > { %v1714_v48 = vpop.f32.mrf.mxu3  ;;  %v1686_v40 = vadd.f32 %v1685_v39, %v4984_v15 }
 0x16a   : > { %v1715_v41 = vadd.f32 %v1714_v48, %v1686_v40 }
 0x16b   : > { %v5017_v42 = vpop.f32.mrf.mxu0 }
 0x16c   : > { %v5022_v43 = vadd.f32 %v1715_v41, %v4928_v27 }
 0x16d   : > { %v5019_v53 = vpop.f32.mrf.mxu1 }
 0x16f   : > { %v1687_v38 = vpop.f32.mrf.mxu2 }
 0x170   : > { %v1716_v5 = vpop.f32.mrf.mxu3  ;;  %v1688_v30 = vadd.f32 %v1687_v38, %v4992_v34 }
 0x172   : > { %v1717_v46 = vadd.f32 %v1716_v5, %v1688_v30 }
 0x173   : > { %v5025_v47 = vpop.f32.mrf.mxu0 }
 0x174   : > { %v5030_v49 = vadd.f32 %v1717_v46, %v4940_v44 }
 0x175   : > { %v5027_v7 = vpop.f32.mrf.mxu1 }
 0x177   : > { %v1690_v15 = vpop.f32.mrf.mxu2 }
 0x178   : > { %v1719_v50 = vpop.f32.mrf.mxu3  ;;  %v1691_v51 = vadd.f32 %v1690_v15, %v4996_v45 }
 0x17a   : > { %v1720_v54 = vadd.f32 %v1719_v50, %v1691_v51 }
 0x17b   : > { %v5033_v55 = vpop.f32.mrf.mxu0 }
 0x17c   : > { %v5038_v56 = vadd.f32 %v1720_v54, %v4951_v62 }
 0x17d   : > { %v5035_v27 = vpop.f32.mrf.mxu1 }
 0x17f   : > { %v1692_v34 = vpop.f32.mrf.mxu2 }
 0x180   : > { %v1721_v57 = vpop.f32.mrf.mxu3  ;;  %v1693_v58 = vadd.f32 %v1692_v34, %v1664_v3 }
 0x182   : > { %v1722_v60 = vadd.f32 %v1721_v57, %v1693_v58 }
 0x183   : > { %v5040_v61 = vpop.f32.mrf.mxu0 }
 0x184   : > { %v5045_v63 = vadd.f32 %v1722_v60, %v4954_v52 }
 0x185   : > { %v5042_v44 = vpop.f32.mrf.mxu1 }
 0x187   : > { %v1695_v45 = vpop.f32.mrf.mxu2 }
 0x188   : > { %v1724_v0 = vpop.f32.mrf.mxu3  ;;  %v1696_v1 = vadd.f32 %v1695_v45, %v1667_v11  ;;  %v3894_v45 = vld [vmem:[%s4418_s15 + $0x38] sm:$0xff] }
 0x18a   : > { %v1725_v35 = vadd.f32 %v1724_v0, %v1696_v1 }
 0x18b   : > { %v5047_v4 = vpop.f32.mrf.mxu0 }
 0x18c   : > { %v5052_v62 = vadd.f32 %v1725_v35, %v4965_v26  ;;  %v2330_v26 = vadd.f32 %v2329_v25, %v2300_v24  ;;  %v2564_v35 = vunpack.c.h.bf16 %v3894_v45 }
 0x18d   : > { %v5049_v6 = vpop.f32.mrf.mxu1 }
 0x18f   : > { %v1697_v3 = vpop.f32.mrf.mxu2 }
 0x190   : > { %v1726_v8 = vpop.f32.mrf.mxu3  ;;  %v1698_v9 = vadd.f32 %v1697_v3, %v1669_v59  ;;  %v5060_v59 = vld [vmem:[%s5191_s2] ss:$0 sm:$0xff] }
 0x192   : > { %v1727_v10 = vadd.f32 %v1726_v8, %v1698_v9  ;;  %v3895_v9 = vld [vmem:[%s4418_s15 + $0x50] sm:$0xff] }
 0x193   : > { %v2414_v12 = vpop.f32.mrf.mxu0 }
 0x194   : > { %v5055_v52 = vadd.f32 %v1727_v10, %v4968_v20 }
 0x195   : > { %v2443_v13 = vpop.f32.mrf.mxu1 }
 0x197   : > { %v2356_v11 = vpop.f32.mrf.mxu2 }
 0x198   : > { %v2385_v16 = vpop.f32.mrf.mxu3  ;;  %v2357_v19 = vadd.f32 %v2356_v11, %v2328_v14  ;;  %v3896_v11 = vld [vmem:[%s4418_s15 + $0x68] sm:$0xff] }
 0x19a   : > { %v2386_v21 = vadd.f32 %v2385_v16, %v2357_v19  ;;  %v2563_v16 = vunpack.c.l.bf16 %v3894_v45 }
 0x19b   : > { %v2416_v22 = vpop.f32.mrf.mxu0 }
 0x19c   : > { %v2415_v29 = vadd.f32 %v2414_v12, %v2386_v21 }
 0x19d   : > { %v2445_v23 = vpop.f32.mrf.mxu1 }
 0x19e   : > { %v2444_v31 = vadd.f32 %v2443_v13, %v2415_v29  ;;  %v3897_v29 = vld [vmem:[%s4418_s15 + $0x80] sm:$0xff] }
 0x19f   : > { %v2358_v32 = vpop.f32.mrf.mxu2 }
 0x1a0   : > { %v2387_v2 = vpop.f32.mrf.mxu3  ;;  %v2463_v20 = vadd.f32 %v2444_v31, %v5006_v28  ;;  %v2359_v18 = vadd.f32 %v2358_v32, %v2330_v26  ;;  %v2333_v28 = vadd.f32 %v5011_v36, %v5009_v33  ;;  %v2335_v33 = vadd.f32 %v5019_v53, %v5017_v42  ;;  %v3893_v36 = vld [vmem:[%s4418_s15 + $0x20] sm:$0xff] }
 0x1a1   : > { %v2561_v14 = vunpack.c.l.bf16 %v3893_v36  ;;  %v2566_v42 = vunpack.c.h.bf16 %v3895_v9 }
 0x1a2   : > { %v2491_v39 = vmul.f32 %v5060_v59, %v2463_v20  ;;  %v2388_v24 = vadd.f32 %v2387_v2, %v2359_v18  ;;  %v2567_v20 = vunpack.c.l.bf16 %v3896_v11  ;;  %v2570_v18 = vunpack.c.h.bf16 %v3897_v29 }
 0x1a3   : > { %v2419_v25 = vpop.f32.mrf.mxu0  ;;  %v2578_v26 = vadd.f32 %v2563_v16, %v2561_v14 }
 0x1a4   : > { %v2503_v40 = vadd.f32 %v5066_v17, %v2491_v39  ;;  %v2417_v41 = vadd.f32 %v2416_v22, %v2388_v24  ;;  %v2565_v22 = vunpack.c.l.bf16 %v3895_v9  ;;  %v2338_v39 = vadd.f32 %v5027_v7, %v5025_v47  ;;  %v3898_v24 = vld [vmem:[%s4418_s15 + $0x98] sm:$0xff] }
 0x1a5   : > { %v2448_v48 = vpop.f32.mrf.mxu1  ;;  %v2571_v7 = vunpack.c.l.bf16 %v3898_v24 }
 0x1a6   : > { %v2511_v38 = vmax.f32 %v2503_v40, 0.0  ;;  %v2446_v5 = vadd.f32 %v2445_v23, %v2417_v41  ;;  %v2568_v23 = vunpack.c.h.bf16 %v3896_v11 }
 0x1a7   : > { %v2361_v30 = vpop.f32.mrf.mxu2 }
 0x1a8   : > { %v2390_v46 = vpop.f32.mrf.mxu3  ;;  %2519 = vst [vmem:[%s5074_s20] sm:$0xff] %v2511_v38  ;;  %v2464_v15 = vadd.f32 %v2446_v5, %v5014_v37  ;;  %v2362_v50 = vadd.f32 %v2361_v30, %v2333_v28  ;;  %v2562_v37 = vunpack.c.h.bf16 %v3893_v36  ;;  %v2572_v5 = vunpack.c.h.bf16 %v3898_v24 }
 0x1aa   : > { %v2492_v51 = vmul.f32 %v5060_v59, %v2464_v15  ;;  %v2391_v54 = vadd.f32 %v2390_v46, %v2362_v50  ;;  %v2591_v53 = vadd.f32 %v2564_v35, %v2562_v37  ;;  %v3899_v15 = vld [vmem:[%s4418_s15 + $0xb0] sm:$0xff] }
 0x1ab   : > { %v2421_v34 = vpop.f32.mrf.mxu0 }
 0x1ac   : > { %v2504_v57 = vadd.f32 %v5066_v17, %v2492_v51  ;;  %v2420_v58 = vadd.f32 %v2419_v25, %v2391_v54  ;;  %v2592_v31 = vadd.f32 %v2591_v53, %v2566_v42  ;;  %v2579_v25 = vadd.f32 %v2578_v26, %v2565_v22 }
 0x1ad   : > { %v2450_v60 = vpop.f32.mrf.mxu1 }
 0x1ae   : > { %v2512_v0 = vmax.f32 %v2504_v57, 0.0  ;;  %v2449_v1 = vadd.f32 %v2448_v48, %v2420_v58  ;;  %v2593_v48 = vadd.f32 %v2592_v31, %v2568_v23  ;;  %v2580_v50 = vadd.f32 %v2579_v25, %v2567_v20  ;;  %v3900_v57 = vld [vmem:[%s4418_s15 + $0xc8] sm:$0xff]  ;;  %s2785_s15 = sshll.u32 %s273_s27, 1 }
 0x1af   : > { %v2363_v3 = vpop.f32.mrf.mxu2  ;;  %v2574_v58 = vunpack.c.h.bf16 %v3899_v15  ;;  %v2575_v9 = vunpack.c.l.bf16 %v3900_v57  ;;  %s5124_s17 = scalar_lea.vmem [#allocation3], %s2785_s15  ;;  %s4213_s15 = scalar_lea.hbm %s4212_s19, 2 }
 0x1b0   : > { %v2392_v8 = vpop.f32.mrf.mxu3  ;;  %2520 = vst [vmem:[%s5074_s20 + $0x8] sm:$0xff] %v2512_v0  ;;  %v2538_v10 = vadd.f32 %v2512_v0, %v2511_v38  ;;  %v2465_v12 = vadd.f32 %v2449_v1, %v5022_v43  ;;  %v2364_v13 = vadd.f32 %v2363_v3, %v2335_v33  ;;  %v2569_v38 = vunpack.c.l.bf16 %v3897_v29  ;;  %s2648_s24 = sshll.u32 %s5124_s17, 4  ;;  %p4214_p12 = scmp.ne.s32.totalorder %s4212_s19, %s4213_s15  ;;  %s2649_s24 = int_to_ptr.vmem [resolvable:$true] %s2648_s24 }
 0x1b1   : > { %v2594_v51 = vadd.f32 %v2593_v48, %v2570_v18  ;;  %v2573_v0 = vunpack.c.l.bf16 %v3899_v15  ;;  %v2576_v1 = vunpack.c.h.bf16 %v3900_v57  ;;  %v2343_v48 = vadd.f32 %v5042_v44, %v5040_v61  ;;  %p4219_p2 = scmp.lt.s32.totalorder %s4217_s11, %s4213_s15 }
 0x1b2   : > { %v2493_v19 = vmul.f32 %v5060_v59, %v2465_v12  ;;  %v2393_v21 = vadd.f32 %v2392_v8, %v2364_v13  ;;  %v2581_v33 = vadd.f32 %v2580_v50, %v2569_v38  ;;  %v2340_v12 = vadd.f32 %v5035_v27, %v5033_v55  ;;  %p4215_p13 = pnand %p4214_p12, %p4353_p4 }
 0x1b3   : > { %v2424_v43 = vpop.f32.mrf.mxu0  ;;  %v2595_v36 = vadd.f32 %v2594_v51, %v2572_v5  ;;  %p4220_p3 = por %p4219_p2, %p4218_p1 }
 0x1b4   : > { %v2505_v32 = vadd.f32 %v5066_v17, %v2493_v19  ;;  %v2422_v2 = vadd.f32 %v2421_v34, %v2393_v21  ;;  %v2582_v37 = vadd.f32 %v2581_v33, %v2571_v7  ;;  %p4216_p0 = pneg %p4215_p13 }
 0x1b5   : > { %v2453_v28 = vpop.f32.mrf.mxu1  ;;  %v2596_v35 = vadd.f32 %v2595_v36, %v2574_v58 }
 0x1b6   : > { %v2513_v40 = vmax.f32 %v2505_v32, 0.0  ;;  %v2451_v41 = vadd.f32 %v2450_v60, %v2422_v2  ;;  %v2532_v32 = vlaneseq  ;;  %p4221_p5 = pnand %p4220_p3, %p4216_p0 }
 0x1b7   : > { %v2366_v30 = vpop.f32.mrf.mxu2 }
 0x1b8   : > { %v2395_v46 = vpop.f32.mrf.mxu3  ;;  %2521 = vst [vmem:[%s5074_s20 + $0x10] sm:$0xff] %v2513_v40  ;;  %v2539_v54 = vadd.f32 %v2538_v10, %v2513_v40  ;;  %v2466_v34 = vadd.f32 %v2451_v41, %v5030_v49  ;;  %v2367_v47 = vadd.f32 %v2366_v30, %v2338_v39  ;;  %v2583_v49 = vadd.f32 %v2582_v37, %v2573_v0 }
 0x1b9   : > { %v2597_v10 = vadd.f32 %v2596_v35, %v2576_v1  ;;  %vm5117_vm0 = vcmp.lt.s32.totalorder %v2532_v32, 256  ;;  %v4277_v39 = vmov 0.0  }
 0x1ba   : > { %v2494_v60 = vmul.f32 %v5060_v59, %v2466_v34  ;;  %v2396_v45 = vadd.f32 %v2395_v46, %v2367_v47  ;;  %v2584_v53 = vadd.f32 %v2583_v49, %v2575_v9  ;;  %2531 = vst [vmem:[%s5114_s8] sm:$0x1] %v4277_v39 }
 0x1bb   : > { %v2426_v11 = vpop.f32.mrf.mxu0  ;;  %v2598_v19 = vrot.slane %v2597_v10, 4  ;;  %2536 = vst.msk [vmem:[%s5124_s17] sm:$0x3] %vm5117_vm0, %v4277_v39 }
 0x1bc   : > { %v2506_v3 = vadd.f32 %v5066_v17, %v2494_v60  ;;  %v2425_v8 = vadd.f32 %v2424_v43, %v2396_v45  ;;  %v2585_v26 = vrot.slane %v2584_v53, 4  ;;  %v2345_v60 = vadd.f32 %v5049_v6, %v5047_v4 }
 0x1bd   : > { %v2455_v29 = vpop.f32.mrf.mxu1  ;;  %v2599_v31 = vadd.f32 %v2598_v19, %v2597_v10 }
 0x1be   : > { %v2514_v13 = vmax.f32 %v2506_v3, 0.0  ;;  %v2454_v14 = vadd.f32 %v2453_v28, %v2425_v8  ;;  %v2586_v2 = vadd.f32 %v2585_v26, %v2584_v53 }
 0x1bf   : > { %v2368_v16 = vpop.f32.mrf.mxu2  ;;  %v2600_v43 = vrot.slane %v2599_v31, 2 }
 0x1c0   : > { %v2397_v42 = vpop.f32.mrf.mxu3  ;;  %2522 = vst [vmem:[%s5074_s20 + $0x18] sm:$0xff] %v2514_v13  ;;  %v2540_v21 = vadd.f32 %v2539_v54, %v2514_v13  ;;  %v2467_v22 = vadd.f32 %v2454_v14, %v5038_v56  ;;  %v2369_v23 = vadd.f32 %v2368_v16, %v2340_v12  ;;  %v2587_v24 = vrot.slane %v2586_v2, 2 }
 0x1c1   : > { %v2601_v25 = vadd.f32 %v2600_v43, %v2599_v31 }
 0x1c2   : > { %v2495_v55 = vmul.f32 %v5060_v59, %v2467_v22  ;;  %v2398_v27 = vadd.f32 %v2397_v42, %v2369_v23  ;;  %v2588_v5 = vadd.f32 %v2587_v24, %v2586_v2  ;;  %v2577_v33 = vld [vmem:[%s5124_s17] sm:$0x3] }
 0x1c3   : > { %v2602_v30 = vrot.slane %v2601_v25, 1  ;;  %v2429_v44 = vpop.f32.mrf.mxu0 }
 0x1c4   : > { %v2507_v56 = vadd.f32 %v5066_v17, %v2495_v55  ;;  %v2427_v20 = vadd.f32 %v2426_v11, %v2398_v27  ;;  %v2589_v50 = vrot.slane %v2588_v5, 1 }
 0x1c5   : > { %v2603_v51 = vadd.f32 %v2602_v30, %v2601_v25  ;;  %v2458_v47 = vpop.f32.mrf.mxu1 }
 0x1c6   : > { %v2515_v40 = vmax.f32 %v2507_v56, 0.0  ;;  %v2456_v41 = vadd.f32 %v2455_v29, %v2427_v20  ;;  %v2590_v7 = vadd.f32 %v2589_v50, %v2588_v5 }
 0x1c7   : > { %v2371_v28 = vpop.f32.mrf.mxu2  ;;  %v2606_v57 = vrot.slane %v2603_v51, 7 }
 0x1c8   : > { %v2400_v38 = vpop.f32.mrf.mxu3  ;;  %2523 = vst [vmem:[%s5074_s20 + $0x20] sm:$0xff] %v2515_v40  ;;  %v2541_v46 = vadd.f32 %v2540_v21, %v2515_v40  ;;  %v2468_v15 = vadd.f32 %v2456_v41, %v5045_v63  ;;  %v2372_v61 = vadd.f32 %v2371_v28, %v2343_v48 }
 0x1c9   : > { %v2608_v36 = vsel %vm2607_vm1, %v2590_v7, %v2606_v57 }
 0x1ca   : > { %v2496_v54 = vmul.f32 %v5060_v59, %v2468_v15  ;;  %v2401_v34 = vadd.f32 %v2400_v38, %v2372_v61  ;;  %v2610_v1 = vadd.f32 %v2608_v36, %v2577_v33 }
 0x1cc   : > { %v2508_v58 = vadd.f32 %v5066_v17, %v2496_v54  ;;  %v2430_v63 = vadd.f32 %v2429_v44, %v2401_v34  ;;  %2615 = vst.msk [vmem:[%s5124_s17] sm:$0x3] %vm5117_vm0, %v2610_v1 }
 0x1ce   : > { %v2516_v45 = vmax.f32 %v2508_v58, 0.0  ;;  %v2459_v0 = vadd.f32 %v2458_v47, %v2430_v63 }
 0x1cf   : > { %v2373_v37 = vpop.f32.mrf.mxu2 }
 0x1d0   : > { %2524 = vst [vmem:[%s5074_s20 + $0x28] sm:$0xff] %v2516_v45  ;;  %v2542_v35 = vadd.f32 %v2541_v46, %v2516_v45  ;;  %v2469_v3 = vadd.f32 %v2459_v0, %v5052_v62  ;;  %v2374_v8 = vadd.f32 %v2373_v37, %v2345_v60  ;;  %v2402_v9 = vpop.f32.mrf.mxu3 }
 0x1d2   : > { %v2497_v49 = vmul.f32 %v5060_v59, %v2469_v3  ;;  %v2403_v10 = vadd.f32 %v2402_v9, %v2374_v8 }
 0x1d3   : > { %4224 = shalt.err (!%p4221_p5)
}
 0x1d4   : > { %4139 = dma.vmem_to_hbm [thread:$0]  (%p4353_p4), %s2649_s24, 32, %s2651_s16, %s2629_s18   ;;  %v2431_v4 = vpop.f32.mrf.mxu0  ;;  %v2509_v6 = vadd.f32 %v5066_v17, %v2497_v49  ;;  %v2460_v12 = vpop.f32.mrf.mxu1  ;;  %v2537_v55 = vld [vmem:[%s5114_s8] sm:$0x1] }
 0x1d5   : > { %v2432_v62 = vadd.f32 %v2431_v4, %v2403_v10 }
 0x1d6   : > { %v2517_v13 = vmax.f32 %v2509_v6, 0.0 }
 0x1d7   : > { %v2461_v14 = vadd.f32 %v2460_v12, %v2432_v62 }
 0x1d8   : > { %2525 = vst [vmem:[%s5074_s20 + $0x30] sm:$0xff] %v2517_v13  ;;  %v2543_v11 = vadd.f32 %v2542_v35, %v2517_v13 }
 0x1d9   : > { %v2470_v16 = vadd.f32 %v2461_v14, %v5055_v52 }
 0x1db   : > { %v2498_v42 = vmul.f32 %v5060_v59, %v2470_v16 }
 0x1dd   : > { %v2510_v53 = vadd.f32 %v5066_v17, %v2498_v42 }
 0x1df   : > { %v2518_v19 = vmax.f32 %v2510_v53, 0.0 }
 0x1e1   : > { %2526 = vst [vmem:[%s5074_s20 + $0x38] sm:$0xff] %v2518_v19  ;;  %v2544_v21 = vadd.f32 %v2543_v11, %v2518_v19 }
 0x1e3   : > { %v2545_v22 = vrot.slane %v2544_v21, 4 }
 0x1e5   : > { %v2546_v23 = vadd.f32 %v2545_v22, %v2544_v21 }
 0x1e7   : > { %v2547_v29 = vrot.slane %v2546_v23, 2 }
 0x1e9   : > { %v2548_v26 = vadd.f32 %v2547_v29, %v2546_v23 }
 0x1eb   : > { %v2549_v31 = vrot.slane %v2548_v26, 1 }
 0x1ed   : > { %v2550_v27 = vadd.f32 %v2549_v31, %v2548_v26 }
 0x1ef   : > { %v2551_v32 = vadd.f32 %v2550_v27, %v2537_v55 }
 0x1f1   : > { %2552 = vst [vmem:[%s5114_s8] sm:$0x1] %v2551_v32 }
 0x1f2 PF: > { %p4145_p4 = scmp.ge.s32.totalorder %s4275_s26, 2  ;;  %s2680_s7 = sand.u32 1, %s4255_s21  }
 0x1f3   : > { %s2681_s20 = scalar_lea.sflag [#allocation4], %s2680_s7 }
 0x1f4   : > { %p4142_p6 = pnand %p4145_p4, %p4360_p8 }
 0x1f6   : > { %p4143_p7 = pneg %p4142_p6 }
 0x1f8   : > { %4250 = dma.done.wait (%p4143_p7), %s2681_s20, 32  }
 0x1f9   : > { %4252 = vsyncadd (%p4143_p7), %s2681_s20, 4294967264  ;;  %s20_s26 = sadd.s32 1, %s4275_s26   ;;  %s5200_s21 = smov %s4259_s22 }
 0x1fa   : > { %p17_p9 = scmp.ge.s32.totalorder %s20_s26, 4   ;;  %s5201_s22 = smov %s4263_s23 }
 0x1fb   : > { %s5202_s23 = smov %s4366_s10  ;;  %s5203_s24 = smov %s4271_s25 }
 0x1fc   : > { %s5204_s25 = smov %s5206_s29  ;;  %19 = sbr.rel (!%p17_p9) target bundleno = 4 (0x4), region = 104 }
 0x201   :  { %2687 = vsyncpa [#allocation4], 1 }
 0x202   :  { %2689 = vsyncpa [#allocation4 + $0x1], 1 }

// kernel: context_path_forward.17
= control target key start
LH: loop header
LB: loop body
LE: loop exit
PB: predicated region body
PF: predicated region fallthrough
CT: control target
= control target key end

     0   :  { %9 = vsyncpa [#allocation4], 0  ;;  %s5579_s0 = inlined_call_operand.vmem [shape: bf16[2,288,384], index: 0, kind: input, shape index: {}]   ;;  %s5580_s1 = inlined_call_operand.vmem [shape: bf16[3,384,128], index: 1, kind: input, shape index: {}]   ;;  %s5581_s2 = inlined_call_operand.vmem [shape: f32[1,128], index: 2, kind: input, shape index: {}]   ;;  %s5582_s3 = inlined_call_operand.vmem [shape: f32[1,128], index: 3, kind: input, shape index: {}]   ;;  %s5583_s4 = inlined_call_operand.hbm [shape: f32[2,16,16,128], index: 4, kind: output, shape index: {}]  }
   0x1   :  { %11 = vsyncpa [#allocation4 + $0x1], 0  ;;  %s4571_s15 = smov 0   ;;  %s4573_s16 = smov 0  }
   0x2   :  { %s4575_s17 = smov 0   ;;  %s4577_s18 = smov 0  }
   0x3   :  { %s4579_s19 = smov 0   ;;  %s4581_s20 = smov 0  }
   0x4 LB: > { %s3061_s21 = sadd.s32 4294967295, %s4542_s20   ;;  %s3062_s22 = sadd.s32 4294967294, %s4542_s20   ;;  %s4542_s20 = sphi %s4581_s20, %s17_s20   ;;  %s4538_s19 = sphi %s4579_s19, %s5638_s19   ;;  %s4534_s18 = sphi %s4577_s18, %s5637_s18   ;;  %s4530_s17 = sphi %s4575_s17, %s5636_s17   ;;  %s4526_s16 = sphi %s4573_s16, %s5635_s16   ;;  %s4522_s15 = sphi %s4571_s15, %s5634_s15  }
   0x5   : > { %s29_s23 = sadd.s32 1, %s4538_s19  ;;  %s127_s24 = sadd.s32 1, %s4530_s17 }
   0x6   : > { %p31_p0 = scmp.ge.s32.totalorder %s29_s23, 2  ;;  %p137_p1 = scmp.ne.s32.totalorder %s4530_s17, %s4526_s16 }
   0x7   : > { %p138_p2 = scmp.eq.s32.totalorder %s3061_s21, 1  ;;  %p143_p3 = scmp.ne.s32.totalorder %s4526_s16, %s4522_s15 }
   0x8   : > { %s5640_s23 = smov (%p31_p0, %s29_s23), 0  ;;  %p144_p5 = scmp.eq.s32.totalorder %s3062_s22, 1 }
   0x9   : > { %p4611_p4 = por %p138_p2, %p137_p1  ;;  %s122_s26 = ssub.s32 %s4538_s19, %s5640_s23 }
   0xa   : > { %p3065_p6 = scmp.ge.s32.totalorder %s4542_s20, 1  ;;  %p125_p7 = scmp.eq.s32.totalorder %s122_s26, 0 }
   0xb   : > { %p4618_p8 = por %p144_p5, %p143_p3  ;;  %p179_p9 = scmp.lt.s32.totalorder %s4542_s20, 3 }
   0xc   : > { %s4624_s28 = scalar_select %p125_p7, %s4530_s17, %s127_s24  }
   0xd   : > { %p180_p10 = pnand %p3065_p6, %p179_p9 }
   0xf   : > { %183 = sbr.rel (%p180_p10) target bundleno = 769 (0x301), region = 36 }
  0x14   : > { %v4216_v0 = vld [vmem:[%s5580_s1 + $0x38] sm:$0xff]  ;;  %v4215_v1 = vld [vmem:[%s5580_s1 + $0x30] sm:$0xff]  ;;  %v4214_v2 = vld [vmem:[%s5580_s1 + $0x28] sm:$0xff]  ;;  %p205_p11 = scmp.lt.s32.totalorder %s4534_s18, 1 }
  0x15   : > { %730 = vmatpush.bf16.msra.mxu0 %v4216_v0  ;;  %4378 = vmatpush.bf16.msra.mxu1 %v4216_v0  ;;  %v4213_v3 = vld [vmem:[%s5580_s1 + $0x20] sm:$0xff]  ;;  %v4212_v4 = vld [vmem:[%s5580_s1 + $0x18] sm:$0xff]  ;;  %v4211_v5 = vld [vmem:[%s5580_s1 + $0x10] sm:$0xff] }
  0x16   : > { %4379 = vmatpush.bf16.msra.mxu2 %v4216_v0  ;;  %4380 = vmatpush.bf16.msra.mxu3 %v4216_v0  ;;  %s206_s13 = scalar_select %p205_p11, %s4534_s18, 1  ;;  %v4210_v6 = vld [vmem:[%s5580_s1 + $0x8] sm:$0xff]  ;;  %v4209_v7 = vld [vmem:[%s5580_s1] sm:$0xff]  ;;  %v4232_v16 = vld [vmem:[%s5580_s1 + $0xb8] sm:$0xff] }
  0x17   : > { %v4288_v17 = vld [vmem:[%s5580_s1 + $0xf8] sm:$0xff]  ;;  %v4231_v24 = vld [vmem:[%s5580_s1 + $0xb0] sm:$0xff]  ;;  %v4230_v28 = vld [vmem:[%s5580_s1 + $0xa8] sm:$0xff] }
  0x18   : > { %s4402_s22 = smul.u32 432, %s206_s13  ;;  %v4224_v22 = vld [vmem:[%s5580_s1 + $0x78] sm:$0xff]  ;;  %v4287_v25 = vld [vmem:[%s5580_s1 + $0xf0] sm:$0xff]  ;;  %v4286_v29 = vld [vmem:[%s5580_s1 + $0xe8] sm:$0xff] }
  0x19   : > { %731 = vmatpush.bf16.msra.mxu0 %v4215_v1  ;;  %4381 = vmatpush.bf16.msra.mxu1 %v4215_v1  ;;  %v4296_v23 = vld [vmem:[%s5580_s1 + $0x138] sm:$0xff]  ;;  %v4223_v26 = vld [vmem:[%s5580_s1 + $0x70] sm:$0xff]  ;;  %v4222_v30 = vld [vmem:[%s5580_s1 + $0x68] sm:$0xff] }
  0x1a   : > { %4382 = vmatpush.bf16.msra.mxu2 %v4215_v1  ;;  %4383 = vmatpush.bf16.msra.mxu3 %v4215_v1  ;;  %s4652_s5 = scalar_lea.vmem %s5579_s0, %s4402_s22  ;;  %v4295_v27 = vld [vmem:[%s5580_s1 + $0x130] sm:$0xff]  ;;  %v4294_v31 = vld [vmem:[%s5580_s1 + $0x128] sm:$0xff]  ;;  %v4229_v33 = vld [vmem:[%s5580_s1 + $0xa0] sm:$0xff]  ;;  %s202_s22 = sand.u32 1, %s4526_s16  }
  0x1b   : > { %v3070_v8 = vld [vmem:[%s4652_s5] sm:$0xf]  ;;  %v4162_v9 = vld [vmem:[%s4652_s5 + $0x8] sm:$0xf0]  ;;  %v3082_v32 = vld [vmem:[%s4652_s5 + $0x18] sm:$0xf] }
  0x1c   : > { %v3118_v10 = vld [vmem:[%s4652_s5 + $0x60] sm:$0xf]  ;;  %v4174_v11 = vld [vmem:[%s4652_s5 + $0x68] sm:$0xf0]  ;;  %v3071_v18 = vor.u32 %v4162_v9, %v3070_v8  ;;  %v4165_v35 = vld [vmem:[%s4652_s5 + $0x20] sm:$0xf0] }
  0x1d   : > { %732 = vmatpush.bf16.msra.mxu0 %v4214_v2  ;;  %4384 = vmatpush.bf16.msra.mxu1 %v4214_v2  ;;  %v3166_v12 = vld [vmem:[%s4652_s5 + $0xc0] sm:$0xf]  ;;  %v4186_v13 = vld [vmem:[%s4652_s5 + $0xc8] sm:$0xf0]  ;;  %v3119_v19 = vor.u32 %v4174_v11, %v3118_v10  ;;  %v3130_v36 = vld [vmem:[%s4652_s5 + $0x78] sm:$0xf]  ;;  %v3083_v46 = vor.u32 %v4165_v35, %v3082_v32 }
  0x1e   : > { %4385 = vmatpush.bf16.msra.mxu2 %v4214_v2  ;;  %4386 = vmatpush.bf16.msra.mxu3 %v4214_v2  ;;  %v3214_v14 = vld [vmem:[%s4652_s5 + $0x120] sm:$0xf]  ;;  %v4198_v15 = vld [vmem:[%s4652_s5 + $0x128] sm:$0xf0]  ;;  %v3167_v20 = vor.u32 %v4186_v13, %v3166_v12  ;;  %v4177_v37 = vld [vmem:[%s4652_s5 + $0x80] sm:$0xf0] }
  0x1f   : > { %v3215_v21 = vor.u32 %v4198_v15, %v3214_v14  ;;  %v4285_v34 = vld [vmem:[%s5580_s1 + $0xe0] sm:$0xff]  ;;  %v3178_v38 = vld [vmem:[%s4652_s5 + $0xd8] sm:$0xf]  ;;  %v3131_v47 = vor.u32 %v4177_v37, %v3130_v36  ;;  %v4227_v52 = vld [vmem:[%s5580_s1 + $0x90] sm:$0xff]  ;;  %s3066_s6 = sshll.u32 %s202_s22, 8  ;;  %s2964_s24 = scalar_lea.sflag [#allocation4], %s202_s22 }
  0x20   : > { %v4189_v39 = vld [vmem:[%s4652_s5 + $0xe0] sm:$0xf0]  ;;  %v3226_v40 = vld [vmem:[%s4652_s5 + $0x138] sm:$0xf]  ;;  %v4283_v53 = vld [vmem:[%s5580_s1 + $0xd0] sm:$0xff]  ;;  %s5334_s7 = scalar_lea.vmem [#allocation3], %s3066_s6 }
  0x21   : > { %733 = vmatpush.bf16.msra.mxu0 %v4213_v3  ;;  %4387 = vmatpush.bf16.msra.mxu1 %v4213_v3  ;;  %v4201_v41 = vld [vmem:[%s4652_s5 + $0x140] sm:$0xf0]  ;;  %v4228_v44 = vld [vmem:[%s5580_s1 + $0x98] sm:$0xff]  ;;  %v3179_v48 = vor.u32 %v4189_v39, %v3178_v38  ;;  %v4219_v54 = vld [vmem:[%s5580_s1 + $0x50] sm:$0xff]  ;;  %s2979_s13 = sshll.u32 %s5334_s7, 4  ;;  %s2980_s13 = int_to_ptr.vmem [resolvable:$true] %s2979_s13 }
  0x22   : > { %4388 = vmatpush.bf16.msra.mxu2 %v4213_v3  ;;  %4389 = vmatpush.bf16.msra.mxu3 %v4213_v3  ;;  %v4221_v42 = vld [vmem:[%s5580_s1 + $0x60] sm:$0xff]  ;;  %v4284_v45 = vld [vmem:[%s5580_s1 + $0xd8] sm:$0xff]  ;;  %v3227_v49 = vor.u32 %v4201_v41, %v3226_v40  ;;  %v4291_v55 = vld [vmem:[%s5580_s1 + $0x110] sm:$0xff] }
  0x23   : > { %v4293_v43 = vld [vmem:[%s5580_s1 + $0x120] sm:$0xff]  ;;  %v4220_v50 = vld [vmem:[%s5580_s1 + $0x58] sm:$0xff]  ;;  %v4226_v56 = vld [vmem:[%s5580_s1 + $0x88] sm:$0xff] }
  0x24   : > { %v4292_v51 = vld [vmem:[%s5580_s1 + $0x118] sm:$0xff]  ;;  %v4282_v57 = vld [vmem:[%s5580_s1 + $0xc8] sm:$0xff]  ;;  %v3094_v60 = vld [vmem:[%s4652_s5 + $0x30] sm:$0xf] }
  0x25   : > { %734 = vmatpush.bf16.msra.mxu0 %v4212_v4  ;;  %4390 = vmatpush.bf16.msra.mxu1 %v4212_v4  ;;  %v4218_v58 = vld [vmem:[%s5580_s1 + $0x48] sm:$0xff]  ;;  %v4225_v61 = vld [vmem:[%s5580_s1 + $0x80] sm:$0xff]  ;;  %v4168_v63 = vld [vmem:[%s4652_s5 + $0x38] sm:$0xf0] }
  0x26   : > { %4391 = vmatpush.bf16.msra.mxu2 %v4212_v4  ;;  %4392 = vmatpush.bf16.msra.mxu3 %v4212_v4  ;;  %v4290_v59 = vld [vmem:[%s5580_s1 + $0x108] sm:$0xff]  ;;  %v4281_v62 = vld [vmem:[%s5580_s1 + $0xc0] sm:$0xff]  ;;  %v3142_v0 = vld [vmem:[%s4652_s5 + $0x90] sm:$0xf]  ;;  %v3095_v8 = vor.u32 %v4168_v63, %v3094_v60 }
  0x27   : > { %v4180_v1 = vld [vmem:[%s4652_s5 + $0x98] sm:$0xf0]  ;;  %v3190_v2 = vld [vmem:[%s4652_s5 + $0xf0] sm:$0xf]  ;;  %v3472_v32 = vld [vmem:[%s4652_s5 + $0x24] sm:$0xf0] }
  0x28   : > { %v4192_v3 = vld [vmem:[%s4652_s5 + $0xf8] sm:$0xf0]  ;;  %v3238_v4 = vld [vmem:[%s4652_s5 + $0x150] sm:$0xf]  ;;  %v3143_v9 = vor.u32 %v4180_v1, %v3142_v0  ;;  %v4234_v35 = vld [vmem:[%s4652_s5 + $0x20] sm:$0xf0] }
  0x29   : > { %735 = vmatpush.bf16.msra.mxu0 %v4211_v5  ;;  %4393 = vmatpush.bf16.msra.mxu1 %v4211_v5  ;;  %v3191_v10 = vor.u32 %v4192_v3, %v3190_v2  ;;  %v4360_v12 = vld [vmem:[%s5580_s1 + $0x1b8] sm:$0xff]  ;;  %v4359_v40 = vld [vmem:[%s5580_s1 + $0x1b0] sm:$0xff] }
  0x2a   : > { %4394 = vmatpush.bf16.msra.mxu2 %v4211_v5  ;;  %4395 = vmatpush.bf16.msra.mxu3 %v4211_v5  ;;  %v4204_v5 = vld [vmem:[%s4652_s5 + $0x158] sm:$0xf0]  ;;  %v4367_v41 = vld [vmem:[%s5580_s1 + $0x1f0] sm:$0xff]  ;;  %v3496_v60 = vld [vmem:[%s4652_s5 + $0x54] sm:$0xf0] }
  0x2b   : > { %v3239_v11 = vor.u32 %v4204_v5, %v3238_v4  ;;  %v4368_v13 = vld [vmem:[%s5580_s1 + $0x1f8] sm:$0xff]  ;;  %v4240_v63 = vld [vmem:[%s4652_s5 + $0x50] sm:$0xf0]  ;;  %v4358_v4 = vld [vmem:[%s5580_s1 + $0x1a8] sm:$0xff] }
  0x2c   : > { %v4304_v14 = vld [vmem:[%s5580_s1 + $0x178] sm:$0xff]  ;;  %v4366_v5 = vld [vmem:[%s5580_s1 + $0x1e8] sm:$0xff] }
  0x2d   : > { %736 = vmatpush.bf16.msra.mxu0 %v4210_v6  ;;  %4396 = vmatpush.bf16.msra.mxu1 %v4210_v6  ;;  %v4376_v15 = vld [vmem:[%s5580_s1 + $0x238] sm:$0xff] }
  0x2e   : > { %4397 = vmatpush.bf16.msra.mxu2 %v4210_v6  ;;  %4398 = vmatpush.bf16.msra.mxu3 %v4210_v6  ;;  %v4217_v6 = vld [vmem:[%s5580_s1 + $0x40] sm:$0xff] }
  0x31   : > { %737 = vmatpush.bf16.msra.mxu0 %v4209_v7  ;;  %4399 = vmatpush.bf16.msra.mxu1 %v4209_v7 }
  0x32   : > { %4400 = vmatpush.bf16.msra.mxu2 %v4209_v7  ;;  %4401 = vmatpush.bf16.msra.mxu3 %v4209_v7  ;;  %v4289_v7 = vld [vmem:[%s5580_s1 + $0x100] sm:$0xff] }
  0x34   : > { %738 = vmatmul.bf16.vlgmr.msra.gmra.mxu0 %v3071_v18  ;;  %758 = vmatmul.bf16.vlgmr.msra.gmra.mxu1 %v3119_v19  ;;  %v3154_v18 = vld [vmem:[%s4652_s5 + $0xa8] sm:$0xf]  ;;  %v4183_v19 = vld [vmem:[%s4652_s5 + $0xb0] sm:$0xf0] }
  0x35   : > { %778 = vmatmul.bf16.vlgmr.msra.gmra.mxu2 %v3167_v20  ;;  %798 = vmatmul.bf16.vlgmr.msra.gmra.mxu3 %v3215_v21  ;;  %v3202_v20 = vld [vmem:[%s4652_s5 + $0x108] sm:$0xf]  ;;  %v4195_v21 = vld [vmem:[%s4652_s5 + $0x110] sm:$0xf0] }
  0x36   : > { %908 = vmatpush.bf16.msrb.mxu2 %v4232_v16  ;;  %1581 = vmatpush.bf16.msrb.mxu3 %v4288_v17  ;;  %v3106_v16 = vld [vmem:[%s4652_s5 + $0x48] sm:$0xf]  ;;  %v4171_v17 = vld [vmem:[%s4652_s5 + $0x50] sm:$0xf0] }
  0x37   : > { %819 = vmatpush.bf16.msrb.mxu1 %v4224_v22  ;;  %1670 = vmatpush.bf16.msrb.mxu0 %v4296_v23  ;;  %v3250_v22 = vld [vmem:[%s4652_s5 + $0x168] sm:$0xf]  ;;  %v4207_v23 = vld [vmem:[%s4652_s5 + $0x170] sm:$0xf0] }
  0x3a   : > { %909 = vmatpush.bf16.msrb.mxu2 %v4231_v24  ;;  %1582 = vmatpush.bf16.msrb.mxu3 %v4287_v25  ;;  %v3107_v24 = vor.u32 %v4171_v17, %v3106_v16  ;;  %v3155_v25 = vor.u32 %v4183_v19, %v3154_v18 }
  0x3b   : > { %820 = vmatpush.bf16.msrb.mxu1 %v4223_v26  ;;  %1671 = vmatpush.bf16.msrb.mxu0 %v4295_v27  ;;  %v3203_v26 = vor.u32 %v4195_v21, %v3202_v20  ;;  %v3251_v27 = vor.u32 %v4207_v23, %v3250_v22  ;;  %v4173_v20 = vld [vmem:[%s4652_s5 + $0x64] sm:$0xf]  ;;  %v3120_v21 = vld [vmem:[%s4652_s5 + $0x6c] sm:$0xf0]  ;;  %v3126_v22 = vld [vmem:[%s4652_s5 + $0x68] sm:$0xf] }
  0x3c   : > { %v4245_v23 = vld [vmem:[%s4652_s5 + $0x7c] sm:$0xf] }
  0x3e   : > { %910 = vmatpush.bf16.msrb.mxu2 %v4230_v28  ;;  %1583 = vmatpush.bf16.msrb.mxu3 %v4286_v29  ;;  %v4161_v28 = vld [vmem:[%s4652_s5 + $0x4] sm:$0xf]  ;;  %v3072_v29 = vld [vmem:[%s4652_s5 + $0xc] sm:$0xf0] }
  0x3f   : > { %821 = vmatpush.bf16.msrb.mxu1 %v4222_v30  ;;  %1672 = vmatpush.bf16.msrb.mxu0 %v4294_v31  ;;  %v3078_v30 = vld [vmem:[%s4652_s5 + $0x8] sm:$0xf]  ;;  %v4233_v31 = vld [vmem:[%s4652_s5 + $0x1c] sm:$0xf]  ;;  %v3075_v36 = vor.u32 %v4161_v28, %v3072_v29  ;;  %v3123_v28 = vor.u32 %v4173_v20, %v3120_v21 }
  0x40   : > { %v3475_v37 = vor.u32 %v4233_v31, %v3472_v32  ;;  %v4300_v20 = vld [vmem:[%s5580_s1 + $0x158] sm:$0xff] }
  0x41   : > { %v4372_v21 = vld [vmem:[%s5580_s1 + $0x218] sm:$0xff] }
  0x42   : > { %911 = vmatpush.bf16.msrb.mxu2 %v4229_v33  ;;  %1584 = vmatpush.bf16.msrb.mxu3 %v4285_v34  ;;  %v4163_v33 = vld [vmem:[%s4652_s5 + $0x10] sm:$0xf0]  ;;  %v3470_v34 = vld [vmem:[%s4652_s5 + $0x18] sm:$0xf] }
  0x43   : > { %822 = vmatpush.bf16.msrb.mxu1 %v4221_v42  ;;  %1673 = vmatpush.bf16.msrb.mxu0 %v4293_v43  ;;  %v3079_v38 = vor.u32 %v4163_v33, %v3078_v30  ;;  %v3471_v39 = vor.u32 %v4234_v35, %v3470_v34  ;;  %v4303_v42 = vld [vmem:[%s5580_s1 + $0x170] sm:$0xff]  ;;  %v4357_v34 = vld [vmem:[%s5580_s1 + $0x1a0] sm:$0xff] }
  0x44   : > { %743 = vmatmul.bf16.gmra.mxu0 %v3083_v46  ;;  %763 = vmatmul.bf16.gmra.mxu1 %v3131_v47  ;;  %v4375_v43 = vld [vmem:[%s5580_s1 + $0x230] sm:$0xff]  ;;  %v3090_v46 = vld [vmem:[%s4652_s5 + $0x20] sm:$0xf] }
  0x45   : > { %783 = vmatmul.bf16.gmra.mxu2 %v3179_v48  ;;  %803 = vmatmul.bf16.gmra.mxu3 %v3227_v49  ;;  %v4236_v47 = vld [vmem:[%s4652_s5 + $0x34] sm:$0xf]  ;;  %v3484_v48 = vld [vmem:[%s4652_s5 + $0x3c] sm:$0xf0]  ;;  %v4166_v49 = vld [vmem:[%s4652_s5 + $0x28] sm:$0xf0] }
  0x46   : > { %912 = vmatpush.bf16.msrb.mxu2 %v4228_v44  ;;  %1585 = vmatpush.bf16.msrb.mxu3 %v4284_v45  ;;  %v4164_v44 = vld [vmem:[%s4652_s5 + $0x1c] sm:$0xf]  ;;  %v3084_v45 = vld [vmem:[%s4652_s5 + $0x24] sm:$0xf0]  ;;  %v4365_v35 = vld [vmem:[%s5580_s1 + $0x1e0] sm:$0xff] }
  0x47   : > { %823 = vmatpush.bf16.msrb.mxu1 %v4220_v50  ;;  %1674 = vmatpush.bf16.msrb.mxu0 %v4292_v51  ;;  %v3482_v50 = vld [vmem:[%s4652_s5 + $0x30] sm:$0xf]  ;;  %v4237_v51 = vld [vmem:[%s4652_s5 + $0x38] sm:$0xf0] }
  0x4a   : > { %913 = vmatpush.bf16.msrb.mxu2 %v4227_v52  ;;  %1586 = vmatpush.bf16.msrb.mxu3 %v4283_v53  ;;  %v3087_v52 = vor.u32 %v4164_v44, %v3084_v45  ;;  %v3487_v53 = vor.u32 %v4236_v47, %v3484_v48  ;;  %v3138_v44 = vld [vmem:[%s4652_s5 + $0x80] sm:$0xf]  ;;  %v4248_v45 = vld [vmem:[%s4652_s5 + $0x94] sm:$0xf]  ;;  %v4178_v47 = vld [vmem:[%s4652_s5 + $0x88] sm:$0xf0] }
  0x4b   : > { %824 = vmatpush.bf16.msrb.mxu1 %v4219_v54  ;;  %1675 = vmatpush.bf16.msrb.mxu0 %v4291_v55  ;;  %v3091_v54 = vor.u32 %v4166_v49, %v3090_v46  ;;  %v3483_v55 = vor.u32 %v4237_v51, %v3482_v50  ;;  %v3532_v46 = vld [vmem:[%s4652_s5 + $0x9c] sm:$0xf0]  ;;  %v3530_v48 = vld [vmem:[%s4652_s5 + $0x90] sm:$0xf]  ;;  %v4249_v49 = vld [vmem:[%s4652_s5 + $0x98] sm:$0xf0] }
  0x4e   : > { %914 = vmatpush.bf16.msrb.mxu2 %v4226_v56  ;;  %1587 = vmatpush.bf16.msrb.mxu3 %v4282_v57  ;;  %v4167_v56 = vld [vmem:[%s4652_s5 + $0x34] sm:$0xf]  ;;  %v3096_v57 = vld [vmem:[%s4652_s5 + $0x3c] sm:$0xf0] }
  0x4f   : > { %825 = vmatpush.bf16.msrb.mxu1 %v4218_v58  ;;  %1676 = vmatpush.bf16.msrb.mxu0 %v4290_v59  ;;  %v3102_v58 = vld [vmem:[%s4652_s5 + $0x38] sm:$0xf]  ;;  %v4239_v59 = vld [vmem:[%s4652_s5 + $0x4c] sm:$0xf]  ;;  %v3099_v0 = vor.u32 %v4167_v56, %v3096_v57  ;;  %v3139_v56 = vor.u32 %v4178_v47, %v3138_v44  ;;  %v3531_v57 = vor.u32 %v4249_v49, %v3530_v48  ;;  %v4185_v48 = vld [vmem:[%s4652_s5 + $0xc4] sm:$0xf] }
  0x50   : > { %v3499_v1 = vor.u32 %v4239_v59, %v3496_v60  ;;  %v3168_v49 = vld [vmem:[%s4652_s5 + $0xcc] sm:$0xf0] }
  0x52   : > { %915 = vmatpush.bf16.msrb.mxu2 %v4225_v61  ;;  %1588 = vmatpush.bf16.msrb.mxu3 %v4281_v62  ;;  %v4169_v61 = vld [vmem:[%s4652_s5 + $0x40] sm:$0xf0]  ;;  %v3494_v62 = vld [vmem:[%s4652_s5 + $0x48] sm:$0xf] }
  0x53   : > { %826 = vmatpush.bf16.msrb.mxu1 %v4217_v6  ;;  %1677 = vmatpush.bf16.msrb.mxu0 %v4289_v7  ;;  %v3103_v2 = vor.u32 %v4169_v61, %v3102_v58  ;;  %v3495_v3 = vor.u32 %v4240_v63, %v3494_v62  ;;  %v4302_v6 = vld [vmem:[%s5580_s1 + $0x168] sm:$0xff]  ;;  %v4179_v62 = vld [vmem:[%s4652_s5 + $0x94] sm:$0xf]  ;;  %v3144_v63 = vld [vmem:[%s4652_s5 + $0x9c] sm:$0xf0] }
  0x54   : > { %748 = vmatmul.bf16.gmra.mxu0 %v3095_v8  ;;  %768 = vmatmul.bf16.gmra.mxu1 %v3143_v9  ;;  %v4374_v7 = vld [vmem:[%s5580_s1 + $0x228] sm:$0xff]  ;;  %v3108_v9 = vld [vmem:[%s4652_s5 + $0x54] sm:$0xf0] }
  0x55   : > { %788 = vmatmul.bf16.gmra.mxu2 %v3191_v10  ;;  %808 = vmatmul.bf16.gmra.mxu3 %v3239_v11  ;;  %v4170_v8 = vld [vmem:[%s4652_s5 + $0x4c] sm:$0xf]  ;;  %v3114_v10 = vld [vmem:[%s4652_s5 + $0x50] sm:$0xf]  ;;  %v4242_v11 = vld [vmem:[%s4652_s5 + $0x64] sm:$0xf] }
  0x56   : > { %2464 = vmatpush.bf16.msra.mxu2 %v4360_v12  ;;  %2553 = vmatpush.bf16.msra.mxu3 %v4368_v13  ;;  %v3508_v12 = vld [vmem:[%s4652_s5 + $0x6c] sm:$0xf0]  ;;  %v4172_v13 = vld [vmem:[%s4652_s5 + $0x58] sm:$0xf0]  ;;  %v3111_v16 = vor.u32 %v4170_v8, %v3108_v9  ;;  %v3147_v8 = vor.u32 %v4179_v62, %v3144_v63  ;;  %v3566_v62 = vld [vmem:[%s4652_s5 + $0xd8] sm:$0xf] }
  0x57   : > { %1759 = vmatpush.bf16.msra.mxu1 %v4304_v14  ;;  %2642 = vmatpush.bf16.msra.mxu0 %v4376_v15  ;;  %v3506_v14 = vld [vmem:[%s4652_s5 + $0x60] sm:$0xf]  ;;  %v4243_v15 = vld [vmem:[%s4652_s5 + $0x68] sm:$0xf0]  ;;  %v3511_v17 = vor.u32 %v4242_v11, %v3508_v12  ;;  %v3115_v18 = vor.u32 %v4172_v13, %v3114_v10  ;;  %v4258_v63 = vld [vmem:[%s4652_s5 + $0xe0] sm:$0xf0] }
  0x58   : > { %v3507_v19 = vor.u32 %v4243_v15, %v3506_v14  ;;  %v4356_v14 = vld [vmem:[%s5580_s1 + $0x198] sm:$0xff] }
  0x59   : > { %v4364_v15 = vld [vmem:[%s5580_s1 + $0x1d8] sm:$0xff] }
  0x5a   : > { %2465 = vmatpush.bf16.msra.mxu2 %v4359_v40  ;;  %2554 = vmatpush.bf16.msra.mxu3 %v4367_v41  ;;  %v4301_v40 = vld [vmem:[%s5580_s1 + $0x160] sm:$0xff] }
  0x5b   : > { %1760 = vmatpush.bf16.msra.mxu1 %v4303_v42  ;;  %2643 = vmatpush.bf16.msra.mxu0 %v4375_v43  ;;  %v4373_v41 = vld [vmem:[%s5580_s1 + $0x220] sm:$0xff]  ;;  %v4176_v42 = vld [vmem:[%s4652_s5 + $0x7c] sm:$0xf]  ;;  %v3132_v43 = vld [vmem:[%s4652_s5 + $0x84] sm:$0xf0] }
  0x5e   : > { %2466 = vmatpush.bf16.msra.mxu2 %v4358_v4  ;;  %2555 = vmatpush.bf16.msra.mxu3 %v4366_v5  ;;  %v3542_v4 = vld [vmem:[%s4652_s5 + $0xa8] sm:$0xf]  ;;  %v4252_v5 = vld [vmem:[%s4652_s5 + $0xb0] sm:$0xf0] }
  0x5f   : > { %1761 = vmatpush.bf16.msra.mxu1 %v4302_v6  ;;  %2644 = vmatpush.bf16.msra.mxu0 %v4374_v7  ;;  %v3543_v13 = vor.u32 %v4252_v5, %v3542_v4 }
  0x62   : > { %2467 = vmatpush.bf16.msra.mxu2 %v4357_v34  ;;  %2556 = vmatpush.bf16.msra.mxu3 %v4365_v35 }
  0x63   : > { %1762 = vmatpush.bf16.msra.mxu1 %v4301_v40  ;;  %2645 = vmatpush.bf16.msra.mxu0 %v4373_v41 }
  0x64   : > { %753 = vmatmul.bf16.gmra.mxu0 %v3107_v24  ;;  %773 = vmatmul.bf16.gmra.mxu1 %v3155_v25  ;;  %v3520_v24 = vld [vmem:[%s4652_s5 + $0x84] sm:$0xf0]  ;;  %v4175_v25 = vld [vmem:[%s4652_s5 + $0x70] sm:$0xf0] }
  0x65   : > { %793 = vmatmul.bf16.gmra.mxu2 %v3203_v26  ;;  %813 = vmatmul.bf16.gmra.mxu3 %v3251_v27  ;;  %v3518_v26 = vld [vmem:[%s4652_s5 + $0x78] sm:$0xf]  ;;  %v4246_v27 = vld [vmem:[%s4652_s5 + $0x80] sm:$0xf0]  ;;  %v3523_v29 = vor.u32 %v4245_v23, %v3520_v24  ;;  %v3127_v32 = vor.u32 %v4175_v25, %v3126_v22  ;;  %v4182_v22 = vld [vmem:[%s4652_s5 + $0xac] sm:$0xf] }
  0x66   : > { %v3519_v33 = vor.u32 %v4246_v27, %v3518_v26  ;;  %2468 = vmatpush.bf16.msra.mxu2 %v4356_v14  ;;  %2557 = vmatpush.bf16.msra.mxu3 %v4364_v15  ;;  %v3156_v23 = vld [vmem:[%s4652_s5 + $0xb4] sm:$0xf0]  ;;  %v3162_v24 = vld [vmem:[%s4652_s5 + $0xb0] sm:$0xf]  ;;  %v4254_v25 = vld [vmem:[%s4652_s5 + $0xc4] sm:$0xf] }
  0x67   : > { %1763 = vmatpush.bf16.msra.mxu1 %v4300_v20  ;;  %2646 = vmatpush.bf16.msra.mxu0 %v4372_v21  ;;  %v3556_v26 = vld [vmem:[%s4652_s5 + $0xcc] sm:$0xf0]  ;;  %v4184_v27 = vld [vmem:[%s4652_s5 + $0xb8] sm:$0xf0]  ;;  %v3159_v34 = vor.u32 %v4182_v22, %v3156_v23 }
  0x68   : > { %v3559_v35 = vor.u32 %v4254_v25, %v3556_v26  ;;  %v4363_v14 = vld [vmem:[%s5580_s1 + $0x1d0] sm:$0xff] }
  0x69   : > { %v4299_v25 = vld [vmem:[%s5580_s1 + $0x150] sm:$0xff] }
  0x6a   : > { %2558 = vmatpush.bf16.msra.mxu3 %v4363_v14  ;;  %v4371_v26 = vld [vmem:[%s5580_s1 + $0x210] sm:$0xff] }
  0x6b   : > { %1764 = vmatpush.bf16.msra.mxu1 %v4299_v25  ;;  %2647 = vmatpush.bf16.msra.mxu0 %v4371_v26  ;;  %v4193_v25 = vld [vmem:[%s4652_s5 + $0x100] sm:$0xf0]  ;;  %v3590_v26 = vld [vmem:[%s4652_s5 + $0x108] sm:$0xf] }
  0x74   : > { %827 = vmatmul.bf16.vlgmr.msrb.gmra.mxu1 %v3075_v36  ;;  %1678 = vmatmul.bf16.vlgmr.msrb.gmra.mxu0 %v3475_v37 }
  0x75   : > { %916 = vmatmul.bf16.vlgmr.msrb.gmra.mxu2 %v3079_v38  ;;  %1589 = vmatmul.bf16.vlgmr.msrb.gmra.mxu3 %v3471_v39 }
  0x84   : > { %832 = vmatmul.bf16.gmra.mxu1 %v3087_v52  ;;  %1683 = vmatmul.bf16.gmra.mxu0 %v3487_v53  ;;  %v3135_v52 = vor.u32 %v4176_v42, %v3132_v43  ;;  %v3535_v53 = vor.u32 %v4248_v45, %v3532_v46  ;;  %v3163_v42 = vor.u32 %v4184_v27, %v3162_v24  ;;  %v4188_v27 = vld [vmem:[%s4652_s5 + $0xdc] sm:$0xf] }
  0x85   : > { %921 = vmatmul.bf16.gmra.mxu2 %v3091_v54  ;;  %1594 = vmatmul.bf16.gmra.mxu3 %v3483_v55 }
  0x94   : > { %837 = vmatmul.bf16.gmra.mxu1 %v3099_v0  ;;  %1688 = vmatmul.bf16.gmra.mxu0 %v3499_v1  ;;  %v3150_v0 = vld [vmem:[%s4652_s5 + $0x98] sm:$0xf]  ;;  %v4251_v1 = vld [vmem:[%s4652_s5 + $0xac] sm:$0xf] }
  0x95   : > { %926 = vmatmul.bf16.gmra.mxu2 %v3103_v2  ;;  %1599 = vmatmul.bf16.gmra.mxu3 %v3495_v3  ;;  %v3544_v2 = vld [vmem:[%s4652_s5 + $0xb4] sm:$0xf0]  ;;  %v4181_v3 = vld [vmem:[%s4652_s5 + $0xa0] sm:$0xf0] }
  0x96   : > { %v3547_v9 = vor.u32 %v4251_v1, %v3544_v2  ;;  %v3151_v12 = vor.u32 %v4181_v3, %v3150_v0  ;;  %v3171_v2 = vor.u32 %v4185_v48, %v3168_v49  ;;  %v4261_v48 = vld [vmem:[%s4652_s5 + $0xf8] sm:$0xf0] }
  0xa4   : > { %842 = vmatmul.bf16.gmra.mxu1 %v3111_v16  ;;  %1693 = vmatmul.bf16.gmra.mxu0 %v3511_v17 }
  0xa5   : > { %931 = vmatmul.bf16.gmra.mxu2 %v3115_v18  ;;  %1604 = vmatmul.bf16.gmra.mxu3 %v3507_v19 }
  0xb1   : > { %v4861_v30 = vpop.f32.mrf.mxu0  ;;  %v4863_v31 = vpop.f32.mrf.mxu1 }
  0xb4   : > { %847 = vmatmul.bf16.gmra.mxu1 %v3123_v28  ;;  %1698 = vmatmul.bf16.gmra.mxu0 %v3523_v29  ;;  %v3554_v28 = vld [vmem:[%s4652_s5 + $0xc0] sm:$0xf]  ;;  %v4255_v29 = vld [vmem:[%s4652_s5 + $0xc8] sm:$0xf0] }
  0xb5   : > { %936 = vmatmul.bf16.gmra.mxu2 %v3127_v32  ;;  %1609 = vmatmul.bf16.gmra.mxu3 %v3519_v33  ;;  %v3555_v43 = vor.u32 %v4255_v29, %v3554_v28  ;;  %v3180_v28 = vld [vmem:[%s4652_s5 + $0xe4] sm:$0xf0]  ;;  %v3186_v29 = vld [vmem:[%s4652_s5 + $0xe0] sm:$0xf] }
  0xb8   : > { %v4871_v36 = vpop.f32.mrf.mxu2  ;;  %v4873_v37 = vpop.f32.mrf.mxu3 }
  0xb9   : > { %v4875_v38 = vpop.f32.mrf.mxu0  ;;  %v4877_v39 = vpop.f32.mrf.mxu1 }
  0xc0   : > { %v4893_v50 = vpop.f32.mrf.mxu2  ;;  %v4895_v51 = vpop.f32.mrf.mxu3 }
  0xc1   : > { %v4897_v54 = vpop.f32.mrf.mxu0  ;;  %v4899_v55 = vpop.f32.mrf.mxu1 }
  0xc4   : > { %852 = vmatmul.bf16.gmra.mxu1 %v3135_v52  ;;  %1703 = vmatmul.bf16.gmra.mxu0 %v3535_v53  ;;  %v3174_v52 = vld [vmem:[%s4652_s5 + $0xc8] sm:$0xf]  ;;  %v4257_v53 = vld [vmem:[%s4652_s5 + $0xdc] sm:$0xf] }
  0xc5   : > { %941 = vmatmul.bf16.gmra.mxu2 %v3139_v56  ;;  %1614 = vmatmul.bf16.gmra.mxu3 %v3531_v57  ;;  %v3568_v56 = vld [vmem:[%s4652_s5 + $0xe4] sm:$0xf0]  ;;  %v4187_v57 = vld [vmem:[%s4652_s5 + $0xd0] sm:$0xf0] }
  0xc6   : > { %v3571_v3 = vor.u32 %v4257_v53, %v3568_v56 }
  0xc8   : > { %v4901_v58 = vpop.f32.mrf.mxu2  ;;  %v4903_v59 = vpop.f32.mrf.mxu3 }
  0xc9   : > { %v4905_v60 = vpop.f32.mrf.mxu0  ;;  %v4907_v61 = vpop.f32.mrf.mxu1 }
  0xd0   : > { %v4917_v6 = vpop.f32.mrf.mxu2  ;;  %v4919_v7 = vpop.f32.mrf.mxu3 }
  0xd1   : > { %v4921_v10 = vpop.f32.mrf.mxu0  ;;  %v4923_v11 = vpop.f32.mrf.mxu1 }
  0xd4   : > { %857 = vmatmul.bf16.gmra.mxu1 %v3147_v8  ;;  %1708 = vmatmul.bf16.gmra.mxu0 %v3547_v9  ;;  %v3175_v8 = vor.u32 %v4187_v57, %v3174_v52  ;;  %v3567_v9 = vor.u32 %v4258_v63, %v3566_v62  ;;  %v3183_v52 = vor.u32 %v4188_v27, %v3180_v28  ;;  %v4264_v27 = vld [vmem:[%s4652_s5 + $0x110] sm:$0xf0] }
  0xd5   : > { %946 = vmatmul.bf16.gmra.mxu2 %v3151_v12  ;;  %1619 = vmatmul.bf16.gmra.mxu3 %v3543_v13  ;;  %v4355_v13 = vld [vmem:[%s5580_s1 + $0x190] sm:$0xff] }
  0xd6   : > { %2469 = vmatpush.bf16.msra.mxu2 %v4355_v13 }
  0xd8   : > { %v4931_v16 = vpop.f32.mrf.mxu2  ;;  %v4933_v17 = vpop.f32.mrf.mxu3 }
  0xd9   : > { %v4935_v18 = vpop.f32.mrf.mxu0  ;;  %v4937_v19 = vpop.f32.mrf.mxu1 }
  0xe0   : > { %v4953_v32 = vpop.f32.mrf.mxu2  ;;  %v4955_v33 = vpop.f32.mrf.mxu3 }
  0xe1   : > { %v4957_v40 = vpop.f32.mrf.mxu0  ;;  %v4959_v41 = vpop.f32.mrf.mxu1 }
  0xe4   : > { %862 = vmatmul.bf16.gmra.mxu1 %v3159_v34  ;;  %1713 = vmatmul.bf16.gmra.mxu0 %v3559_v35  ;;  %v4260_v34 = vld [vmem:[%s4652_s5 + $0xf4] sm:$0xf]  ;;  %v3580_v35 = vld [vmem:[%s4652_s5 + $0xfc] sm:$0xf0] }
  0xe5   : > { %951 = vmatmul.bf16.gmra.mxu2 %v3163_v42  ;;  %1624 = vmatmul.bf16.gmra.mxu3 %v3555_v43  ;;  %v4190_v42 = vld [vmem:[%s4652_s5 + $0xe8] sm:$0xf0]  ;;  %v3578_v43 = vld [vmem:[%s4652_s5 + $0xf0] sm:$0xf]  ;;  %v3583_v53 = vor.u32 %v4260_v34, %v3580_v35 }
  0xe8   : > { %v4961_v44 = vpop.f32.mrf.mxu2  ;;  %v4963_v45 = vpop.f32.mrf.mxu3 }
  0xe9   : > { %v4965_v46 = vpop.f32.mrf.mxu0  ;;  %v4967_v47 = vpop.f32.mrf.mxu1 }
  0xf0   : > { %v4977_v0 = vpop.f32.mrf.mxu2  ;;  %v4979_v1 = vpop.f32.mrf.mxu3 }
  0xf1   : > { %v828_v4 = vpop.f32.mrf.mxu1  ;;  %v1679_v5 = vpop.f32.mrf.mxu0 }
  0xf2   : > { %v829_v12 = vadd.f32 %v828_v4, %v4861_v30 }
  0xf4   : > { %867 = vmatmul.bf16.gmra.mxu1 %v3171_v2  ;;  %1718 = vmatmul.bf16.gmra.mxu0 %v3571_v3  ;;  %v3187_v2 = vor.u32 %v4190_v42, %v3186_v29  ;;  %v3579_v3 = vor.u32 %v4261_v48, %v3578_v43 }
  0xf5   : > { %956 = vmatmul.bf16.gmra.mxu2 %v3175_v8  ;;  %1629 = vmatmul.bf16.gmra.mxu3 %v3567_v9 }
  0xf8   : > { %v917_v30 = vpop.f32.mrf.mxu2  ;;  %v1590_v15 = vpop.f32.mrf.mxu3 }
  0xf9   : > { %v4988_v20 = vadd.f32 %v917_v30, %v829_v12  ;;  %v4990_v21 = vadd.f32 %v1679_v5, %v1590_v15  ;;  %v830_v22 = vpop.f32.mrf.mxu1  ;;  %v1681_v23 = vpop.f32.mrf.mxu0  ;;  %v4191_v15 = vld [vmem:[%s4652_s5 + $0xf4] sm:$0xf] }
  0xfa   : > { %v831_v24 = vadd.f32 %v830_v22, %v4875_v38  ;;  %v3198_v22 = vld [vmem:[%s4652_s5 + $0xf8] sm:$0xf] }
 0x100   : > { %v919_v49 = vpop.f32.mrf.mxu2  ;;  %v1592_v38 = vpop.f32.mrf.mxu3 }
 0x101   : > { %v5007_v56 = vadd.f32 %v919_v49, %v831_v24  ;;  %v5009_v57 = vadd.f32 %v1681_v23, %v1592_v38  ;;  %v833_v62 = vpop.f32.mrf.mxu1  ;;  %v1684_v63 = vpop.f32.mrf.mxu0  ;;  %v4263_v23 = vld [vmem:[%s4652_s5 + $0x10c] sm:$0xf]  ;;  %v3592_v24 = vld [vmem:[%s4652_s5 + $0x114] sm:$0xf0]  ;;  %v3199_v38 = vor.u32 %v4193_v25, %v3198_v22  ;;  %v4266_v22 = vld [vmem:[%s4652_s5 + $0x124] sm:$0xf] }
 0x102   : > { %v834_v4 = vadd.f32 %v833_v62, %v4897_v54  ;;  %v3192_v54 = vld [vmem:[%s4652_s5 + $0xfc] sm:$0xf0]  ;;  %v3595_v35 = vor.u32 %v4263_v23, %v3592_v24  ;;  %v4362_v62 = vld [vmem:[%s5580_s1 + $0x1c8] sm:$0xff]  ;;  %v3604_v23 = vld [vmem:[%s4652_s5 + $0x12c] sm:$0xf0] }
 0x103   : > { %v3195_v34 = vor.u32 %v4191_v15, %v3192_v54  ;;  %2559 = vmatpush.bf16.msra.mxu3 %v4362_v62  ;;  %v3204_v15 = vld [vmem:[%s4652_s5 + $0x114] sm:$0xf0]  ;;  %v3210_v54 = vld [vmem:[%s4652_s5 + $0x110] sm:$0xf]  ;;  %v4196_v24 = vld [vmem:[%s4652_s5 + $0x118] sm:$0xf0] }
 0x104   : > { %872 = vmatmul.bf16.gmra.mxu1 %v3183_v52  ;;  %1723 = vmatmul.bf16.gmra.mxu0 %v3583_v53  ;;  %v4354_v53 = vld [vmem:[%s5580_s1 + $0x188] sm:$0xff]  ;;  %v3602_v25 = vld [vmem:[%s4652_s5 + $0x120] sm:$0xf] }
 0x105   : > { %961 = vmatmul.bf16.gmra.mxu2 %v3187_v2  ;;  %1634 = vmatmul.bf16.gmra.mxu3 %v3579_v3 }
 0x106   : > { %2470 = vmatpush.bf16.msra.mxu2 %v4354_v53 }
 0x108   : > { %v922_v5 = vpop.f32.mrf.mxu2  ;;  %v1595_v8 = vpop.f32.mrf.mxu3 }
 0x109   : > { %v5012_v9 = vadd.f32 %v922_v5, %v834_v4  ;;  %v5014_v12 = vadd.f32 %v1684_v63, %v1595_v8  ;;  %v835_v13 = vpop.f32.mrf.mxu1  ;;  %v1686_v14 = vpop.f32.mrf.mxu0 }
 0x10a   : > { %v836_v30 = vadd.f32 %v835_v13, %v4905_v60  ;;  %v3591_v60 = vor.u32 %v4264_v27, %v3590_v26  ;;  %v4298_v13 = vld [vmem:[%s5580_s1 + $0x148] sm:$0xff] }
 0x10b   : > { %1765 = vmatpush.bf16.msra.mxu1 %v4298_v13  ;;  %v4267_v26 = vld [vmem:[%s4652_s5 + $0x128] sm:$0xf0]  ;;  %v4197_v13 = vld [vmem:[%s4652_s5 + $0x124] sm:$0xf] }
 0x110   : > { %v924_v28 = vpop.f32.mrf.mxu2  ;;  %v1597_v29 = vpop.f32.mrf.mxu3 }
 0x111   : > { %v5025_v42 = vadd.f32 %v924_v28, %v836_v30  ;;  %v5027_v43 = vadd.f32 %v1686_v14, %v1597_v29  ;;  %v838_v48 = vpop.f32.mrf.mxu1  ;;  %v1689_v49 = vpop.f32.mrf.mxu0  ;;  %v4370_v14 = vld [vmem:[%s5580_s1 + $0x208] sm:$0xff]  ;;  %v3607_v29 = vor.u32 %v4266_v22, %v3604_v23  ;;  %v3614_v22 = vld [vmem:[%s4652_s5 + $0x138] sm:$0xf]  ;;  %v4270_v23 = vld [vmem:[%s4652_s5 + $0x140] sm:$0xf0] }
 0x112   : > { %v839_v52 = vadd.f32 %v838_v48, %v4921_v10  ;;  %v4194_v30 = vld [vmem:[%s4652_s5 + $0x10c] sm:$0xf]  ;;  %2648 = vmatpush.bf16.msra.mxu0 %v4370_v14  ;;  %v3222_v14 = vld [vmem:[%s4652_s5 + $0x128] sm:$0xf] }
 0x113   : > { %v3207_v28 = vor.u32 %v4194_v30, %v3204_v15  ;;  %v4269_v30 = vld [vmem:[%s4652_s5 + $0x13c] sm:$0xf]  ;;  %v3616_v15 = vld [vmem:[%s4652_s5 + $0x144] sm:$0xf0] }
 0x114   : > { %877 = vmatmul.bf16.gmra.mxu1 %v3195_v34  ;;  %1728 = vmatmul.bf16.gmra.mxu0 %v3595_v35 }
 0x115   : > { %966 = vmatmul.bf16.gmra.mxu2 %v3199_v38  ;;  %1639 = vmatmul.bf16.gmra.mxu3 %v3591_v60  ;;  %v3211_v38 = vor.u32 %v4196_v24, %v3210_v54  ;;  %v3603_v60 = vor.u32 %v4267_v26, %v3602_v25  ;;  %v4199_v54 = vld [vmem:[%s4652_s5 + $0x130] sm:$0xf0] }
 0x118   : > { %v927_v10 = vpop.f32.mrf.mxu2  ;;  %v1600_v63 = vpop.f32.mrf.mxu3 }
 0x119   : > { %v5036_v2 = vadd.f32 %v927_v10, %v839_v52  ;;  %v5038_v3 = vadd.f32 %v1689_v49, %v1600_v63  ;;  %v840_v4 = vpop.f32.mrf.mxu1  ;;  %v1691_v5 = vpop.f32.mrf.mxu0 }
 0x11a   : > { %v841_v8 = vadd.f32 %v840_v4, %v4935_v18 }
 0x120   : > { %v929_v27 = vpop.f32.mrf.mxu2  ;;  %v1602_v18 = vpop.f32.mrf.mxu3 }
 0x121   : > { %v5055_v34 = vadd.f32 %v929_v27, %v841_v8  ;;  %v5057_v35 = vadd.f32 %v1691_v5, %v1602_v18  ;;  %v843_v48 = vpop.f32.mrf.mxu1  ;;  %v1694_v49 = vpop.f32.mrf.mxu0  ;;  %v3619_v27 = vor.u32 %v4269_v30, %v3616_v15  ;;  %v3228_v30 = vld [vmem:[%s4652_s5 + $0x144] sm:$0xf0]  ;;  %v3234_v15 = vld [vmem:[%s4652_s5 + $0x140] sm:$0xf] }
 0x122   : > { %v844_v52 = vadd.f32 %v843_v48, %v4957_v40  ;;  %v3216_v40 = vld [vmem:[%s4652_s5 + $0x12c] sm:$0xf0] }
 0x123   : > { %v3219_v26 = vor.u32 %v4197_v13, %v3216_v40  ;;  %v4297_v40 = vld [vmem:[%s5580_s1 + $0x140] sm:$0xff] }
 0x124   : > { %882 = vmatmul.bf16.gmra.mxu1 %v3207_v28  ;;  %1733 = vmatmul.bf16.gmra.mxu0 %v3607_v29 }
 0x125   : > { %971 = vmatmul.bf16.gmra.mxu2 %v3211_v38  ;;  %1644 = vmatmul.bf16.gmra.mxu3 %v3603_v60  ;;  %v4353_v38 = vld [vmem:[%s5580_s1 + $0x180] sm:$0xff] }
 0x126   : > { %v4361_v60 = vld [vmem:[%s5580_s1 + $0x1c0] sm:$0xff]  ;;  %2471 = vmatpush.bf16.msra.mxu2 %v4353_v38  ;;  %1766 = vmatpush.bf16.msra.mxu1 %v4297_v40 }
 0x127   : > { %2560 = vmatpush.bf16.msra.mxu3 %v4361_v60 }
 0x128   : > { %v932_v53 = vpop.f32.mrf.mxu2  ;;  %v1605_v62 = vpop.f32.mrf.mxu3 }
 0x129   : > { %v5060_v10 = vadd.f32 %v932_v53, %v844_v52  ;;  %v5062_v63 = vadd.f32 %v1694_v49, %v1605_v62  ;;  %v845_v4 = vpop.f32.mrf.mxu1  ;;  %v1696_v5 = vpop.f32.mrf.mxu0  ;;  %v3223_v49 = vor.u32 %v4199_v54, %v3222_v14  ;;  %v4200_v14 = vld [vmem:[%s4652_s5 + $0x13c] sm:$0xf]  ;;  %v4272_v54 = vld [vmem:[%s4652_s5 + $0x154] sm:$0xf] }
 0x12a   : > { %v846_v8 = vadd.f32 %v845_v4, %v4965_v46  ;;  %v3615_v46 = vor.u32 %v4270_v23, %v3614_v22  ;;  %v3628_v22 = vld [vmem:[%s4652_s5 + $0x15c] sm:$0xf0]  ;;  %v4202_v23 = vld [vmem:[%s4652_s5 + $0x148] sm:$0xf0] }
 0x130   : > { %v934_v24 = vpop.f32.mrf.mxu2  ;;  %v1607_v25 = vpop.f32.mrf.mxu3 }
 0x131   : > { %v5073_v18 = vadd.f32 %v934_v24, %v846_v8  ;;  %v5075_v28 = vadd.f32 %v1696_v5, %v1607_v25  ;;  %v848_v29 = vpop.f32.mrf.mxu1  ;;  %v1699_v48 = vpop.f32.mrf.mxu0  ;;  %v3626_v24 = vld [vmem:[%s4652_s5 + $0x150] sm:$0xf]  ;;  %v4273_v25 = vld [vmem:[%s4652_s5 + $0x158] sm:$0xf0] }
 0x132   : > { %v849_v52 = vadd.f32 %v848_v29, %v4863_v31  ;;  %v4369_v31 = vld [vmem:[%s5580_s1 + $0x200] sm:$0xff] }
 0x133   : > { %2649 = vmatpush.bf16.msra.mxu0 %v4369_v31 }
 0x134   : > { %887 = vmatmul.bf16.gmra.mxu1 %v3219_v26  ;;  %1738 = vmatmul.bf16.gmra.mxu0 %v3619_v27 }
 0x135   : > { %976 = vmatmul.bf16.gmra.mxu2 %v3223_v49  ;;  %1649 = vmatmul.bf16.gmra.mxu3 %v3615_v46  ;;  %v3631_v49 = vor.u32 %v4272_v54, %v3628_v22  ;;  %v3240_v54 = vld [vmem:[%s4652_s5 + $0x15c] sm:$0xf0]  ;;  %v3246_v22 = vld [vmem:[%s4652_s5 + $0x158] sm:$0xf] }
 0x138   : > { %v937_v53 = vpop.f32.mrf.mxu2  ;;  %v1610_v62 = vpop.f32.mrf.mxu3 }
 0x139   : > { %v5084_v4 = vadd.f32 %v937_v53, %v849_v52  ;;  %v5086_v5 = vadd.f32 %v1699_v48, %v1610_v62  ;;  %v850_v8 = vpop.f32.mrf.mxu1  ;;  %v1701_v13 = vpop.f32.mrf.mxu0  ;;  %v3231_v48 = vor.u32 %v4200_v14, %v3228_v30  ;;  %v3235_v53 = vor.u32 %v4202_v23, %v3234_v15  ;;  %v4203_v15 = vld [vmem:[%s4652_s5 + $0x154] sm:$0xf]  ;;  %v4275_v23 = vld [vmem:[%s4652_s5 + $0x16c] sm:$0xf] }
 0x13a   : > { %v851_v26 = vadd.f32 %v850_v8, %v4877_v39  ;;  %v3627_v62 = vor.u32 %v4273_v25, %v3626_v24  ;;  %v3640_v24 = vld [vmem:[%s4652_s5 + $0x174] sm:$0xf0]  ;;  %v4205_v25 = vld [vmem:[%s4652_s5 + $0x160] sm:$0xf0] }
 0x140   : > { %v939_v27 = vpop.f32.mrf.mxu2  ;;  %v1612_v29 = vpop.f32.mrf.mxu3 }
 0x141   : > { %v5103_v46 = vadd.f32 %v939_v27, %v851_v26  ;;  %v5105_v38 = vadd.f32 %v1701_v13, %v1612_v29  ;;  %v853_v60 = vpop.f32.mrf.mxu1  ;;  %v1704_v52 = vpop.f32.mrf.mxu0  ;;  %v3638_v26 = vld [vmem:[%s4652_s5 + $0x168] sm:$0xf]  ;;  %v4276_v27 = vld [vmem:[%s4652_s5 + $0x170] sm:$0xf0] }
 0x142   : > { %v854_v39 = vadd.f32 %v853_v60, %v4899_v55  ;;  %v3643_v60 = vor.u32 %v4275_v23, %v3640_v24  ;;  %v4206_v24 = vld [vmem:[%s4652_s5 + $0x16c] sm:$0xf] }
 0x144   : > { %892 = vmatmul.bf16.gmra.mxu1 %v3231_v48  ;;  %1743 = vmatmul.bf16.gmra.mxu0 %v3631_v49  ;;  %v3243_v49 = vor.u32 %v4203_v15, %v3240_v54 }
 0x145   : > { %981 = vmatmul.bf16.gmra.mxu2 %v3235_v53  ;;  %1654 = vmatmul.bf16.gmra.mxu3 %v3627_v62 }
 0x148   : > { %v942_v8 = vpop.f32.mrf.mxu2  ;;  %v1615_v13 = vpop.f32.mrf.mxu3 }
 0x149   : > { %v5108_v40 = vadd.f32 %v942_v8, %v854_v39  ;;  %v5110_v31 = vadd.f32 %v1704_v52, %v1615_v13  ;;  %v855_v14 = vpop.f32.mrf.mxu1  ;;  %v1706_v30 = vpop.f32.mrf.mxu0  ;;  %v3247_v8 = vor.u32 %v4205_v25, %v3246_v22  ;;  %v3639_v13 = vor.u32 %v4276_v27, %v3638_v26  ;;  %v3252_v25 = vld [vmem:[%s4652_s5 + $0x174] sm:$0xf0]  ;;  %v3258_v26 = vld [vmem:[%s4652_s5 + $0x170] sm:$0xf]  ;;  %v4278_v27 = vld [vmem:[%s4652_s5 + $0x184] sm:$0xf] }
 0x14a   : > { %v856_v29 = vadd.f32 %v855_v14, %v4907_v61 }
 0x150   : > { %v944_v48 = vpop.f32.mrf.mxu2  ;;  %v1617_v55 = vpop.f32.mrf.mxu3 }
 0x151   : > { %v5121_v53 = vadd.f32 %v944_v48, %v856_v29  ;;  %v5123_v52 = vadd.f32 %v1706_v30, %v1617_v55  ;;  %v858_v62 = vpop.f32.mrf.mxu1  ;;  %v1709_v39 = vpop.f32.mrf.mxu0  ;;  %v3652_v29 = vld [vmem:[%s4652_s5 + $0x18c] sm:$0xf0]  ;;  %v4208_v48 = vld [vmem:[%s4652_s5 + $0x178] sm:$0xf0]  ;;  %v3650_v55 = vld [vmem:[%s4652_s5 + $0x180] sm:$0xf] }
 0x152   : > { %v859_v61 = vadd.f32 %v858_v62, %v4923_v11  ;;  %v3255_v62 = vor.u32 %v4206_v24, %v3252_v25 }
 0x154   : > { %897 = vmatmul.bf16.gmra.mxu1 %v3243_v49  ;;  %1748 = vmatmul.bf16.gmra.mxu0 %v3643_v60  ;;  %v4279_v49 = vld [vmem:[%s4652_s5 + $0x188] sm:$0xf0] }
 0x155   : > { %986 = vmatmul.bf16.gmra.mxu2 %v3247_v8  ;;  %1659 = vmatmul.bf16.gmra.mxu3 %v3639_v13  ;;  %v3655_v13 = vor.u32 %v4278_v27, %v3652_v29  ;;  %v3478_v29 = vld [vmem:[%s4652_s5 + $0x20] sm:$0xf] }
 0x158   : > { %v947_v14 = vpop.f32.mrf.mxu2  ;;  %v1620_v30 = vpop.f32.mrf.mxu3 }
 0x159   : > { %v5126_v15 = vadd.f32 %v947_v14, %v859_v61  ;;  %v5128_v54 = vadd.f32 %v1709_v39, %v1620_v30  ;;  %v860_v23 = vpop.f32.mrf.mxu1  ;;  %v1711_v22 = vpop.f32.mrf.mxu0 }
 0x15a   : > { %v861_v60 = vadd.f32 %v860_v23, %v4937_v19 }
 0x15b   : > { %5586 = vst [vmem:[#allocation6_spill] sm:$0xff] %v5126_v15  ;;  %v3259_v15 = vor.u32 %v4208_v48, %v3258_v26  ;;  %v4235_v48 = vld [vmem:[%s4652_s5 + $0x28] sm:$0xf0] }
 0x15c   : > { %5587 = vst [vmem:[#allocation7_spill] sm:$0xff] %v5128_v54  ;;  %v3651_v54 = vor.u32 %v4279_v49, %v3650_v55  ;;  %v3870_v55 = vld [vmem:[%s4652_s5 + $0x30] sm:$0xf]  ;;  %v3878_v49 = vld [vmem:[%s4652_s5 + $0x38] sm:$0xf] }
 0x160   : > { %v949_v8 = vpop.f32.mrf.mxu2  ;;  %v1622_v11 = vpop.f32.mrf.mxu3 }
 0x161   : > { %v5139_v61 = vadd.f32 %v949_v8, %v861_v60  ;;  %v5141_v39 = vadd.f32 %v1711_v22, %v1622_v11  ;;  %v863_v14 = vpop.f32.mrf.mxu1  ;;  %v1714_v30 = vpop.f32.mrf.mxu0  ;;  %v4307_v60 = vld [vmem:[%s4652_s5 + $0x40] sm:$0xf0]  ;;  %v4306_v8 = vld [vmem:[%s4652_s5 + $0x38] sm:$0xf0]  ;;  %v4305_v11 = vld [vmem:[%s4652_s5 + $0x34] sm:$0xf] }
 0x162   : > { %v864_v19 = vadd.f32 %v863_v14, %v4959_v41  ;;  %v3879_v14 = vor.u32 %v4307_v60, %v3878_v49  ;;  %v3490_v60 = vld [vmem:[%s4652_s5 + $0x38] sm:$0xf] }
 0x164   : > { %902 = vmatmul.bf16.gmra.mxu1 %v3255_v62  ;;  %1753 = vmatmul.bf16.gmra.mxu0 %v3655_v13  ;;  %v3479_v13 = vor.u32 %v4235_v48, %v3478_v29 }
 0x165   : > { %991 = vmatmul.bf16.gmra.mxu2 %v3259_v15  ;;  %1664 = vmatmul.bf16.gmra.mxu3 %v3651_v54  ;;  %v3872_v15 = vld [vmem:[%s4652_s5 + $0x3c] sm:$0xf0] }
 0x168   : > { %v952_v23 = vpop.f32.mrf.mxu2  ;;  %v1625_v22 = vpop.f32.mrf.mxu3 }
 0x169   : > { %v5144_v24 = vadd.f32 %v952_v23, %v864_v19  ;;  %v5146_v25 = vadd.f32 %v1714_v30, %v1625_v22  ;;  %v865_v27 = vpop.f32.mrf.mxu1  ;;  %v1716_v26 = vpop.f32.mrf.mxu0 }
 0x16a   : > { %v866_v54 = vadd.f32 %v865_v27, %v4967_v47 }
 0x16b   : > { %5588 = vst [vmem:[#allocation8_spill] sm:$0xff] %v5144_v24  ;;  %v3871_v24 = vor.u32 %v4306_v8, %v3870_v55  ;;  %v4238_v8 = vld [vmem:[%s4652_s5 + $0x40] sm:$0xf0] }
 0x16c   : > { %5589 = vst [vmem:[#allocation9_spill] sm:$0xff] %v5146_v25  ;;  %v3875_v25 = vor.u32 %v4305_v11, %v3872_v15  ;;  %v3882_v11 = vld [vmem:[%s4652_s5 + $0x48] sm:$0xf]  ;;  %v3890_v15 = vld [vmem:[%s4652_s5 + $0x50] sm:$0xf] }
 0x170   : > { %v954_v62 = vpop.f32.mrf.mxu2  ;;  %v1627_v41 = vpop.f32.mrf.mxu3 }
 0x171   : > { %v5157_v19 = vadd.f32 %v954_v62, %v866_v54  ;;  %v5159_v30 = vadd.f32 %v1716_v26, %v1627_v41  ;;  %v868_v23 = vpop.f32.mrf.mxu1  ;;  %v1719_v22 = vpop.f32.mrf.mxu0  ;;  %v4310_v54 = vld [vmem:[%s4652_s5 + $0x58] sm:$0xf0]  ;;  %v4309_v62 = vld [vmem:[%s4652_s5 + $0x50] sm:$0xf0]  ;;  %v4308_v41 = vld [vmem:[%s4652_s5 + $0x4c] sm:$0xf] }
 0x172   : > { %v869_v47 = vadd.f32 %v868_v23, %v4871_v36  ;;  %v3891_v23 = vor.u32 %v4310_v54, %v3890_v15  ;;  %v3502_v54 = vld [vmem:[%s4652_s5 + $0x50] sm:$0xf] }
 0x174   : > { %1767 = vmatmul.bf16.vlgmr.msra.gmra.mxu1 %v3479_v13  ;;  %2650 = vmatmul.bf16.vlgmr.msra.gmra.mxu0 %v3879_v14  ;;  %v3491_v14 = vor.u32 %v4238_v8, %v3490_v60 }
 0x175   : > { %2472 = vmatmul.bf16.vlgmr.msra.gmra.mxu2 %v3871_v24  ;;  %2561 = vmatmul.bf16.vlgmr.msra.gmra.mxu3 %v3875_v25  ;;  %v3884_v24 = vld [vmem:[%s4652_s5 + $0x54] sm:$0xf0] }
 0x178   : > { %v957_v27 = vpop.f32.mrf.mxu2  ;;  %v1630_v26 = vpop.f32.mrf.mxu3 }
 0x179   : > { %v5162_v29 = vadd.f32 %v957_v27, %v869_v47  ;;  %v5164_v48 = vadd.f32 %v1719_v22, %v1630_v26  ;;  %v870_v49 = vpop.f32.mrf.mxu1  ;;  %v1721_v55 = vpop.f32.mrf.mxu0 }
 0x17a   : > { %v871_v25 = vadd.f32 %v870_v49, %v4893_v50 }
 0x17b   : > { %5590 = vst [vmem:[#allocation10_spill] sm:$0xff] %v5162_v29  ;;  %v3883_v29 = vor.u32 %v4309_v62, %v3882_v11  ;;  %v4241_v62 = vld [vmem:[%s4652_s5 + $0x58] sm:$0xf0] }
 0x17c   : > { %5591 = vst [vmem:[#allocation11_spill] sm:$0xff] %v5164_v48  ;;  %v3887_v48 = vor.u32 %v4308_v41, %v3884_v24  ;;  %v3894_v41 = vld [vmem:[%s4652_s5 + $0x60] sm:$0xf]  ;;  %v3902_v24 = vld [vmem:[%s4652_s5 + $0x68] sm:$0xf] }
 0x180   : > { %v959_v13 = vpop.f32.mrf.mxu2  ;;  %v1632_v36 = vpop.f32.mrf.mxu3 }
 0x181   : > { %v5175_v47 = vadd.f32 %v959_v13, %v871_v25  ;;  %v5177_v22 = vadd.f32 %v1721_v55, %v1632_v36  ;;  %v873_v27 = vpop.f32.mrf.mxu1  ;;  %v1724_v26 = vpop.f32.mrf.mxu0  ;;  %v4313_v25 = vld [vmem:[%s4652_s5 + $0x70] sm:$0xf0]  ;;  %v4312_v13 = vld [vmem:[%s4652_s5 + $0x68] sm:$0xf0]  ;;  %v4311_v36 = vld [vmem:[%s4652_s5 + $0x64] sm:$0xf] }
 0x182   : > { %v874_v50 = vadd.f32 %v873_v27, %v4901_v58  ;;  %v3903_v27 = vor.u32 %v4313_v25, %v3902_v24  ;;  %v3514_v25 = vld [vmem:[%s4652_s5 + $0x68] sm:$0xf] }
 0x184   : > { %1772 = vmatmul.bf16.gmra.mxu1 %v3491_v14  ;;  %2655 = vmatmul.bf16.gmra.mxu0 %v3891_v23  ;;  %v3503_v23 = vor.u32 %v4241_v62, %v3502_v54 }
 0x185   : > { %2477 = vmatmul.bf16.gmra.mxu2 %v3883_v29  ;;  %2566 = vmatmul.bf16.gmra.mxu3 %v3887_v48  ;;  %v3896_v29 = vld [vmem:[%s4652_s5 + $0x6c] sm:$0xf0] }
 0x188   : > { %v962_v49 = vpop.f32.mrf.mxu2  ;;  %v1635_v55 = vpop.f32.mrf.mxu3 }
 0x189   : > { %v5180_v60 = vadd.f32 %v962_v49, %v874_v50  ;;  %v5182_v8 = vadd.f32 %v1724_v26, %v1635_v55  ;;  %v875_v15 = vpop.f32.mrf.mxu1  ;;  %v1726_v11 = vpop.f32.mrf.mxu0 }
 0x18a   : > { %v876_v48 = vadd.f32 %v875_v15, %v4917_v6 }
 0x18b   : > { %5592 = vst [vmem:[#allocation12_spill] sm:$0xff] %v5180_v60  ;;  %v3895_v60 = vor.u32 %v4312_v13, %v3894_v41  ;;  %v4244_v13 = vld [vmem:[%s4652_s5 + $0x70] sm:$0xf0] }
 0x18c   : > { %5593 = vst [vmem:[#allocation13_spill] sm:$0xff] %v5182_v8  ;;  %v3899_v8 = vor.u32 %v4311_v36, %v3896_v29  ;;  %v3906_v36 = vld [vmem:[%s4652_s5 + $0x78] sm:$0xf]  ;;  %v3914_v29 = vld [vmem:[%s4652_s5 + $0x80] sm:$0xf] }
 0x190   : > { %v964_v14 = vpop.f32.mrf.mxu2  ;;  %v1637_v58 = vpop.f32.mrf.mxu3 }
 0x191   : > { %v5193_v50 = vadd.f32 %v964_v14, %v876_v48  ;;  %v5195_v26 = vadd.f32 %v1726_v11, %v1637_v58  ;;  %v878_v49 = vpop.f32.mrf.mxu1  ;;  %v1729_v55 = vpop.f32.mrf.mxu0  ;;  %v4316_v48 = vld [vmem:[%s4652_s5 + $0x88] sm:$0xf0]  ;;  %v4315_v14 = vld [vmem:[%s4652_s5 + $0x80] sm:$0xf0]  ;;  %v4314_v58 = vld [vmem:[%s4652_s5 + $0x7c] sm:$0xf] }
 0x192   : > { %v879_v6 = vadd.f32 %v878_v49, %v4931_v16  ;;  %v3915_v49 = vor.u32 %v4316_v48, %v3914_v29  ;;  %v3526_v48 = vld [vmem:[%s4652_s5 + $0x80] sm:$0xf] }
 0x194   : > { %1777 = vmatmul.bf16.gmra.mxu1 %v3503_v23  ;;  %2660 = vmatmul.bf16.gmra.mxu0 %v3903_v27  ;;  %v3515_v27 = vor.u32 %v4244_v13, %v3514_v25 }
 0x195   : > { %2482 = vmatmul.bf16.gmra.mxu2 %v3895_v60  ;;  %2571 = vmatmul.bf16.gmra.mxu3 %v3899_v8  ;;  %v3908_v60 = vld [vmem:[%s4652_s5 + $0x84] sm:$0xf0] }
 0x198   : > { %v967_v15 = vpop.f32.mrf.mxu2  ;;  %v1640_v11 = vpop.f32.mrf.mxu3 }
 0x199   : > { %v5198_v54 = vadd.f32 %v967_v15, %v879_v6  ;;  %v5200_v62 = vadd.f32 %v1729_v55, %v1640_v11  ;;  %v880_v24 = vpop.f32.mrf.mxu1  ;;  %v1731_v41 = vpop.f32.mrf.mxu0 }
 0x19a   : > { %v881_v8 = vadd.f32 %v880_v24, %v4953_v32 }
 0x19b   : > { %5594 = vst [vmem:[#allocation14_spill] sm:$0xff] %v5198_v54  ;;  %v3907_v54 = vor.u32 %v4315_v14, %v3906_v36  ;;  %v4247_v14 = vld [vmem:[%s4652_s5 + $0x88] sm:$0xf0] }
 0x19c   : > { %5595 = vst [vmem:[#allocation15_spill] sm:$0xff] %v5200_v62  ;;  %v3911_v62 = vor.u32 %v4314_v58, %v3908_v60  ;;  %v3918_v58 = vld [vmem:[%s4652_s5 + $0x90] sm:$0xf]  ;;  %v3926_v60 = vld [vmem:[%s4652_s5 + $0x98] sm:$0xf] }
 0x1a0   : > { %v969_v23 = vpop.f32.mrf.mxu2  ;;  %v1642_v16 = vpop.f32.mrf.mxu3 }
 0x1a1   : > { %v5211_v6 = vadd.f32 %v969_v23, %v881_v8  ;;  %v5213_v55 = vadd.f32 %v1731_v41, %v1642_v16  ;;  %v883_v15 = vpop.f32.mrf.mxu1  ;;  %v1734_v11 = vpop.f32.mrf.mxu0  ;;  %v4319_v8 = vld [vmem:[%s4652_s5 + $0xa0] sm:$0xf0]  ;;  %v4318_v23 = vld [vmem:[%s4652_s5 + $0x98] sm:$0xf0]  ;;  %v4317_v16 = vld [vmem:[%s4652_s5 + $0x94] sm:$0xf] }
 0x1a2   : > { %v884_v32 = vadd.f32 %v883_v15, %v4961_v44  ;;  %v3927_v15 = vor.u32 %v4319_v8, %v3926_v60  ;;  %v3538_v8 = vld [vmem:[%s4652_s5 + $0x98] sm:$0xf] }
 0x1a4   : > { %1782 = vmatmul.bf16.gmra.mxu1 %v3515_v27  ;;  %2665 = vmatmul.bf16.gmra.mxu0 %v3915_v49  ;;  %v3527_v49 = vor.u32 %v4247_v14, %v3526_v48 }
 0x1a5   : > { %2487 = vmatmul.bf16.gmra.mxu2 %v3907_v54  ;;  %2576 = vmatmul.bf16.gmra.mxu3 %v3911_v62  ;;  %v3920_v54 = vld [vmem:[%s4652_s5 + $0x9c] sm:$0xf0] }
 0x1a8   : > { %v972_v24 = vpop.f32.mrf.mxu2  ;;  %v1645_v41 = vpop.f32.mrf.mxu3 }
 0x1a9   : > { %v5216_v25 = vadd.f32 %v972_v24, %v884_v32  ;;  %v5218_v13 = vadd.f32 %v1734_v11, %v1645_v41  ;;  %v885_v29 = vpop.f32.mrf.mxu1  ;;  %v1736_v36 = vpop.f32.mrf.mxu0 }
 0x1aa   : > { %v886_v62 = vadd.f32 %v885_v29, %v4977_v0 }
 0x1ab   : > { %5596 = vst [vmem:[#allocation16_spill] sm:$0xff] %v5216_v25  ;;  %v3919_v25 = vor.u32 %v4318_v23, %v3918_v58  ;;  %v4250_v23 = vld [vmem:[%s4652_s5 + $0xa0] sm:$0xf0] }
 0x1ac   : > { %5597 = vst [vmem:[#allocation17_spill] sm:$0xff] %v5218_v13  ;;  %v3923_v13 = vor.u32 %v4317_v16, %v3920_v54  ;;  %v3930_v16 = vld [vmem:[%s4652_s5 + $0xa8] sm:$0xf]  ;;  %v3938_v54 = vld [vmem:[%s4652_s5 + $0xb0] sm:$0xf] }
 0x1b0   : > { %v974_v27 = vpop.f32.mrf.mxu2  ;;  %v1647_v44 = vpop.f32.mrf.mxu3 }
 0x1b1   : > { %v5229_v32 = vadd.f32 %v974_v27, %v886_v62  ;;  %v5231_v11 = vadd.f32 %v1736_v36, %v1647_v44  ;;  %v888_v24 = vpop.f32.mrf.mxu1  ;;  %v1739_v41 = vpop.f32.mrf.mxu0  ;;  %v4322_v62 = vld [vmem:[%s4652_s5 + $0xb8] sm:$0xf0]  ;;  %v4321_v27 = vld [vmem:[%s4652_s5 + $0xb0] sm:$0xf0]  ;;  %v4320_v44 = vld [vmem:[%s4652_s5 + $0xac] sm:$0xf] }
 0x1b2   : > { %v889_v0 = vadd.f32 %v888_v24, %v4873_v37  ;;  %v3939_v24 = vor.u32 %v4322_v62, %v3938_v54  ;;  %v3550_v62 = vld [vmem:[%s4652_s5 + $0xb0] sm:$0xf] }
 0x1b4   : > { %1787 = vmatmul.bf16.gmra.mxu1 %v3527_v49  ;;  %2670 = vmatmul.bf16.gmra.mxu0 %v3927_v15  ;;  %v3539_v15 = vor.u32 %v4250_v23, %v3538_v8 }
 0x1b5   : > { %2492 = vmatmul.bf16.gmra.mxu2 %v3919_v25  ;;  %2581 = vmatmul.bf16.gmra.mxu3 %v3923_v13  ;;  %v3932_v25 = vld [vmem:[%s4652_s5 + $0xb4] sm:$0xf0] }
 0x1b8   : > { %v977_v29 = vpop.f32.mrf.mxu2  ;;  %v1650_v36 = vpop.f32.mrf.mxu3 }
 0x1b9   : > { %v5234_v48 = vadd.f32 %v977_v29, %v889_v0  ;;  %v5236_v14 = vadd.f32 %v1739_v41, %v1650_v36  ;;  %v890_v60 = vpop.f32.mrf.mxu1  ;;  %v1741_v58 = vpop.f32.mrf.mxu0 }
 0x1ba   : > { %v891_v13 = vadd.f32 %v890_v60, %v4895_v51 }
 0x1bb   : > { %5598 = vst [vmem:[#allocation18_spill] sm:$0xff] %v5234_v48  ;;  %v3931_v48 = vor.u32 %v4321_v27, %v3930_v16  ;;  %v4253_v27 = vld [vmem:[%s4652_s5 + $0xb8] sm:$0xf0] }
 0x1bc   : > { %5599 = vst [vmem:[#allocation19_spill] sm:$0xff] %v5236_v14  ;;  %v3935_v14 = vor.u32 %v4320_v44, %v3932_v25  ;;  %v3942_v44 = vld [vmem:[%s4652_s5 + $0xc0] sm:$0xf]  ;;  %v3950_v25 = vld [vmem:[%s4652_s5 + $0xc8] sm:$0xf] }
 0x1c0   : > { %v979_v49 = vpop.f32.mrf.mxu2  ;;  %v1652_v37 = vpop.f32.mrf.mxu3 }
 0x1c1   : > { %v5247_v0 = vadd.f32 %v979_v49, %v891_v13  ;;  %v5249_v41 = vadd.f32 %v1741_v58, %v1652_v37  ;;  %v893_v29 = vpop.f32.mrf.mxu1  ;;  %v1744_v36 = vpop.f32.mrf.mxu0  ;;  %v4325_v13 = vld [vmem:[%s4652_s5 + $0xd0] sm:$0xf0]  ;;  %v4324_v49 = vld [vmem:[%s4652_s5 + $0xc8] sm:$0xf0]  ;;  %v4323_v37 = vld [vmem:[%s4652_s5 + $0xc4] sm:$0xf] }
 0x1c2   : > { %v894_v51 = vadd.f32 %v893_v29, %v4903_v59  ;;  %v3951_v29 = vor.u32 %v4325_v13, %v3950_v25  ;;  %v3562_v13 = vld [vmem:[%s4652_s5 + $0xc8] sm:$0xf] }
 0x1c4   : > { %1792 = vmatmul.bf16.gmra.mxu1 %v3539_v15  ;;  %2675 = vmatmul.bf16.gmra.mxu0 %v3939_v24  ;;  %v3551_v24 = vor.u32 %v4253_v27, %v3550_v62 }
 0x1c5   : > { %2497 = vmatmul.bf16.gmra.mxu2 %v3931_v48  ;;  %2586 = vmatmul.bf16.gmra.mxu3 %v3935_v14  ;;  %v3944_v48 = vld [vmem:[%s4652_s5 + $0xcc] sm:$0xf0] }
 0x1c8   : > { %v982_v60 = vpop.f32.mrf.mxu2  ;;  %v1655_v58 = vpop.f32.mrf.mxu3 }
 0x1c9   : > { %v5252_v8 = vadd.f32 %v982_v60, %v894_v51  ;;  %v5254_v23 = vadd.f32 %v1744_v36, %v1655_v58  ;;  %v895_v54 = vpop.f32.mrf.mxu1  ;;  %v1746_v16 = vpop.f32.mrf.mxu0 }
 0x1ca   : > { %v896_v14 = vadd.f32 %v895_v54, %v4919_v7 }
 0x1cb   : > { %5600 = vst [vmem:[#allocation20_spill] sm:$0xff] %v5252_v8  ;;  %v3943_v8 = vor.u32 %v4324_v49, %v3942_v44  ;;  %v4256_v49 = vld [vmem:[%s4652_s5 + $0xd0] sm:$0xf0] }
 0x1cc   : > { %5601 = vst [vmem:[#allocation21_spill] sm:$0xff] %v5254_v23  ;;  %v3947_v23 = vor.u32 %v4323_v37, %v3944_v48  ;;  %v3954_v37 = vld [vmem:[%s4652_s5 + $0xd8] sm:$0xf]  ;;  %v3962_v48 = vld [vmem:[%s4652_s5 + $0xe0] sm:$0xf] }
 0x1d0   : > { %v984_v15 = vpop.f32.mrf.mxu2  ;;  %v1657_v59 = vpop.f32.mrf.mxu3 }
 0x1d1   : > { %v5265_v51 = vadd.f32 %v984_v15, %v896_v14  ;;  %v5267_v36 = vadd.f32 %v1746_v16, %v1657_v59  ;;  %v898_v60 = vpop.f32.mrf.mxu1  ;;  %v1749_v58 = vpop.f32.mrf.mxu0  ;;  %v4328_v14 = vld [vmem:[%s4652_s5 + $0xe8] sm:$0xf0]  ;;  %v4327_v15 = vld [vmem:[%s4652_s5 + $0xe0] sm:$0xf0]  ;;  %v4326_v59 = vld [vmem:[%s4652_s5 + $0xdc] sm:$0xf] }
 0x1d2   : > { %v899_v7 = vadd.f32 %v898_v60, %v4933_v17  ;;  %v3963_v60 = vor.u32 %v4328_v14, %v3962_v48  ;;  %v3574_v14 = vld [vmem:[%s4652_s5 + $0xe0] sm:$0xf] }
 0x1d4   : > { %1797 = vmatmul.bf16.gmra.mxu1 %v3551_v24  ;;  %2680 = vmatmul.bf16.gmra.mxu0 %v3951_v29  ;;  %v3563_v29 = vor.u32 %v4256_v49, %v3562_v13 }
 0x1d5   : > { %2502 = vmatmul.bf16.gmra.mxu2 %v3943_v8  ;;  %2591 = vmatmul.bf16.gmra.mxu3 %v3947_v23  ;;  %v3956_v8 = vld [vmem:[%s4652_s5 + $0xe4] sm:$0xf0] }
 0x1d8   : > { %v987_v54 = vpop.f32.mrf.mxu2  ;;  %v1660_v16 = vpop.f32.mrf.mxu3 }
 0x1d9   : > { %v5270_v62 = vadd.f32 %v987_v54, %v899_v7  ;;  %v5272_v27 = vadd.f32 %v1749_v58, %v1660_v16  ;;  %v900_v25 = vpop.f32.mrf.mxu1  ;;  %v1751_v44 = vpop.f32.mrf.mxu0 }
 0x1da   : > { %v901_v23 = vadd.f32 %v900_v25, %v4955_v33 }
 0x1db   : > { %5602 = vst [vmem:[#allocation22_spill] sm:$0xff] %v5270_v62  ;;  %v3955_v62 = vor.u32 %v4327_v15, %v3954_v37  ;;  %v4259_v15 = vld [vmem:[%s4652_s5 + $0xe8] sm:$0xf0] }
 0x1dc   : > { %5603 = vst [vmem:[#allocation23_spill] sm:$0xff] %v5272_v27  ;;  %v3959_v27 = vor.u32 %v4326_v59, %v3956_v8  ;;  %v3966_v59 = vld [vmem:[%s4652_s5 + $0xf0] sm:$0xf]  ;;  %v3974_v8 = vld [vmem:[%s4652_s5 + $0xf8] sm:$0xf] }
 0x1e0   : > { %v989_v24 = vpop.f32.mrf.mxu2  ;;  %v1662_v17 = vpop.f32.mrf.mxu3 }
 0x1e1   : > { %v5283_v7 = vadd.f32 %v989_v24, %v901_v23  ;;  %v5285_v58 = vadd.f32 %v1751_v44, %v1662_v17  ;;  %v903_v54 = vpop.f32.mrf.mxu1  ;;  %v1754_v16 = vpop.f32.mrf.mxu0  ;;  %v4331_v23 = vld [vmem:[%s4652_s5 + $0x100] sm:$0xf0]  ;;  %v4330_v24 = vld [vmem:[%s4652_s5 + $0xf8] sm:$0xf0]  ;;  %v4329_v17 = vld [vmem:[%s4652_s5 + $0xf4] sm:$0xf] }
 0x1e2   : > { %v904_v33 = vadd.f32 %v903_v54, %v4963_v45  ;;  %v3975_v54 = vor.u32 %v4331_v23, %v3974_v8  ;;  %v4262_v8 = vld [vmem:[%s4652_s5 + $0x100] sm:$0xf0] }
 0x1e3   : > { %5604 = vst [vmem:[#allocation24_spill] sm:$0xff] %v5283_v7 }
 0x1e4   : > { %5605 = vst [vmem:[#allocation25_spill] sm:$0xff] %v5285_v58  ;;  %1802 = vmatmul.bf16.gmra.mxu1 %v3563_v29  ;;  %2685 = vmatmul.bf16.gmra.mxu0 %v3963_v60  ;;  %v3575_v60 = vor.u32 %v4259_v15, %v3574_v14 }
 0x1e5   : > { %2507 = vmatmul.bf16.gmra.mxu2 %v3955_v62  ;;  %2596 = vmatmul.bf16.gmra.mxu3 %v3959_v27  ;;  %v3968_v62 = vld [vmem:[%s4652_s5 + $0xfc] sm:$0xf0] }
 0x1e8   : > { %v992_v25 = vpop.f32.mrf.mxu2  ;;  %v1665_v44 = vpop.f32.mrf.mxu3 }
 0x1e9   : > { %v5288_v13 = vadd.f32 %v992_v25, %v904_v33  ;;  %v5290_v49 = vadd.f32 %v1754_v16, %v1665_v44  ;;  %v905_v48 = vpop.f32.mrf.mxu1  ;;  %v1756_v37 = vpop.f32.mrf.mxu0 }
 0x1ea   : > { %v906_v27 = vadd.f32 %v905_v48, %v4979_v1 }
 0x1eb   : > { %5606 = vst [vmem:[#allocation26_spill] sm:$0xff] %v5288_v13  ;;  %v3967_v13 = vor.u32 %v4330_v24, %v3966_v59  ;;  %v3586_v59 = vld [vmem:[%s4652_s5 + $0xf8] sm:$0xf]  ;;  %v3978_v24 = vld [vmem:[%s4652_s5 + $0x108] sm:$0xf] }
 0x1ec   : > { %5607 = vst [vmem:[#allocation27_spill] sm:$0xff] %v5290_v49  ;;  %v3971_v49 = vor.u32 %v4329_v17, %v3968_v62  ;;  %v3986_v17 = vld [vmem:[%s4652_s5 + $0x110] sm:$0xf]  ;;  %v4333_v62 = vld [vmem:[%s4652_s5 + $0x110] sm:$0xf0] }
 0x1f0   : > { %v994_v29 = vpop.f32.mrf.mxu2  ;;  %v1667_v45 = vpop.f32.mrf.mxu3 }
 0x1f1   : > { %v5301_v33 = vadd.f32 %v994_v29, %v906_v27  ;;  %v5303_v16 = vadd.f32 %v1756_v37, %v1667_v45  ;;  %v1768_v25 = vpop.f32.mrf.mxu1  ;;  %v2651_v44 = vpop.f32.mrf.mxu0  ;;  %v4332_v27 = vld [vmem:[%s4652_s5 + $0x10c] sm:$0xf]  ;;  %v3980_v29 = vld [vmem:[%s4652_s5 + $0x114] sm:$0xf0] }
 0x1f2   : > { %v1769_v7 = vadd.f32 %v1768_v25, %v4990_v21  ;;  %v3587_v25 = vor.u32 %v4262_v8, %v3586_v59 }
 0x1f3   : > { %5608 = vst [vmem:[#allocation28_spill] sm:$0xff] %v5301_v33 }
 0x1f4   : > { %5609 = vst [vmem:[#allocation29_spill] sm:$0xff] %v5303_v16  ;;  %v1848_v58 = vadd.f32 %v1769_v7, %v4988_v20  ;;  %1807 = vmatmul.bf16.gmra.mxu1 %v3575_v60  ;;  %2690 = vmatmul.bf16.gmra.mxu0 %v3975_v54  ;;  %v5312_v7 = vld [vmem:[%s5581_s2] ss:$0 sm:$0xff] }
 0x1f5   : > { %2512 = vmatmul.bf16.gmra.mxu2 %v3967_v13  ;;  %2601 = vmatmul.bf16.gmra.mxu3 %v3971_v49  ;;  %v5317_v13 = vld [vmem:[%s5582_s3] ss:$0 sm:$0xff] }
 0x1f8   : > { %v2473_v1 = vpop.f32.mrf.mxu2  ;;  %v2562_v48 = vpop.f32.mrf.mxu3 }
 0x1f9   : > { %v2563_v37 = vadd.f32 %v2562_v48, %v2473_v1  ;;  %v1770_v14 = vpop.f32.mrf.mxu1  ;;  %v2653_v15 = vpop.f32.mrf.mxu0 }
 0x1fa   : > { %v1771_v20 = vadd.f32 %v1770_v14, %v5009_v57  ;;  %v4334_v57 = vld [vmem:[%s4652_s5 + $0x118] sm:$0xf0]  ;;  %v3983_v14 = vor.u32 %v4332_v27, %v3980_v29  ;;  %v3598_v27 = vld [vmem:[%s4652_s5 + $0x110] sm:$0xf] }
 0x1fb   : > { %v2652_v21 = vadd.f32 %v2651_v44, %v2563_v37  ;;  %v3987_v44 = vor.u32 %v4334_v57, %v3986_v17  ;;  %v4265_v29 = vld [vmem:[%s4652_s5 + $0x118] sm:$0xf0] }
 0x1fc   : > { %v1849_v49 = vadd.f32 %v1771_v20, %v5007_v56 }
 0x1fd   : > { %v2731_v23 = vadd.f32 %v2652_v21, %v1848_v58  ;;  %v3979_v58 = vor.u32 %v4333_v62, %v3978_v24 }
 0x1ff   : > { %v2831_v45 = vmul.f32 %v5312_v7, %v2731_v23 }
 0x200   : > { %v2475_v60 = vpop.f32.mrf.mxu2  ;;  %v2564_v54 = vpop.f32.mrf.mxu3 }
 0x201   : > { %v2867_v1 = vadd.f32 %v5317_v13, %v2831_v45  ;;  %v2565_v56 = vadd.f32 %v2564_v54, %v2475_v60  ;;  %v1773_v48 = vpop.f32.mrf.mxu1  ;;  %v2656_v37 = vpop.f32.mrf.mxu0  ;;  %v3990_v45 = vld [vmem:[%s4652_s5 + $0x120] sm:$0xf]  ;;  %v3998_v54 = vld [vmem:[%s4652_s5 + $0x128] sm:$0xf] }
 0x202   : > { %v1774_v20 = vadd.f32 %v1773_v48, %v5014_v12 }
 0x203   : > { %v2899_v21 = vmax.f32 %v2867_v1, 0.0  ;;  %v2654_v33 = vadd.f32 %v2653_v15, %v2565_v56  ;;  %v4335_v1 = vld [vmem:[%s4652_s5 + $0x124] sm:$0xf]  ;;  %v3992_v56 = vld [vmem:[%s4652_s5 + $0x12c] sm:$0xf0] }
 0x204   : > { %v1850_v16 = vadd.f32 %v1774_v20, %v5012_v9  ;;  %1812 = vmatmul.bf16.gmra.mxu1 %v3587_v25  ;;  %2695 = vmatmul.bf16.gmra.mxu0 %v3987_v44  ;;  %v4337_v25 = vld [vmem:[%s4652_s5 + $0x130] sm:$0xf0]  ;;  %v4336_v44 = vld [vmem:[%s4652_s5 + $0x128] sm:$0xf0] }
 0x205   : > { %2931 = vst [vmem:[%s5334_s7] sm:$0xff] %v2899_v21  ;;  %v2732_v59 = vadd.f32 %v2654_v33, %v1849_v49  ;;  %2517 = vmatmul.bf16.gmra.mxu2 %v3979_v58  ;;  %2606 = vmatmul.bf16.gmra.mxu3 %v3983_v14  ;;  %v3999_v20 = vor.u32 %v4337_v25, %v3998_v54  ;;  %v3610_v54 = vld [vmem:[%s4652_s5 + $0x128] sm:$0xf]  ;;  %v4268_v25 = vld [vmem:[%s4652_s5 + $0x130] sm:$0xf0] }
 0x207   : > { %v2832_v8 = vmul.f32 %v5312_v7, %v2732_v59 }
 0x208   : > { %v2478_v12 = vpop.f32.mrf.mxu2  ;;  %v2567_v15 = vpop.f32.mrf.mxu3 }
 0x209   : > { %v2868_v9 = vadd.f32 %v5317_v13, %v2832_v8  ;;  %v2568_v23 = vadd.f32 %v2567_v15, %v2478_v12  ;;  %v1775_v24 = vpop.f32.mrf.mxu1  ;;  %v2658_v17 = vpop.f32.mrf.mxu0  ;;  %v3991_v8 = vor.u32 %v4336_v44, %v3990_v45  ;;  %v3995_v12 = vor.u32 %v4335_v1, %v3992_v56  ;;  %v4002_v44 = vld [vmem:[%s4652_s5 + $0x138] sm:$0xf]  ;;  %v4010_v56 = vld [vmem:[%s4652_s5 + $0x140] sm:$0xf] }
 0x20a   : > { %v1776_v33 = vadd.f32 %v1775_v24, %v5027_v43  ;;  %v3599_v43 = vor.u32 %v4265_v29, %v3598_v27 }
 0x20b   : > { %v2900_v49 = vmax.f32 %v2868_v9, 0.0  ;;  %v2657_v57 = vadd.f32 %v2656_v37, %v2568_v23 }
 0x20c   : > { %v1851_v62 = vadd.f32 %v1776_v33, %v5025_v42 }
 0x20d   : > { %2932 = vst [vmem:[%s5334_s7 + $0x8] sm:$0xff] %v2900_v49  ;;  %v2733_v60 = vadd.f32 %v2657_v57, %v1850_v16 }
 0x20f   : > { %v2833_v48 = vmul.f32 %v5312_v7, %v2733_v60 }
 0x210   : > { %v2480_v58 = vpop.f32.mrf.mxu2  ;;  %v2569_v14 = vpop.f32.mrf.mxu3 }
 0x211   : > { %v2869_v37 = vadd.f32 %v5317_v13, %v2833_v48  ;;  %v2570_v42 = vadd.f32 %v2569_v14, %v2480_v58  ;;  %v1778_v21 = vpop.f32.mrf.mxu1  ;;  %v2661_v59 = vpop.f32.mrf.mxu0  ;;  %v4340_v48 = vld [vmem:[%s4652_s5 + $0x148] sm:$0xf0]  ;;  %v4339_v58 = vld [vmem:[%s4652_s5 + $0x140] sm:$0xf0]  ;;  %v4338_v14 = vld [vmem:[%s4652_s5 + $0x13c] sm:$0xf] }
 0x212   : > { %v1779_v16 = vadd.f32 %v1778_v21, %v5038_v3  ;;  %v4011_v21 = vor.u32 %v4340_v48, %v4010_v56  ;;  %v4022_v56 = vld [vmem:[%s4652_s5 + $0x158] sm:$0xf]  ;;  %v4343_v48 = vld [vmem:[%s4652_s5 + $0x160] sm:$0xf0] }
 0x213   : > { %v2901_v15 = vmax.f32 %v2869_v37, 0.0  ;;  %v2659_v9 = vadd.f32 %v2658_v17, %v2570_v42 }
 0x214   : > { %v1852_v23 = vadd.f32 %v1779_v16, %v5036_v2  ;;  %1817 = vmatmul.bf16.gmra.mxu1 %v3599_v43  ;;  %2700 = vmatmul.bf16.gmra.mxu0 %v3999_v20  ;;  %v4004_v43 = vld [vmem:[%s4652_s5 + $0x144] sm:$0xf0]  ;;  %v4003_v16 = vor.u32 %v4339_v58, %v4002_v44  ;;  %v4014_v44 = vld [vmem:[%s4652_s5 + $0x150] sm:$0xf]  ;;  %v4342_v58 = vld [vmem:[%s4652_s5 + $0x158] sm:$0xf0] }
 0x215   : > { %2933 = vst [vmem:[%s5334_s7 + $0x10] sm:$0xff] %v2901_v15  ;;  %v2734_v24 = vadd.f32 %v2659_v9, %v1851_v62  ;;  %2522 = vmatmul.bf16.gmra.mxu2 %v3991_v8  ;;  %2611 = vmatmul.bf16.gmra.mxu3 %v3995_v12  ;;  %v4007_v15 = vor.u32 %v4338_v14, %v4004_v43  ;;  %v4341_v14 = vld [vmem:[%s4652_s5 + $0x154] sm:$0xf]  ;;  %v4016_v43 = vld [vmem:[%s4652_s5 + $0x15c] sm:$0xf0] }
 0x217   : > { %v2834_v33 = vmul.f32 %v5312_v7, %v2734_v24 }
 0x218   : > { %v2483_v49 = vpop.f32.mrf.mxu2  ;;  %v2572_v3 = vpop.f32.mrf.mxu3 }
 0x219   : > { %v2870_v17 = vadd.f32 %v5317_v13, %v2834_v33  ;;  %v2573_v2 = vadd.f32 %v2572_v3, %v2483_v49  ;;  %v1780_v57 = vpop.f32.mrf.mxu1  ;;  %v2663_v27 = vpop.f32.mrf.mxu0 }
 0x21a   : > { %v1781_v62 = vadd.f32 %v1780_v57, %v5057_v35  ;;  %v3611_v35 = vor.u32 %v4268_v25, %v3610_v54  ;;  %v3622_v54 = vld [vmem:[%s4652_s5 + $0x140] sm:$0xf]  ;;  %v4271_v25 = vld [vmem:[%s4652_s5 + $0x148] sm:$0xf0] }
 0x21b   : > { %v2902_v29 = vmax.f32 %v2870_v17, 0.0  ;;  %v2662_v45 = vadd.f32 %v2661_v59, %v2573_v2 }
 0x21c   : > { %v1853_v60 = vadd.f32 %v1781_v62, %v5055_v34 }
 0x21d   : > { %2934 = vst [vmem:[%s5334_s7 + $0x18] sm:$0xff] %v2902_v29  ;;  %v2735_v1 = vadd.f32 %v2662_v45, %v1852_v23 }
 0x21f   : > { %v2835_v20 = vmul.f32 %v5312_v7, %v2735_v1 }
 0x220   : > { %v2485_v37 = vpop.f32.mrf.mxu2  ;;  %v2574_v42 = vpop.f32.mrf.mxu3 }
 0x221   : > { %v2871_v59 = vadd.f32 %v5317_v13, %v2835_v20  ;;  %v2575_v34 = vadd.f32 %v2574_v42, %v2485_v37  ;;  %v1783_v8 = vpop.f32.mrf.mxu1  ;;  %v2666_v12 = vpop.f32.mrf.mxu0 }
 0x222   : > { %v1784_v9 = vadd.f32 %v1783_v8, %v5062_v63  ;;  %v4015_v8 = vor.u32 %v4342_v58, %v4014_v44  ;;  %v4345_v44 = vld [vmem:[%s4652_s5 + $0x170] sm:$0xf0] }
 0x223   : > { %v2903_v23 = vmax.f32 %v2871_v59, 0.0  ;;  %v2664_v24 = vadd.f32 %v2663_v27, %v2575_v34 }
 0x224   : > { %v1854_v33 = vadd.f32 %v1784_v9, %v5060_v10  ;;  %1822 = vmatmul.bf16.gmra.mxu1 %v3611_v35  ;;  %2705 = vmatmul.bf16.gmra.mxu0 %v4011_v21  ;;  %v4023_v35 = vor.u32 %v4343_v48, %v4022_v56  ;;  %v4028_v56 = vld [vmem:[%s4652_s5 + $0x174] sm:$0xf0] }
 0x225   : > { %2935 = vst [vmem:[%s5334_s7 + $0x20] sm:$0xff] %v2903_v23  ;;  %v2736_v49 = vadd.f32 %v2664_v24, %v1853_v60  ;;  %2527 = vmatmul.bf16.gmra.mxu2 %v4003_v16  ;;  %2616 = vmatmul.bf16.gmra.mxu3 %v4007_v15 }
 0x227   : > { %v2836_v3 = vmul.f32 %v5312_v7, %v2736_v49 }
 0x228   : > { %v2488_v17 = vpop.f32.mrf.mxu2  ;;  %v2577_v63 = vpop.f32.mrf.mxu3 }
 0x229   : > { %v2872_v2 = vadd.f32 %v5317_v13, %v2836_v3  ;;  %v2578_v10 = vadd.f32 %v2577_v63, %v2488_v17  ;;  %v1785_v57 = vpop.f32.mrf.mxu1  ;;  %v2668_v27 = vpop.f32.mrf.mxu0 }
 0x22a   : > { %v1786_v62 = vadd.f32 %v1785_v57, %v5075_v28  ;;  %v3623_v28 = vor.u32 %v4271_v25, %v3622_v54  ;;  %v4034_v54 = vld [vmem:[%s4652_s5 + $0x170] sm:$0xf]  ;;  %v4346_v25 = vld [vmem:[%s4652_s5 + $0x178] sm:$0xf0] }
 0x22b   : > { %v2904_v29 = vmax.f32 %v2872_v2, 0.0  ;;  %v2667_v45 = vadd.f32 %v2666_v12, %v2578_v10  ;;  %v4019_v12 = vor.u32 %v4341_v14, %v4016_v43  ;;  %v4035_v43 = vor.u32 %v4346_v25, %v4034_v54 }
 0x22c   : > { %v1855_v60 = vadd.f32 %v1786_v62, %v5073_v18  ;;  %v3634_v62 = vld [vmem:[%s4652_s5 + $0x158] sm:$0xf] }
 0x22d   : > { %2936 = vst [vmem:[%s5334_s7 + $0x28] sm:$0xff] %v2904_v29  ;;  %v2737_v1 = vadd.f32 %v2667_v45, %v1854_v33  ;;  %v4274_v29 = vld [vmem:[%s4652_s5 + $0x160] sm:$0xf0]  ;;  %v4026_v45 = vld [vmem:[%s4652_s5 + $0x168] sm:$0xf] }
 0x22f   : > { %v2837_v20 = vmul.f32 %v5312_v7, %v2737_v1  ;;  %v4344_v1 = vld [vmem:[%s4652_s5 + $0x16c] sm:$0xf] }
 0x230   : > { %v2490_v37 = vpop.f32.mrf.mxu2  ;;  %v2579_v42 = vpop.f32.mrf.mxu3 }
 0x231   : > { %v2873_v21 = vadd.f32 %v5317_v13, %v2837_v20  ;;  %v2580_v18 = vadd.f32 %v2579_v42, %v2490_v37  ;;  %v1788_v59 = vpop.f32.mrf.mxu1  ;;  %v2671_v34 = vpop.f32.mrf.mxu0 }
 0x232   : > { %v1789_v16 = vadd.f32 %v1788_v59, %v5086_v5 }
 0x233   : > { %v2905_v15 = vmax.f32 %v2873_v21, 0.0  ;;  %v2669_v9 = vadd.f32 %v2668_v27, %v2580_v18 }
 0x234   : > { %v1856_v23 = vadd.f32 %v1789_v16, %v5084_v4  ;;  %1827 = vmatmul.bf16.gmra.mxu1 %v3623_v28  ;;  %2710 = vmatmul.bf16.gmra.mxu0 %v4023_v35  ;;  %v4027_v28 = vor.u32 %v4345_v44, %v4026_v45  ;;  %v4031_v35 = vor.u32 %v4344_v1, %v4028_v56 }
 0x235   : > { %2937 = vst [vmem:[%s5334_s7 + $0x30] sm:$0xff] %v2905_v15  ;;  %v2738_v24 = vadd.f32 %v2669_v9, %v1855_v60  ;;  %2532 = vmatmul.bf16.gmra.mxu2 %v4015_v8  ;;  %2621 = vmatmul.bf16.gmra.mxu3 %v4019_v12 }
 0x237   : > { %v2838_v33 = vmul.f32 %v5312_v7, %v2738_v24 }
 0x238   : > { %v2493_v49 = vpop.f32.mrf.mxu2  ;;  %v2582_v5 = vpop.f32.mrf.mxu3 }
 0x239   : > { %v2874_v3 = vadd.f32 %v5317_v13, %v2838_v33  ;;  %v2583_v4 = vadd.f32 %v2582_v5, %v2493_v49  ;;  %v1790_v17 = vpop.f32.mrf.mxu1  ;;  %v2673_v63 = vpop.f32.mrf.mxu0 }
 0x23a   : > { %v1791_v2 = vadd.f32 %v1790_v17, %v5105_v38  ;;  %v3635_v38 = vor.u32 %v4274_v29, %v3634_v62  ;;  %v4038_v17 = vld [vmem:[%s4652_s5 + $0x180] sm:$0xf]  ;;  %v4040_v62 = vld [vmem:[%s4652_s5 + $0x18c] sm:$0xf0] }
 0x23b   : > { %v2906_v10 = vmax.f32 %v2874_v3, 0.0  ;;  %v2672_v57 = vadd.f32 %v2671_v34, %v2583_v4  ;;  %v3646_v3 = vld [vmem:[%s4652_s5 + $0x170] sm:$0xf]  ;;  %v4277_v4 = vld [vmem:[%s4652_s5 + $0x178] sm:$0xf0] }
 0x23c   : > { %v1857_v27 = vadd.f32 %v1791_v2, %v5103_v46  ;;  %v4046_v2 = vld [vmem:[%s4652_s5 + $0x188] sm:$0xf] }
 0x23d   : > { %2938 = vst [vmem:[%s5334_s7 + $0x38] sm:$0xff] %v2906_v10  ;;  %v2739_v60 = vadd.f32 %v2672_v57, %v1856_v23  ;;  %v4349_v10 = vld [vmem:[%s4652_s5 + $0x190] sm:$0xf0]  ;;  %v4348_v57 = vld [vmem:[%s4652_s5 + $0x188] sm:$0xf0] }
 0x23e   : > { %v4047_v54 = vor.u32 %v4349_v10, %v4046_v2  ;;  %v4039_v56 = vor.u32 %v4348_v57, %v4038_v17 }
 0x23f   : > { %v2839_v48 = vmul.f32 %v5312_v7, %v2739_v60 }
 0x240   : > { %v2495_v58 = vpop.f32.mrf.mxu2  ;;  %v2584_v14 = vpop.f32.mrf.mxu3 }
 0x241   : > { %v2875_v20 = vadd.f32 %v5317_v13, %v2839_v48  ;;  %v2585_v46 = vadd.f32 %v2584_v14, %v2495_v58  ;;  %v1793_v37 = vpop.f32.mrf.mxu1  ;;  %v2676_v42 = vpop.f32.mrf.mxu0  ;;  %v5610_v58 = vld [vmem:[#allocation7_spill] sm:$0xff] }
 0x242   : > { %v1794_v21 = vadd.f32 %v1793_v37, %v5110_v31 }
 0x243   : > { %v2907_v18 = vmax.f32 %v2875_v20, 0.0  ;;  %v2674_v59 = vadd.f32 %v2673_v63, %v2585_v46  ;;  %v5611_v20 = vld [vmem:[#allocation6_spill] sm:$0xff] }
 0x244   : > { %v1858_v34 = vadd.f32 %v1794_v21, %v5108_v40  ;;  %1832 = vmatmul.bf16.gmra.mxu1 %v3635_v38  ;;  %2715 = vmatmul.bf16.gmra.mxu0 %v4035_v43 }
 0x245   : > { %2939 = vst [vmem:[%s5334_s7 + $0x40] sm:$0xff] %v2907_v18  ;;  %v2740_v8 = vadd.f32 %v2674_v59, %v1857_v27  ;;  %2537 = vmatmul.bf16.gmra.mxu2 %v4027_v28  ;;  %2626 = vmatmul.bf16.gmra.mxu3 %v4031_v35  ;;  %v4347_v27 = vld [vmem:[%s4652_s5 + $0x184] sm:$0xf] }
 0x246   : > { %v4043_v48 = vor.u32 %v4347_v27, %v4040_v62 }
 0x247   : > { %v2840_v12 = vmul.f32 %v5312_v7, %v2740_v8 }
 0x248   : > { %v2498_v16 = vpop.f32.mrf.mxu2  ;;  %v2587_v31 = vpop.f32.mrf.mxu3 }
 0x249   : > { %v2876_v15 = vadd.f32 %v5317_v13, %v2840_v12  ;;  %v2588_v40 = vadd.f32 %v2587_v31, %v2498_v16  ;;  %v1795_v9 = vpop.f32.mrf.mxu1  ;;  %v2678_v23 = vpop.f32.mrf.mxu0 }
 0x24a   : > { %v1796_v24 = vadd.f32 %v1795_v9, %v5123_v52  ;;  %v3647_v52 = vor.u32 %v4277_v4, %v3646_v3  ;;  %v4050_v9 = vld [vmem:[%s4652_s5 + $0x198] sm:$0xf]  ;;  %v4052_v3 = vld [vmem:[%s4652_s5 + $0x1a4] sm:$0xf0] }
 0x24b   : > { %v2908_v33 = vmax.f32 %v2876_v15, 0.0  ;;  %v2677_v49 = vadd.f32 %v2676_v42, %v2588_v40  ;;  %v3658_v15 = vld [vmem:[%s4652_s5 + $0x188] sm:$0xf]  ;;  %v4280_v40 = vld [vmem:[%s4652_s5 + $0x190] sm:$0xf0] }
 0x24c   : > { %v1859_v5 = vadd.f32 %v1796_v24, %v5121_v53  ;;  %v4058_v24 = vld [vmem:[%s4652_s5 + $0x1a0] sm:$0xf] }
 0x24d   : > { %2940 = vst [vmem:[%s5334_s7 + $0x48] sm:$0xff] %v2908_v33  ;;  %v2741_v63 = vadd.f32 %v2677_v49, %v1858_v34  ;;  %v4352_v33 = vld [vmem:[%s4652_s5 + $0x1a8] sm:$0xf0]  ;;  %v4351_v49 = vld [vmem:[%s4652_s5 + $0x1a0] sm:$0xf0] }
 0x24e   : > { %v4059_v2 = vor.u32 %v4352_v33, %v4058_v24  ;;  %v4051_v62 = vor.u32 %v4351_v49, %v4050_v9 }
 0x24f   : > { %v2841_v29 = vmul.f32 %v5312_v7, %v2741_v63 }
 0x250   : > { %v2500_v45 = vpop.f32.mrf.mxu2  ;;  %v2589_v60 = vpop.f32.mrf.mxu3 }
 0x251   : > { %v2877_v25 = vadd.f32 %v5317_v13, %v2841_v29  ;;  %v2590_v53 = vadd.f32 %v2589_v60, %v2500_v45  ;;  %v1798_v44 = vpop.f32.mrf.mxu1  ;;  %v2681_v1 = vpop.f32.mrf.mxu0  ;;  %v5612_v45 = vld [vmem:[#allocation9_spill] sm:$0xff] }
 0x252   : > { %v1799_v14 = vadd.f32 %v1798_v44, %v5610_v58 }
 0x253   : > { %v2909_v38 = vmax.f32 %v2877_v25, 0.0  ;;  %v2679_v43 = vadd.f32 %v2678_v23, %v2590_v53  ;;  %v5613_v25 = vld [vmem:[#allocation8_spill] sm:$0xff] }
 0x254   : > { %v1860_v46 = vadd.f32 %v1799_v14, %v5611_v20  ;;  %1837 = vmatmul.bf16.gmra.mxu1 %v3647_v52  ;;  %2720 = vmatmul.bf16.gmra.mxu0 %v4047_v54 }
 0x255   : > { %2941 = vst [vmem:[%s5334_s7 + $0x50] sm:$0xff] %v2909_v38  ;;  %v2742_v37 = vadd.f32 %v2679_v43, %v1859_v5  ;;  %2542 = vmatmul.bf16.gmra.mxu2 %v4039_v56  ;;  %2631 = vmatmul.bf16.gmra.mxu3 %v4043_v48  ;;  %v4350_v5 = vld [vmem:[%s4652_s5 + $0x19c] sm:$0xf]  ;;  %s4377_s5 = sshll.u32 %s4534_s18, 8 }
 0x256   : > { %v4055_v29 = vor.u32 %v4350_v5, %v4052_v3  ;;  %s2978_s10 = scalar_lea.hbm %s5583_s4, %s4377_s5  ;;  %s4484_s5 = scalar_lea.hbm %s5583_s4, 512 }
 0x257   : > { %v2842_v42 = vmul.f32 %v5312_v7, %v2742_v37  ;;  %s2981_s14 = sshll.u32 %s2978_s10, 4  ;;  %s2982_s14 = int_to_ptr.hbm [resolvable:$true] %s2981_s14 }
 0x258   : > { %v2503_v28 = vpop.f32.mrf.mxu2  ;;  %v2592_v35 = vpop.f32.mrf.mxu3  ;;  %s4478_s26 = sshra.s32 %s2982_s14, 4  ;;  %s4479_s26 = int_to_ptr.hbm [resolvable:$true] %s4478_s26 }
 0x259   : > { %v2878_v21 = vadd.f32 %v5317_v13, %v2842_v42  ;;  %v2593_v18 = vadd.f32 %v2592_v35, %v2503_v28  ;;  %v1800_v59 = vpop.f32.mrf.mxu1  ;;  %v2683_v34 = vpop.f32.mrf.mxu0  ;;  %s4480_s29 = scalar_lea.hbm %s4479_s26, 256  ;;  %p4485_p1 = scmp.lt.s32.totalorder %s4479_s26, %s5583_s4 }
 0x25a   : > { %v1801_v8 = vadd.f32 %v1800_v59, %v5141_v39  ;;  %v3659_v39 = vor.u32 %v4280_v40, %v3658_v15  ;;  %v5615_v40 = vld [vmem:[#allocation10_spill] sm:$0xff]  ;;  %p4481_p12 = scmp.ne.s32.totalorder %s4479_s26, %s4480_s29  ;;  %p4486_p2 = scmp.lt.s32.totalorder %s4484_s5, %s4480_s29 }
 0x25b   : > { %v2910_v12 = vmax.f32 %v2878_v21, 0.0  ;;  %v2682_v16 = vadd.f32 %v2681_v1, %v2593_v18 }
 0x25c   : > { %v1861_v31 = vadd.f32 %v1801_v8, %v5139_v61  ;;  %p4482_p13 = pnand %p4481_p12, %p4611_p4  ;;  %p4487_p3 = por %p4486_p2, %p4485_p1 }
 0x25d   : > { %2942 = vst [vmem:[%s5334_s7 + $0x58] sm:$0xff] %v2910_v12  ;;  %v2743_v23 = vadd.f32 %v2682_v16, %v1860_v46  ;;  %v5614_v16 = vld [vmem:[#allocation11_spill] sm:$0xff] }
 0x25e   : > { %p4483_p0 = pneg %p4482_p13 }
 0x25f   : > { %v2843_v4 = vmul.f32 %v5312_v7, %v2743_v23 }
 0x260   : > { %v2505_v17 = vpop.f32.mrf.mxu2  ;;  %v2594_v63 = vpop.f32.mrf.mxu3  ;;  %p4488_p5 = pnand %p4487_p3, %p4483_p0 }
 0x261   : > { %v2879_v10 = vadd.f32 %v5317_v13, %v2843_v4  ;;  %v2595_v61 = vadd.f32 %v2594_v63, %v2505_v17  ;;  %v1803_v57 = vpop.f32.mrf.mxu1  ;;  %v2686_v27 = vpop.f32.mrf.mxu0 }
 0x262   : > { %v1804_v60 = vadd.f32 %v1803_v57, %v5612_v45 }
 0x263   : > { %v2911_v52 = vmax.f32 %v2879_v10, 0.0  ;;  %v2684_v54 = vadd.f32 %v2683_v34, %v2595_v61 }
 0x264   : > { %v1862_v53 = vadd.f32 %v1804_v60, %v5613_v25  ;;  %1842 = vmatmul.bf16.gmra.mxu1 %v3659_v39  ;;  %2725 = vmatmul.bf16.gmra.mxu0 %v4059_v2 }
 0x265   : > { %2943 = vst [vmem:[%s5334_s7 + $0x60] sm:$0xff] %v2911_v52  ;;  %v2744_v44 = vadd.f32 %v2684_v54, %v1861_v31  ;;  %2547 = vmatmul.bf16.gmra.mxu2 %v4051_v62  ;;  %2636 = vmatmul.bf16.gmra.mxu3 %v4055_v29  ;;  %v5616_v52 = vld [vmem:[#allocation13_spill] sm:$0xff] }
 0x267   : > { %v2844_v1 = vmul.f32 %v5312_v7, %v2744_v44 }
 0x268   : > { %v2508_v56 = vpop.f32.mrf.mxu2  ;;  %v2597_v48 = vpop.f32.mrf.mxu3 }
 0x269   : > { %v2880_v58 = vadd.f32 %v5317_v13, %v2844_v1  ;;  %v2598_v14 = vadd.f32 %v2597_v48, %v2508_v56  ;;  %v1805_v38 = vpop.f32.mrf.mxu1  ;;  %v2688_v43 = vpop.f32.mrf.mxu0 }
 0x26a   : > { %v1806_v20 = vadd.f32 %v1805_v38, %v5159_v30 }
 0x26b   : > { %v2912_v46 = vmax.f32 %v2880_v58, 0.0  ;;  %v2687_v37 = vadd.f32 %v2686_v27, %v2598_v14 }
 0x26c   : > { %v1863_v42 = vadd.f32 %v1806_v20, %v5157_v19 }
 0x26d   : > { %2944 = vst [vmem:[%s5334_s7 + $0x68] sm:$0xff] %v2912_v46  ;;  %v2745_v28 = vadd.f32 %v2687_v37, %v1862_v53  ;;  %v5617_v53 = vld [vmem:[#allocation12_spill] sm:$0xff] }
 0x26f   : > { %v2845_v35 = vmul.f32 %v5312_v7, %v2745_v28 }
 0x270   : > { %v2510_v21 = vpop.f32.mrf.mxu2  ;;  %v2599_v18 = vpop.f32.mrf.mxu3 }
 0x271   : > { %v2881_v59 = vadd.f32 %v5317_v13, %v2845_v35  ;;  %v2600_v34 = vadd.f32 %v2599_v18, %v2510_v21  ;;  %v1808_v8 = vpop.f32.mrf.mxu1  ;;  %v2691_v12 = vpop.f32.mrf.mxu0 }
 0x272   : > { %v1809_v31 = vadd.f32 %v1808_v8, %v5614_v16  ;;  %v5618_v16 = vld [vmem:[#allocation15_spill] sm:$0xff] }
 0x273   : > { %v2913_v15 = vmax.f32 %v2881_v59, 0.0  ;;  %v2689_v30 = vadd.f32 %v2688_v43, %v2600_v34 }
 0x274   : > { %v1864_v9 = vadd.f32 %v1809_v31, %v5615_v40 }
 0x275   : > { %2945 = vst [vmem:[%s5334_s7 + $0x70] sm:$0xff] %v2913_v15  ;;  %v2746_v19 = vadd.f32 %v2689_v30, %v1863_v42  ;;  %v5619_v30 = vld [vmem:[#allocation14_spill] sm:$0xff] }
 0x277   : > { %v2846_v23 = vmul.f32 %v5312_v7, %v2746_v19 }
 0x278   : > { %v2513_v24 = vpop.f32.mrf.mxu2  ;;  %v2602_v33 = vpop.f32.mrf.mxu3 }
 0x279   : > { %v2882_v49 = vadd.f32 %v5317_v13, %v2846_v23  ;;  %v2603_v5 = vadd.f32 %v2602_v33, %v2513_v24  ;;  %v1810_v3 = vpop.f32.mrf.mxu1  ;;  %v2693_v4 = vpop.f32.mrf.mxu0 }
 0x27a   : > { %v1811_v17 = vadd.f32 %v1810_v3, %v5177_v22 }
 0x27b   : > { %v2914_v63 = vmax.f32 %v2882_v49, 0.0  ;;  %v2692_v39 = vadd.f32 %v2691_v12, %v2603_v5 }
 0x27c   : > { %v1865_v2 = vadd.f32 %v1811_v17, %v5175_v47 }
 0x27d   : > { %2946 = vst [vmem:[%s5334_s7 + $0x78] sm:$0xff] %v2914_v63  ;;  %v2747_v10 = vadd.f32 %v2692_v39, %v1864_v9 }
 0x27f   : > { %v2847_v61 = vmul.f32 %v5312_v7, %v2747_v10 }
 0x280   : > { %v2515_v57 = vpop.f32.mrf.mxu2  ;;  %v2604_v27 = vpop.f32.mrf.mxu3 }
 0x281   : > { %v2883_v62 = vadd.f32 %v5317_v13, %v2847_v61  ;;  %v2605_v29 = vadd.f32 %v2604_v27, %v2515_v57  ;;  %v1813_v45 = vpop.f32.mrf.mxu1  ;;  %v2696_v60 = vpop.f32.mrf.mxu0 }
 0x282   : > { %v1814_v54 = vadd.f32 %v1813_v45, %v5616_v52  ;;  %v5620_v45 = vld [vmem:[#allocation17_spill] sm:$0xff] }
 0x283   : > { %v2915_v25 = vmax.f32 %v2883_v62, 0.0  ;;  %v2694_v22 = vadd.f32 %v2693_v4, %v2605_v29 }
 0x284   : > { %v1866_v44 = vadd.f32 %v1814_v54, %v5617_v53  ;;  %v5621_v54 = vld [vmem:[#allocation16_spill] sm:$0xff] }
 0x285   : > { %2947 = vst [vmem:[%s5334_s7 + $0x80] sm:$0xff] %v2915_v25  ;;  %v2748_v47 = vadd.f32 %v2694_v22, %v1865_v2 }
 0x287   : > { %v2848_v1 = vmul.f32 %v5312_v7, %v2748_v47 }
 0x288   : > { %v2518_v56 = vpop.f32.mrf.mxu2  ;;  %v2607_v48 = vpop.f32.mrf.mxu3 }
 0x289   : > { %v2884_v58 = vadd.f32 %v5317_v13, %v2848_v1  ;;  %v2608_v14 = vadd.f32 %v2607_v48, %v2518_v56  ;;  %v1815_v38 = vpop.f32.mrf.mxu1  ;;  %v2698_v43 = vpop.f32.mrf.mxu0 }
 0x28a   : > { %v1816_v20 = vadd.f32 %v1815_v38, %v5195_v26 }
 0x28b   : > { %v2916_v46 = vmax.f32 %v2884_v58, 0.0  ;;  %v2697_v37 = vadd.f32 %v2696_v60, %v2608_v14 }
 0x28c   : > { %v1867_v42 = vadd.f32 %v1816_v20, %v5193_v50 }
 0x28d   : > { %2948 = vst [vmem:[%s5334_s7 + $0x88] sm:$0xff] %v2916_v46  ;;  %v2749_v28 = vadd.f32 %v2697_v37, %v1866_v44 }
 0x28f   : > { %v2849_v35 = vmul.f32 %v5312_v7, %v2749_v28 }
 0x290   : > { %v2520_v21 = vpop.f32.mrf.mxu2  ;;  %v2609_v18 = vpop.f32.mrf.mxu3 }
 0x291   : > { %v2885_v59 = vadd.f32 %v5317_v13, %v2849_v35  ;;  %v2610_v34 = vadd.f32 %v2609_v18, %v2520_v21  ;;  %v1818_v8 = vpop.f32.mrf.mxu1  ;;  %v2701_v12 = vpop.f32.mrf.mxu0 }
 0x292   : > { %v1819_v31 = vadd.f32 %v1818_v8, %v5618_v16 }
 0x293   : > { %v2917_v15 = vmax.f32 %v2885_v59, 0.0  ;;  %v2699_v26 = vadd.f32 %v2698_v43, %v2610_v34  ;;  %v5622_v59 = vld [vmem:[#allocation19_spill] sm:$0xff] }
 0x294   : > { %v1868_v40 = vadd.f32 %v1819_v31, %v5619_v30 }
 0x295   : > { %2949 = vst [vmem:[%s5334_s7 + $0x90] sm:$0xff] %v2917_v15  ;;  %v2750_v50 = vadd.f32 %v2699_v26, %v1867_v42 }
 0x297   : > { %v2850_v9 = vmul.f32 %v5312_v7, %v2750_v50 }
 0x298   : > { %v2523_v19 = vpop.f32.mrf.mxu2  ;;  %v2612_v23 = vpop.f32.mrf.mxu3 }
 0x299   : > { %v2886_v24 = vadd.f32 %v5317_v13, %v2850_v9  ;;  %v2613_v33 = vadd.f32 %v2612_v23, %v2523_v19  ;;  %v1820_v49 = vpop.f32.mrf.mxu1  ;;  %v2703_v5 = vpop.f32.mrf.mxu0 }
 0x29a   : > { %v1821_v3 = vadd.f32 %v1820_v49, %v5213_v55 }
 0x29b   : > { %v2918_v4 = vmax.f32 %v2886_v24, 0.0  ;;  %v2702_v17 = vadd.f32 %v2701_v12, %v2613_v33  ;;  %v5623_v12 = vld [vmem:[#allocation18_spill] sm:$0xff] }
 0x29c   : > { %v1869_v63 = vadd.f32 %v1821_v3, %v5211_v6 }
 0x29d   : > { %2950 = vst [vmem:[%s5334_s7 + $0x98] sm:$0xff] %v2918_v4  ;;  %v2751_v39 = vadd.f32 %v2702_v17, %v1868_v40 }
 0x29f   : > { %v2851_v2 = vmul.f32 %v5312_v7, %v2751_v39 }
 0x2a0   : > { %v2525_v10 = vpop.f32.mrf.mxu2  ;;  %v2614_v61 = vpop.f32.mrf.mxu3 }
 0x2a1   : > { %v2887_v57 = vadd.f32 %v5317_v13, %v2851_v2  ;;  %v2615_v27 = vadd.f32 %v2614_v61, %v2525_v10  ;;  %v1823_v62 = vpop.f32.mrf.mxu1  ;;  %v2706_v29 = vpop.f32.mrf.mxu0  ;;  %v5624_v10 = vld [vmem:[#allocation21_spill] sm:$0xff] }
 0x2a2   : > { %v1824_v60 = vadd.f32 %v1823_v62, %v5620_v45 }
 0x2a3   : > { %v2919_v52 = vmax.f32 %v2887_v57, 0.0  ;;  %v2704_v55 = vadd.f32 %v2703_v5, %v2615_v27  ;;  %v5625_v27 = vld [vmem:[#allocation20_spill] sm:$0xff] }
 0x2a4   : > { %v1870_v25 = vadd.f32 %v1824_v60, %v5621_v54 }
 0x2a5   : > { %2951 = vst [vmem:[%s5334_s7 + $0xa0] sm:$0xff] %v2919_v52  ;;  %v2752_v6 = vadd.f32 %v2704_v55, %v1869_v63 }
 0x2a7   : > { %v2852_v22 = vmul.f32 %v5312_v7, %v2752_v6 }
 0x2a8   : > { %v2528_v53 = vpop.f32.mrf.mxu2  ;;  %v2617_v44 = vpop.f32.mrf.mxu3 }
 0x2a9   : > { %v2888_v47 = vadd.f32 %v5317_v13, %v2852_v22  ;;  %v2618_v1 = vadd.f32 %v2617_v44, %v2528_v53  ;;  %v1825_v56 = vpop.f32.mrf.mxu1  ;;  %v2708_v48 = vpop.f32.mrf.mxu0 }
 0x2aa   : > { %v1826_v58 = vadd.f32 %v1825_v56, %v5231_v11 }
 0x2ab   : > { %v2920_v14 = vmax.f32 %v2888_v47, 0.0  ;;  %v2707_v38 = vadd.f32 %v2706_v29, %v2618_v1 }
 0x2ac   : > { %v1871_v43 = vadd.f32 %v1826_v58, %v5229_v32 }
 0x2ad   : > { %2952 = vst [vmem:[%s5334_s7 + $0xa8] sm:$0xff] %v2920_v14  ;;  %v2753_v20 = vadd.f32 %v2707_v38, %v1870_v25 }
 0x2af   : > { %v2853_v46 = vmul.f32 %v5312_v7, %v2753_v20 }
 0x2b0   : > { %v2530_v37 = vpop.f32.mrf.mxu2  ;;  %v2619_v42 = vpop.f32.mrf.mxu3 }
 0x2b1   : > { %v2889_v28 = vadd.f32 %v5317_v13, %v2853_v46  ;;  %v2620_v35 = vadd.f32 %v2619_v42, %v2530_v37  ;;  %v1828_v21 = vpop.f32.mrf.mxu1  ;;  %v2711_v18 = vpop.f32.mrf.mxu0  ;;  %v5627_v42 = vld [vmem:[#allocation22_spill] sm:$0xff] }
 0x2b2   : > { %v1829_v34 = vadd.f32 %v1828_v21, %v5622_v59 }
 0x2b3   : > { %v2921_v8 = vmax.f32 %v2889_v28, 0.0  ;;  %v2709_v11 = vadd.f32 %v2708_v48, %v2620_v35 }
 0x2b4   : > { %v1872_v16 = vadd.f32 %v1829_v34, %v5623_v12 }
 0x2b5   : > { %2953 = vst [vmem:[%s5334_s7 + $0xb0] sm:$0xff] %v2921_v8  ;;  %v2754_v32 = vadd.f32 %v2709_v11, %v1871_v43  ;;  %v5626_v43 = vld [vmem:[#allocation23_spill] sm:$0xff]  ;;  %v5628_v11 = vld [vmem:[#allocation25_spill] sm:$0xff] }
 0x2b7   : > { %v2854_v31 = vmul.f32 %v5312_v7, %v2754_v32 }
 0x2b8   : > { %v2533_v15 = vpop.f32.mrf.mxu2  ;;  %v2622_v26 = vpop.f32.mrf.mxu3 }
 0x2b9   : > { %v2890_v30 = vadd.f32 %v5317_v13, %v2854_v31  ;;  %v2623_v40 = vadd.f32 %v2622_v26, %v2533_v15  ;;  %v1830_v50 = vpop.f32.mrf.mxu1  ;;  %v2713_v9 = vpop.f32.mrf.mxu0  ;;  %v5629_v31 = vld [vmem:[#allocation24_spill] sm:$0xff] }
 0x2ba   : > { %v1831_v19 = vadd.f32 %v1830_v50, %v5249_v41 }
 0x2bb   : > { %v2922_v23 = vmax.f32 %v2890_v30, 0.0  ;;  %v2712_v24 = vadd.f32 %v2711_v18, %v2623_v40 }
 0x2bc   : > { %v1873_v33 = vadd.f32 %v1831_v19, %v5247_v0 }
 0x2bd   : > { %2954 = vst [vmem:[%s5334_s7 + $0xb8] sm:$0xff] %v2922_v23  ;;  %v2755_v49 = vadd.f32 %v2712_v24, %v1872_v16 }
 0x2bf   : > { %v2855_v5 = vmul.f32 %v5312_v7, %v2755_v49 }
 0x2c0   : > { %v2535_v3 = vpop.f32.mrf.mxu2  ;;  %v2624_v4 = vpop.f32.mrf.mxu3 }
 0x2c1   : > { %v2891_v17 = vadd.f32 %v5317_v13, %v2855_v5  ;;  %v2625_v63 = vadd.f32 %v2624_v4, %v2535_v3  ;;  %v1833_v39 = vpop.f32.mrf.mxu1  ;;  %v2716_v2 = vpop.f32.mrf.mxu0  ;;  %v5631_v4 = vld [vmem:[#allocation26_spill] sm:$0xff] }
 0x2c2   : > { %v1834_v61 = vadd.f32 %v1833_v39, %v5624_v10 }
 0x2c3   : > { %v2923_v57 = vmax.f32 %v2891_v17, 0.0  ;;  %v2714_v41 = vadd.f32 %v2713_v9, %v2625_v63 }
 0x2c4   : > { %v1874_v62 = vadd.f32 %v1834_v61, %v5625_v27 }
 0x2c5   : > { %2955 = vst [vmem:[%s5334_s7 + $0xc0] sm:$0xff] %v2923_v57  ;;  %v2756_v0 = vadd.f32 %v2714_v41, %v1873_v33  ;;  %v5630_v33 = vld [vmem:[#allocation27_spill] sm:$0xff] }
 0x2c7   : > { %v2856_v29 = vmul.f32 %v5312_v7, %v2756_v0 }
 0x2c8   : > { %v2538_v45 = vpop.f32.mrf.mxu2  ;;  %v2627_v60 = vpop.f32.mrf.mxu3 }
 0x2c9   : > { %v2892_v52 = vadd.f32 %v5317_v13, %v2856_v29  ;;  %v2628_v55 = vadd.f32 %v2627_v60, %v2538_v45  ;;  %v1835_v54 = vpop.f32.mrf.mxu1  ;;  %v2718_v25 = vpop.f32.mrf.mxu0  ;;  %v5633_v60 = vld [vmem:[#allocation28_spill] sm:$0xff] }
 0x2ca   : > { %v1836_v6 = vadd.f32 %v1835_v54, %v5267_v36 }
 0x2cb   : > { %v2924_v22 = vmax.f32 %v2892_v52, 0.0  ;;  %v2717_v53 = vadd.f32 %v2716_v2, %v2628_v55 }
 0x2cc   : > { %v1875_v44 = vadd.f32 %v1836_v6, %v5265_v51 }
 0x2cd   : > { %2956 = vst [vmem:[%s5334_s7 + $0xc8] sm:$0xff] %v2924_v22  ;;  %v2757_v47 = vadd.f32 %v2717_v53, %v1874_v62  ;;  %v5632_v62 = vld [vmem:[#allocation29_spill] sm:$0xff] }
 0x2cf   : > { %v2857_v1 = vmul.f32 %v5312_v7, %v2757_v47 }
 0x2d0   : > { %v2540_v56 = vpop.f32.mrf.mxu2  ;;  %v2629_v48 = vpop.f32.mrf.mxu3 }
 0x2d1   : > { %v2893_v58 = vadd.f32 %v5317_v13, %v2857_v1  ;;  %v2630_v14 = vadd.f32 %v2629_v48, %v2540_v56  ;;  %v1838_v38 = vpop.f32.mrf.mxu1  ;;  %v2721_v37 = vpop.f32.mrf.mxu0 }
 0x2d2   : > { %v1839_v20 = vadd.f32 %v1838_v38, %v5626_v43 }
 0x2d3   : > { %v2925_v46 = vmax.f32 %v2893_v58, 0.0  ;;  %v2719_v36 = vadd.f32 %v2718_v25, %v2630_v14 }
 0x2d4   : > { %v1876_v28 = vadd.f32 %v1839_v20, %v5627_v42 }
 0x2d5   : > { %2957 = vst [vmem:[%s5334_s7 + $0xd0] sm:$0xff] %v2925_v46  ;;  %v2758_v51 = vadd.f32 %v2719_v36, %v1875_v44 }
 0x2d7   : > { %v2858_v35 = vmul.f32 %v5312_v7, %v2758_v51 }
 0x2d8   : > { %v2543_v21 = vpop.f32.mrf.mxu2  ;;  %v2632_v18 = vpop.f32.mrf.mxu3 }
 0x2d9   : > { %v2894_v59 = vadd.f32 %v5317_v13, %v2858_v35  ;;  %v2633_v34 = vadd.f32 %v2632_v18, %v2543_v21  ;;  %v1840_v8 = vpop.f32.mrf.mxu1  ;;  %v2723_v30 = vpop.f32.mrf.mxu0 }
 0x2da   : > { %v1841_v12 = vadd.f32 %v1840_v8, %v5628_v11 }
 0x2db   : > { %v2926_v16 = vmax.f32 %v2894_v59, 0.0  ;;  %v2722_v32 = vadd.f32 %v2721_v37, %v2633_v34 }
 0x2dc   : > { %v1877_v15 = vadd.f32 %v1841_v12, %v5629_v31 }
 0x2dd   : > { %2958 = vst [vmem:[%s5334_s7 + $0xd8] sm:$0xff] %v2926_v16  ;;  %v2759_v26 = vadd.f32 %v2722_v32, %v1876_v28 }
 0x2df   : > { %v2859_v40 = vmul.f32 %v5312_v7, %v2759_v26 }
 0x2e0   : > { %v2545_v50 = vpop.f32.mrf.mxu2  ;;  %v2634_v9 = vpop.f32.mrf.mxu3 }
 0x2e1   : > { %v2895_v19 = vadd.f32 %v5317_v13, %v2859_v40  ;;  %v2635_v23 = vadd.f32 %v2634_v9, %v2545_v50  ;;  %v1843_v24 = vpop.f32.mrf.mxu1  ;;  %v2726_v2 = vpop.f32.mrf.mxu0 }
 0x2e2   : > { %v1844_v49 = vadd.f32 %v1843_v24, %v5630_v33 }
 0x2e3   : > { %v2927_v5 = vmax.f32 %v2895_v19, 0.0  ;;  %v2724_v3 = vadd.f32 %v2723_v30, %v2635_v23 }
 0x2e4   : > { %v1878_v17 = vadd.f32 %v1844_v49, %v5631_v4 }
 0x2e5   : > { %2959 = vst [vmem:[%s5334_s7 + $0xe0] sm:$0xff] %v2927_v5  ;;  %v2760_v63 = vadd.f32 %v2724_v3, %v1877_v15 }
 0x2e7   : > { %v2860_v39 = vmul.f32 %v5312_v7, %v2760_v63 }
 0x2e8   : > { %v2548_v10 = vpop.f32.mrf.mxu2  ;;  %v2637_v61 = vpop.f32.mrf.mxu3 }
 0x2e9   : > { %v2896_v57 = vadd.f32 %v5317_v13, %v2860_v39  ;;  %v2638_v41 = vadd.f32 %v2637_v61, %v2548_v10  ;;  %v1845_v27 = vpop.f32.mrf.mxu1  ;;  %v2728_v44 = vpop.f32.mrf.mxu0 }
 0x2ea   : > { %v1846_v0 = vadd.f32 %v1845_v27, %v5632_v62 }
 0x2eb   : > { %v2928_v29 = vmax.f32 %v2896_v57, 0.0  ;;  %v2727_v45 = vadd.f32 %v2726_v2, %v2638_v41 }
 0x2ec   : > { %v1879_v52 = vadd.f32 %v1846_v0, %v5633_v60 }
 0x2ed   : > { %2960 = vst [vmem:[%s5334_s7 + $0xe8] sm:$0xff] %v2928_v29  ;;  %v2761_v55 = vadd.f32 %v2727_v45, %v1878_v17 }
 0x2ef   : > { %v2861_v54 = vmul.f32 %v5312_v7, %v2761_v55  ;;  %v4462_v7 = vld [vmem:[%s5581_s2] ss:$0 sm:$0xff] }
 0x2f0   : > { %v2550_v25 = vpop.f32.mrf.mxu2  ;;  %v2639_v6 = vpop.f32.mrf.mxu3 }
 0x2f1   : > { %v2897_v22 = vadd.f32 %v5317_v13, %v2861_v54  ;;  %v2640_v53 = vadd.f32 %v2639_v6, %v2550_v25  ;;  %v4463_v13 = vld [vmem:[%s5582_s3] ss:$0 sm:$0xff] }
 0x2f3   : > { %v2929_v47 = vmax.f32 %v2897_v22, 0.0  ;;  %v2729_v1 = vadd.f32 %v2728_v44, %v2640_v53 }
 0x2f5   : > { %2961 = vst [vmem:[%s5334_s7 + $0xf0] sm:$0xff] %v2929_v47  ;;  %v2762_v56 = vadd.f32 %v2729_v1, %v1879_v52 }
 0x2f7   : > { %v2862_v48 = vmul.f32 %v4462_v7, %v2762_v56 }
 0x2f9   : > { %v2898_v58 = vadd.f32 %v4463_v13, %v2862_v48 }
 0x2fb   : > { %v2930_v14 = vmax.f32 %v2898_v58, 0.0 }
 0x2fd   : > { %2962 = vst [vmem:[%s5334_s7 + $0xf8] sm:$0xff] %v2930_v14 }
 0x2fe   : > { %4491 = shalt.err (!%p4488_p5)
}
 0x2ff   : > { %s4544_s22 = smov 128   ;;  %s4545_s7 = smov 8  }
 0x300   : > { %4403 = dma.vmem_to_hbm [thread:$0]  (%p4611_p4), %s2980_s13, 4096, %s2982_s14, %s2964_s24, %s4544_s22, %s4544_s22, %s4545_s7  }
 0x301 PF: > { %p4409_p6 = scmp.ge.s32.totalorder %s4542_s20, 2  ;;  %s2996_s10 = sand.u32 1, %s4522_s15  }
 0x302   : > { %s2997_s11 = scalar_lea.sflag [#allocation4], %s2996_s10 }
 0x303   : > { %p4406_p7 = pnand %p4409_p6, %p4618_p8 }
 0x305   : > { %p4407_p9 = pneg %p4406_p7 }
 0x307   : > { %4517 = dma.done.wait (%p4407_p9), %s2997_s11, 4096  }
 0x308   : > { %4519 = vsyncadd (%p4407_p9), %s2997_s11, 4294963200  ;;  %s17_s20 = sadd.s32 1, %s4542_s20   ;;  %s5634_s15 = smov %s4526_s16 }
 0x309   : > { %p14_p10 = scmp.ge.s32.totalorder %s17_s20, 4   ;;  %s5635_s16 = smov %s4530_s17 }
 0x30a   : > { %s5636_s17 = smov %s4624_s28  ;;  %s5637_s18 = smov %s4538_s19 }
 0x30b   : > { %s5638_s19 = smov %s5640_s23  ;;  %16 = sbr.rel (!%p14_p10) target bundleno = 4 (0x4), region = 76 }
 0x310   :  { %3003 = vsyncpa [#allocation4], 1 }
 0x311   :  { %3005 = vsyncpa [#allocation4 + $0x1], 1 }

</bundles_post_ra>
